<compile_context>
chip_gen: v7x
topology: tpu7x:2x2x1
jax: 0.10.0
libtpu: 0.0.40
codegen_flags: <defaults>
</compile_context>

<pallas_src>
import numpy as np
import jax
import jax.numpy as jnp
from jax.experimental import pallas as pl
from jax.experimental.pallas import tpu as pltpu


def _round_up(x, m):
    return -(-x // m) * m


# ----------------------------------------------------------------------------
# Static layout plan: channel progression + packed-slab row offsets.
# ----------------------------------------------------------------------------
def _plan(C0, output_channels):
    chans = [C0, output_channels // 32, output_channels // 16,
             output_channels // 4, output_channels]
    c3 = chans[3]
    cq = max(1, c3 // 8)
    cv = max(1, c3 // 8)

    wsegs = [("w0", 9 * C0, C0)]
    bsegs = [("b0", C0)]
    for i in range(4):
        cin, cout = chans[i], chans[i + 1]
        if cout > cin:                       # LBlock 1x1-conv shortcut branch
            wsegs.append((f"lb{i+1}_wsc", cin, cout - cin))
            bsegs.append((f"lb{i+1}_bsc", cout - cin))
        wsegs.append((f"lb{i+1}_wa", 9 * cin, cout))
        wsegs.append((f"lb{i+1}_wb", 9 * cout, cout))
        bsegs.append((f"lb{i+1}_ba", cout))
        bsegs.append((f"lb{i+1}_bb", cout))
    wsegs += [("att_wq", c3, cq), ("att_wk", c3, cq),
              ("att_wv", c3, cv), ("att_wl", cv, c3)]

    wmap, row = {}, 0
    for name, k, n in wsegs:
        wmap[name] = (row, k, n)
        row = _round_up(row + k, 16)         # bf16 native sublane tiling
    wrows = _round_up(row, 16)

    bmap = {name: (i, n) for i, (name, n) in enumerate(bsegs)}
    brows = _round_up(len(bsegs), 8)

    lanes = _round_up(max(max(n for _, _, n in wsegs),
                          max(n for _, n in bsegs)), 128)
    return dict(chans=chans, cq=cq, cv=cv, wmap=wmap, wrows=wrows,
                bmap=bmap, brows=brows, lanes=lanes)


# ----------------------------------------------------------------------------
# Pallas kernel: the entire conditioning stack on one [L, C] sample.
# ----------------------------------------------------------------------------
def _make_kernel(C0, H, W, plan):
    L = H * W
    chans = plan["chans"]
    wmap, bmap = plan["wmap"], plan["bmap"]

    def kernel(z_ref, mask_ref, w_ref, b_ref, o_ref):
        def weight(name):
            r, k, n = wmap[name]
            return w_ref[r:r + k, :n]                       # bf16 (k, n)

        def bias(name):
            r, n = bmap[name]
            return b_ref[r:r + 1, :n]                       # f32 (1, n)

        def mm(x, w):                                       # bf16 MXU, f32 acc
            return jnp.dot(x.astype(jnp.bfloat16), w,
                           preferred_element_type=jnp.float32)

        # 0/1 per-position masks of the 9 conv taps (zero padding at borders)
        taps = []
        for t in range(9):
            dh, dw = t // 3 - 1, t % 3 - 1
            taps.append((dh * W + dw, mask_ref[:, t:t + 1]))

        def conv3x3(x, wname, bname):
            # im2col: 9 sublane-rolls + masks, then one matmul with K = 9*Cin.
            cols = []
            for off, m in taps:
                xs = x if off == 0 else pltpu.roll(x, shift=(-off) % L, axis=0)
                cols.append(xs * m)
            x9 = jnp.concatenate(cols, axis=1)              # (L, 9*Cin) f32
            return mm(x9, weight(wname)) + bias(bname)

        def lblock(x, idx, cin, cout):
            p = f"lb{idx}"
            if cout > cin:
                sc1 = mm(x, weight(p + "_wsc")) + bias(p + "_bsc")
                sc = jnp.concatenate([x, sc1], axis=1)      # concat([x, 1x1(x)])
            else:
                sc = x
            h = jnp.maximum(x, 0.0)
            h = conv3x3(h, p + "_wa", p + "_ba")
            h = jnp.maximum(h, 0.0)
            h = conv3x3(h, p + "_wb", p + "_bb")
            return h + sc

        z = z_ref[...].astype(jnp.float32)                  # (L, C0)
        z = conv3x3(z, "w0", "b0")                          # spectral-normed conv_3x3
        z = lblock(z, 1, chans[0], chans[1])
        z = lblock(z, 2, chans[1], chans[2])
        z = lblock(z, 3, chans[2], chans[3])

        # spatial self-attention over the L = H*W tokens
        q = mm(z, weight("att_wq"))
        k = mm(z, weight("att_wk"))
        v = mm(z, weight("att_wv"))
        logits = jax.lax.dot_general(
            q.astype(jnp.bfloat16), k.astype(jnp.bfloat16),
            (((1,), (1,)), ((), ())), preferred_element_type=jnp.float32)
        mx = jnp.max(logits, axis=-1, keepdims=True)
        e = jnp.exp(logits - mx)
        beta = e * pl.reciprocal(jnp.sum(e, axis=-1, keepdims=True), approx=True)
        attn = jnp.dot(beta.astype(jnp.bfloat16), v.astype(jnp.bfloat16),
                       preferred_element_type=jnp.float32)  # (L, cv)
        # gamma is folded into att_wl in glue (PyTorch initializes gamma = 0).
        z = mm(attn, weight("att_wl")) + z

        z = lblock(z, 4, chans[3], chans[4])
        o_ref[...] = z.astype(o_ref.dtype)

    return kernel


# ----------------------------------------------------------------------------
# Glue: parameter init / packing, tap masks, wrapper.
# ----------------------------------------------------------------------------
def _make_tap_masks(H, W):
    L = H * W
    m = np.zeros((L, 9), np.float32)
    for t in range(9):
        dh, dw = t // 3 - 1, t % 3 - 1
        for h in range(H):
            for w in range(W):
                if 0 <= h + dh < H and 0 <= w + dw < W:
                    m[h * W + w, t] = 1.0
    return m


def init_params(key, shape, output_channels, *, att_gamma=0.0):
    C0, H, W = shape
    plan = _plan(C0, output_channels)
    chans, cq, cv = plan["chans"], plan["cq"], plan["cv"]
    keys = iter(jax.random.split(key, 64))

    def nrm(shp, scale=0.1):
        return np.asarray(scale * jax.random.normal(next(keys), shp,
                                                    dtype=jnp.float32))

    wslab = np.zeros((plan["wrows"], plan["lanes"]), np.float32)
    bslab = np.zeros((plan["brows"], plan["lanes"]), np.float32)

    def put_w(name, w):
        r, k, n = plan["wmap"][name]
        assert w.shape == (k, n), (name, w.shape, (k, n))
        wslab[r:r + k, :n] = w

    def put_b(name, b):
        r, n = plan["bmap"][name]
        bslab[r, :n] = b

    # conv_3x3 (spectral-normalized), generated in PyTorch (O, I, kh, kw) layout.
    # TODO(synk): PyTorch spectral_norm keeps persistent power-iteration state
    # (u, v) updated once per forward; here the weight is normalized once by its
    # exact largest singular value (deterministic equivalent).
    w0_oihw = nrm((C0, C0, 3, 3))
    sigma = float(np.linalg.svd(w0_oihw.reshape(C0, -1), compute_uv=False)[0])
    w0_oihw = w0_oihw / sigma
    put_w("w0", np.transpose(w0_oihw, (2, 3, 1, 0)).reshape(9 * C0, C0))
    put_b("b0", nrm((C0,), 0.05))

    for i in range(4):
        cin, cout = chans[i], chans[i + 1]
        p = f"lb{i+1}"
        if cout > cin:
            put_w(p + "_wsc", nrm((cin, cout - cin)))        # 1x1 shortcut conv
            put_b(p + "_bsc", nrm((cout - cin,), 0.05))
        put_w(p + "_wa", nrm((9, cin, cout)).reshape(9 * cin, cout))
        put_b(p + "_ba", nrm((cout,), 0.05))
        put_w(p + "_wb", nrm((9, cout, cout)).reshape(9 * cout, cout))
        put_b(p + "_bb", nrm((cout,), 0.05))

    c3 = chans[3]
    put_w("att_wq", nrm((c3, cq)))
    put_w("att_wk", nrm((c3, cq)))
    put_w("att_wv", nrm((c3, cv)))
    # PyTorch initializes gamma = 0 (attention branch is zero at init); gamma
    # is folded into the last 1x1 attention weight so there is no per-call mul.
    put_w("att_wl", att_gamma * nrm((cv, c3)))

    return {
        "wslab": jnp.asarray(wslab, dtype=jnp.bfloat16),   # matmul-RHS weight slab
        "bslab": jnp.asarray(bslab, dtype=jnp.float32),    # biases stay f32
        "masks": jnp.asarray(_make_tap_masks(H, W)),       # (L, 9) conv tap masks
    }


def latent_conditioning_stack_forward(x, params, *, shape, output_channels,
                                      rng, num_samples=1):
    """Forward pass of LatentConditioningStack.  `x` is only consulted for its
    dtype, matching the PyTorch module (`type_as`)."""
    C0, H, W = shape
    L = H * W
    c4 = output_channels
    plan = _plan(C0, output_channels)

    # TODO(synk): torch.distributions Normal sampling is replaced by
    # jax.random.normal (same N(0,1) semantics, different RNG stream).
    # z = Normal(0,1).sample(shape) -> (*shape,1) -> permute(3,0,1,2) = (1,C0,H,W)
    z = jax.random.normal(rng, (num_samples, C0, H, W), dtype=jnp.float32)
    z = z.astype(x.dtype)
    z_lc = jnp.transpose(z, (0, 2, 3, 1)).reshape(num_samples, L, C0)

    kernel = _make_kernel(C0, H, W, plan)
    resident = lambda n: (0, 0)   # masks/weights: same block every grid step

    out_lc = pl.pallas_call(
        kernel,
        out_shape=jax.ShapeDtypeStruct((num_samples, L, c4), jnp.float32),
        grid=(num_samples,),
        in_specs=[
            pl.BlockSpec((None, L, C0), lambda n: (n, 0, 0)),        # z sample
            pl.BlockSpec((L, 9), resident),                          # tap masks
            pl.BlockSpec((plan["wrows"], plan["lanes"]), resident),  # bf16 weights
            pl.BlockSpec((plan["brows"], plan["lanes"]), resident),  # f32 biases
        ],
        out_specs=pl.BlockSpec((None, L, c4), lambda n: (n, 0, 0)),
        compiler_params=pltpu.CompilerParams(
            dimension_semantics=("parallel",)),
    )(z_lc, params["masks"], params["wslab"], params["bslab"])

    out = jnp.transpose(out_lc.reshape(num_samples, H, W, c4), (0, 3, 1, 2))
    return out.astype(x.dtype)


if __name__ == "__main__":
    # shape = (H/32, W/32, x) of the final image; output_channels must be /32.
    shape = (2, 8, 8)          # (C0, H, W) of the latent
    output_channels = 128      # -> LBlock channel progression 2->4->8->32->128

    key = jax.random.PRNGKey(0)
    k_param, k_x, k_z = jax.random.split(key, 3)

    # att_gamma=0.1 exercises the attention branch; PyTorch init is gamma=0.
    params = init_params(k_param, shape, output_channels, att_gamma=0.1)
    # x is only consulted for its dtype/device in the PyTorch module.
    x = jax.random.normal(k_x, (1, shape[0], shape[1], shape[2]), dtype=jnp.float32)

    out = latent_conditioning_stack_forward(
        x, params, shape=shape, output_channels=output_channels, rng=k_z)
    out = jax.block_until_ready(out)

    assert out.shape == (1, output_channels, shape[1], shape[2]), out.shape
    assert bool(jnp.all(jnp.isfinite(out)))
    print("KERNEL_OK")
</pallas_src>

<mosaic_0001>
module attributes {stable_mosaic.version = 11 : i64} {
  func.func @kernel(%arg0: i32, %arg1: memref<1x64x2xf32, #tpu.memory_space<vmem>>, %arg2: memref<64x9xf32, #tpu.memory_space<vmem>>, %arg3: memref<2240x128xbf16, #tpu.memory_space<vmem>>, %arg4: memref<16x128xf32, #tpu.memory_space<vmem>>, %arg5: memref<1x64x128xf32, #tpu.memory_space<vmem>>) attributes {dimension_semantics = [#tpu.dimension_semantics<parallel>], iteration_bounds = array<i64: 1>, scalar_prefetch = 0 : i64, scratch_operands = 0 : i64, tpu.core_type = #tpu.core_type<tc>, window_params = [{transform_indices = @transform_0, window_bounds = array<i64: 1, 64, 2>}, {pipeline_mode = #tpu.pipeline_mode<synchronous>, transform_indices = @transform_1, window_bounds = array<i64: 64, 9>}, {pipeline_mode = #tpu.pipeline_mode<synchronous>, transform_indices = @transform_2, window_bounds = array<i64: 2240, 128>}, {pipeline_mode = #tpu.pipeline_mode<synchronous>, transform_indices = @transform_3, window_bounds = array<i64: 16, 128>}, {transform_indices = @transform_4, window_bounds = array<i64: 1, 64, 128>}]} {
    %c0 = arith.constant 0 : index
    %c0_0 = arith.constant 0 : index
    %0 = vector.load %arg2[%c0, %c0_0] : memref<64x9xf32, #tpu.memory_space<vmem>>, vector<64x1xf32>
    %c0_1 = arith.constant 0 : index
    %c1 = arith.constant 1 : index
    %1 = vector.load %arg2[%c0_1, %c1] : memref<64x9xf32, #tpu.memory_space<vmem>>, vector<64x1xf32>
    %c0_2 = arith.constant 0 : index
    %c2 = arith.constant 2 : index
    %2 = vector.load %arg2[%c0_2, %c2] : memref<64x9xf32, #tpu.memory_space<vmem>>, vector<64x1xf32>
    %c0_3 = arith.constant 0 : index
    %c3 = arith.constant 3 : index
    %3 = vector.load %arg2[%c0_3, %c3] : memref<64x9xf32, #tpu.memory_space<vmem>>, vector<64x1xf32>
    %c0_4 = arith.constant 0 : index
    %c4 = arith.constant 4 : index
    %4 = vector.load %arg2[%c0_4, %c4] : memref<64x9xf32, #tpu.memory_space<vmem>>, vector<64x1xf32>
    %c0_5 = arith.constant 0 : index
    %c5 = arith.constant 5 : index
    %5 = vector.load %arg2[%c0_5, %c5] : memref<64x9xf32, #tpu.memory_space<vmem>>, vector<64x1xf32>
    %c0_6 = arith.constant 0 : index
    %c6 = arith.constant 6 : index
    %6 = vector.load %arg2[%c0_6, %c6] : memref<64x9xf32, #tpu.memory_space<vmem>>, vector<64x1xf32>
    %c0_7 = arith.constant 0 : index
    %c7 = arith.constant 7 : index
    %7 = vector.load %arg2[%c0_7, %c7] : memref<64x9xf32, #tpu.memory_space<vmem>>, vector<64x1xf32>
    %c0_8 = arith.constant 0 : index
    %c8 = arith.constant 8 : index
    %8 = vector.load %arg2[%c0_8, %c8] : memref<64x9xf32, #tpu.memory_space<vmem>>, vector<64x1xf32>
    %c0_9 = arith.constant 0 : index
    %c0_10 = arith.constant 0 : index
    %c0_11 = arith.constant 0 : index
    %9 = vector.load %arg1[%c0_9, %c0_10, %c0_11] : memref<1x64x2xf32, #tpu.memory_space<vmem>>, vector<1x64x2xf32>
    %10 = vector.shape_cast %9 : vector<1x64x2xf32> to vector<64x2xf32>
    %c9_i32 = arith.constant 9 : i32
    %11 = tpu.dynamic_rotate %10 by %c9_i32 dim 0 : vector<64x2xf32>, i32 -> vector<64x2xf32>
    %12 = vector.broadcast %0 : vector<64x1xf32> to vector<64x2xf32>
    %13 = arith.mulf %11, %12 : vector<64x2xf32>
    %c8_i32 = arith.constant 8 : i32
    %14 = tpu.dynamic_rotate %10 by %c8_i32 dim 0 : vector<64x2xf32>, i32 -> vector<64x2xf32>
    %15 = vector.broadcast %1 : vector<64x1xf32> to vector<64x2xf32>
    %16 = arith.mulf %14, %15 : vector<64x2xf32>
    %c7_i32 = arith.constant 7 : i32
    %17 = tpu.dynamic_rotate %10 by %c7_i32 dim 0 : vector<64x2xf32>, i32 -> vector<64x2xf32>
    %18 = vector.broadcast %2 : vector<64x1xf32> to vector<64x2xf32>
    %19 = arith.mulf %17, %18 : vector<64x2xf32>
    %c1_i32 = arith.constant 1 : i32
    %20 = tpu.dynamic_rotate %10 by %c1_i32 dim 0 : vector<64x2xf32>, i32 -> vector<64x2xf32>
    %21 = vector.broadcast %3 : vector<64x1xf32> to vector<64x2xf32>
    %22 = arith.mulf %20, %21 : vector<64x2xf32>
    %23 = vector.broadcast %4 : vector<64x1xf32> to vector<64x2xf32>
    %24 = arith.mulf %10, %23 : vector<64x2xf32>
    %c63_i32 = arith.constant 63 : i32
    %25 = tpu.dynamic_rotate %10 by %c63_i32 dim 0 : vector<64x2xf32>, i32 -> vector<64x2xf32>
    %26 = vector.broadcast %5 : vector<64x1xf32> to vector<64x2xf32>
    %27 = arith.mulf %25, %26 : vector<64x2xf32>
    %c57_i32 = arith.constant 57 : i32
    %28 = tpu.dynamic_rotate %10 by %c57_i32 dim 0 : vector<64x2xf32>, i32 -> vector<64x2xf32>
    %29 = vector.broadcast %6 : vector<64x1xf32> to vector<64x2xf32>
    %30 = arith.mulf %28, %29 : vector<64x2xf32>
    %c56_i32 = arith.constant 56 : i32
    %31 = tpu.dynamic_rotate %10 by %c56_i32 dim 0 : vector<64x2xf32>, i32 -> vector<64x2xf32>
    %32 = vector.broadcast %7 : vector<64x1xf32> to vector<64x2xf32>
    %33 = arith.mulf %31, %32 : vector<64x2xf32>
    %c55_i32 = arith.constant 55 : i32
    %34 = tpu.dynamic_rotate %10 by %c55_i32 dim 0 : vector<64x2xf32>, i32 -> vector<64x2xf32>
    %35 = vector.broadcast %8 : vector<64x1xf32> to vector<64x2xf32>
    %36 = arith.mulf %34, %35 : vector<64x2xf32>
    %37 = tpu.concatenate %13, %16, %19, %22, %24, %27, %30, %33, %36 in 1 : vector<64x2xf32>, vector<64x2xf32>, vector<64x2xf32>, vector<64x2xf32>, vector<64x2xf32>, vector<64x2xf32>, vector<64x2xf32>, vector<64x2xf32>, vector<64x2xf32> -> vector<64x18xf32>
    %c0_12 = arith.constant 0 : index
    %c0_13 = arith.constant 0 : index
    %38 = vector.load %arg3[%c0_12, %c0_13] : memref<2240x128xbf16, #tpu.memory_space<vmem>>, vector<18x2xbf16>
    %39 = arith.truncf %37 : vector<64x18xf32> to vector<64x18xbf16>
    %cst = arith.constant dense<0.000000e+00> : vector<64x2xf32>
    %40 = tpu.matmul %39, %38, %cst {dimension_numbers = #tpu.dot_dimension_numbers<[1], [0], [0], [1], [0, 0, 1, 1], [], []>} : vector<64x18xbf16>, vector<18x2xbf16>, vector<64x2xf32> -> vector<64x2xf32>
    %c0_14 = arith.constant 0 : index
    %c0_15 = arith.constant 0 : index
    %41 = vector.load %arg4[%c0_14, %c0_15] : memref<16x128xf32, #tpu.memory_space<vmem>>, vector<1x2xf32>
    %42 = vector.broadcast %41 : vector<1x2xf32> to vector<64x2xf32>
    %43 = arith.addf %40, %42 : vector<64x2xf32>
    %c32 = arith.constant 32 : index
    %c0_16 = arith.constant 0 : index
    %44 = vector.load %arg3[%c32, %c0_16] : memref<2240x128xbf16, #tpu.memory_space<vmem>>, vector<2x2xbf16>
    %45 = arith.truncf %43 : vector<64x2xf32> to vector<64x2xbf16>
    %cst_17 = arith.constant dense<0.000000e+00> : vector<64x2xf32>
    %46 = tpu.matmul %45, %44, %cst_17 {dimension_numbers = #tpu.dot_dimension_numbers<[1], [0], [0], [1], [0, 0, 1, 1], [], []>} : vector<64x2xbf16>, vector<2x2xbf16>, vector<64x2xf32> -> vector<64x2xf32>
    %c1_18 = arith.constant 1 : index
    %c0_19 = arith.constant 0 : index
    %47 = vector.load %arg4[%c1_18, %c0_19] : memref<16x128xf32, #tpu.memory_space<vmem>>, vector<1x2xf32>
    %48 = vector.broadcast %47 : vector<1x2xf32> to vector<64x2xf32>
    %49 = arith.addf %46, %48 : vector<64x2xf32>
    %50 = tpu.concatenate %43, %49 in 1 : vector<64x2xf32>, vector<64x2xf32> -> vector<64x4xf32>
    %cst_20 = arith.constant 0.000000e+00 : f32
    %51 = vector.broadcast %cst_20 : f32 to vector<64x2xf32>
    %52 = arith.maximumf %43, %51 : vector<64x2xf32>
    %c9_i32_21 = arith.constant 9 : i32
    %53 = tpu.dynamic_rotate %52 by %c9_i32_21 dim 0 : vector<64x2xf32>, i32 -> vector<64x2xf32>
    %54 = vector.broadcast %0 : vector<64x1xf32> to vector<64x2xf32>
    %55 = arith.mulf %53, %54 : vector<64x2xf32>
    %c8_i32_22 = arith.constant 8 : i32
    %56 = tpu.dynamic_rotate %52 by %c8_i32_22 dim 0 : vector<64x2xf32>, i32 -> vector<64x2xf32>
    %57 = vector.broadcast %1 : vector<64x1xf32> to vector<64x2xf32>
    %58 = arith.mulf %56, %57 : vector<64x2xf32>
    %c7_i32_23 = arith.constant 7 : i32
    %59 = tpu.dynamic_rotate %52 by %c7_i32_23 dim 0 : vector<64x2xf32>, i32 -> vector<64x2xf32>
    %60 = vector.broadcast %2 : vector<64x1xf32> to vector<64x2xf32>
    %61 = arith.mulf %59, %60 : vector<64x2xf32>
    %c1_i32_24 = arith.constant 1 : i32
    %62 = tpu.dynamic_rotate %52 by %c1_i32_24 dim 0 : vector<64x2xf32>, i32 -> vector<64x2xf32>
    %63 = vector.broadcast %3 : vector<64x1xf32> to vector<64x2xf32>
    %64 = arith.mulf %62, %63 : vector<64x2xf32>
    %65 = vector.broadcast %4 : vector<64x1xf32> to vector<64x2xf32>
    %66 = arith.mulf %52, %65 : vector<64x2xf32>
    %c63_i32_25 = arith.constant 63 : i32
    %67 = tpu.dynamic_rotate %52 by %c63_i32_25 dim 0 : vector<64x2xf32>, i32 -> vector<64x2xf32>
    %68 = vector.broadcast %5 : vector<64x1xf32> to vector<64x2xf32>
    %69 = arith.mulf %67, %68 : vector<64x2xf32>
    %c57_i32_26 = arith.constant 57 : i32
    %70 = tpu.dynamic_rotate %52 by %c57_i32_26 dim 0 : vector<64x2xf32>, i32 -> vector<64x2xf32>
    %71 = vector.broadcast %6 : vector<64x1xf32> to vector<64x2xf32>
    %72 = arith.mulf %70, %71 : vector<64x2xf32>
    %c56_i32_27 = arith.constant 56 : i32
    %73 = tpu.dynamic_rotate %52 by %c56_i32_27 dim 0 : vector<64x2xf32>, i32 -> vector<64x2xf32>
    %74 = vector.broadcast %7 : vector<64x1xf32> to vector<64x2xf32>
    %75 = arith.mulf %73, %74 : vector<64x2xf32>
    %c55_i32_28 = arith.constant 55 : i32
    %76 = tpu.dynamic_rotate %52 by %c55_i32_28 dim 0 : vector<64x2xf32>, i32 -> vector<64x2xf32>
    %77 = vector.broadcast %8 : vector<64x1xf32> to vector<64x2xf32>
    %78 = arith.mulf %76, %77 : vector<64x2xf32>
    %79 = tpu.concatenate %55, %58, %61, %64, %66, %69, %72, %75, %78 in 1 : vector<64x2xf32>, vector<64x2xf32>, vector<64x2xf32>, vector<64x2xf32>, vector<64x2xf32>, vector<64x2xf32>, vector<64x2xf32>, vector<64x2xf32>, vector<64x2xf32> -> vector<64x18xf32>
    %c48 = arith.constant 48 : index
    %c0_29 = arith.constant 0 : index
    %80 = vector.load %arg3[%c48, %c0_29] : memref<2240x128xbf16, #tpu.memory_space<vmem>>, vector<18x4xbf16>
    %81 = arith.truncf %79 : vector<64x18xf32> to vector<64x18xbf16>
    %cst_30 = arith.constant dense<0.000000e+00> : vector<64x4xf32>
    %82 = tpu.matmul %81, %80, %cst_30 {dimension_numbers = #tpu.dot_dimension_numbers<[1], [0], [0], [1], [0, 0, 1, 1], [], []>} : vector<64x18xbf16>, vector<18x4xbf16>, vector<64x4xf32> -> vector<64x4xf32>
    %c2_31 = arith.constant 2 : index
    %c0_32 = arith.constant 0 : index
    %83 = vector.load %arg4[%c2_31, %c0_32] : memref<16x128xf32, #tpu.memory_space<vmem>>, vector<1x4xf32>
    %84 = vector.broadcast %83 : vector<1x4xf32> to vector<64x4xf32>
    %85 = arith.addf %82, %84 : vector<64x4xf32>
    %cst_33 = arith.constant 0.000000e+00 : f32
    %86 = vector.broadcast %cst_33 : f32 to vector<64x4xf32>
    %87 = arith.maximumf %85, %86 : vector<64x4xf32>
    %c9_i32_34 = arith.constant 9 : i32
    %88 = tpu.dynamic_rotate %87 by %c9_i32_34 dim 0 : vector<64x4xf32>, i32 -> vector<64x4xf32>
    %89 = vector.broadcast %0 : vector<64x1xf32> to vector<64x4xf32>
    %90 = arith.mulf %88, %89 : vector<64x4xf32>
    %c8_i32_35 = arith.constant 8 : i32
    %91 = tpu.dynamic_rotate %87 by %c8_i32_35 dim 0 : vector<64x4xf32>, i32 -> vector<64x4xf32>
    %92 = vector.broadcast %1 : vector<64x1xf32> to vector<64x4xf32>
    %93 = arith.mulf %91, %92 : vector<64x4xf32>
    %c7_i32_36 = arith.constant 7 : i32
    %94 = tpu.dynamic_rotate %87 by %c7_i32_36 dim 0 : vector<64x4xf32>, i32 -> vector<64x4xf32>
    %95 = vector.broadcast %2 : vector<64x1xf32> to vector<64x4xf32>
    %96 = arith.mulf %94, %95 : vector<64x4xf32>
    %c1_i32_37 = arith.constant 1 : i32
    %97 = tpu.dynamic_rotate %87 by %c1_i32_37 dim 0 : vector<64x4xf32>, i32 -> vector<64x4xf32>
    %98 = vector.broadcast %3 : vector<64x1xf32> to vector<64x4xf32>
    %99 = arith.mulf %97, %98 : vector<64x4xf32>
    %100 = vector.broadcast %4 : vector<64x1xf32> to vector<64x4xf32>
    %101 = arith.mulf %87, %100 : vector<64x4xf32>
    %c63_i32_38 = arith.constant 63 : i32
    %102 = tpu.dynamic_rotate %87 by %c63_i32_38 dim 0 : vector<64x4xf32>, i32 -> vector<64x4xf32>
    %103 = vector.broadcast %5 : vector<64x1xf32> to vector<64x4xf32>
    %104 = arith.mulf %102, %103 : vector<64x4xf32>
    %c57_i32_39 = arith.constant 57 : i32
    %105 = tpu.dynamic_rotate %87 by %c57_i32_39 dim 0 : vector<64x4xf32>, i32 -> vector<64x4xf32>
    %106 = vector.broadcast %6 : vector<64x1xf32> to vector<64x4xf32>
    %107 = arith.mulf %105, %106 : vector<64x4xf32>
    %c56_i32_40 = arith.constant 56 : i32
    %108 = tpu.dynamic_rotate %87 by %c56_i32_40 dim 0 : vector<64x4xf32>, i32 -> vector<64x4xf32>
    %109 = vector.broadcast %7 : vector<64x1xf32> to vector<64x4xf32>
    %110 = arith.mulf %108, %109 : vector<64x4xf32>
    %c55_i32_41 = arith.constant 55 : i32
    %111 = tpu.dynamic_rotate %87 by %c55_i32_41 dim 0 : vector<64x4xf32>, i32 -> vector<64x4xf32>
    %112 = vector.broadcast %8 : vector<64x1xf32> to vector<64x4xf32>
    %113 = arith.mulf %111, %112 : vector<64x4xf32>
    %114 = tpu.concatenate %90, %93, %96, %99, %101, %104, %107, %110, %113 in 1 : vector<64x4xf32>, vector<64x4xf32>, vector<64x4xf32>, vector<64x4xf32>, vector<64x4xf32>, vector<64x4xf32>, vector<64x4xf32>, vector<64x4xf32>, vector<64x4xf32> -> vector<64x36xf32>
    %c80 = arith.constant 80 : index
    %c0_42 = arith.constant 0 : index
    %115 = vector.load %arg3[%c80, %c0_42] : memref<2240x128xbf16, #tpu.memory_space<vmem>>, vector<36x4xbf16>
    %116 = arith.truncf %114 : vector<64x36xf32> to vector<64x36xbf16>
    %cst_43 = arith.constant dense<0.000000e+00> : vector<64x4xf32>
    %117 = tpu.matmul %116, %115, %cst_43 {dimension_numbers = #tpu.dot_dimension_numbers<[1], [0], [0], [1], [0, 0, 1, 1], [], []>} : vector<64x36xbf16>, vector<36x4xbf16>, vector<64x4xf32> -> vector<64x4xf32>
    %c3_44 = arith.constant 3 : index
    %c0_45 = arith.constant 0 : index
    %118 = vector.load %arg4[%c3_44, %c0_45] : memref<16x128xf32, #tpu.memory_space<vmem>>, vector<1x4xf32>
    %119 = vector.broadcast %118 : vector<1x4xf32> to vector<64x4xf32>
    %120 = arith.addf %117, %119 : vector<64x4xf32>
    %121 = arith.addf %120, %50 : vector<64x4xf32>
    %c128 = arith.constant 128 : index
    %c0_46 = arith.constant 0 : index
    %122 = vector.load %arg3[%c128, %c0_46] : memref<2240x128xbf16, #tpu.memory_space<vmem>>, vector<4x4xbf16>
    %123 = arith.truncf %121 : vector<64x4xf32> to vector<64x4xbf16>
    %cst_47 = arith.constant dense<0.000000e+00> : vector<64x4xf32>
    %124 = tpu.matmul %123, %122, %cst_47 {dimension_numbers = #tpu.dot_dimension_numbers<[1], [0], [0], [1], [0, 0, 1, 1], [], []>} : vector<64x4xbf16>, vector<4x4xbf16>, vector<64x4xf32> -> vector<64x4xf32>
    %c4_48 = arith.constant 4 : index
    %c0_49 = arith.constant 0 : index
    %125 = vector.load %arg4[%c4_48, %c0_49] : memref<16x128xf32, #tpu.memory_space<vmem>>, vector<1x4xf32>
    %126 = vector.broadcast %125 : vector<1x4xf32> to vector<64x4xf32>
    %127 = arith.addf %124, %126 : vector<64x4xf32>
    %128 = tpu.concatenate %121, %127 in 1 : vector<64x4xf32>, vector<64x4xf32> -> vector<64x8xf32>
    %cst_50 = arith.constant 0.000000e+00 : f32
    %129 = vector.broadcast %cst_50 : f32 to vector<64x4xf32>
    %130 = arith.maximumf %121, %129 : vector<64x4xf32>
    %c9_i32_51 = arith.constant 9 : i32
    %131 = tpu.dynamic_rotate %130 by %c9_i32_51 dim 0 : vector<64x4xf32>, i32 -> vector<64x4xf32>
    %132 = vector.broadcast %0 : vector<64x1xf32> to vector<64x4xf32>
    %133 = arith.mulf %131, %132 : vector<64x4xf32>
    %c8_i32_52 = arith.constant 8 : i32
    %134 = tpu.dynamic_rotate %130 by %c8_i32_52 dim 0 : vector<64x4xf32>, i32 -> vector<64x4xf32>
    %135 = vector.broadcast %1 : vector<64x1xf32> to vector<64x4xf32>
    %136 = arith.mulf %134, %135 : vector<64x4xf32>
    %c7_i32_53 = arith.constant 7 : i32
    %137 = tpu.dynamic_rotate %130 by %c7_i32_53 dim 0 : vector<64x4xf32>, i32 -> vector<64x4xf32>
    %138 = vector.broadcast %2 : vector<64x1xf32> to vector<64x4xf32>
    %139 = arith.mulf %137, %138 : vector<64x4xf32>
    %c1_i32_54 = arith.constant 1 : i32
    %140 = tpu.dynamic_rotate %130 by %c1_i32_54 dim 0 : vector<64x4xf32>, i32 -> vector<64x4xf32>
    %141 = vector.broadcast %3 : vector<64x1xf32> to vector<64x4xf32>
    %142 = arith.mulf %140, %141 : vector<64x4xf32>
    %143 = vector.broadcast %4 : vector<64x1xf32> to vector<64x4xf32>
    %144 = arith.mulf %130, %143 : vector<64x4xf32>
    %c63_i32_55 = arith.constant 63 : i32
    %145 = tpu.dynamic_rotate %130 by %c63_i32_55 dim 0 : vector<64x4xf32>, i32 -> vector<64x4xf32>
    %146 = vector.broadcast %5 : vector<64x1xf32> to vector<64x4xf32>
    %147 = arith.mulf %145, %146 : vector<64x4xf32>
    %c57_i32_56 = arith.constant 57 : i32
    %148 = tpu.dynamic_rotate %130 by %c57_i32_56 dim 0 : vector<64x4xf32>, i32 -> vector<64x4xf32>
    %149 = vector.broadcast %6 : vector<64x1xf32> to vector<64x4xf32>
    %150 = arith.mulf %148, %149 : vector<64x4xf32>
    %c56_i32_57 = arith.constant 56 : i32
    %151 = tpu.dynamic_rotate %130 by %c56_i32_57 dim 0 : vector<64x4xf32>, i32 -> vector<64x4xf32>
    %152 = vector.broadcast %7 : vector<64x1xf32> to vector<64x4xf32>
    %153 = arith.mulf %151, %152 : vector<64x4xf32>
    %c55_i32_58 = arith.constant 55 : i32
    %154 = tpu.dynamic_rotate %130 by %c55_i32_58 dim 0 : vector<64x4xf32>, i32 -> vector<64x4xf32>
    %155 = vector.broadcast %8 : vector<64x1xf32> to vector<64x4xf32>
    %156 = arith.mulf %154, %155 : vector<64x4xf32>
    %157 = tpu.concatenate %133, %136, %139, %142, %144, %147, %150, %153, %156 in 1 : vector<64x4xf32>, vector<64x4xf32>, vector<64x4xf32>, vector<64x4xf32>, vector<64x4xf32>, vector<64x4xf32>, vector<64x4xf32>, vector<64x4xf32>, vector<64x4xf32> -> vector<64x36xf32>
    %c144 = arith.constant 144 : index
    %c0_59 = arith.constant 0 : index
    %158 = vector.load %arg3[%c144, %c0_59] : memref<2240x128xbf16, #tpu.memory_space<vmem>>, vector<36x8xbf16>
    %159 = arith.truncf %157 : vector<64x36xf32> to vector<64x36xbf16>
    %cst_60 = arith.constant dense<0.000000e+00> : vector<64x8xf32>
    %160 = tpu.matmul %159, %158, %cst_60 {dimension_numbers = #tpu.dot_dimension_numbers<[1], [0], [0], [1], [0, 0, 1, 1], [], []>} : vector<64x36xbf16>, vector<36x8xbf16>, vector<64x8xf32> -> vector<64x8xf32>
    %c5_61 = arith.constant 5 : index
    %c0_62 = arith.constant 0 : index
    %161 = vector.load %arg4[%c5_61, %c0_62] : memref<16x128xf32, #tpu.memory_space<vmem>>, vector<1x8xf32>
    %162 = vector.broadcast %161 : vector<1x8xf32> to vector<64x8xf32>
    %163 = arith.addf %160, %162 : vector<64x8xf32>
    %cst_63 = arith.constant 0.000000e+00 : f32
    %164 = vector.broadcast %cst_63 : f32 to vector<64x8xf32>
    %165 = arith.maximumf %163, %164 : vector<64x8xf32>
    %c9_i32_64 = arith.constant 9 : i32
    %166 = tpu.dynamic_rotate %165 by %c9_i32_64 dim 0 : vector<64x8xf32>, i32 -> vector<64x8xf32>
    %167 = vector.broadcast %0 : vector<64x1xf32> to vector<64x8xf32>
    %168 = arith.mulf %166, %167 : vector<64x8xf32>
    %c8_i32_65 = arith.constant 8 : i32
    %169 = tpu.dynamic_rotate %165 by %c8_i32_65 dim 0 : vector<64x8xf32>, i32 -> vector<64x8xf32>
    %170 = vector.broadcast %1 : vector<64x1xf32> to vector<64x8xf32>
    %171 = arith.mulf %169, %170 : vector<64x8xf32>
    %c7_i32_66 = arith.constant 7 : i32
    %172 = tpu.dynamic_rotate %165 by %c7_i32_66 dim 0 : vector<64x8xf32>, i32 -> vector<64x8xf32>
    %173 = vector.broadcast %2 : vector<64x1xf32> to vector<64x8xf32>
    %174 = arith.mulf %172, %173 : vector<64x8xf32>
    %c1_i32_67 = arith.constant 1 : i32
    %175 = tpu.dynamic_rotate %165 by %c1_i32_67 dim 0 : vector<64x8xf32>, i32 -> vector<64x8xf32>
    %176 = vector.broadcast %3 : vector<64x1xf32> to vector<64x8xf32>
    %177 = arith.mulf %175, %176 : vector<64x8xf32>
    %178 = vector.broadcast %4 : vector<64x1xf32> to vector<64x8xf32>
    %179 = arith.mulf %165, %178 : vector<64x8xf32>
    %c63_i32_68 = arith.constant 63 : i32
    %180 = tpu.dynamic_rotate %165 by %c63_i32_68 dim 0 : vector<64x8xf32>, i32 -> vector<64x8xf32>
    %181 = vector.broadcast %5 : vector<64x1xf32> to vector<64x8xf32>
    %182 = arith.mulf %180, %181 : vector<64x8xf32>
    %c57_i32_69 = arith.constant 57 : i32
    %183 = tpu.dynamic_rotate %165 by %c57_i32_69 dim 0 : vector<64x8xf32>, i32 -> vector<64x8xf32>
    %184 = vector.broadcast %6 : vector<64x1xf32> to vector<64x8xf32>
    %185 = arith.mulf %183, %184 : vector<64x8xf32>
    %c56_i32_70 = arith.constant 56 : i32
    %186 = tpu.dynamic_rotate %165 by %c56_i32_70 dim 0 : vector<64x8xf32>, i32 -> vector<64x8xf32>
    %187 = vector.broadcast %7 : vector<64x1xf32> to vector<64x8xf32>
    %188 = arith.mulf %186, %187 : vector<64x8xf32>
    %c55_i32_71 = arith.constant 55 : i32
    %189 = tpu.dynamic_rotate %165 by %c55_i32_71 dim 0 : vector<64x8xf32>, i32 -> vector<64x8xf32>
    %190 = vector.broadcast %8 : vector<64x1xf32> to vector<64x8xf32>
    %191 = arith.mulf %189, %190 : vector<64x8xf32>
    %192 = tpu.concatenate %168, %171, %174, %177, %179, %182, %185, %188, %191 in 1 : vector<64x8xf32>, vector<64x8xf32>, vector<64x8xf32>, vector<64x8xf32>, vector<64x8xf32>, vector<64x8xf32>, vector<64x8xf32>, vector<64x8xf32>, vector<64x8xf32> -> vector<64x72xf32>
    %c192 = arith.constant 192 : index
    %c0_72 = arith.constant 0 : index
    %193 = vector.load %arg3[%c192, %c0_72] : memref<2240x128xbf16, #tpu.memory_space<vmem>>, vector<72x8xbf16>
    %194 = arith.truncf %192 : vector<64x72xf32> to vector<64x72xbf16>
    %cst_73 = arith.constant dense<0.000000e+00> : vector<64x8xf32>
    %195 = tpu.matmul %194, %193, %cst_73 {dimension_numbers = #tpu.dot_dimension_numbers<[1], [0], [0], [1], [0, 0, 1, 1], [], []>} : vector<64x72xbf16>, vector<72x8xbf16>, vector<64x8xf32> -> vector<64x8xf32>
    %c6_74 = arith.constant 6 : index
    %c0_75 = arith.constant 0 : index
    %196 = vector.load %arg4[%c6_74, %c0_75] : memref<16x128xf32, #tpu.memory_space<vmem>>, vector<1x8xf32>
    %197 = vector.broadcast %196 : vector<1x8xf32> to vector<64x8xf32>
    %198 = arith.addf %195, %197 : vector<64x8xf32>
    %199 = arith.addf %198, %128 : vector<64x8xf32>
    %c272 = arith.constant 272 : index
    %c0_76 = arith.constant 0 : index
    %200 = vector.load %arg3[%c272, %c0_76] : memref<2240x128xbf16, #tpu.memory_space<vmem>>, vector<8x24xbf16>
    %201 = arith.truncf %199 : vector<64x8xf32> to vector<64x8xbf16>
    %cst_77 = arith.constant dense<0.000000e+00> : vector<64x24xf32>
    %202 = tpu.matmul %201, %200, %cst_77 {dimension_numbers = #tpu.dot_dimension_numbers<[1], [0], [0], [1], [0, 0, 1, 1], [], []>} : vector<64x8xbf16>, vector<8x24xbf16>, vector<64x24xf32> -> vector<64x24xf32>
    %c7_78 = arith.constant 7 : index
    %c0_79 = arith.constant 0 : index
    %203 = vector.load %arg4[%c7_78, %c0_79] : memref<16x128xf32, #tpu.memory_space<vmem>>, vector<1x24xf32>
    %204 = vector.broadcast %203 : vector<1x24xf32> to vector<64x24xf32>
    %205 = arith.addf %202, %204 : vector<64x24xf32>
    %206 = tpu.concatenate %199, %205 in 1 : vector<64x8xf32>, vector<64x24xf32> -> vector<64x32xf32>
    %cst_80 = arith.constant 0.000000e+00 : f32
    %207 = vector.broadcast %cst_80 : f32 to vector<64x8xf32>
    %208 = arith.maximumf %199, %207 : vector<64x8xf32>
    %c9_i32_81 = arith.constant 9 : i32
    %209 = tpu.dynamic_rotate %208 by %c9_i32_81 dim 0 : vector<64x8xf32>, i32 -> vector<64x8xf32>
    %210 = vector.broadcast %0 : vector<64x1xf32> to vector<64x8xf32>
    %211 = arith.mulf %209, %210 : vector<64x8xf32>
    %c8_i32_82 = arith.constant 8 : i32
    %212 = tpu.dynamic_rotate %208 by %c8_i32_82 dim 0 : vector<64x8xf32>, i32 -> vector<64x8xf32>
    %213 = vector.broadcast %1 : vector<64x1xf32> to vector<64x8xf32>
    %214 = arith.mulf %212, %213 : vector<64x8xf32>
    %c7_i32_83 = arith.constant 7 : i32
    %215 = tpu.dynamic_rotate %208 by %c7_i32_83 dim 0 : vector<64x8xf32>, i32 -> vector<64x8xf32>
    %216 = vector.broadcast %2 : vector<64x1xf32> to vector<64x8xf32>
    %217 = arith.mulf %215, %216 : vector<64x8xf32>
    %c1_i32_84 = arith.constant 1 : i32
    %218 = tpu.dynamic_rotate %208 by %c1_i32_84 dim 0 : vector<64x8xf32>, i32 -> vector<64x8xf32>
    %219 = vector.broadcast %3 : vector<64x1xf32> to vector<64x8xf32>
    %220 = arith.mulf %218, %219 : vector<64x8xf32>
    %221 = vector.broadcast %4 : vector<64x1xf32> to vector<64x8xf32>
    %222 = arith.mulf %208, %221 : vector<64x8xf32>
    %c63_i32_85 = arith.constant 63 : i32
    %223 = tpu.dynamic_rotate %208 by %c63_i32_85 dim 0 : vector<64x8xf32>, i32 -> vector<64x8xf32>
    %224 = vector.broadcast %5 : vector<64x1xf32> to vector<64x8xf32>
    %225 = arith.mulf %223, %224 : vector<64x8xf32>
    %c57_i32_86 = arith.constant 57 : i32
    %226 = tpu.dynamic_rotate %208 by %c57_i32_86 dim 0 : vector<64x8xf32>, i32 -> vector<64x8xf32>
    %227 = vector.broadcast %6 : vector<64x1xf32> to vector<64x8xf32>
    %228 = arith.mulf %226, %227 : vector<64x8xf32>
    %c56_i32_87 = arith.constant 56 : i32
    %229 = tpu.dynamic_rotate %208 by %c56_i32_87 dim 0 : vector<64x8xf32>, i32 -> vector<64x8xf32>
    %230 = vector.broadcast %7 : vector<64x1xf32> to vector<64x8xf32>
    %231 = arith.mulf %229, %230 : vector<64x8xf32>
    %c55_i32_88 = arith.constant 55 : i32
    %232 = tpu.dynamic_rotate %208 by %c55_i32_88 dim 0 : vector<64x8xf32>, i32 -> vector<64x8xf32>
    %233 = vector.broadcast %8 : vector<64x1xf32> to vector<64x8xf32>
    %234 = arith.mulf %232, %233 : vector<64x8xf32>
    %235 = tpu.concatenate %211, %214, %217, %220, %222, %225, %228, %231, %234 in 1 : vector<64x8xf32>, vector<64x8xf32>, vector<64x8xf32>, vector<64x8xf32>, vector<64x8xf32>, vector<64x8xf32>, vector<64x8xf32>, vector<64x8xf32>, vector<64x8xf32> -> vector<64x72xf32>
    %c288 = arith.constant 288 : index
    %c0_89 = arith.constant 0 : index
    %236 = vector.load %arg3[%c288, %c0_89] : memref<2240x128xbf16, #tpu.memory_space<vmem>>, vector<72x32xbf16>
    %237 = arith.truncf %235 : vector<64x72xf32> to vector<64x72xbf16>
    %cst_90 = arith.constant dense<0.000000e+00> : vector<64x32xf32>
    %238 = tpu.matmul %237, %236, %cst_90 {dimension_numbers = #tpu.dot_dimension_numbers<[1], [0], [0], [1], [0, 0, 1, 1], [], []>} : vector<64x72xbf16>, vector<72x32xbf16>, vector<64x32xf32> -> vector<64x32xf32>
    %c8_91 = arith.constant 8 : index
    %c0_92 = arith.constant 0 : index
    %239 = vector.load %arg4[%c8_91, %c0_92] : memref<16x128xf32, #tpu.memory_space<vmem>>, vector<1x32xf32>
    %240 = vector.broadcast %239 : vector<1x32xf32> to vector<64x32xf32>
    %241 = arith.addf %238, %240 : vector<64x32xf32>
    %cst_93 = arith.constant 0.000000e+00 : f32
    %242 = vector.broadcast %cst_93 : f32 to vector<64x32xf32>
    %243 = arith.maximumf %241, %242 : vector<64x32xf32>
    %c9_i32_94 = arith.constant 9 : i32
    %244 = tpu.dynamic_rotate %243 by %c9_i32_94 dim 0 : vector<64x32xf32>, i32 -> vector<64x32xf32>
    %245 = vector.broadcast %0 : vector<64x1xf32> to vector<64x32xf32>
    %246 = arith.mulf %244, %245 : vector<64x32xf32>
    %c8_i32_95 = arith.constant 8 : i32
    %247 = tpu.dynamic_rotate %243 by %c8_i32_95 dim 0 : vector<64x32xf32>, i32 -> vector<64x32xf32>
    %248 = vector.broadcast %1 : vector<64x1xf32> to vector<64x32xf32>
    %249 = arith.mulf %247, %248 : vector<64x32xf32>
    %c7_i32_96 = arith.constant 7 : i32
    %250 = tpu.dynamic_rotate %243 by %c7_i32_96 dim 0 : vector<64x32xf32>, i32 -> vector<64x32xf32>
    %251 = vector.broadcast %2 : vector<64x1xf32> to vector<64x32xf32>
    %252 = arith.mulf %250, %251 : vector<64x32xf32>
    %c1_i32_97 = arith.constant 1 : i32
    %253 = tpu.dynamic_rotate %243 by %c1_i32_97 dim 0 : vector<64x32xf32>, i32 -> vector<64x32xf32>
    %254 = vector.broadcast %3 : vector<64x1xf32> to vector<64x32xf32>
    %255 = arith.mulf %253, %254 : vector<64x32xf32>
    %256 = vector.broadcast %4 : vector<64x1xf32> to vector<64x32xf32>
    %257 = arith.mulf %243, %256 : vector<64x32xf32>
    %c63_i32_98 = arith.constant 63 : i32
    %258 = tpu.dynamic_rotate %243 by %c63_i32_98 dim 0 : vector<64x32xf32>, i32 -> vector<64x32xf32>
    %259 = vector.broadcast %5 : vector<64x1xf32> to vector<64x32xf32>
    %260 = arith.mulf %258, %259 : vector<64x32xf32>
    %c57_i32_99 = arith.constant 57 : i32
    %261 = tpu.dynamic_rotate %243 by %c57_i32_99 dim 0 : vector<64x32xf32>, i32 -> vector<64x32xf32>
    %262 = vector.broadcast %6 : vector<64x1xf32> to vector<64x32xf32>
    %263 = arith.mulf %261, %262 : vector<64x32xf32>
    %c56_i32_100 = arith.constant 56 : i32
    %264 = tpu.dynamic_rotate %243 by %c56_i32_100 dim 0 : vector<64x32xf32>, i32 -> vector<64x32xf32>
    %265 = vector.broadcast %7 : vector<64x1xf32> to vector<64x32xf32>
    %266 = arith.mulf %264, %265 : vector<64x32xf32>
    %c55_i32_101 = arith.constant 55 : i32
    %267 = tpu.dynamic_rotate %243 by %c55_i32_101 dim 0 : vector<64x32xf32>, i32 -> vector<64x32xf32>
    %268 = vector.broadcast %8 : vector<64x1xf32> to vector<64x32xf32>
    %269 = arith.mulf %267, %268 : vector<64x32xf32>
    %270 = tpu.concatenate %246, %249, %252, %255, %257, %260, %263, %266, %269 in 1 : vector<64x32xf32>, vector<64x32xf32>, vector<64x32xf32>, vector<64x32xf32>, vector<64x32xf32>, vector<64x32xf32>, vector<64x32xf32>, vector<64x32xf32>, vector<64x32xf32> -> vector<64x288xf32>
    %c368 = arith.constant 368 : index
    %c0_102 = arith.constant 0 : index
    %271 = vector.load %arg3[%c368, %c0_102] : memref<2240x128xbf16, #tpu.memory_space<vmem>>, vector<288x32xbf16>
    %272 = arith.truncf %270 : vector<64x288xf32> to vector<64x288xbf16>
    %cst_103 = arith.constant dense<0.000000e+00> : vector<64x32xf32>
    %273 = tpu.matmul %272, %271, %cst_103 {dimension_numbers = #tpu.dot_dimension_numbers<[1], [0], [0], [1], [0, 0, 1, 1], [], []>} : vector<64x288xbf16>, vector<288x32xbf16>, vector<64x32xf32> -> vector<64x32xf32>
    %c9 = arith.constant 9 : index
    %c0_104 = arith.constant 0 : index
    %274 = vector.load %arg4[%c9, %c0_104] : memref<16x128xf32, #tpu.memory_space<vmem>>, vector<1x32xf32>
    %275 = vector.broadcast %274 : vector<1x32xf32> to vector<64x32xf32>
    %276 = arith.addf %273, %275 : vector<64x32xf32>
    %277 = arith.addf %276, %206 : vector<64x32xf32>
    %c2128 = arith.constant 2128 : index
    %c0_105 = arith.constant 0 : index
    %278 = vector.load %arg3[%c2128, %c0_105] : memref<2240x128xbf16, #tpu.memory_space<vmem>>, vector<32x4xbf16>
    %279 = arith.truncf %277 : vector<64x32xf32> to vector<64x32xbf16>
    %cst_106 = arith.constant dense<0.000000e+00> : vector<64x4xf32>
    %280 = tpu.matmul %279, %278, %cst_106 {dimension_numbers = #tpu.dot_dimension_numbers<[1], [0], [0], [1], [0, 0, 1, 1], [], []>} : vector<64x32xbf16>, vector<32x4xbf16>, vector<64x4xf32> -> vector<64x4xf32>
    %c2160 = arith.constant 2160 : index
    %c0_107 = arith.constant 0 : index
    %281 = vector.load %arg3[%c2160, %c0_107] : memref<2240x128xbf16, #tpu.memory_space<vmem>>, vector<32x4xbf16>
    %282 = arith.truncf %277 : vector<64x32xf32> to vector<64x32xbf16>
    %cst_108 = arith.constant dense<0.000000e+00> : vector<64x4xf32>
    %283 = tpu.matmul %282, %281, %cst_108 {dimension_numbers = #tpu.dot_dimension_numbers<[1], [0], [0], [1], [0, 0, 1, 1], [], []>} : vector<64x32xbf16>, vector<32x4xbf16>, vector<64x4xf32> -> vector<64x4xf32>
    %c2192 = arith.constant 2192 : index
    %c0_109 = arith.constant 0 : index
    %284 = vector.load %arg3[%c2192, %c0_109] : memref<2240x128xbf16, #tpu.memory_space<vmem>>, vector<32x4xbf16>
    %285 = arith.truncf %277 : vector<64x32xf32> to vector<64x32xbf16>
    %cst_110 = arith.constant dense<0.000000e+00> : vector<64x4xf32>
    %286 = tpu.matmul %285, %284, %cst_110 {dimension_numbers = #tpu.dot_dimension_numbers<[1], [0], [0], [1], [0, 0, 1, 1], [], []>} : vector<64x32xbf16>, vector<32x4xbf16>, vector<64x4xf32> -> vector<64x4xf32>
    %287 = arith.truncf %280 : vector<64x4xf32> to vector<64x4xbf16>
    %288 = arith.truncf %283 : vector<64x4xf32> to vector<64x4xbf16>
    %cst_111 = arith.constant dense<0.000000e+00> : vector<64x64xf32>
    %289 = tpu.matmul %287, %288, %cst_111 {dimension_numbers = #tpu.dot_dimension_numbers<[1], [1], [0], [0], [0, 0, 1, 0], [], []>} : vector<64x4xbf16>, vector<64x4xbf16>, vector<64x64xf32> -> vector<64x64xf32>
    %cst_112 = arith.constant dense<0xFF800000> : vector<64xf32>
    %290 = vector.multi_reduction <maximumf>, %289, %cst_112 [1] : vector<64x64xf32> to vector<64xf32>
    %291 = vector.shape_cast %290 : vector<64xf32> to vector<64x1xf32>
    %292 = vector.broadcast %291 : vector<64x1xf32> to vector<64x64xf32>
    %293 = arith.subf %289, %292 : vector<64x64xf32>
    %294 = math.exp %293 : vector<64x64xf32>
    %cst_113 = arith.constant dense<0.000000e+00> : vector<64xf32>
    %295 = vector.multi_reduction <add>, %294, %cst_113 [1] : vector<64x64xf32> to vector<64xf32>
    %296 = vector.shape_cast %295 : vector<64xf32> to vector<64x1xf32>
    %297 = tpu.reciprocal %296 {approx = true} : vector<64x1xf32> -> vector<64x1xf32>
    %298 = vector.broadcast %297 : vector<64x1xf32> to vector<64x64xf32>
    %299 = arith.mulf %294, %298 : vector<64x64xf32>
    %300 = arith.truncf %299 : vector<64x64xf32> to vector<64x64xbf16>
    %301 = arith.truncf %286 : vector<64x4xf32> to vector<64x4xbf16>
    %cst_114 = arith.constant dense<0.000000e+00> : vector<64x4xf32>
    %302 = tpu.matmul %300, %301, %cst_114 {dimension_numbers = #tpu.dot_dimension_numbers<[1], [0], [0], [1], [0, 0, 1, 1], [], []>} : vector<64x64xbf16>, vector<64x4xbf16>, vector<64x4xf32> -> vector<64x4xf32>
    %c2224 = arith.constant 2224 : index
    %c0_115 = arith.constant 0 : index
    %303 = vector.load %arg3[%c2224, %c0_115] : memref<2240x128xbf16, #tpu.memory_space<vmem>>, vector<4x32xbf16>
    %304 = arith.truncf %302 : vector<64x4xf32> to vector<64x4xbf16>
    %cst_116 = arith.constant dense<0.000000e+00> : vector<64x32xf32>
    %305 = tpu.matmul %304, %303, %cst_116 {dimension_numbers = #tpu.dot_dimension_numbers<[1], [0], [0], [1], [0, 0, 1, 1], [], []>} : vector<64x4xbf16>, vector<4x32xbf16>, vector<64x32xf32> -> vector<64x32xf32>
    %306 = arith.addf %305, %277 : vector<64x32xf32>
    %c656 = arith.constant 656 : index
    %c0_117 = arith.constant 0 : index
    %307 = vector.load %arg3[%c656, %c0_117] : memref<2240x128xbf16, #tpu.memory_space<vmem>>, vector<32x96xbf16>
    %308 = arith.truncf %306 : vector<64x32xf32> to vector<64x32xbf16>
    %cst_118 = arith.constant dense<0.000000e+00> : vector<64x96xf32>
    %309 = tpu.matmul %308, %307, %cst_118 {dimension_numbers = #tpu.dot_dimension_numbers<[1], [0], [0], [1], [0, 0, 1, 1], [], []>} : vector<64x32xbf16>, vector<32x96xbf16>, vector<64x96xf32> -> vector<64x96xf32>
    %c10 = arith.constant 10 : index
    %c0_119 = arith.constant 0 : index
    %310 = vector.load %arg4[%c10, %c0_119] : memref<16x128xf32, #tpu.memory_space<vmem>>, vector<1x96xf32>
    %311 = vector.broadcast %310 : vector<1x96xf32> to vector<64x96xf32>
    %312 = arith.addf %309, %311 : vector<64x96xf32>
    %313 = tpu.concatenate %306, %312 in 1 : vector<64x32xf32>, vector<64x96xf32> -> vector<64x128xf32>
    %cst_120 = arith.constant 0.000000e+00 : f32
    %314 = vector.broadcast %cst_120 : f32 to vector<64x32xf32>
    %315 = arith.maximumf %306, %314 : vector<64x32xf32>
    %c9_i32_121 = arith.constant 9 : i32
    %316 = tpu.dynamic_rotate %315 by %c9_i32_121 dim 0 : vector<64x32xf32>, i32 -> vector<64x32xf32>
    %317 = vector.broadcast %0 : vector<64x1xf32> to vector<64x32xf32>
    %318 = arith.mulf %316, %317 : vector<64x32xf32>
    %c8_i32_122 = arith.constant 8 : i32
    %319 = tpu.dynamic_rotate %315 by %c8_i32_122 dim 0 : vector<64x32xf32>, i32 -> vector<64x32xf32>
    %320 = vector.broadcast %1 : vector<64x1xf32> to vector<64x32xf32>
    %321 = arith.mulf %319, %320 : vector<64x32xf32>
    %c7_i32_123 = arith.constant 7 : i32
    %322 = tpu.dynamic_rotate %315 by %c7_i32_123 dim 0 : vector<64x32xf32>, i32 -> vector<64x32xf32>
    %323 = vector.broadcast %2 : vector<64x1xf32> to vector<64x32xf32>
    %324 = arith.mulf %322, %323 : vector<64x32xf32>
    %c1_i32_124 = arith.constant 1 : i32
    %325 = tpu.dynamic_rotate %315 by %c1_i32_124 dim 0 : vector<64x32xf32>, i32 -> vector<64x32xf32>
    %326 = vector.broadcast %3 : vector<64x1xf32> to vector<64x32xf32>
    %327 = arith.mulf %325, %326 : vector<64x32xf32>
    %328 = vector.broadcast %4 : vector<64x1xf32> to vector<64x32xf32>
    %329 = arith.mulf %315, %328 : vector<64x32xf32>
    %c63_i32_125 = arith.constant 63 : i32
    %330 = tpu.dynamic_rotate %315 by %c63_i32_125 dim 0 : vector<64x32xf32>, i32 -> vector<64x32xf32>
    %331 = vector.broadcast %5 : vector<64x1xf32> to vector<64x32xf32>
    %332 = arith.mulf %330, %331 : vector<64x32xf32>
    %c57_i32_126 = arith.constant 57 : i32
    %333 = tpu.dynamic_rotate %315 by %c57_i32_126 dim 0 : vector<64x32xf32>, i32 -> vector<64x32xf32>
    %334 = vector.broadcast %6 : vector<64x1xf32> to vector<64x32xf32>
    %335 = arith.mulf %333, %334 : vector<64x32xf32>
    %c56_i32_127 = arith.constant 56 : i32
    %336 = tpu.dynamic_rotate %315 by %c56_i32_127 dim 0 : vector<64x32xf32>, i32 -> vector<64x32xf32>
    %337 = vector.broadcast %7 : vector<64x1xf32> to vector<64x32xf32>
    %338 = arith.mulf %336, %337 : vector<64x32xf32>
    %c55_i32_128 = arith.constant 55 : i32
    %339 = tpu.dynamic_rotate %315 by %c55_i32_128 dim 0 : vector<64x32xf32>, i32 -> vector<64x32xf32>
    %340 = vector.broadcast %8 : vector<64x1xf32> to vector<64x32xf32>
    %341 = arith.mulf %339, %340 : vector<64x32xf32>
    %342 = tpu.concatenate %318, %321, %324, %327, %329, %332, %335, %338, %341 in 1 : vector<64x32xf32>, vector<64x32xf32>, vector<64x32xf32>, vector<64x32xf32>, vector<64x32xf32>, vector<64x32xf32>, vector<64x32xf32>, vector<64x32xf32>, vector<64x32xf32> -> vector<64x288xf32>
    %c688 = arith.constant 688 : index
    %c0_129 = arith.constant 0 : index
    %343 = vector.load %arg3[%c688, %c0_129] : memref<2240x128xbf16, #tpu.memory_space<vmem>>, vector<288x128xbf16>
    %344 = arith.truncf %342 : vector<64x288xf32> to vector<64x288xbf16>
    %cst_130 = arith.constant dense<0.000000e+00> : vector<64x128xf32>
    %345 = tpu.matmul %344, %343, %cst_130 {dimension_numbers = #tpu.dot_dimension_numbers<[1], [0], [0], [1], [0, 0, 1, 1], [], []>} : vector<64x288xbf16>, vector<288x128xbf16>, vector<64x128xf32> -> vector<64x128xf32>
    %c11 = arith.constant 11 : index
    %c0_131 = arith.constant 0 : index
    %346 = vector.load %arg4[%c11, %c0_131] : memref<16x128xf32, #tpu.memory_space<vmem>>, vector<1x128xf32>
    %347 = vector.broadcast %346 : vector<1x128xf32> to vector<64x128xf32>
    %348 = arith.addf %345, %347 : vector<64x128xf32>
    %cst_132 = arith.constant 0.000000e+00 : f32
    %349 = vector.broadcast %cst_132 : f32 to vector<64x128xf32>
    %350 = arith.maximumf %348, %349 : vector<64x128xf32>
    %c9_i32_133 = arith.constant 9 : i32
    %351 = tpu.dynamic_rotate %350 by %c9_i32_133 dim 0 : vector<64x128xf32>, i32 -> vector<64x128xf32>
    %352 = vector.broadcast %0 : vector<64x1xf32> to vector<64x128xf32>
    %353 = arith.mulf %351, %352 : vector<64x128xf32>
    %c8_i32_134 = arith.constant 8 : i32
    %354 = tpu.dynamic_rotate %350 by %c8_i32_134 dim 0 : vector<64x128xf32>, i32 -> vector<64x128xf32>
    %355 = vector.broadcast %1 : vector<64x1xf32> to vector<64x128xf32>
    %356 = arith.mulf %354, %355 : vector<64x128xf32>
    %c7_i32_135 = arith.constant 7 : i32
    %357 = tpu.dynamic_rotate %350 by %c7_i32_135 dim 0 : vector<64x128xf32>, i32 -> vector<64x128xf32>
    %358 = vector.broadcast %2 : vector<64x1xf32> to vector<64x128xf32>
    %359 = arith.mulf %357, %358 : vector<64x128xf32>
    %c1_i32_136 = arith.constant 1 : i32
    %360 = tpu.dynamic_rotate %350 by %c1_i32_136 dim 0 : vector<64x128xf32>, i32 -> vector<64x128xf32>
    %361 = vector.broadcast %3 : vector<64x1xf32> to vector<64x128xf32>
    %362 = arith.mulf %360, %361 : vector<64x128xf32>
    %363 = vector.broadcast %4 : vector<64x1xf32> to vector<64x128xf32>
    %364 = arith.mulf %350, %363 : vector<64x128xf32>
    %c63_i32_137 = arith.constant 63 : i32
    %365 = tpu.dynamic_rotate %350 by %c63_i32_137 dim 0 : vector<64x128xf32>, i32 -> vector<64x128xf32>
    %366 = vector.broadcast %5 : vector<64x1xf32> to vector<64x128xf32>
    %367 = arith.mulf %365, %366 : vector<64x128xf32>
    %c57_i32_138 = arith.constant 57 : i32
    %368 = tpu.dynamic_rotate %350 by %c57_i32_138 dim 0 : vector<64x128xf32>, i32 -> vector<64x128xf32>
    %369 = vector.broadcast %6 : vector<64x1xf32> to vector<64x128xf32>
    %370 = arith.mulf %368, %369 : vector<64x128xf32>
    %c56_i32_139 = arith.constant 56 : i32
    %371 = tpu.dynamic_rotate %350 by %c56_i32_139 dim 0 : vector<64x128xf32>, i32 -> vector<64x128xf32>
    %372 = vector.broadcast %7 : vector<64x1xf32> to vector<64x128xf32>
    %373 = arith.mulf %371, %372 : vector<64x128xf32>
    %c55_i32_140 = arith.constant 55 : i32
    %374 = tpu.dynamic_rotate %350 by %c55_i32_140 dim 0 : vector<64x128xf32>, i32 -> vector<64x128xf32>
    %375 = vector.broadcast %8 : vector<64x1xf32> to vector<64x128xf32>
    %376 = arith.mulf %374, %375 : vector<64x128xf32>
    %377 = tpu.concatenate %353, %356, %359, %362, %364, %367, %370, %373, %376 in 1 : vector<64x128xf32>, vector<64x128xf32>, vector<64x128xf32>, vector<64x128xf32>, vector<64x128xf32>, vector<64x128xf32>, vector<64x128xf32>, vector<64x128xf32>, vector<64x128xf32> -> vector<64x1152xf32>
    %c976 = arith.constant 976 : index
    %c0_141 = arith.constant 0 : index
    %378 = vector.load %arg3[%c976, %c0_141] : memref<2240x128xbf16, #tpu.memory_space<vmem>>, vector<1152x128xbf16>
    %379 = arith.truncf %377 : vector<64x1152xf32> to vector<64x1152xbf16>
    %cst_142 = arith.constant dense<0.000000e+00> : vector<64x128xf32>
    %380 = tpu.matmul %379, %378, %cst_142 {dimension_numbers = #tpu.dot_dimension_numbers<[1], [0], [0], [1], [0, 0, 1, 1], [], []>} : vector<64x1152xbf16>, vector<1152x128xbf16>, vector<64x128xf32> -> vector<64x128xf32>
    %c12 = arith.constant 12 : index
    %c0_143 = arith.constant 0 : index
    %381 = vector.load %arg4[%c12, %c0_143] : memref<16x128xf32, #tpu.memory_space<vmem>>, vector<1x128xf32>
    %382 = vector.broadcast %381 : vector<1x128xf32> to vector<64x128xf32>
    %383 = arith.addf %380, %382 : vector<64x128xf32>
    %384 = arith.addf %383, %313 : vector<64x128xf32>
    %c0_144 = arith.constant 0 : index
    %c0_145 = arith.constant 0 : index
    %c0_146 = arith.constant 0 : index
    %385 = vector.load %arg5[%c0_144, %c0_145, %c0_146] : memref<1x64x128xf32, #tpu.memory_space<vmem>>, vector<1x64x128xf32>
    %386 = vector.shape_cast %385 : vector<1x64x128xf32> to vector<64x128xf32>
    %387 = vector.shape_cast %384 : vector<64x128xf32> to vector<1x64x128xf32>
    tpu.vector_store %arg5[%c0_144, %c0_145, %c0_146], %387 {strides = array<i32>} : memref<1x64x128xf32, #tpu.memory_space<vmem>>, vector<1x64x128xf32>,
    return
  }
  func.func @transform_0(%arg0: i32) -> (i32, i32, i32) {
    %c0_i32 = arith.constant 0 : i32
    %c0_i32_0 = arith.constant 0 : i32
    %c0_i32_1 = arith.constant 0 : i32
    return %arg0, %c0_i32, %c0_i32_0 : i32, i32, i32
  }
  func.func @transform_1(%arg0: i32) -> (i32, i32) {
    %c0_i32 = arith.constant 0 : i32
    %c0_i32_0 = arith.constant 0 : i32
    %c0_i32_1 = arith.constant 0 : i32
    return %c0_i32, %c0_i32_0 : i32, i32
  }
  func.func @transform_2(%arg0: i32) -> (i32, i32) {
    %c0_i32 = arith.constant 0 : i32
    %c0_i32_0 = arith.constant 0 : i32
    %c0_i32_1 = arith.constant 0 : i32
    return %c0_i32, %c0_i32_0 : i32, i32
  }
  func.func @transform_3(%arg0: i32) -> (i32, i32) {
    %c0_i32 = arith.constant 0 : i32
    %c0_i32_0 = arith.constant 0 : i32
    %c0_i32_1 = arith.constant 0 : i32
    return %c0_i32, %c0_i32_0 : i32, i32
  }
  func.func @transform_4(%arg0: i32) -> (i32, i32, i32) {
    %c0_i32 = arith.constant 0 : i32
    %c0_i32_0 = arith.constant 0 : i32
    %c0_i32_1 = arith.constant 0 : i32
    return %arg0, %c0_i32, %c0_i32_0 : i32, i32, i32
  }
}

</mosaic_0001>

<bundles_post_ra>
// kernel: tpu_custom_call.1
= control target key start
LH: loop header
LB: loop body
LE: loop exit
PB: predicated region body
PF: predicated region fallthrough
CT: control target
= control target key end

     0   :  { %9 = vsyncpa [#allocation3], 0  ;;  %s13916_s0 = inlined_call_operand.vmem [shape: f32[1,64,2], index: 0, kind: input, shape index: {}]   ;;  %s13917_s1 = inlined_call_operand.vmem [shape: f32[64,9], index: 1, kind: input, shape index: {}]   ;;  %s13918_s2 = inlined_call_operand.hbm [shape: bf16[2240,128], index: 2, kind: input, shape index: {}]   ;;  %s13919_s3 = inlined_call_operand.vmem [shape: f32[16,128], index: 3, kind: input, shape index: {}]   ;;  %s13920_s4 = inlined_call_operand.hbm [shape: f32[1,64,128], index: 4, kind: output, shape index: {}]  }
   0x1   :  { %10 = vsyncpa [#allocation4], 0  ;;  %s9542_s15 = smov [#allocation2]   ;;  %s9494_s19 = scalar_lea.hbm %s13918_s2, 17920 }
   0x2   :  { %s20_s16 = sshll.u32 %s9542_s15, 4  ;;  %p9495_p0 = scmp.ne.s32.totalorder %s13918_s2, %s9494_s19  ;;  %s21_s16 = int_to_ptr.vmem [resolvable:$true] %s20_s16 }
   0x3   :  { %p9498_p1 = scmp.lt.u32.totalorder %s9494_s19, %s13918_s2 }
   0x5   :  { %p9500_p2 = pnand %p9498_p1, %p9495_p0 }
   0x7   :  { %9503 = shalt.err (!%p9500_p2)
}
   0x8   :  { %s9504_s24 = scalar_lea.vmem %s21_s16, 17920  ;;  %p9509_p4 = scmp.lt.s32.totalorder %s21_s16, %s21_s16 }
   0x9   :  { %p9505_p3 = scmp.ne.s32.totalorder %s21_s16, %s9504_s24  ;;  %p9510_p5 = scmp.lt.s32.totalorder %s9504_s24, %s9504_s24 }
   0xb   :  { %p9511_p6 = por %p9510_p5, %p9509_p4 }
   0xd   :  { %p9512_p7 = pnand %p9511_p6, %p9505_p3 }
   0xf   :  { %9515 = shalt.err (!%p9512_p7)
}
  0x10   :  { %s9543_s25 = smov 64   ;;  %s9544_s26 = smov 4  }
  0x11   :  { %26 = dma.hbm_to_vmem [thread:$0]  %s13918_s2, 17920, %s21_s16, [#allocation3], %s9543_s25, %s9543_s25, %s9544_s26  }
  0x12   :  { %9538 = dma.done.wait [#allocation3], 17920  }
  0x13   :  { %9539 = vsyncadd [#allocation3], 4294949376  ;;  %v9545_v0 = vmov 1   ;;  %v9616_v1 = vld [vmem:[%s13917_s1 + $0x10] sm:$0xff]  ;;  %v9621_v2 = vld [vmem:[%s13917_s1] sm:$0xff]  ;;  %v9546_v7 = vmov 2   ;;  %v57_v24 = vlaneseq }
  0x14   :  { %8098 = vset.pattern.permute.xlu1 %v9545_v0  ;;  %8097 = vset.pattern.permute.xlu0 %v9545_v0  ;;  %v9628_v3 = vld [vmem:[%s13917_s1 + $0x18] sm:$0xff]  ;;  %v9633_v4 = vld [vmem:[%s13917_s1 + $0x8] sm:$0xff]  ;;  %v9645_v6 = vld [vmem:[%s13917_s1 + $0x30] sm:$0xff]  ;;  %v9547_v8 = vmov 3   ;;  %v9548_v11 = vmov 4   ;;  %v9549_v12 = vmov 5  }
  0x15   :  { %125 = vperm.xlu1 %8098, %v9616_v1   ;;  %117 = vperm.xlu0 %8097, %v9621_v2   ;;  %v9640_v5 = vld [vmem:[%s13917_s1 + $0x28] sm:$0xff]  ;;  %v9659_v9 = vld [vmem:[%s13917_s1 + $0x20] sm:$0xff]  ;;  %v9666_v10 = vld [vmem:[%s13917_s1 + $0x38] sm:$0xff]  ;;  %v9550_v13 = vmov 6   ;;  %v9551_v14 = vmov 7   ;;  %v9552_v15 = vmov 8  }
  0x16   :  { %v9553_v16 = vmov 0   ;;  %v9734_v19 = vld [vmem:[%s13916_s0 + $0x38] sm:$0xff]  ;;  %v9746_v23 = vld [vmem:[%s13916_s0] sm:$0xff]  ;;  %v9753_v28 = vshrl.u32 %v57_v24, 7  ;;  %s9554_s21 = smov 2   ;;  %v9761_v30 = vld [vmem:[%s13916_s0 + $0x8] sm:$0xff] }
  0x17   :  { %v156_v31 = vrot.slane %v9746_v23, 1  ;;  %v157_v32 = vrot.slane %v9761_v30, 1  ;;  %v13922_v33 = vrot.slane %v9734_v19, 1  ;;  %v49_v47 = vrot.slane %v9746_v23, 7  ;;  %s9555_s24 = smov 6   ;;  %s9556_s27 = smov 8  }
  0x18   :  { %14188 = vst [vmem:[#allocation13_spill] sm:$0xff] %v9753_v28  ;;  %vm164_vm0 = vcmp.lt.s32.totalorder %v9753_v28, 7  ;;  %v13921_v48 = vrot.slane %v9734_v19, 7  ;;  %vm59_vm1 = vcmp.lt.s32.totalorder %v9753_v28, 1  ;;  %v50_v50 = vrot.slane %v9761_v30, 7  ;;  %s9557_s6 = smov 10  }
  0x19   :  { %129 = vperm.xlu1 %8098, %v9628_v3   ;;  %121 = vperm.xlu0 %8097, %v9633_v4   ;;  %v9777_v36 = vsel %vm164_vm0, %v156_v31, %v157_v32  ;;  %v9783_v37 = vsel %vm164_vm0, %v13922_v33, %v156_v31  ;;  %s9558_s8 = smov 12   ;;  %s9559_s11 = smov 14   ;;  %vm815_vm2 = vcmask 1040384   ;;  %vm709_vm3 = vcmask 15360  }
  0x1a   :  { %v9817_v52 = vsel %vm59_vm1, %v49_v47, %v50_v50  ;;  %v9823_v53 = vsel %vm59_vm1, %v13921_v48, %v49_v47  ;;  %vm718_vm4 = vcmask 31744   ;;  %vm727_vm5 = vcmask 48128   ;;  %s9561_s1 = smov 28   ;;  %s9562_s18 = smov 20  }
  0x1b   :  { %vm736_vm6 = vcmask 64512   ;;  %vm745_vm7 = vcmask 80896   ;;  %vm754_vm8 = vcmask 97280   ;;  %vm763_vm9 = vcmask 113664   ;;  %s9563_s19 = smov 24   ;;  %s9564_s20 = smov 32  }
  0x1c   :  { %vm772_vm10 = vcmask 130048   ;;  %vm802_vm11 = vcmask 146432   ;;  %vm2025_vm12 = vcmask 1041408   ;;  %vm1947_vm13 = vcmask 162816   ;;  %s9565_s30 = smov 56   ;;  %s9566_s5 = smov 40  }
  0x1d   :  { %8099 = vset.pattern.permute.xlu1 %v9546_v7  ;;  %137 = vperm.xlu0 %8097, %v9640_v5   ;;  %vm1956_vm14 = vcmask 195584   ;;  %vm1965_vm15 = vcmask 228352  }
  0x1e   :  { %178 = vperm.xlu1 %8099, %v9633_v4  }
  0x21   :  { %141 = vperm.xlu0 %8097, %v9645_v6  }
  0x22   :  { %182 = vperm.xlu1 %8099, %v9616_v1  }
  0x25   :  { %8108 = vset.pattern.permute.xlu0 %v9546_v7 }
  0x26   :  { %8100 = vset.pattern.permute.xlu1 %v9547_v8  ;;  %174 = vperm.xlu0 %8108, %v9621_v2  }
  0x27   :  { %214 = vperm.xlu1 %8100, %v9621_v2  }
  0x2a   :  { %186 = vperm.xlu0 %8108, %v9628_v3  }
  0x2b   :  { %222 = vperm.xlu1 %8100, %v9616_v1  }
  0x2e   :  { %190 = vperm.xlu0 %8108, %v9659_v9  }
  0x2f   :  { %226 = vperm.xlu1 %8100, %v9628_v3  }
  0x32   :  { %202 = vperm.xlu0 %8108, %v9666_v10  }
  0x33   :  { %8101 = vset.pattern.permute.xlu1 %v9548_v11 }
  0x34   :  { %258 = vperm.xlu1 %8101, %v9633_v4  }
  0x36   :  { %8111 = vset.pattern.permute.xlu0 %v9547_v8 }
  0x37   :  { %218 = vperm.xlu0 %8111, %v9633_v4  }
  0x38   :  { %262 = vperm.xlu1 %8101, %v9616_v1  }
  0x3b   :  { %234 = vperm.xlu0 %8111, %v9640_v5  }
  0x3c   :  { %8102 = vset.pattern.permute.xlu1 %v9549_v12 }
  0x3d   :  { %294 = vperm.xlu1 %8102, %v9621_v2  }
  0x3f   :  { %8113 = vset.pattern.permute.xlu0 %v9548_v11 }
  0x40   :  { %254 = vperm.xlu0 %8113, %v9621_v2  }
  0x41   :  { %302 = vperm.xlu1 %8102, %v9616_v1  }
  0x44   :  { %266 = vperm.xlu0 %8113, %v9628_v3  }
  0x45   :  { %306 = vperm.xlu1 %8102, %v9628_v3  }
  0x48   :  { %270 = vperm.xlu0 %8113, %v9659_v9  }
  0x49   :  { %8103 = vset.pattern.permute.xlu1 %v9550_v13 }
  0x4a   :  { %338 = vperm.xlu1 %8103, %v9633_v4  }
  0x4c   :  { %282 = vperm.xlu0 %8113, %v9666_v10  }
  0x4e   :  { %342 = vperm.xlu1 %8103, %v9616_v1  }
  0x50   :  { %8115 = vset.pattern.permute.xlu0 %v9549_v12 }
  0x51   :  { %298 = vperm.xlu0 %8115, %v9633_v4  }
  0x52   :  { %8104 = vset.pattern.permute.xlu1 %v9551_v14 }
  0x53   :  { %374 = vperm.xlu1 %8104, %v9621_v2  }
  0x55   :  { %314 = vperm.xlu0 %8115, %v9640_v5  }
  0x57   :  { %382 = vperm.xlu1 %8104, %v9616_v1  }
  0x59   :  { %8117 = vset.pattern.permute.xlu0 %v9550_v13 }
  0x5a   :  { %334 = vperm.xlu0 %8117, %v9621_v2  }
  0x5b   :  { %386 = vperm.xlu1 %8104, %v9628_v3  }
  0x5e   :  { %346 = vperm.xlu0 %8117, %v9628_v3  }
  0x5f   :  { %8105 = vset.pattern.permute.xlu1 %v9552_v15 }
  0x60   :  { %418 = vperm.xlu1 %8105, %v9633_v4  }
  0x62   :  { %350 = vperm.xlu0 %8117, %v9659_v9  }
  0x64   :  { %8106 = vset.pattern.permute.xlu1 %v9545_v0 }
  0x65   :  { %133 = vperm.xlu1 %8106, %v9659_v9  }
  0x66   :  { %362 = vperm.xlu0 %8117, %v9666_v10  }
  0x69   :  { %8107 = vset.pattern.permute.xlu1 %v9552_v15 }
  0x6a   :  { %422 = vperm.xlu1 %8107, %v9616_v1   ;;  %8119 = vset.pattern.permute.xlu0 %v9551_v14 }
  0x6b   :  { %378 = vperm.xlu0 %8119, %v9633_v4  }
  0x6e   :  { %426 = vperm.xlu1 %8107, %v9628_v3  }
  0x6f   :  { %394 = vperm.xlu0 %8119, %v9640_v5  }
  0x72   :  { %8109 = vset.pattern.permute.xlu1 %v9545_v0 }
  0x73   :  { %145 = vperm.xlu1 %8109, %v9666_v10   ;;  %8121 = vset.pattern.permute.xlu0 %v9552_v15 }
  0x74   :  { %414 = vperm.xlu0 %8121, %v9621_v2  }
  0x77   :  { %8110 = vset.pattern.permute.xlu1 %v9546_v7 }
  0x78   :  { %194 = vperm.xlu1 %8110, %v9640_v5   ;;  %430 = vperm.xlu0 %8121, %v9659_v9  }
  0x7c   :  { %198 = vperm.xlu1 %8110, %v9645_v6   ;;  %442 = vperm.xlu0 %8121, %v9666_v10  }
  0x80   :  { %8112 = vset.pattern.permute.xlu1 %v9547_v8  ;;  %8124 = vset.pattern.permute.xlu0 %v9553_v16 }
  0x81   :  { %230 = vperm.xlu1 %8112, %v9659_v9   ;;  %75 = vperm.xlu0 %8124, %v9633_v4  }
  0x85   :  { %238 = vperm.xlu1 %8112, %v9645_v6   ;;  %90 = vperm.xlu0 %8124, %v9659_v9  }
  0x89   :  { %242 = vperm.xlu1 %8112, %v9666_v10   ;;  %100 = vperm.xlu0 %8124, %v9645_v6  }
  0x8d   :  { %8114 = vset.pattern.permute.xlu1 %v9548_v11  ;;  %9325 = vset.pattern.permute.xlu0 %v9552_v15 }
  0x8e   :  { %274 = vperm.xlu1 %8114, %v9640_v5  }
  0x92   :  { %278 = vperm.xlu1 %8114, %v9645_v6  }
  0x94   :  { %v9727_v17 = vpop.permute.xlu1 %125  ;;  %v9729_v18 = vpop.permute.xlu0 %117 }
  0x95   :  { %14183 = vst [vmem:[#allocation8_spill] sm:$0xff] %v9727_v17  ;;  %14184 = vst [vmem:[#allocation9_spill] sm:$0xff] %v9729_v18  ;;  %v148_v20 = vmul.f32 %v9729_v18, %v9734_v19 }
  0x96   :  { %8116 = vset.pattern.permute.xlu1 %v9549_v12  ;;  %v9873_v12 = vld [vmem:[%s13916_s0 + $0x18] sm:$0xff] }
  0x97   :  { %310 = vperm.xlu1 %8116, %v9659_v9  }
  0x98   :  { %v9739_v21 = vpop.permute.xlu1 %129  ;;  %v9741_v22 = vpop.permute.xlu0 %121 }
  0x99   :  { %14185 = vst [vmem:[#allocation10_spill] sm:$0xff] %v9739_v21  ;;  %14186 = vst [vmem:[#allocation11_spill] sm:$0xff] %v9741_v22  ;;  %v149_v25 = vmul.f32 %v9741_v22, %v9746_v23 }
  0x9b   :  { %318 = vperm.xlu1 %8116, %v9645_v6   ;;  %v8125_v26 = vpack.i.bf16 %v149_v25, %v148_v20 }
  0x9c   :  { %v9751_v27 = vpop.permute.xlu0 %137 }
  0x9d   :  { %14187 = vst [vmem:[#allocation12_spill] sm:$0xff] %v9751_v27  ;;  %v9755_v29 = vpop.permute.xlu1 %178  ;;  %8126 = vrot.lane.b32.xlu0 %v8125_v26, %s9554_s21  ;;  %v52_v26 = vrot.slane %v9873_v12, 7 }
  0x9e   :  { %14189 = vst [vmem:[#allocation14_spill] sm:$0xff] %v9755_v29  ;;  %v206_v41 = vmul.f32 %v9755_v29, %v9777_v36 }
  0x9f   :  { %322 = vperm.xlu1 %8116, %v9666_v10  }
  0xa0   :  { %v9767_v34 = vpop.permute.xlu0 %141 }
  0xa1   :  { %14190 = vst [vmem:[#allocation15_spill] sm:$0xff] %v9767_v34  ;;  %v9770_v35 = vpop.permute.xlu1 %182 }
  0xa2   :  { %14191 = vst [vmem:[#allocation16_spill] sm:$0xff] %v9770_v35 }
  0xa3   :  { %8118 = vset.pattern.permute.xlu1 %v9550_v13 }
  0xa4   :  { %354 = vperm.xlu1 %8118, %v9640_v5  }
  0xa5   :  { %v9786_v38 = vpop.permute.xlu0 %174 }
  0xa6   :  { %14192 = vst [vmem:[#allocation17_spill] sm:$0xff] %v9786_v38  ;;  %v9788_v39 = vpop.permute.xlu1 %214  ;;  %v205_v40 = vmul.f32 %v9786_v38, %v9783_v37 }
  0xa7   :  { %14193 = vst [vmem:[#allocation18_spill] sm:$0xff] %v9788_v39  ;;  %v245_v56 = vmul.f32 %v9788_v39, %v9823_v53 }
  0xa8   :  { %358 = vperm.xlu1 %8118, %v9645_v6   ;;  %v8135_v42 = vpack.i.bf16 %v206_v41, %v205_v40 }
  0xa9   :  { %v9795_v43 = vpop.permute.xlu0 %186 }
  0xaa   :  { %14194 = vst [vmem:[#allocation19_spill] sm:$0xff] %v9795_v43  ;;  %v9797_v44 = vpop.permute.xlu1 %222  ;;  %8136 = vrot.lane.b32.xlu0 %v8135_v42, %s9544_s26 }
  0xab   :  { %14195 = vst [vmem:[#allocation20_spill] sm:$0xff] %v9797_v44 }
  0xac   :  { %8120 = vset.pattern.permute.xlu1 %v9551_v14  ;;  %v159_v14 = vrot.slane %v9873_v12, 1 }
  0xad   :  { %390 = vperm.xlu1 %8120, %v9659_v9   ;;  %v9802_v45 = vpop.permute.xlu0 %190 }
  0xae   :  { %14196 = vst [vmem:[#allocation21_spill] sm:$0xff] %v9802_v45  ;;  %v9804_v46 = vpop.permute.xlu1 %226 }
  0xaf   :  { %14197 = vst [vmem:[#allocation22_spill] sm:$0xff] %v9804_v46 }
  0xb1   :  { %398 = vperm.xlu1 %8120, %v9645_v6   ;;  %v9809_v49 = vpop.permute.xlu0 %202 }
  0xb2   :  { %14198 = vst [vmem:[#allocation23_spill] sm:$0xff] %v9809_v49 }
  0xb3   :  { %v9813_v51 = vpop.permute.xlu1 %258 }
  0xb4   :  { %14199 = vst [vmem:[#allocation24_spill] sm:$0xff] %v9813_v51  ;;  %v286_v0 = vmul.f32 %v9813_v51, %v9761_v30 }
  0xb5   :  { %402 = vperm.xlu1 %8120, %v9666_v10  }
  0xb6   :  { %v9826_v54 = vpop.permute.xlu0 %218 }
  0xb7   :  { %14200 = vst [vmem:[#allocation25_spill] sm:$0xff] %v9826_v54  ;;  %v9828_v55 = vpop.permute.xlu1 %262  ;;  %v246_v57 = vmul.f32 %v9826_v54, %v9817_v52 }
  0xb8   :  { %14201 = vst [vmem:[#allocation26_spill] sm:$0xff] %v9828_v55 }
  0xb9   :  { %8122 = vset.pattern.permute.xlu1 %v9552_v15  ;;  %v8145_v58 = vpack.i.bf16 %v246_v57, %v245_v56 }
  0xba   :  { %434 = vperm.xlu1 %8122, %v9640_v5   ;;  %v9836_v59 = vpop.permute.xlu0 %234 }
  0xbb   :  { %14202 = vst [vmem:[#allocation27_spill] sm:$0xff] %v9836_v59  ;;  %8146 = vrot.lane.b32.xlu0 %v8145_v58, %s9555_s24 }
  0xbc   :  { %v9839_v60 = vpop.permute.xlu1 %294 }
  0xbd   :  { %14203 = vst [vmem:[#allocation28_spill] sm:$0xff] %v9839_v60 }
  0xbe   :  { %438 = vperm.xlu1 %8122, %v9645_v6  }
  0xbf   :  { %v9842_v61 = vpop.permute.xlu0 %254 }
  0xc0   :  { %14204 = vst [vmem:[#allocation29_spill] sm:$0xff] %v9842_v61  ;;  %v9844_v62 = vpop.permute.xlu1 %302  ;;  %v285_v63 = vmul.f32 %v9842_v61, %v9746_v23 }
  0xc1   :  { %14205 = vst [vmem:[#allocation30_spill] sm:$0xff] %v9844_v62 }
  0xc2   :  { %8123 = vset.pattern.permute.xlu1 %v9553_v16  ;;  %v8155_v4 = vpack.i.bf16 %v286_v0, %v285_v63  ;;  %v325_v16 = vmul.f32 %v9839_v60, %v9777_v36 }
  0xc3   :  { %70 = vperm.xlu1 %8123, %v9621_v2   ;;  %v9852_v7 = vpop.permute.xlu0 %266  ;;  %v9868_v2 = vld [vmem:[%s13916_s0 + $0x10] sm:$0xff] }
  0xc4   :  { %14206 = vst [vmem:[#allocation31_spill] sm:$0xff] %v9852_v7  ;;  %v9854_v8 = vpop.permute.xlu1 %306  ;;  %8156 = vrot.lane.b32.xlu0 %v8155_v4, %s9556_s27  ;;  %v151_v24 = vmul.f32 %v9739_v21, %v9868_v2  ;;  %v51_v41 = vrot.slane %v9868_v2, 7 }
  0xc5   :  { %14207 = vst [vmem:[#allocation32_spill] sm:$0xff] %v9854_v8 }
  0xc6   :  { %v9921_v58 = vsel %vm59_vm1, %v50_v50, %v51_v41 }
  0xc7   :  { %80 = vperm.xlu1 %8123, %v9616_v1   ;;  %v9858_v6 = vpop.permute.xlu0 %270  ;;  %v158_v1 = vrot.slane %v9868_v2, 1 }
  0xc8   :  { %14208 = vst [vmem:[#allocation33_spill] sm:$0xff] %v9858_v6 }
  0xc9   :  { %v9860_v9 = vpop.permute.xlu1 %338  ;;  %v9886_v15 = vsel %vm164_vm0, %v157_v32, %v158_v1  ;;  %v150_v32 = vmul.f32 %v9727_v17, %v9761_v30 }
  0xca   :  { %14209 = vst [vmem:[#allocation34_spill] sm:$0xff] %v9860_v9  ;;  %v207_v57 = vmul.f32 %v9770_v35, %v9886_v15  ;;  %v366_v50 = vmul.f32 %v9860_v9, %v9921_v58 }
  0xcb   :  { %85 = vperm.xlu1 %8123, %v9628_v3   ;;  %v9863_v11 = vpop.permute.xlu0 %282  ;;  %v8130_v42 = vpack.i.bf16 %v151_v24, %v150_v32 }
  0xcc   :  { %14210 = vst [vmem:[#allocation35_spill] sm:$0xff] %v9863_v11 }
  0xcd   :  { %v9876_v13 = vpop.permute.xlu1 %342 }
  0xce   :  { %14211 = vst [vmem:[#allocation36_spill] sm:$0xff] %v9876_v13 }
  0xcf   :  { %95 = vperm.xlu1 %8123, %v9640_v5   ;;  %v9898_v5 = vsel %vm164_vm0, %v158_v1, %v159_v14  ;;  %v9930_v1 = vld [vmem:[%s13916_s0 + $0x20] sm:$0xff] }
  0xd0   :  { %v9880_v3 = vpop.permute.xlu0 %298  ;;  %v208_v47 = vmul.f32 %v9795_v43, %v9898_v5  ;;  %v160_v24 = vrot.slane %v9930_v1, 1  ;;  %v13925_v48 = vrot.slane %v9930_v1, 7 }
  0xd1   :  { %14212 = vst [vmem:[#allocation37_spill] sm:$0xff] %v9880_v3  ;;  %v326_v20 = vmul.f32 %v9880_v3, %v9886_v15 }
  0xd2   :  { %v9894_v25 = vpop.permute.xlu1 %374  ;;  %v8140_v0 = vpack.i.bf16 %v208_v47, %v207_v57  ;;  %v288_v47 = vmul.f32 %v9852_v7, %v9873_v12  ;;  %v9949_v57 = vsel %vm164_vm0, %v159_v14, %v160_v24  ;;  %v9965_v14 = vsel %vm59_vm1, %v52_v26, %v13925_v48 }
  0xd3   :  { %14213 = vst [vmem:[#allocation38_spill] sm:$0xff] %v9894_v25  ;;  %105 = vperm.xlu1 %8123, %v9666_v10   ;;  %v8165_v31 = vpack.i.bf16 %v326_v20, %v325_v16  ;;  %v9914_v10 = vsel %vm59_vm1, %v51_v41, %v52_v26 }
  0xd4   :  { %v9904_v40 = vpop.permute.xlu0 %314  ;;  %v248_v4 = vmul.f32 %v9804_v46, %v9914_v10 }
  0xd5   :  { %14214 = vst [vmem:[#allocation39_spill] sm:$0xff] %v9904_v40  ;;  %8166 = vrot.lane.b32.xlu0 %v8165_v31, %s9557_s6  ;;  %v247_v31 = vmul.f32 %v9797_v44, %v9921_v58 }
  0xd6   :  { %v9910_v56 = vpop.permute.xlu1 %382 }
  0xd7   :  { %14215 = vst [vmem:[#allocation40_spill] sm:$0xff] %v9910_v56  ;;  %8131 = vrot.lane.b32.xlu1 %v8130_v42, %s9554_s21  ;;  %v8150_v42 = vpack.i.bf16 %v248_v4, %v247_v31  ;;  %v328_v31 = vmul.f32 %v9854_v8, %v9949_v57 }
  0xd9   :  { %v9923_v63 = vpop.permute.xlu0 %334 }
  0xda   :  { %14216 = vst [vmem:[#allocation41_spill] sm:$0xff] %v9923_v63  ;;  %v9932_v16 = vpop.permute.xlu1 %386  ;;  %v365_v20 = vmul.f32 %v9923_v63, %v9817_v52 }
  0xdb   :  { %14217 = vst [vmem:[#allocation42_spill] sm:$0xff] %v9932_v16  ;;  %8141 = vrot.lane.b32.xlu1 %v8140_v0, %s9544_s26 }
  0xdc   :  { %v8175_v32 = vpack.i.bf16 %v366_v50, %v365_v20  ;;  %v287_v20 = vmul.f32 %v9828_v55, %v9868_v2 }
  0xdd   :  { %v9942_v41 = vpop.permute.xlu0 %346 }
  0xde   :  { %14218 = vst [vmem:[#allocation43_spill] sm:$0xff] %v9942_v41  ;;  %8176 = vrot.lane.b32.xlu0 %v8175_v32, %s9558_s8  ;;  %v8160_v50 = vpack.i.bf16 %v288_v47, %v287_v20  ;;  %v327_v32 = vmul.f32 %v9844_v62, %v9898_v5  ;;  %v368_v47 = vmul.f32 %v9942_v41, %v9965_v14 }
  0xdf   :  { %v9952_v0 = vpop.permute.xlu1 %418  ;;  %8151 = vrot.lane.b32.xlu1 %v8150_v42, %s9555_s24  ;;  %v367_v20 = vmul.f32 %v9876_v13, %v9914_v10  ;;  %v9326_v13 = vld [vmem:[#allocation2] sm:$0xff]  }
  0xe0   :  { %14219 = vst [vmem:[#allocation44_spill] sm:$0xff] %v9952_v0  ;;  %v8170_v54 = vpack.i.bf16 %v328_v31, %v327_v32  ;;  %v407_v31 = vmul.f32 %v9910_v56, %v9873_v12  ;;  %v405_v32 = vmul.f32 %v9894_v25, %v9761_v30  ;;  %7782 = vmatprep.subr.bf16.mxu0 %v9326_v13 }
  0xe1   :  { %v9957_v4 = vpop.permute.xlu0 %350  ;;  %v8180_v48 = vpack.i.bf16 %v368_v47, %v367_v20  ;;  %7783 = vmatpush3.bf16.msra.mxu0 %v9326_v13  ;;  %v153_v30 = vmul.f32 %v9751_v27, %v9930_v1  ;;  %v10015_v13 = vld [vmem:[%s13916_s0 + $0x30] sm:$0xff] }
  0xe2   :  { %14220 = vst [vmem:[#allocation45_spill] sm:$0xff] %v9957_v4 }
  0xe3   :  { %8161 = vrot.lane.b32.xlu1 %v8160_v50, %s9556_s27  ;;  %v408_v50 = vmul.f32 %v9932_v16, %v9930_v1 }
  0xe4   :  { %v9970_v42 = vpop.permute.xlu1 %133 }
  0xe5   :  { %14221 = vst [vmem:[#allocation46_spill] sm:$0xff] %v9970_v42  ;;  %v9972_v33 = vpop.permute.xlu0 %362  ;;  %v8190_v47 = vpack.i.bf16 %v408_v50, %v407_v31  ;;  %v152_v39 = vmul.f32 %v9970_v42, %v9873_v12  ;;  %v9327_v12 = vld [vmem:[#allocation2 + $0x8] ss:$0 sps:$4 sm:$0x11]  }
  0xe6   :  { %14222 = vst [vmem:[#allocation47_spill] sm:$0xff] %v9972_v33  ;;  %8054 = vmatprep.subr.msk.bf16.mxu0 %vm815_vm2, %v9327_v12  ;;  %v817_v31 = vsel %vm815_vm2, %v9327_v12, 0  ;;  %v446_v12 = vmul.f32 %v9952_v0, %v9898_v5 }
  0xe7   :  { %8171 = vrot.lane.b32.xlu1 %v8170_v54, %s9557_s6  ;;  %v8200_v50 = vpack.i.bf16 %v153_v30, %v152_v39  ;;  %7785 = vmatpush3.bf16.msra.mxu0 %v817_v31 }
  0xe9   :  { %v9979_v26 = vpop.permute.xlu1 %422 }
  0xea   :  { %14223 = vst [vmem:[#allocation48_spill] sm:$0xff] %v9979_v26  ;;  %v9983_v62 = vpop.permute.xlu0 %378 }
  0xeb   :  { %14224 = vst [vmem:[#allocation49_spill] sm:$0xff] %v9983_v62  ;;  %8181 = vrot.lane.b32.xlu1 %v8180_v48, %s9558_s8  ;;  %v406_v54 = vmul.f32 %v9983_v62, %v9868_v2  ;;  %v10001_v48 = vld [vmem:[%s13916_s0 + $0x28] sm:$0xff]  ;;  %s9560_s0 = smov 16  }
  0xec   :  { %v161_v2 = vrot.slane %v10001_v48, 1 }
  0xed   :  { %v9992_v41 = vpop.permute.xlu1 %426  ;;  %v8185_v20 = vpack.i.bf16 %v406_v54, %v405_v32 }
  0xee   :  { %14225 = vst [vmem:[#allocation50_spill] sm:$0xff] %v9992_v41  ;;  %v9996_v8 = vpop.permute.xlu0 %394 }
  0xef   :  { %14226 = vst [vmem:[#allocation51_spill] sm:$0xff] %v9996_v8  ;;  %8191 = vrot.lane.b32.xlu1 %v8190_v47, %s9559_s11  ;;  %8186 = vrot.lane.b32.xlu0 %v8185_v20, %s9559_s11  ;;  %v154_v47 = vmul.f32 %v9767_v34, %v10001_v48  ;;  %v167_v20 = vsel %vm164_vm0, %v160_v24, %v161_v2 }
  0xf0   :  { %v448_v38 = vmul.f32 %v9992_v41, %v167_v20  ;;  %v447_v24 = vmul.f32 %v9979_v26, %v9949_v57  ;;  %v14232_v26 = vrot.slane %v9930_v1, 7 }
  0xf2   :  { %v10010_v32 = vpop.permute.xlu1 %145 }
  0xf3   :  { %14227 = vst [vmem:[#allocation52_spill] sm:$0xff] %v10010_v32  ;;  %8201 = vrot.lane.b32.xlu1 %v8200_v50, %s9554_s21  ;;  %v10018_v54 = vpop.permute.xlu0 %414  ;;  %v155_v39 = vmul.f32 %v10010_v32, %v10015_v13  ;;  %v162_v50 = vrot.slane %v10015_v13, 1 }
  0xf4   :  { %14228 = vst [vmem:[#allocation53_spill] sm:$0xff] %v10018_v54  ;;  %v445_v30 = vmul.f32 %v10018_v54, %v9886_v15  ;;  %v14230_v15 = vrot.slane %v9734_v19, 1 }
  0xf5   :  { %v8210_v31 = vpack.i.bf16 %v155_v39, %v154_v47  ;;  %v8205_v47 = vpack.i.bf16 %v448_v38, %v447_v24  ;;  %v209_v38 = vmul.f32 %v9802_v45, %v9949_v57 }
  0xf6   :  { %v8195_v29 = vpack.i.bf16 %v446_v12, %v445_v30  ;;  %v10042_v5 = vsel %vm164_vm0, %v162_v50, %v14230_v15  ;;  %v54_v30 = vrot.slane %v10001_v48, 7 }
  0xf7   :  { %v10032_v42 = vpop.permute.xlu1 %194  ;;  %8211 = vrot.lane.b32.xlu1 %v8210_v31, %s9554_s21  ;;  %v10050_v31 = vsel %vm164_vm0, %v161_v2, %v162_v50  ;;  %v212_v15 = vmul.f32 %v9809_v49, %v10042_v5 }
  0xf8   :  { %14229 = vst [vmem:[#allocation54_spill] sm:$0xff] %v10032_v42  ;;  %8196 = vrot.lane.b32.xlu0 %v8195_v29, %s9560_s0  ;;  %v210_v39 = vmul.f32 %v10032_v42, %v167_v20  ;;  %v10063_v41 = vsel %vm59_vm1, %v14232_v26, %v54_v30  ;;  %v14235_v26 = vrot.slane %v9734_v19, 7 }
  0xf9   :  { %v250_v57 = vmul.f32 %v9836_v59, %v10063_v41 }
  0xfa   :  { %v8215_v42 = vpack.i.bf16 %v210_v39, %v209_v38 }
  0xfb   :  { %v10046_v12 = vpop.permute.xlu1 %198 }
  0xfc   :  { %14231 = vst [vmem:[#allocation55_spill] sm:$0xff] %v10046_v12  ;;  %8206 = vrot.lane.b32.xlu0 %v8205_v47, %s9560_s0  ;;  %v211_v29 = vmul.f32 %v10046_v12, %v10050_v31  ;;  %v55_v47 = vrot.slane %v10015_v13, 7 }
  0xfe   :  { %v8220_v24 = vpack.i.bf16 %v212_v15, %v211_v29  ;;  %v10081_v15 = vsel %vm59_vm1, %v55_v47, %v14235_v26  ;;  %v289_v26 = vmul.f32 %v9858_v6, %v9930_v1 }
 0x100   :  { %v10065_v2 = vpop.permute.xlu1 %230  ;;  %8221 = vrot.lane.b32.xlu1 %v8220_v24, %s9544_s26  ;;  %8216 = vrot.lane.b32.xlu0 %v8215_v42, %s9544_s26  ;;  %v10085_v42 = vsel %vm59_vm1, %v54_v30, %v55_v47 }
 0x101   :  { %14233 = vst [vmem:[#allocation56_spill] sm:$0xff] %v10065_v2  ;;  %v249_v50 = vmul.f32 %v10065_v2, %v9965_v14 }
 0x103   :  { %v8225_v39 = vpack.i.bf16 %v250_v57, %v249_v50 }
 0x104   :  { %v10074_v29 = vpop.permute.xlu1 %238 }
 0x105   :  { %14234 = vst [vmem:[#allocation57_spill] sm:$0xff] %v10074_v29  ;;  %8226 = vrot.lane.b32.xlu0 %v8225_v39, %s9555_s24  ;;  %v251_v24 = vmul.f32 %v10074_v29, %v10085_v42 }
 0x108   :  { %v10087_v38 = vpop.permute.xlu1 %242 }
 0x109   :  { %14236 = vst [vmem:[#allocation58_spill] sm:$0xff] %v10087_v38  ;;  %v252_v50 = vmul.f32 %v10087_v38, %v10081_v15 }
 0x10b   :  { %v8230_v57 = vpack.i.bf16 %v252_v50, %v251_v24  ;;  %v292_v24 = vmul.f32 %v9863_v11, %v9734_v19 }
 0x10d   :  { %v10093_v39 = vpop.permute.xlu1 %274  ;;  %8231 = vrot.lane.b32.xlu1 %v8230_v57, %s9555_s24  ;;  %v330_v57 = vmul.f32 %v9904_v40, %v10050_v31 }
 0x10e   :  { %14237 = vst [vmem:[#allocation59_spill] sm:$0xff] %v10093_v39  ;;  %v290_v30 = vmul.f32 %v10093_v39, %v10001_v48 }
 0x110   :  { %v8235_v47 = vpack.i.bf16 %v290_v30, %v289_v26 }
 0x111   :  { %v10100_v49 = vpop.permute.xlu1 %278 }
 0x112   :  { %14238 = vst [vmem:[#allocation60_spill] sm:$0xff] %v10100_v49  ;;  %8236 = vrot.lane.b32.xlu0 %v8235_v47, %s9556_s27  ;;  %v291_v29 = vmul.f32 %v10100_v49, %v10015_v13 }
 0x114   :  { %v8240_v50 = vpack.i.bf16 %v292_v24, %v291_v29 }
 0x116   :  { %v10107_v38 = vpop.permute.xlu1 %310  ;;  %8241 = vrot.lane.b32.xlu1 %v8240_v50, %s9556_s27 }
 0x117   :  { %14239 = vst [vmem:[#allocation61_spill] sm:$0xff] %v10107_v38  ;;  %v329_v1 = vmul.f32 %v10107_v38, %v167_v20  ;;  %v369_v20 = vmul.f32 %v9957_v4, %v10063_v41 }
 0x119   :  { %v8245_v26 = vpack.i.bf16 %v330_v57, %v329_v1 }
 0x11a   :  { %v10113_v30 = vpop.permute.xlu1 %318 }
 0x11b   :  { %14240 = vst [vmem:[#allocation62_spill] sm:$0xff] %v10113_v30  ;;  %8246 = vrot.lane.b32.xlu0 %v8245_v26, %s9557_s6  ;;  %v331_v12 = vmul.f32 %v10113_v30, %v10042_v5 }
 0x11e   :  { %v10116_v47 = vpop.permute.xlu1 %322 }
 0x11f   :  { %14241 = vst [vmem:[#allocation63_spill] sm:$0xff] %v10116_v47  ;;  %v332_v29 = vmul.f32 %v10116_v47, %v9783_v37 }
 0x121   :  { %v8250_v24 = vpack.i.bf16 %v332_v29, %v331_v12  ;;  %v372_v12 = vmul.f32 %v9972_v33, %v9823_v53 }
 0x123   :  { %v10122_v50 = vpop.permute.xlu1 %354  ;;  %8251 = vrot.lane.b32.xlu1 %v8250_v24, %s9557_s6  ;;  %v10139_v24 = vpop.permute.xlu0 %430 }
 0x124   :  { %14242 = vst [vmem:[#allocation64_spill] sm:$0xff] %v10122_v50  ;;  %v370_v1 = vmul.f32 %v10122_v50, %v10085_v42  ;;  %14245 = vst [vmem:[#allocation67_spill] sm:$0xff] %v10139_v24 }
 0x126   :  { %v8255_v57 = vpack.i.bf16 %v370_v1, %v369_v20  ;;  %v410_v1 = vmul.f32 %v9996_v8, %v10015_v13  ;;  %v449_v13 = vmul.f32 %v10139_v24, %v10050_v31 }
 0x127   :  { %v10129_v26 = vpop.permute.xlu1 %358  ;;  %v10148_v4 = vpop.permute.xlu0 %442 }
 0x128   :  { %14243 = vst [vmem:[#allocation65_spill] sm:$0xff] %v10129_v26  ;;  %8256 = vrot.lane.b32.xlu0 %v8255_v57, %s9558_s8  ;;  %v371_v40 = vmul.f32 %v10129_v26, %v10081_v15  ;;  %14247 = vst [vmem:[#allocation69_spill] sm:$0xff] %v10148_v4 }
 0x12a   :  { %v8260_v29 = vpack.i.bf16 %v372_v12, %v371_v40 }
 0x12c   :  { %v10136_v38 = vpop.permute.xlu1 %390  ;;  %8261 = vrot.lane.b32.xlu1 %v8260_v29, %s9558_s8 }
 0x12d   :  { %14244 = vst [vmem:[#allocation66_spill] sm:$0xff] %v10136_v38  ;;  %v409_v20 = vmul.f32 %v10136_v38, %v10001_v48  ;;  %v10156_v48 = vpop.permute.xlu0 %75 }
 0x12e   :  { %14249 = vst [vmem:[#allocation71_spill] sm:$0xff] %v10156_v48  ;;  %v109_v24 = vmul.f32 %v10156_v48, %v9823_v53 }
 0x12f   :  { %v8265_v57 = vpack.i.bf16 %v410_v1, %v409_v20 }
 0x130   :  { %v10145_v50 = vpop.permute.xlu1 %398 }
 0x131   :  { %14246 = vst [vmem:[#allocation68_spill] sm:$0xff] %v10145_v50  ;;  %8266 = vrot.lane.b32.xlu0 %v8265_v57, %s9559_s11  ;;  %v411_v12 = vmul.f32 %v10145_v50, %v9734_v19 }
 0x134   :  { %v10150_v40 = vpop.permute.xlu1 %402 }
 0x135   :  { %14248 = vst [vmem:[#allocation70_spill] sm:$0xff] %v10150_v40  ;;  %v412_v29 = vmul.f32 %v10150_v40, %v9746_v23  ;;  %v452_v23 = vmul.f32 %v10148_v4, %v9777_v36 }
 0x137   :  { %v8270_v2 = vpack.i.bf16 %v412_v29, %v411_v12  ;;  %v10172_v12 = vpop.permute.xlu0 %90 }
 0x139   :  { %v10158_v59 = vpop.permute.xlu1 %434  ;;  %8271 = vrot.lane.b32.xlu1 %v8270_v2, %s9559_s11 }
 0x13a   :  { %14250 = vst [vmem:[#allocation72_spill] sm:$0xff] %v10158_v59  ;;  %v450_v20 = vmul.f32 %v10158_v59, %v10042_v5 }
 0x13b   :  { %v10177_v31 = vpop.permute.xlu0 %100 }
 0x13c   :  { %v8275_v1 = vpack.i.bf16 %v450_v20, %v449_v13  ;;  %14253 = vst [vmem:[#allocation75_spill] sm:$0xff] %v10177_v31 }
 0x13d   :  { %v10165_v57 = vpop.permute.xlu1 %438 }
 0x13e   :  { %14251 = vst [vmem:[#allocation73_spill] sm:$0xff] %v10165_v57  ;;  %8276 = vrot.lane.b32.xlu0 %v8275_v1, %s9560_s0  ;;  %v451_v19 = vmul.f32 %v10165_v57, %v9783_v37 }
 0x13f   :  { %v8127_v20 = vpop.permute.xlu0 %8126 }
 0x140   :  { %v8280_v2 = vpack.i.bf16 %v452_v23, %v451_v19  ;;  %v8128_v23 = vunpack.i.l.bf16 %v8127_v20  ;;  %v8129_v50 = vunpack.i.h.bf16 %v8127_v20 }
 0x142   :  { %v10174_v29 = vpop.permute.xlu1 %70  ;;  %8281 = vrot.lane.b32.xlu1 %v8280_v2, %s9560_s0 }
 0x143   :  { %14252 = vst [vmem:[#allocation74_spill] sm:$0xff] %v10174_v29  ;;  %v8137_v37 = vpop.permute.xlu0 %8136  ;;  %v108_v19 = vmul.f32 %v10174_v29, %v10081_v15  ;;  %v711_v15 = vsel %vm709_vm3, %v109_v24, %v8129_v50 }
 0x144   :  { %v8138_v33 = vunpack.i.l.bf16 %v8137_v37  ;;  %v8139_v30 = vunpack.i.h.bf16 %v8137_v37 }
 0x145   :  { %v710_v59 = vsel %vm709_vm3, %v108_v19, %v8128_v23  ;;  %v14366_v28 = vld [vmem:[#allocation73_spill] sm:$0xff] }
 0x146   :  { %v10179_v5 = vpop.permute.xlu1 %80  ;;  %v719_v45 = vsel %vm718_vm4, %v710_v59, %v8138_v33  ;;  %v720_v48 = vsel %vm718_vm4, %v711_v15, %v8139_v30 }
 0x147   :  { %14254 = vst [vmem:[#allocation76_spill] sm:$0xff] %v10179_v5  ;;  %v8147_v36 = vpop.permute.xlu0 %8146 }
 0x148   :  { %v8148_v32 = vunpack.i.l.bf16 %v8147_v36  ;;  %v8149_v29 = vunpack.i.h.bf16 %v8147_v36 }
 0x14a   :  { %v10181_v13 = vpop.permute.xlu1 %85  ;;  %v728_v19 = vsel %vm727_vm5, %v719_v45, %v8148_v32  ;;  %v729_v37 = vsel %vm727_vm5, %v720_v48, %v8149_v29  ;;  %v110_v45 = vmul.f32 %v10179_v5, %v9817_v52 }
 0x14b   :  { %14255 = vst [vmem:[#allocation77_spill] sm:$0xff] %v10181_v13  ;;  %v8157_v40 = vpop.permute.xlu0 %8156  ;;  %v111_v32 = vmul.f32 %v10181_v13, %v9921_v58 }
 0x14c   :  { %v8159_v34 = vunpack.i.h.bf16 %v8157_v40  ;;  %v8158_v53 = vunpack.i.l.bf16 %v8157_v40 }
 0x14e   :  { %v10183_v1 = vpop.permute.xlu1 %95  ;;  %v737_v50 = vsel %vm736_vm6, %v728_v19, %v8158_v53  ;;  %v738_v30 = vsel %vm736_vm6, %v729_v37, %v8159_v34 }
 0x14f   :  { %v8167_v26 = vpop.permute.xlu0 %8166 }
 0x150   :  { %v8169_v33 = vunpack.i.h.bf16 %v8167_v26  ;;  %v8168_v59 = vunpack.i.l.bf16 %v8167_v26 }
 0x152   :  { %v10185_v57 = vpop.permute.xlu1 %105  ;;  %v746_v48 = vsel %vm745_vm7, %v737_v50, %v8168_v59  ;;  %v747_v29 = vsel %vm745_vm7, %v738_v30, %v8169_v33 }
 0x153   :  { %14256 = vst [vmem:[#allocation78_spill] sm:$0xff] %v10185_v57  ;;  %v8177_v23 = vpop.permute.xlu0 %8176 }
 0x154   :  { %v8179_v24 = vunpack.i.h.bf16 %v8177_v23  ;;  %v8178_v36 = vunpack.i.l.bf16 %v8177_v23 }
 0x156   :  { %v8132_v4 = vpop.permute.xlu1 %8131  ;;  %v755_v5 = vsel %vm754_vm8, %v746_v48, %v8178_v36  ;;  %v756_v58 = vsel %vm754_vm8, %v747_v29, %v8179_v24 }
 0x157   :  { %v8134_v40 = vunpack.i.h.bf16 %v8132_v4  ;;  %v8133_v8 = vunpack.i.l.bf16 %v8132_v4 }
 0x159   :  { %v713_v4 = vsel %vm709_vm3, %v111_v32, %v8134_v40  ;;  %v712_v34 = vsel %vm709_vm3, %v110_v45, %v8133_v8 }
 0x15a   :  { %v8142_v2 = vpop.permute.xlu1 %8141 }
 0x15b   :  { %v8144_v15 = vunpack.i.h.bf16 %v8142_v2  ;;  %v8143_v26 = vunpack.i.l.bf16 %v8142_v2 }
 0x15d   :  { %v722_v13 = vsel %vm718_vm4, %v713_v4, %v8144_v15  ;;  %v721_v59 = vsel %vm718_vm4, %v712_v34, %v8143_v26 }
 0x15e   :  { %v8152_v47 = vpop.permute.xlu1 %8151 }
 0x15f   :  { %v8154_v19 = vunpack.i.h.bf16 %v8152_v47  ;;  %v8153_v23 = vunpack.i.l.bf16 %v8152_v47 }
 0x161   :  { %v8187_v49 = vpop.permute.xlu0 %8186  ;;  %v731_v36 = vsel %vm727_vm5, %v722_v13, %v8154_v19 }
 0x162   :  { %v8162_v20 = vpop.permute.xlu1 %8161  ;;  %v8189_v53 = vunpack.i.h.bf16 %v8187_v49  ;;  %v8188_v52 = vunpack.i.l.bf16 %v8187_v49  ;;  %v730_v49 = vsel %vm727_vm5, %v721_v59, %v8153_v23 }
 0x163   :  { %v8164_v37 = vunpack.i.h.bf16 %v8162_v20  ;;  %v8163_v2 = vunpack.i.l.bf16 %v8162_v20 }
 0x164   :  { %v764_v8 = vsel %vm763_vm9, %v755_v5, %v8188_v52  ;;  %v765_v20 = vsel %vm763_vm9, %v756_v58, %v8189_v53 }
 0x165   :  { %v740_v45 = vsel %vm736_vm6, %v731_v36, %v8164_v37  ;;  %v739_v40 = vsel %vm736_vm6, %v730_v49, %v8163_v2 }
 0x166   :  { %v8172_v38 = vpop.permute.xlu1 %8171 }
 0x167   :  { %v8174_v50 = vunpack.i.h.bf16 %v8172_v38  ;;  %v8173_v33 = vunpack.i.l.bf16 %v8172_v38 }
 0x169   :  { %v748_v26 = vsel %vm745_vm7, %v739_v40, %v8173_v33  ;;  %v749_v13 = vsel %vm745_vm7, %v740_v45, %v8174_v50 }
 0x16a   :  { %v8182_v30 = vpop.permute.xlu1 %8181  ;;  %v8197_v47 = vpop.permute.xlu0 %8196 }
 0x16b   :  { %v8199_v48 = vunpack.i.h.bf16 %v8197_v47  ;;  %v8198_v24 = vunpack.i.l.bf16 %v8197_v47  ;;  %v8184_v29 = vunpack.i.h.bf16 %v8182_v30  ;;  %v8183_v32 = vunpack.i.l.bf16 %v8182_v30 }
 0x16d   :  { %v773_v38 = vsel %vm772_vm10, %v764_v8, %v8198_v24  ;;  %v774_v15 = vsel %vm772_vm10, %v765_v20, %v8199_v48  ;;  %v758_v53 = vsel %vm754_vm8, %v749_v13, %v8184_v29  ;;  %v757_v58 = vsel %vm754_vm8, %v748_v26, %v8183_v32 }
 0x16e   :  { %v8192_v19 = vpop.permute.xlu1 %8191  ;;  %v8207_v23 = vpop.permute.xlu0 %8206  ;;  %v784_v4 = vpack.c.bf16 %v774_v15, %v773_v38  ;;  %v113_v38 = vmul.f32 %v10183_v1, %v9965_v14  ;;  %v112_v15 = vmul.f32 %v10172_v12, %v9914_v10 }
 0x16f   :  { %v8194_v34 = vunpack.i.h.bf16 %v8192_v19  ;;  %v8193_v59 = vunpack.i.l.bf16 %v8192_v19  ;;  %v8209_v5 = vunpack.i.h.bf16 %v8207_v23  ;;  %v8208_v52 = vunpack.i.l.bf16 %v8207_v23 }
 0x170   :  { %7786 = vmatprep.mubr.msk.bf16.mxu0 %vm802_vm11, %v784_v4 }
 0x171   :  { %v766_v37 = vsel %vm763_vm9, %v757_v58, %v8193_v59  ;;  %v767_v2 = vsel %vm763_vm9, %v758_v53, %v8194_v34  ;;  %v114_v53 = vmul.f32 %v10177_v31, %v10063_v41 }
 0x172   :  { %v776_v33 = vsel %vm772_vm10, %v767_v2, %v8209_v5  ;;  %v775_v50 = vsel %vm772_vm10, %v766_v37, %v8208_v52  ;;  %v8202_v47 = vpop.permute.xlu1 %8201  ;;  %v8217_v36 = vpop.permute.xlu0 %8216  ;;  %v115_v52 = vmul.f32 %v10185_v57, %v10085_v42 }
 0x173   :  { %v785_v30 = vpack.c.bf16 %v776_v33, %v775_v50  ;;  %v8204_v8 = vunpack.i.h.bf16 %v8202_v47  ;;  %v8203_v20 = vunpack.i.l.bf16 %v8202_v47  ;;  %v8219_v26 = vunpack.i.h.bf16 %v8217_v36 }
 0x174   :  { %v8218_v13 = vunpack.i.l.bf16 %v8217_v36 }
 0x175   :  { %7787 = vmatmul.mubr.msk.bf16.vlgmr.msra.gmra.mrb[0].mxu0 %vm802_vm11, %v785_v30  ;;  %v715_v19 = vsel %vm709_vm3, %v113_v38, %v8204_v8  ;;  %v714_v23 = vsel %vm709_vm3, %v112_v15, %v8203_v20 }
 0x176   :  { %v8212_v49 = vpop.permute.xlu1 %8211  ;;  %v724_v50 = vsel %vm718_vm4, %v715_v19, %v8219_v26  ;;  %v723_v30 = vsel %vm718_vm4, %v714_v23, %v8218_v13 }
 0x177   :  { %v8227_v24 = vpop.permute.xlu0 %8226  ;;  %v8214_v4 = vunpack.i.h.bf16 %v8212_v49  ;;  %v8213_v34 = vunpack.i.l.bf16 %v8212_v49 }
 0x178   :  { %v8229_v37 = vunpack.i.h.bf16 %v8227_v24  ;;  %v8228_v10 = vunpack.i.l.bf16 %v8227_v24 }
 0x179   :  { %v717_v36 = vsel %vm709_vm3, %v115_v52, %v8214_v4  ;;  %v716_v8 = vsel %vm709_vm3, %v114_v53, %v8213_v34 }
 0x17a   :  { %v8222_v48 = vpop.permute.xlu1 %8221  ;;  %v732_v26 = vsel %vm727_vm5, %v723_v30, %v8228_v10  ;;  %v733_v13 = vsel %vm727_vm5, %v724_v50, %v8229_v37 }
 0x17b   :  { %v8224_v14 = vunpack.i.h.bf16 %v8222_v48  ;;  %v8223_v58 = vunpack.i.l.bf16 %v8222_v48 }
 0x17d   :  { %v725_v48 = vsel %vm718_vm4, %v716_v8, %v8223_v58  ;;  %v726_v24 = vsel %vm718_vm4, %v717_v36, %v8224_v14 }
 0x17f   :  { %v8232_v29 = vpop.permute.xlu1 %8231 }
 0x180   :  { %v8234_v2 = vunpack.i.h.bf16 %v8232_v29  ;;  %v8233_v33 = vunpack.i.l.bf16 %v8232_v29 }
 0x182   :  { %v735_v19 = vsel %vm727_vm5, %v726_v24, %v8234_v2 }
 0x184   :  { %v8237_v32 = vpop.permute.xlu0 %8236 }
 0x185   :  { %v8239_v47 = vunpack.i.h.bf16 %v8237_v32  ;;  %v8238_v49 = vunpack.i.l.bf16 %v8237_v32  ;;  %v734_v32 = vsel %vm727_vm5, %v725_v48, %v8233_v33 }
 0x187   :  { %v741_v23 = vsel %vm736_vm6, %v732_v26, %v8238_v49 }
 0x188   :  { %v10229_v45 = vpop.permute.xlu1 %8241 }
 0x189   :  { %v8244_v52 = vunpack.i.h.bf16 %v10229_v45  ;;  %v8243_v53 = vunpack.i.l.bf16 %v10229_v45 }
 0x18b   :  { %v744_v48 = vsel %vm736_vm6, %v735_v19, %v8244_v52 }
 0x18d   :  { %v8247_v40 = vpop.permute.xlu0 %8246 }
 0x18e   :  { %v8249_v42 = vunpack.i.h.bf16 %v8247_v40  ;;  %v8248_v20 = vunpack.i.l.bf16 %v8247_v40  ;;  %v742_v40 = vsel %vm736_vm6, %v733_v13, %v8239_v47 }
 0x190   :  { %v751_v14 = vsel %vm745_vm7, %v742_v40, %v8249_v42  ;;  %v743_v42 = vsel %vm736_vm6, %v734_v32, %v8243_v53 }
 0x195   :  { %v8252_v59 = vpop.permute.xlu1 %8251 }
 0x196   :  { %v8254_v37 = vunpack.i.h.bf16 %v8252_v59  ;;  %v8253_v10 = vunpack.i.l.bf16 %v8252_v59 }
 0x19a   :  { %v8257_v5 = vpop.permute.xlu0 %8256 }
 0x19b   :  { %v8259_v15 = vunpack.i.h.bf16 %v8257_v5  ;;  %v8258_v29 = vunpack.i.l.bf16 %v8257_v5  ;;  %v750_v5 = vsel %vm745_vm7, %v741_v23, %v8248_v20 }
 0x19d   :  { %v759_v33 = vsel %vm754_vm8, %v750_v5, %v8258_v29  ;;  %v760_v2 = vsel %vm754_vm8, %v751_v14, %v8259_v15  ;;  %v752_v15 = vsel %vm745_vm7, %v743_v42, %v8253_v10  ;;  %v884_v5 = vld [vmem:[#allocation2 + $0x10] sm:$0x1] }
 0x19e   :  { %v8262_v38 = vpop.permute.xlu1 %8261  ;;  %8055 = vmatprep.subr.msk.bf16.mxu1 %vm815_vm2, %v884_v5  ;;  %v907_v14 = vsel %vm815_vm2, %v884_v5, 0 }
 0x19f   :  { %v8264_v30 = vunpack.i.h.bf16 %v8262_v38  ;;  %v8263_v47 = vunpack.i.l.bf16 %v8262_v38  ;;  %v753_v38 = vsel %vm745_vm7, %v744_v48, %v8254_v37  ;;  %7795 = vmatpush3.bf16.msra.mxu1 %v907_v14 }
 0x1a1   :  { %v762_v13 = vsel %vm754_vm8, %v753_v38, %v8264_v30  ;;  %v761_v23 = vsel %vm754_vm8, %v752_v15, %v8263_v47 }
 0x1a3   :  { %v8267_v41 = vpop.permute.xlu0 %8266 }
 0x1a4   :  { %v8269_v4 = vunpack.i.h.bf16 %v8267_v41  ;;  %v8268_v34 = vunpack.i.l.bf16 %v8267_v41 }
 0x1a6   :  { %v768_v8 = vsel %vm763_vm9, %v759_v33, %v8268_v34  ;;  %v769_v45 = vsel %vm763_vm9, %v760_v2, %v8269_v4 }
 0x1ab   :  { %v8272_v58 = vpop.permute.xlu1 %8271 }
 0x1ac   :  { %v8274_v41 = vunpack.i.h.bf16 %v8272_v58  ;;  %v8273_v20 = vunpack.i.l.bf16 %v8272_v58  ;;  %v10280_v58 = vld [vmem:[%s13919_s3] ss:$0 sm:$0xff] }
 0x1ae   :  { %v770_v32 = vsel %vm763_vm9, %v761_v23, %v8273_v20  ;;  %v771_v19 = vsel %vm763_vm9, %v762_v13, %v8274_v41 }
 0x1b0   :  { %v8277_v50 = vpop.permute.xlu0 %8276 }
 0x1b1   :  { %v8279_v49 = vunpack.i.h.bf16 %v8277_v50  ;;  %v8278_v36 = vunpack.i.l.bf16 %v8277_v50 }
 0x1b3   :  { %v777_v59 = vsel %vm772_vm10, %v768_v8, %v8278_v36  ;;  %v778_v24 = vsel %vm772_vm10, %v769_v45, %v8279_v49 }
 0x1b4   :  { %v8282_v29 = vpop.permute.xlu1 %8281  ;;  %v786_v26 = vpack.c.bf16 %v778_v24, %v777_v59 }
 0x1b5   :  { %v8284_v40 = vunpack.i.h.bf16 %v8282_v29  ;;  %v8283_v4 = vunpack.i.l.bf16 %v8282_v29 }
 0x1b6   :  { %7790 = vmatprep.mubr.msk.bf16.mxu0 %vm802_vm11, %v786_v26 }
 0x1b7   :  { %v780_v34 = vsel %vm772_vm10, %v771_v19, %v8284_v40  ;;  %v779_v52 = vsel %vm772_vm10, %v770_v32, %v8283_v4 }
 0x1b8   :  { %v787_v53 = vpack.c.bf16 %v780_v34, %v779_v52 }
 0x1ba   :  { %7791 = vmatmul.mubr.msk.bf16.gmra.mrb[4].mxu0 %vm802_vm11, %v787_v53 }
 0x248   :  { %v7788_v37 = vpop.f32.mrb[0].mxu0 }
 0x249   :  { %v10283_v10 = vadd.f32 %v7788_v37, %v10280_v58  ;;  %v853_v33 = vpop.f32.mrb[1].mxu0 }
 0x24a   :  { %v10286_v2 = vadd.f32 %v10280_v58, %v853_v33  ;;  %v7789_v50 = vpop.f32.mrb[2].mxu0 }
 0x24b   :  { %14257 = vst [vmem:[#allocation79_spill] sm:$0xff] %v10283_v10  ;;  %v1016_v30 = vmax.f32 %v10283_v10, 0.0  ;;  %v10290_v47 = vadd.f32 %v7789_v50, %v10280_v58  ;;  %v856_v49 = vpop.f32.mrb[3].mxu0 }
 0x24c   :  { %14258 = vst [vmem:[#allocation80_spill] sm:$0xff] %v10286_v2  ;;  %v10293_v36 = vmax.f32 %v10286_v2, 0.0  ;;  %v10296_v8 = vadd.f32 %v10280_v58, %v856_v49 }
 0x24d   :  { %14259 = vst [vmem:[#allocation81_spill] sm:$0xff] %v10290_v47  ;;  %v10299_v45 = vmax.f32 %v10290_v47, 0.0  ;;  %v886_v41 = vpack.c.bf16 %v10290_v47, %v10283_v10  ;;  %v1088_v48 = vmul.f32 %v1016_v30, %v9828_v55  ;;  %v1056_v13 = vrot.slane %v1016_v30, 1  ;;  %v14271_v47 = vld [vmem:[#allocation17_spill] sm:$0xff] }
 0x24e   :  { %14260 = vst [vmem:[#allocation82_spill] sm:$0xff] %v10296_v8  ;;  %v1015_v20 = vmax.f32 %v10296_v8, 0.0  ;;  %v885_v42 = vpack.c.bf16 %v10296_v8, %v10286_v2  ;;  %v1086_v24 = vmul.f32 %v10293_v36, %v9842_v61  ;;  %v1049_v40 = vmul.f32 %v1016_v30, %v9739_v21 }
 0x24f   :  { %v1089_v59 = vmul.f32 %v10299_v45, %v9852_v7  ;;  %v14010_v15 = vrot.slane %v10299_v45, 1  ;;  %v14011_v32 = vrot.slane %v10293_v36, 1  ;;  %v1111_v5 = vmul.f32 %v1016_v30, %v9983_v62 }
 0x250   :  { %7796 = vmatprep.mubr.msk.bf16.mxu1 %vm709_vm3, %v885_v42  ;;  %v1087_v38 = vmul.f32 %v1015_v20, %v9813_v51  ;;  %v1048_v29 = vmul.f32 %v1015_v20, %v9727_v17  ;;  %v1055_v26 = vrot.slane %v1015_v20, 1  ;;  %v1110_v4 = vmul.f32 %v1015_v20, %v9894_v25 }
 0x251   :  { %7797 = vmatmul.mubr.msk.bf16.vlgmr.msra.gmra.mrb[0].mxu1 %vm709_vm3, %v886_v41  ;;  %v8285_v23 = vpack.i.bf16 %v1089_v59, %v1088_v48  ;;  %v10323_v34 = vsel %vm164_vm0, %v1056_v13, %v14010_v15  ;;  %v1023_v53 = vrot.slane %v1015_v20, 7  ;;  %v1024_v33 = vrot.slane %v1016_v30, 7  ;;  %v14266_v15 = vld [vmem:[#allocation66_spill] sm:$0xff] }
 0x252   :  { %v8295_v19 = vpack.i.bf16 %v1087_v38, %v1086_v24  ;;  %v1067_v52 = vsel %vm164_vm0, %v1055_v26, %v1056_v13  ;;  %v10333_v14 = vsel %vm164_vm0, %v14011_v32, %v1055_v26  ;;  %v8290_v37 = vpack.i.bf16 %v1049_v40, %v1048_v29 }
 0x253   :  { %8286 = vrot.lane.b32.xlu1 %v8285_v23, %s9556_s27  ;;  %v14008_v50 = vrot.slane %v10299_v45, 7  ;;  %v8300_v49 = vpack.i.bf16 %v1111_v5, %v1110_v4  ;;  %v1072_v41 = vmul.f32 %v1067_v52, %v9770_v35  ;;  %v1073_v20 = vmul.f32 %v10323_v34, %v9795_v43 }
 0x254   :  { %8296 = vrot.lane.b32.xlu0 %v8295_v19, %s9556_s27  ;;  %v14009_v42 = vrot.slane %v10293_v36, 7  ;;  %v1094_v48 = vmul.f32 %v10333_v14, %v9839_v60  ;;  %v1095_v59 = vmul.f32 %v1067_v52, %v9880_v3  ;;  %v10352_v24 = vsel %vm59_vm1, %v1023_v53, %v1024_v33 }
 0x255   :  { %v10348_v30 = vsel %vm59_vm1, %v1024_v33, %v14008_v50  ;;  %v8305_v29 = vpack.i.bf16 %v1073_v20, %v1072_v41  ;;  %v1080_v26 = vmul.f32 %v10352_v24, %v9797_v44  ;;  %v1103_v4 = vmul.f32 %v10352_v24, %v9860_v9  ;;  %v14265_v50 = vld [vmem:[#allocation46_spill] sm:$0xff] }
 0x256   :  { %v10359_v38 = vsel %vm59_vm1, %v14009_v42, %v1023_v53  ;;  %v1081_v13 = vmul.f32 %v10348_v30, %v9804_v46  ;;  %v8315_v23 = vpack.i.bf16 %v1095_v59, %v1094_v48  ;;  %v1118_v5 = vmul.f32 %v1067_v52, %v10018_v54 }
 0x257   :  { %8291 = vrot.lane.b32.xlu1 %v8290_v37, %s9554_s21  ;;  %v1102_v40 = vmul.f32 %v10359_v38, %v9923_v63  ;;  %v1119_v37 = vmul.f32 %v10323_v34, %v9952_v0  ;;  %v1050_v42 = vmul.f32 %v10299_v45, %v14265_v50  ;;  %v14272_v10 = vrot.slane %v10299_v45, 1 }
 0x258   :  { %8301 = vrot.lane.b32.xlu0 %v8300_v49, %s9559_s11  ;;  %v8310_v19 = vpack.i.bf16 %v1081_v13, %v1080_v26 }
 0x259   :  { %v8320_v53 = vpack.i.bf16 %v1103_v4, %v1102_v40  ;;  %v8325_v33 = vpack.i.bf16 %v1119_v37, %v1118_v5  ;;  %v1047_v37 = vmul.f32 %v10293_v36, %v9741_v22 }
 0x25b   :  { %8306 = vrot.lane.b32.xlu1 %v8305_v29, %s9544_s26 }
 0x25c   :  { %8316 = vrot.lane.b32.xlu0 %v8315_v23, %s9557_s6 }
 0x25f   :  { %8311 = vrot.lane.b32.xlu1 %v8310_v19, %s9555_s24  ;;  %v1112_v19 = vmul.f32 %v10299_v45, %v9910_v56 }
 0x260   :  { %8321 = vrot.lane.b32.xlu0 %v8320_v53, %s9558_s8 }
 0x264   :  { %8326 = vrot.lane.b32.xlu0 %v8325_v33, %s9560_s0 }
 0x28d   :  { %v7792_v49 = vpop.f32.mrb[4].mxu0 }
 0x28e   :  { %v869_v41 = vpop.f32.mrb[5].mxu0  ;;  %v10391_v13 = vadd.f32 %v7792_v49, %v10280_v58 }
 0x28f   :  { %v10379_v20 = vadd.f32 %v10280_v58, %v869_v41  ;;  %v7793_v48 = vpop.f32.mrb[6].mxu0 }
 0x290   :  { %v10382_v59 = vadd.f32 %v7793_v48, %v10280_v58  ;;  %v872_v52 = vpop.f32.mrb[7].mxu0  ;;  %14264 = vst [vmem:[#allocation86_spill] sm:$0xff] %v10391_v13 }
 0x291   :  { %14261 = vst [vmem:[#allocation83_spill] sm:$0xff] %v10379_v20  ;;  %v10385_v29 = vmax.f32 %v10379_v20, 0.0  ;;  %v10388_v26 = vadd.f32 %v10280_v58, %v872_v52  ;;  %v10418_v52 = vmax.f32 %v10391_v13, 0.0 }
 0x292   :  { %14262 = vst [vmem:[#allocation84_spill] sm:$0xff] %v10382_v59  ;;  %v10394_v23 = vmax.f32 %v10382_v59, 0.0  ;;  %v888_v5 = vpack.c.bf16 %v10382_v59, %v10391_v13  ;;  %v14267_v13 = vld [vmem:[#allocation60_spill] sm:$0xff] }
 0x293   :  { %14263 = vst [vmem:[#allocation85_spill] sm:$0xff] %v10388_v26  ;;  %v887_v40 = vpack.c.bf16 %v10388_v26, %v10379_v20  ;;  %v10399_v4 = vmax.f32 %v10388_v26, 0.0  ;;  %v1113_v53 = vmul.f32 %v10385_v29, %v9932_v16  ;;  %v1051_v49 = vmul.f32 %v10385_v29, %v9751_v27  ;;  %v14270_v20 = vld [vmem:[#allocation15_spill] sm:$0xff] }
 0x294   :  { %v1046_v58 = vmul.f32 %v10394_v23, %v9729_v18  ;;  %v1092_v26 = vmul.f32 %v10418_v52, %v14267_v13 }
 0x295   :  { %7800 = vmatprep.mubr.msk.bf16.mxu1 %vm709_vm3, %v887_v40  ;;  %v8330_v33 = vpack.i.bf16 %v1113_v53, %v1112_v19  ;;  %v1091_v48 = vmul.f32 %v10399_v4, %v10093_v39  ;;  %v1061_v40 = vrot.slane %v10394_v23, 1  ;;  %v1090_v19 = vmul.f32 %v10385_v29, %v9858_v6  ;;  %v14279_v39 = vld [vmem:[#allocation30_spill] sm:$0xff] }
 0x296   :  { %7801 = vmatmul.mubr.msk.bf16.gmra.mrb[4].mxu1 %vm709_vm3, %v888_v5  ;;  %v8340_v41 = vpack.i.bf16 %v1047_v37, %v1046_v58  ;;  %v8335_v53 = vpack.i.bf16 %v1051_v49, %v1050_v42  ;;  %v1093_v5 = vmul.f32 %v10394_v23, %v9863_v11  ;;  %v9328_v58 = vld [vmem:[#allocation2 + $0x18] sm:$0xff]   ;;  %v1114_v32 = vmul.f32 %v10399_v4, %v14266_v15  ;;  %v14282_v6 = vld [vmem:[#allocation50_spill] sm:$0xff] }
 0x297   :  { %8331 = vrot.lane.b32.xlu1 %v8330_v33, %s9559_s11  ;;  %v8355_v37 = vpack.i.bf16 %v1091_v48, %v1090_v19  ;;  %v1058_v33 = vrot.slane %v10385_v29, 1  ;;  %v1029_v49 = vrot.slane %v10394_v23, 7  ;;  %v14269_v48 = vld [vmem:[#allocation51_spill] sm:$0xff]  ;;  %7804 = vmatprep.subr.bf16.mxu1 %v9328_v58  ;;  %v1026_v15 = vrot.slane %v10385_v29, 7 }
 0x298   :  { %8341 = vrot.lane.b32.xlu0 %v8340_v41, %s9554_s21  ;;  %v14268_v41 = vrot.slane %v10293_v36, 1  ;;  %v1115_v19 = vmul.f32 %v10418_v52, %v14269_v48  ;;  %v8345_v59 = vpack.i.bf16 %v1093_v5, %v1092_v26  ;;  %7805 = vmatpush3.bf16.msra.mxu1 %v9328_v58  ;;  %v14274_v5 = vrot.slane %v10293_v36, 7  ;;  %v14276_v58 = vld [vmem:[#allocation32_spill] sm:$0xff]  ;;  %v14277_v48 = vld [vmem:[#allocation18_spill] sm:$0xff] }
 0x299   :  { %v14278_v11 = vrot.slane %v10299_v45, 7  ;;  %v1060_v45 = vrot.slane %v10418_v52, 1  ;;  %v1027_v18 = vrot.slane %v10399_v4, 7 }
 0x29a   :  { %v10439_v42 = vsel %vm164_vm0, %v1061_v40, %v14268_v41  ;;  %v8360_v8 = vpack.i.bf16 %v1115_v19, %v1114_v32  ;;  %v1065_v41 = vsel %vm164_vm0, %v14272_v10, %v1058_v33  ;;  %v10461_v32 = vsel %vm59_vm1, %v1029_v49, %v14274_v5 }
 0x29b   :  { %8336 = vrot.lane.b32.xlu1 %v8335_v53, %s9554_s21  ;;  %v1052_v53 = vmul.f32 %v10399_v4, %v14270_v20  ;;  %v1070_v2 = vmul.f32 %v10439_v42, %v14271_v47  ;;  %v1059_v19 = vrot.slane %v10399_v4, 1  ;;  %v14275_v47 = vld [vmem:[#allocation14_spill] sm:$0xff]  ;;  %v1097_v20 = vmul.f32 %v1065_v41, %v14276_v58  ;;  %v14281_v58 = vld [vmem:[#allocation43_spill] sm:$0xff] }
 0x29c   :  { %8356 = vrot.lane.b32.xlu0 %v8355_v37, %s9556_s27  ;;  %v14273_v37 = vld [vmem:[#allocation52_spill] sm:$0xff]  ;;  %v1071_v10 = vmul.f32 %v10333_v14, %v14275_v47  ;;  %v10474_v5 = vsel %vm59_vm1, %v14278_v11, %v1026_v15 }
 0x29d   :  { %v1053_v26 = vmul.f32 %v10418_v52, %v14273_v37  ;;  %v1078_v37 = vmul.f32 %v10461_v32, %v14277_v48  ;;  %v1105_v11 = vmul.f32 %v10474_v5, %v14281_v58 }
 0x29f   :  { %8346 = vrot.lane.b32.xlu1 %v8345_v59, %s9556_s27  ;;  %v8350_v29 = vpack.i.bf16 %v1053_v26, %v1052_v53  ;;  %v8375_v59 = vpack.i.bf16 %v1071_v10, %v1070_v2  ;;  %v1064_v53 = vsel %vm164_vm0, %v1058_v33, %v1059_v19  ;;  %v9329_v26 = vld [vmem:[#allocation2 + $0x20] ss:$0 sps:$4 sm:$0x11]   ;;  %v14280_v2 = vld [vmem:[#allocation25_spill] sm:$0xff]  ;;  %v1062_v33 = vsel %vm164_vm0, %v1060_v45, %v1061_v40  ;;  %v14286_v40 = vld [vmem:[#allocation63_spill] sm:$0xff] }
 0x2a0   :  { %8361 = vrot.lane.b32.xlu0 %v8360_v8, %s9559_s11  ;;  %v1096_v8 = vmul.f32 %v10323_v34, %v14279_v39  ;;  %v1079_v10 = vmul.f32 %v10359_v38, %v14280_v2  ;;  %8056 = vmatprep.subr.msk.bf16.mxu1 %vm815_vm2, %v9329_v26  ;;  %v1121_v34 = vmul.f32 %v1064_v53, %v14282_v6  ;;  %v14285_v6 = vld [vmem:[#allocation62_spill] sm:$0xff] }
 0x2a1   :  { %v1100_v16 = vmul.f32 %v1062_v33, %v14285_v6  ;;  %v14287_v2 = vld [vmem:[#allocation54_spill] sm:$0xff] }
 0x2a2   :  { %v8365_v48 = vpack.i.bf16 %v1097_v20, %v1096_v8  ;;  %v1480_v20 = vsel %vm815_vm2, %v9329_v26, 0  ;;  %v14284_v8 = vld [vmem:[#allocation48_spill] sm:$0xff]  ;;  %v10510_v26 = vsel %vm59_vm1, %v1026_v15, %v1027_v18  ;;  %vm1974_vm2 = vcmask 261120  }
 0x2a3   :  { %8351 = vrot.lane.b32.xlu1 %v8350_v29, %s9554_s21  ;;  %v8380_v29 = vpack.i.bf16 %v1079_v10, %v1078_v37  ;;  %v1120_v58 = vmul.f32 %v1065_v41, %v14284_v8  ;;  %v1028_v37 = vrot.slane %v10418_v52, 7  ;;  %7807 = vmatpush3.bf16.msra.mxu1 %v1480_v20  ;;  %v14292_v15 = vld [vmem:[#allocation56_spill] sm:$0xff] }
 0x2a4   :  { %8376 = vrot.lane.b32.xlu0 %v8375_v59, %s9544_s26  ;;  %v14283_v59 = vld [vmem:[#allocation36_spill] sm:$0xff] }
 0x2a5   :  { %v1104_v27 = vmul.f32 %v10348_v30, %v14283_v59  ;;  %v8395_v13 = vpack.i.bf16 %v1121_v34, %v1120_v58  ;;  %v1075_v59 = vmul.f32 %v1064_v53, %v14287_v2  ;;  %v10505_v4 = vsel %vm59_vm1, %v1028_v37, %v1029_v49  ;;  %v14290_v34 = vld [vmem:[#allocation47_spill] sm:$0xff] }
 0x2a6   :  { %v1109_v20 = vmul.f32 %v10461_v32, %v14290_v34  ;;  %v14291_v49 = vld [vmem:[#allocation27_spill] sm:$0xff] }
 0x2a7   :  { %8366 = vrot.lane.b32.xlu1 %v8365_v48, %s9557_s6  ;;  %v8370_v10 = vpack.i.bf16 %v1105_v11, %v1104_v27  ;;  %v1101_v48 = vmul.f32 %v10439_v42, %v14286_v40  ;;  %v14288_v27 = vld [vmem:[#allocation21_spill] sm:$0xff]  ;;  %v1083_v6 = vmul.f32 %v10510_v26, %v14291_v49  ;;  %v14296_v40 = vld [vmem:[#allocation39_spill] sm:$0xff] }
 0x2a8   :  { %8381 = vrot.lane.b32.xlu0 %v8380_v29, %s9555_s24  ;;  %v1074_v52 = vmul.f32 %v1065_v41, %v14288_v27  ;;  %v14289_v29 = vld [vmem:[#allocation65_spill] sm:$0xff]  ;;  %v14293_v41 = vld [vmem:[#allocation55_spill] sm:$0xff] }
 0x2a9   :  { %v8385_v11 = vpack.i.bf16 %v1101_v48, %v1100_v16  ;;  %v1108_v58 = vmul.f32 %v10505_v4, %v14289_v29  ;;  %v1082_v16 = vmul.f32 %v10474_v5, %v14292_v15  ;;  %v14294_v29 = vld [vmem:[#allocation23_spill] sm:$0xff] }
 0x2aa   :  { %v8400_v2 = vpack.i.bf16 %v1075_v59, %v1074_v52  ;;  %v1077_v27 = vmul.f32 %v1062_v33, %v14294_v29  ;;  %v14295_v59 = vld [vmem:[#allocation61_spill] sm:$0xff] }
 0x2ab   :  { %8371 = vrot.lane.b32.xlu1 %v8370_v10, %s9558_s8  ;;  %v1063_v10 = vsel %vm164_vm0, %v1059_v19, %v1060_v45  ;;  %v8410_v34 = vpack.i.bf16 %v1083_v6, %v1082_v16  ;;  %v1098_v52 = vmul.f32 %v1064_v53, %v14295_v59  ;;  %v10532_v19 = vsel %vm59_vm1, %v1027_v18, %v1028_v37  ;;  %v14297_v45 = vld [vmem:[#allocation57_spill] sm:$0xff]  ;;  %v14301_v37 = vld [vmem:[#allocation68_spill] sm:$0xff] }
 0x2ac   :  { %8396 = vrot.lane.b32.xlu0 %v8395_v13, %s9560_s0  ;;  %v8390_v13 = vpack.i.bf16 %v1109_v20, %v1108_v58  ;;  %v1076_v48 = vmul.f32 %v1063_v10, %v14293_v41  ;;  %v1099_v49 = vmul.f32 %v1063_v10, %v14296_v40  ;;  %v14298_v58 = vld [vmem:[#allocation58_spill] sm:$0xff]  ;;  %v14299_v16 = vld [vmem:[#allocation45_spill] sm:$0xff]  ;;  %v14300_v40 = vld [vmem:[#allocation64_spill] sm:$0xff] }
 0x2ad   :  { %v1085_v20 = vmul.f32 %v10505_v4, %v14298_v58  ;;  %v1106_v53 = vmul.f32 %v10510_v26, %v14299_v16  ;;  %v1107_v41 = vmul.f32 %v10532_v19, %v14300_v40  ;;  %v14308_v59 = vld [vmem:[#allocation77_spill] sm:$0xff] }
 0x2ae   :  { %v8425_v6 = vpack.i.bf16 %v1099_v49, %v1098_v52  ;;  %v14304_v49 = vld [vmem:[#allocation70_spill] sm:$0xff]  ;;  %v1041_v29 = vmul.f32 %v10352_v24, %v14308_v59 }
 0x2af   :  { %8386 = vrot.lane.b32.xlu1 %v8385_v11, %s9557_s6  ;;  %v1084_v11 = vmul.f32 %v10532_v19, %v14297_v45  ;;  %v14303_v45 = vld [vmem:[#allocation72_spill] sm:$0xff]  ;;  %v1117_v52 = vmul.f32 %v10293_v36, %v14304_v49 }
 0x2b0   :  { %8401 = vrot.lane.b32.xlu0 %v8400_v2, %s9544_s26  ;;  %v8405_v2 = vpack.i.bf16 %v1077_v27, %v1076_v48  ;;  %v1116_v27 = vmul.f32 %v10394_v23, %v14301_v37  ;;  %v1123_v58 = vmul.f32 %v1062_v33, %v14303_v45  ;;  %v14306_v23 = vld [vmem:[#allocation69_spill] sm:$0xff] }
 0x2b1   :  { %v8415_v18 = vpack.i.bf16 %v1085_v20, %v1084_v11 }
 0x2b2   :  { %v8420_v40 = vpack.i.bf16 %v1117_v52, %v1116_v27 }
 0x2b3   :  { %8391 = vrot.lane.b32.xlu1 %v8390_v13, %s9558_s8  ;;  %v14302_v13 = vld [vmem:[#allocation67_spill] sm:$0xff] }
 0x2b4   :  { %8411 = vrot.lane.b32.xlu0 %v8410_v34, %s9555_s24  ;;  %v8430_v34 = vpack.i.bf16 %v1107_v41, %v1106_v53  ;;  %v1122_v48 = vmul.f32 %v1063_v10, %v14302_v13  ;;  %v1125_v41 = vmul.f32 %v10333_v14, %v14306_v23  ;;  %v14309_v23 = vld [vmem:[#allocation74_spill] sm:$0xff] }
 0x2b5   :  { %v1038_v49 = vmul.f32 %v10505_v4, %v14309_v23 }
 0x2b6   :  { %v8435_v11 = vpack.i.bf16 %v1123_v58, %v1122_v48 }
 0x2b7   :  { %8406 = vrot.lane.b32.xlu1 %v8405_v2, %s9544_s26  ;;  %v14305_v2 = vld [vmem:[#allocation73_spill] sm:$0xff] }
 0x2b8   :  { %8426 = vrot.lane.b32.xlu0 %v8425_v6, %s9557_s6  ;;  %v1124_v6 = vmul.f32 %v10439_v42, %v14305_v2  ;;  %v14307_v2 = vld [vmem:[#allocation76_spill] sm:$0xff]  ;;  %s9567_s6 = smov 48  }
 0x2b9   :  { %v1040_v45 = vmul.f32 %v10359_v38, %v14307_v2 }
 0x2ba   :  { %v8440_v33 = vpack.i.bf16 %v1125_v41, %v1124_v6 }
 0x2bb   :  { %8416 = vrot.lane.b32.xlu1 %v8415_v18, %s9555_s24 }
 0x2bc   :  { %8431 = vrot.lane.b32.xlu0 %v8430_v34, %s9558_s8 }
 0x2bf   :  { %8421 = vrot.lane.b32.xlu1 %v8420_v40, %s9559_s11  ;;  %s9568_s11 = smov 96  }
 0x2c0   :  { %8436 = vrot.lane.b32.xlu0 %v8435_v11, %s9560_s0 }
 0x2c3   :  { %8441 = vrot.lane.b32.xlu1 %v8440_v33, %s9560_s0 }
 0x2c5   :  { %v8287_v36 = vpop.permute.xlu1 %8286 }
 0x2c6   :  { %v10561_v10 = vpop.permute.xlu0 %8296  ;;  %v8289_v47 = vunpack.i.h.bf16 %v8287_v36  ;;  %v8288_v50 = vunpack.i.l.bf16 %v8287_v36 }
 0x2c7   :  { %v8299_v22 = vunpack.i.h.bf16 %v10561_v10  ;;  %v8298_v24 = vunpack.i.l.bf16 %v10561_v10 }
 0x2c9   :  { %v8292_v53 = vpop.permute.xlu1 %8291 }
 0x2ca   :  { %v10563_v20 = vpop.permute.xlu0 %8301  ;;  %v8293_v6 = vunpack.i.l.bf16 %v8292_v53  ;;  %v8294_v11 = vunpack.i.h.bf16 %v8292_v53  ;;  %v14310_v53 = vld [vmem:[#allocation71_spill] sm:$0xff] }
 0x2cb   :  { %v1039_v39 = vmul.f32 %v10461_v32, %v14310_v53 }
 0x2cc   :  { %v1384_v8 = vsel %vm709_vm3, %v1040_v45, %v8293_v6  ;;  %v1385_v38 = vsel %vm709_vm3, %v1041_v29, %v8294_v11  ;;  %v8304_v6 = vunpack.i.h.bf16 %v10563_v20  ;;  %v8303_v29 = vunpack.i.l.bf16 %v10563_v20 }
 0x2cd   :  { %v8307_v42 = vpop.permute.xlu1 %8306 }
 0x2ce   :  { %v10565_v18 = vpop.permute.xlu0 %8316  ;;  %v8308_v41 = vunpack.i.l.bf16 %v8307_v42  ;;  %v8309_v13 = vunpack.i.h.bf16 %v8307_v42 }
 0x2cf   :  { %v8318_v23 = vunpack.i.l.bf16 %v10565_v18 }
 0x2d0   :  { %v1392_v42 = vsel %vm718_vm4, %v1384_v8, %v8308_v41  ;;  %v1393_v45 = vsel %vm718_vm4, %v1385_v38, %v8309_v13  ;;  %v8319_v8 = vunpack.i.h.bf16 %v10565_v18 }
 0x2d1   :  { %v8312_v40 = vpop.permute.xlu1 %8311 }
 0x2d2   :  { %v10567_v58 = vpop.permute.xlu0 %8321  ;;  %v8313_v37 = vunpack.i.l.bf16 %v8312_v40  ;;  %v8314_v15 = vunpack.i.h.bf16 %v8312_v40 }
 0x2d3   :  { %v8324_v10 = vunpack.i.h.bf16 %v10567_v58  ;;  %v8323_v13 = vunpack.i.l.bf16 %v10567_v58 }
 0x2d4   :  { %v1400_v40 = vsel %vm727_vm5, %v1392_v42, %v8313_v37  ;;  %v1401_v32 = vsel %vm727_vm5, %v1393_v45, %v8314_v15 }
 0x2d5   :  { %v1408_v38 = vsel %vm736_vm6, %v1400_v40, %v8288_v50 }
 0x2d6   :  { %v10569_v27 = vpop.permute.xlu0 %8326 }
 0x2d7   :  { %v8328_v42 = vunpack.i.l.bf16 %v10569_v27 }
 0x309   :  { %v10571_v14 = vpop.permute.xlu1 %8331 }
 0x30a   :  { %v8342_v34 = vpop.permute.xlu0 %8341  ;;  %v8334_v0 = vunpack.i.h.bf16 %v10571_v14  ;;  %v8333_v58 = vunpack.i.l.bf16 %v10571_v14 }
 0x30b   :  { %v8344_v36 = vunpack.i.h.bf16 %v8342_v34  ;;  %v8343_v53 = vunpack.i.l.bf16 %v8342_v34  ;;  %v1409_v34 = vsel %vm736_vm6, %v1401_v32, %v8289_v47 }
 0x30d   :  { %v10573_v48 = vpop.permute.xlu1 %8336  ;;  %v1383_v59 = vsel %vm709_vm3, %v1039_v39, %v8344_v36 }
 0x30e   :  { %v10575_v52 = vpop.permute.xlu0 %8356 }
 0x311   :  { %v10577_v33 = vpop.permute.xlu1 %8346 }
 0x312   :  { %v10581_v16 = vpop.permute.xlu0 %8361 }
 0x315   :  { %v10592_v2 = vpop.permute.xlu1 %8351 }
 0x316   :  { %v8377_v4 = vpop.permute.xlu0 %8376 }
 0x317   :  { %v8379_v11 = vunpack.i.h.bf16 %v8377_v4  ;;  %v8378_v41 = vunpack.i.l.bf16 %v8377_v4  ;;  %v1382_v4 = vsel %vm709_vm3, %v1038_v49, %v8343_v53 }
 0x319   :  { %v8367_v37 = vpop.permute.xlu1 %8366  ;;  %v1390_v54 = vsel %vm718_vm4, %v1382_v4, %v8378_v41  ;;  %v1391_v50 = vsel %vm718_vm4, %v1383_v59, %v8379_v11  ;;  %v8329_v4 = vunpack.i.h.bf16 %v10569_v27 }
 0x31a   :  { %v8369_v15 = vunpack.i.h.bf16 %v8367_v37  ;;  %v8368_v45 = vunpack.i.l.bf16 %v8367_v37  ;;  %v8382_v20 = vpop.permute.xlu0 %8381 }
 0x31b   :  { %v8384_v56 = vunpack.i.h.bf16 %v8382_v20  ;;  %v8383_v18 = vunpack.i.l.bf16 %v8382_v20 }
 0x31c   :  { %v1416_v40 = vsel %vm745_vm7, %v1408_v38, %v8368_v45  ;;  %v1417_v37 = vsel %vm745_vm7, %v1409_v34, %v8369_v15 }
 0x31d   :  { %v1399_v47 = vsel %vm727_vm5, %v1391_v50, %v8384_v56  ;;  %v1398_v39 = vsel %vm727_vm5, %v1390_v54, %v8383_v18  ;;  %v8372_v32 = vpop.permute.xlu1 %8371 }
 0x31e   :  { %v1407_v49 = vsel %vm736_vm6, %v1399_v47, %v8299_v22  ;;  %v1406_v53 = vsel %vm736_vm6, %v1398_v39, %v8298_v24  ;;  %v8374_v36 = vunpack.i.h.bf16 %v8372_v32  ;;  %v8373_v20 = vunpack.i.l.bf16 %v8372_v32  ;;  %v8397_v14 = vpop.permute.xlu0 %8396 }
 0x31f   :  { %v1415_v41 = vsel %vm745_vm7, %v1407_v49, %v8319_v8  ;;  %v1414_v59 = vsel %vm745_vm7, %v1406_v53, %v8318_v23  ;;  %v8399_v11 = vunpack.i.h.bf16 %v8397_v14  ;;  %v8398_v38 = vunpack.i.l.bf16 %v8397_v14 }
 0x320   :  { %v1424_v15 = vsel %vm754_vm8, %v1416_v40, %v8373_v20  ;;  %v1425_v56 = vsel %vm754_vm8, %v1417_v37, %v8374_v36  ;;  %v1422_v54 = vsel %vm754_vm8, %v1414_v59, %v8323_v13  ;;  %v1423_v45 = vsel %vm754_vm8, %v1415_v41, %v8324_v10 }
 0x321   :  { %v1433_v22 = vsel %vm763_vm9, %v1425_v56, %v8334_v0  ;;  %v1432_v24 = vsel %vm763_vm9, %v1424_v15, %v8333_v58  ;;  %v10628_v34 = vpop.permute.xlu1 %8386  ;;  %v1430_v8 = vsel %vm763_vm9, %v1422_v54, %v8303_v29  ;;  %v1431_v23 = vsel %vm763_vm9, %v1423_v45, %v8304_v6 }
 0x322   :  { %v1441_v18 = vsel %vm772_vm10, %v1433_v22, %v8399_v11  ;;  %v1440_v50 = vsel %vm772_vm10, %v1432_v24, %v8398_v38  ;;  %v8402_v40 = vpop.permute.xlu0 %8401  ;;  %v1438_v10 = vsel %vm772_vm10, %v1430_v8, %v8328_v42  ;;  %v1439_v0 = vsel %vm772_vm10, %v1431_v23, %v8329_v4 }
 0x323   :  { %v1450_v13 = vpack.c.bf16 %v1441_v18, %v1440_v50  ;;  %v8339_v58 = vunpack.i.h.bf16 %v10573_v48  ;;  %v8338_v37 = vunpack.i.l.bf16 %v10573_v48  ;;  %v1449_v6 = vpack.c.bf16 %v1439_v0, %v1438_v10 }
 0x324   :  { %v10639_v47 = vpop.f32.mrb[0].mxu1  ;;  %v8404_v27 = vunpack.i.h.bf16 %v8402_v40  ;;  %v8403_v39 = vunpack.i.l.bf16 %v8402_v40  ;;  %v1042_v53 = vmul.f32 %v10348_v30, %v10172_v12  ;;  %v1043_v42 = vmul.f32 %v10474_v5, %v10183_v1 }
 0x325   :  { %v10641_v29 = vpop.permute.xlu1 %8391  ;;  %v10643_v32 = vpop.f32.mrb[1].mxu1  ;;  %7808 = vmatprep.mubr.msk.bf16.mxu1 %vm802_vm11, %v1449_v6  ;;  %v8359_v14 = vunpack.i.h.bf16 %v10575_v52  ;;  %v8358_v41 = vunpack.i.l.bf16 %v10575_v52  ;;  %v1044_v59 = vmul.f32 %v10510_v26, %v10177_v31  ;;  %v1045_v11 = vmul.f32 %v10532_v19, %v10185_v57 }
 0x326   :  { %v8412_v49 = vpop.permute.xlu0 %8411  ;;  %v10650_v20 = vpop.f32.mrb[2].mxu1  ;;  %7809 = vmatmul.mubr.msk.bf16.vlgmr.msra.gmra.mrb[8].mxu1 %vm802_vm11, %v1450_v13  ;;  %v1387_v5 = vsel %vm709_vm3, %v1043_v42, %v8339_v58  ;;  %v1386_v38 = vsel %vm709_vm3, %v1042_v53, %v8338_v37  ;;  %v8354_v15 = vunpack.i.h.bf16 %v10592_v2  ;;  %v8353_v56 = vunpack.i.l.bf16 %v10592_v2 }
 0x327   :  { %v8414_v36 = vunpack.i.h.bf16 %v8412_v49  ;;  %v8413_v48 = vunpack.i.l.bf16 %v8412_v49  ;;  %v10659_v30 = vpop.f32.mrb[3].mxu1  ;;  %v8349_v52 = vunpack.i.h.bf16 %v10577_v33  ;;  %v8348_v26 = vunpack.i.l.bf16 %v10577_v33 }
 0x328   :  { %v1395_v45 = vsel %vm718_vm4, %v1387_v5, %v8404_v27  ;;  %v1394_v19 = vsel %vm718_vm4, %v1386_v38, %v8403_v39  ;;  %v8364_v18 = vunpack.i.h.bf16 %v10581_v16  ;;  %v8363_v2 = vunpack.i.l.bf16 %v10581_v16 }
 0x329   :  { %v8407_v54 = vpop.permute.xlu1 %8406  ;;  %v1402_v24 = vsel %vm727_vm5, %v1394_v19, %v8413_v48  ;;  %v1403_v8 = vsel %vm727_vm5, %v1395_v45, %v8414_v36  ;;  %v1389_v13 = vsel %vm709_vm3, %v1045_v11, %v8354_v15  ;;  %v1388_v33 = vsel %vm709_vm3, %v1044_v59, %v8353_v56 }
 0x32a   :  { %v8427_v22 = vpop.permute.xlu0 %8426  ;;  %v8409_v23 = vunpack.i.h.bf16 %v8407_v54  ;;  %v8408_v4 = vunpack.i.l.bf16 %v8407_v54  ;;  %v8389_v10 = vunpack.i.h.bf16 %v10628_v34  ;;  %v8388_v0 = vunpack.i.l.bf16 %v10628_v34 }
 0x32b   :  { %v8429_v50 = vunpack.i.h.bf16 %v8427_v22  ;;  %v8428_v40 = vunpack.i.l.bf16 %v8427_v22  ;;  %v1410_v37 = vsel %vm736_vm6, %v1402_v24, %v8358_v41  ;;  %v1411_v6 = vsel %vm736_vm6, %v1403_v8, %v8359_v14 }
 0x32c   :  { %v1397_v16 = vsel %vm718_vm4, %v1389_v13, %v8409_v23  ;;  %v1396_v53 = vsel %vm718_vm4, %v1388_v33, %v8408_v4  ;;  %v8394_v56 = vunpack.i.h.bf16 %v10641_v29  ;;  %v8393_v54 = vunpack.i.l.bf16 %v10641_v29 }
 0x32d   :  { %v8417_v58 = vpop.permute.xlu1 %8416  ;;  %v1418_v48 = vsel %vm745_vm7, %v1410_v37, %v8428_v40  ;;  %v1419_v59 = vsel %vm745_vm7, %v1411_v6, %v8429_v50 }
 0x32e   :  { %v8419_v27 = vunpack.i.h.bf16 %v8417_v58  ;;  %v8418_v39 = vunpack.i.l.bf16 %v8417_v58  ;;  %v8432_v49 = vpop.permute.xlu0 %8431 }
 0x32f   :  { %v8434_v42 = vunpack.i.h.bf16 %v8432_v49  ;;  %v8433_v36 = vunpack.i.l.bf16 %v8432_v49 }
 0x330   :  { %v1404_v34 = vsel %vm727_vm5, %v1396_v53, %v8418_v39  ;;  %v1405_v11 = vsel %vm727_vm5, %v1397_v16, %v8419_v27  ;;  %vm2012_vm5 = vcmask 293888  }
 0x331   :  { %v1412_v41 = vsel %vm736_vm6, %v1404_v34, %v8348_v26  ;;  %v1413_v14 = vsel %vm736_vm6, %v1405_v11, %v8349_v52  ;;  %v1426_v5 = vsel %vm754_vm8, %v1418_v48, %v8433_v36  ;;  %v1427_v38 = vsel %vm754_vm8, %v1419_v59, %v8434_v42  ;;  %v8422_v15 = vpop.permute.xlu1 %8421  ;;  %v10716_v42 = vld [vmem:[%s13919_s3 + $0x2] ss:$0 sm:$0xff] }
 0x332   :  { %v1420_v45 = vsel %vm745_vm7, %v1412_v41, %v8388_v0  ;;  %v1421_v19 = vsel %vm745_vm7, %v1413_v14, %v8389_v10  ;;  %v8437_v22 = vpop.permute.xlu0 %8436  ;;  %v8424_v24 = vunpack.i.h.bf16 %v8422_v15  ;;  %v8423_v8 = vunpack.i.l.bf16 %v8422_v15 }
 0x333   :  { %v8439_v23 = vunpack.i.h.bf16 %v8437_v22  ;;  %v8438_v26 = vunpack.i.l.bf16 %v8437_v22  ;;  %v1428_v52 = vsel %vm754_vm8, %v1420_v45, %v8393_v54  ;;  %v1429_v4 = vsel %vm754_vm8, %v1421_v19, %v8394_v56 }
 0x334   :  { %v1434_v50 = vsel %vm763_vm9, %v1426_v5, %v8363_v2  ;;  %v1435_v40 = vsel %vm763_vm9, %v1427_v38, %v8364_v18  ;;  %v1436_v37 = vsel %vm763_vm9, %v1428_v52, %v8423_v8  ;;  %v1437_v6 = vsel %vm763_vm9, %v1429_v4, %v8424_v24 }
 0x335   :  { %v1442_v13 = vsel %vm772_vm10, %v1434_v50, %v8438_v26  ;;  %v1443_v29 = vsel %vm772_vm10, %v1435_v40, %v8439_v23  ;;  %v8442_v33 = vpop.permute.xlu1 %8441  ;;  %vm3173_vm7 = vcmask 326656   ;;  %vm3191_vm9 = vcmask 457728  }
 0x336   :  { %v8444_v0 = vunpack.i.h.bf16 %v8442_v33  ;;  %v8443_v10 = vunpack.i.l.bf16 %v8442_v33  ;;  %v1451_v58 = vpack.c.bf16 %v1443_v29, %v1442_v13 }
 0x338   :  { %v1444_v27 = vsel %vm772_vm10, %v1436_v37, %v8443_v10  ;;  %v1445_v39 = vsel %vm772_vm10, %v1437_v6, %v8444_v0  ;;  %7812 = vmatprep.mubr.msk.bf16.mxu1 %vm802_vm11, %v1451_v58 }
 0x339   :  { %v1452_v2 = vpack.c.bf16 %v1445_v39, %v1444_v27 }
 0x33b   :  { %7813 = vmatmul.mubr.msk.bf16.gmra.mrb[12].mxu1 %vm802_vm11, %v1452_v2  ;;  %vm3200_vm11 = vcmask 523264  }
 0x369   :  { %v10705_v18 = vpop.f32.mrb[4].mxu1 }
 0x36a   :  { %v10707_v49 = vpop.f32.mrb[5].mxu1 }
 0x36b   :  { %v10709_v16 = vpop.f32.mrb[6].mxu1 }
 0x36c   :  { %v10711_v53 = vpop.f32.mrb[7].mxu1 }
 0x3f9   :  { %v7810_v36 = vpop.f32.mrb[8].mxu1 }
 0x3fa   :  { %v1525_v48 = vadd.f32 %v7810_v36, %v10716_v42  ;;  %v1516_v59 = vpop.f32.mrb[9].mxu1 }
 0x3fb   :  { %v1517_v34 = vadd.f32 %v10716_v42, %v1516_v59  ;;  %v7811_v11 = vpop.f32.mrb[10].mxu1 }
 0x3fc   :  { %v1549_v41 = vmax.f32 %v1525_v48, 0.0  ;;  %v1528_v14 = vadd.f32 %v7811_v11, %v10716_v42  ;;  %v1519_v5 = vpop.f32.mrb[11].mxu1 }
 0x3fd   :  { %v10721_v38 = vmax.f32 %v1517_v34, 0.0  ;;  %v1520_v15 = vadd.f32 %v10716_v42, %v1519_v5 }
 0x3fe   :  { %v1557_v56 = vrot.slane %v1549_v41, 7  ;;  %v1589_v54 = vrot.slane %v1549_v41, 1  ;;  %v10724_v45 = vmax.f32 %v1528_v14, 0.0  ;;  %v1621_v19 = vmul.f32 %v1549_v41, %v9828_v55 }
 0x3ff   :  { %v14041_v22 = vrot.slane %v10721_v38, 7  ;;  %v14043_v24 = vrot.slane %v10721_v38, 1  ;;  %v1548_v8 = vmax.f32 %v1520_v15, 0.0  ;;  %v1619_v23 = vmul.f32 %v10721_v38, %v9842_v61 }
 0x400   :  { %v14040_v26 = vrot.slane %v10724_v45, 7  ;;  %v14042_v52 = vrot.slane %v10724_v45, 1  ;;  %v1622_v4 = vmul.f32 %v10724_v45, %v9852_v7  ;;  %v1582_v50 = vmul.f32 %v1549_v41, %v9739_v21 }
 0x401   :  { %v1556_v40 = vrot.slane %v1548_v8, 7  ;;  %v1588_v13 = vrot.slane %v1548_v8, 1  ;;  %v1620_v29 = vmul.f32 %v1548_v8, %v9813_v51  ;;  %v1581_v33 = vmul.f32 %v1548_v8, %v9727_v17 }
 0x402   :  { %v8445_v0 = vpack.i.bf16 %v1622_v4, %v1621_v19  ;;  %v1643_v10 = vmul.f32 %v1548_v8, %v9894_v25  ;;  %v1644_v58 = vmul.f32 %v1549_v41, %v9983_v62  ;;  %v1599_v37 = vsel %vm164_vm0, %v1589_v54, %v14042_v52  ;;  %v14311_v4 = vld [vmem:[#allocation53_spill] sm:$0xff] }
 0x403   :  { %v8455_v6 = vpack.i.bf16 %v1620_v29, %v1619_v23  ;;  %v8450_v27 = vpack.i.bf16 %v1582_v50, %v1581_v33  ;;  %v1600_v39 = vsel %vm164_vm0, %v1588_v13, %v1589_v54  ;;  %v1606_v2 = vmul.f32 %v1599_v37, %v9795_v43 }
 0x404   :  { %8446 = vrot.lane.b32.xlu1 %v8445_v0, %s9560_s0  ;;  %v8460_v36 = vpack.i.bf16 %v1644_v58, %v1643_v10  ;;  %v1605_v48 = vmul.f32 %v1600_v39, %v9770_v35  ;;  %v1601_v59 = vsel %vm164_vm0, %v14043_v24, %v1588_v13  ;;  %v1628_v34 = vmul.f32 %v1600_v39, %v9880_v3  ;;  %v14312_v13 = vld [vmem:[#allocation44_spill] sm:$0xff]  ;;  %v14320_v24 = vld [vmem:[#allocation70_spill] sm:$0xff] }
 0x405   :  { %8456 = vrot.lane.b32.xlu0 %v8455_v6, %s9560_s0  ;;  %v1627_v11 = vmul.f32 %v1601_v59, %v9839_v60  ;;  %v10760_v41 = vsel %vm59_vm1, %v1557_v56, %v14040_v26  ;;  %v10764_v14 = vsel %vm59_vm1, %v1556_v40, %v1557_v56  ;;  %v10770_v5 = vsel %vm59_vm1, %v14041_v22, %v1556_v40  ;;  %v14335_v60 = vld [vmem:[#allocation17_spill] sm:$0xff]  ;;  %v14347_v35 = vld [vmem:[#allocation54_spill] sm:$0xff] }
 0x406   :  { %v8465_v15 = vpack.i.bf16 %v1606_v2, %v1605_v48  ;;  %v1613_v54 = vmul.f32 %v10764_v14, %v9797_v44  ;;  %v1614_v19 = vmul.f32 %v10760_v41, %v9804_v46  ;;  %v1635_v8 = vmul.f32 %v10770_v5, %v9923_v63  ;;  %v14314_v48 = vld [vmem:[#allocation11_spill] sm:$0xff] }
 0x407   :  { %v8475_v23 = vpack.i.bf16 %v1628_v34, %v1627_v11  ;;  %v1636_v56 = vmul.f32 %v10764_v14, %v9860_v9  ;;  %v1651_v50 = vmul.f32 %v1600_v39, %v14311_v4  ;;  %v1652_v29 = vmul.f32 %v1599_v37, %v14312_v13  ;;  %v14313_v39 = vld [vmem:[#allocation40_spill] sm:$0xff]  ;;  %v14315_v11 = vld [vmem:[#allocation46_spill] sm:$0xff]  ;;  %v14327_v9 = vld [vmem:[#allocation59_spill] sm:$0xff] }
 0x408   :  { %8451 = vrot.lane.b32.xlu1 %v8450_v27, %s9544_s26  ;;  %v8470_v40 = vpack.i.bf16 %v1614_v19, %v1613_v54  ;;  %v1645_v2 = vmul.f32 %v10724_v45, %v14313_v39  ;;  %v1580_v27 = vmul.f32 %v10721_v38, %v14314_v48  ;;  %v1583_v54 = vmul.f32 %v10724_v45, %v14315_v11 }
 0x409   :  { %8461 = vrot.lane.b32.xlu0 %v8460_v36, %s9561_s1  ;;  %v8480_v33 = vpack.i.bf16 %v1636_v56, %v1635_v8  ;;  %v8485_v0 = vpack.i.bf16 %v1652_v29, %v1651_v50  ;;  %v14317_v8 = vld [vmem:[#allocation30_spill] sm:$0xff] }
 0x40c   :  { %8466 = vrot.lane.b32.xlu1 %v8465_v15, %s9556_s27  ;;  %v14316_v15 = vld [vmem:[#allocation14_spill] sm:$0xff] }
 0x40d   :  { %8476 = vrot.lane.b32.xlu0 %v8475_v23, %s9562_s18  ;;  %v10795_v19 = vmul.f32 %v1601_v59, %v14316_v15  ;;  %v10798_v23 = vmul.f32 %v1599_v37, %v14317_v8  ;;  %v14324_v8 = vld [vmem:[#allocation9_spill] sm:$0xff] }
 0x40e   :  { %v7814_v10 = vpop.f32.mrb[12].mxu1 }
 0x40f   :  { %v1541_v58 = vadd.f32 %v7814_v10, %v10716_v42  ;;  %v1532_v6 = vpop.f32.mrb[13].mxu1  ;;  %v14318_v10 = vld [vmem:[#allocation25_spill] sm:$0xff] }
 0x410   :  { %v1533_v34 = vadd.f32 %v10716_v42, %v1532_v6  ;;  %v7815_v36 = vpop.f32.mrb[14].mxu1  ;;  %v10805_v26 = vmul.f32 %v10770_v5, %v14318_v10  ;;  %v14319_v6 = vld [vmem:[#allocation36_spill] sm:$0xff]  ;;  %8471 = vrot.lane.b32.xlu1 %v8470_v40, %s9558_s8 }
 0x411   :  { %v10800_v56 = vmax.f32 %v1541_v58, 0.0  ;;  %v1544_v50 = vadd.f32 %v7815_v36, %v10716_v42  ;;  %v1535_v29 = vpop.f32.mrb[15].mxu1  ;;  %v10809_v22 = vmul.f32 %v10760_v41, %v14319_v6  ;;  %v10817_v58 = vmul.f32 %v10721_v38, %v14320_v24  ;;  %v14321_v36 = vld [vmem:[#allocation69_spill] sm:$0xff]  ;;  %8481 = vrot.lane.b32.xlu0 %v8480_v33, %s9563_s19  ;;  %v14325_v33 = vld [vmem:[#allocation12_spill] sm:$0xff] }
 0x412   :  { %v10811_v52 = vmax.f32 %v1533_v34, 0.0  ;;  %v1536_v37 = vadd.f32 %v10716_v42, %v1535_v29  ;;  %v10820_v15 = vmul.f32 %v1601_v59, %v14321_v36  ;;  %v14322_v34 = vld [vmem:[#allocation60_spill] sm:$0xff]  ;;  %v14323_v59 = vld [vmem:[#allocation42_spill] sm:$0xff] }
 0x413   :  { %v10824_v11 = vmax.f32 %v1544_v50, 0.0  ;;  %v1625_v40 = vmul.f32 %v10800_v56, %v14322_v34  ;;  %v14348_v62 = vrot.slane %v10800_v56, 7 }
 0x414   :  { %v1559_v42 = vrot.slane %v10811_v52, 7  ;;  %v1591_v29 = vrot.slane %v10811_v52, 1  ;;  %v10831_v24 = vmax.f32 %v1536_v37, 0.0  ;;  %v1646_v36 = vmul.f32 %v10811_v52, %v14323_v59  ;;  %v14326_v37 = vld [vmem:[#allocation33_spill] sm:$0xff] }
 0x415   :  { %v1562_v10 = vrot.slane %v10824_v11, 7  ;;  %v1594_v50 = vrot.slane %v10824_v11, 1  ;;  %v1579_v6 = vmul.f32 %v10824_v11, %v14324_v8  ;;  %v1584_v48 = vmul.f32 %v10811_v52, %v14325_v33  ;;  %8486 = vrot.lane.b32.xlu0 %v8485_v0, %s9564_s20  ;;  %v14328_v8 = vld [vmem:[#allocation35_spill] sm:$0xff]  ;;  %v14329_v33 = vld [vmem:[#allocation66_spill] sm:$0xff]  ;;  %v14332_v0 = vld [vmem:[#allocation52_spill] sm:$0xff] }
 0x416   :  { %v1560_v34 = vrot.slane %v10831_v24, 7  ;;  %v1592_v39 = vrot.slane %v10831_v24, 1  ;;  %v8490_v13 = vpack.i.bf16 %v1646_v36, %v1645_v2  ;;  %v1623_v4 = vmul.f32 %v10811_v52, %v14326_v37  ;;  %v14330_v2 = vld [vmem:[#allocation51_spill] sm:$0xff] }
 0x417   :  { %v8500_v59 = vpack.i.bf16 %v1580_v27, %v1579_v6  ;;  %v8495_v63 = vpack.i.bf16 %v1584_v48, %v1583_v54  ;;  %v1624_v46 = vmul.f32 %v10831_v24, %v14327_v9  ;;  %v1626_v44 = vmul.f32 %v10824_v11, %v14328_v8  ;;  %v14331_v52 = vld [vmem:[#allocation15_spill] sm:$0xff] }
 0x418   :  { %8491 = vrot.lane.b32.xlu1 %v8490_v13, %s9561_s1  ;;  %v1647_v3 = vmul.f32 %v10831_v24, %v14329_v33  ;;  %v1648_v36 = vmul.f32 %v10800_v56, %v14330_v2  ;;  %v1585_v37 = vmul.f32 %v10831_v24, %v14331_v52  ;;  %v1586_v48 = vmul.f32 %v10800_v56, %v14332_v0  ;;  %v14336_v24 = vld [vmem:[#allocation32_spill] sm:$0xff] }
 0x419   :  { %v8515_v27 = vpack.i.bf16 %v1624_v46, %v1623_v4  ;;  %v8505_v54 = vpack.i.bf16 %v1626_v44, %v1625_v40  ;;  %v14333_v6 = vrot.slane %v10721_v38, 1  ;;  %v14334_v13 = vrot.slane %v10724_v45, 1  ;;  %8501 = vrot.lane.b32.xlu0 %v8500_v59, %s9544_s26 }
 0x41a   :  { %v8520_v8 = vpack.i.bf16 %v1648_v36, %v1647_v3  ;;  %v8510_v2 = vpack.i.bf16 %v1586_v48, %v1585_v37  ;;  %v14337_v44 = vrot.slane %v10721_v38, 7  ;;  %v14338_v4 = vrot.slane %v10724_v45, 7  ;;  %v14339_v37 = vld [vmem:[#allocation48_spill] sm:$0xff]  ;;  %v14340_v48 = vld [vmem:[#allocation18_spill] sm:$0xff] }
 0x41b   :  { %v1602_v9 = vsel %vm164_vm0, %v1594_v50, %v14333_v6  ;;  %v1598_v33 = vsel %vm164_vm0, %v14334_v13, %v1591_v29  ;;  %v1597_v3 = vsel %vm164_vm0, %v1591_v29, %v1592_v39  ;;  %v14341_v6 = vld [vmem:[#allocation43_spill] sm:$0xff]  ;;  %v14343_v29 = vrot.slane %v10800_v56, 1 }
 0x41c   :  { %v1603_v43 = vmul.f32 %v1602_v9, %v14335_v60  ;;  %v10869_v52 = vmul.f32 %v1598_v33, %v14336_v24  ;;  %v10876_v46 = vsel %vm59_vm1, %v1562_v10, %v14337_v44  ;;  %v10882_v40 = vsel %vm59_vm1, %v14338_v4, %v1559_v42  ;;  %8496 = vrot.lane.b32.xlu1 %v8495_v63, %s9544_s26  ;;  %v9330_v44 = vld [vmem:[#allocation2 + $0x28] sm:$0xff]   ;;  %v14342_v4 = vld [vmem:[#allocation50_spill] sm:$0xff]  ;;  %v14344_v63 = vld [vmem:[#allocation63_spill] sm:$0xff] }
 0x41d   :  { %v10887_v36 = vmul.f32 %v1598_v33, %v14339_v37  ;;  %v1611_v45 = vmul.f32 %v10876_v46, %v14340_v48  ;;  %v1638_v13 = vmul.f32 %v10882_v40, %v14341_v6  ;;  %v1654_v60 = vmul.f32 %v1597_v3, %v14342_v4  ;;  %v14346_v48 = vld [vmem:[#allocation62_spill] sm:$0xff]  ;;  %7816 = vmatprep.subr.bf16.mxu0 %v9330_v44 }
 0x41e   :  { %v8535_v38 = vpack.i.bf16 %v10795_v19, %v1603_v43  ;;  %v8525_v59 = vpack.i.bf16 %v10869_v52, %v10798_v23  ;;  %v1595_v37 = vsel %vm164_vm0, %v14343_v29, %v1594_v50  ;;  %v1634_v24 = vmul.f32 %v1602_v9, %v14344_v63  ;;  %v14345_v43 = vld [vmem:[#allocation21_spill] sm:$0xff]  ;;  %8516 = vrot.lane.b32.xlu0 %v8515_v27, %s9560_s0 }
 0x41f   :  { %v1607_v19 = vmul.f32 %v1598_v33, %v14345_v43  ;;  %v8540_v23 = vpack.i.bf16 %v10805_v26, %v1611_v45  ;;  %v8530_v52 = vpack.i.bf16 %v1638_v13, %v10809_v22  ;;  %v1633_v0 = vmul.f32 %v1595_v37, %v14346_v48  ;;  %v14349_v33 = vld [vmem:[#allocation47_spill] sm:$0xff]  ;;  %v14350_v27 = vld [vmem:[#allocation65_spill] sm:$0xff]  ;;  %7817 = vmatpush3.bf16.msra.mxu0 %v9330_v44  ;;  %v9331_v48 = vld [vmem:[#allocation2 + $0x30] sm:$0xff]  }
 0x420   :  { %v1608_v6 = vmul.f32 %v1597_v3, %v14347_v35  ;;  %v8555_v4 = vpack.i.bf16 %v1654_v60, %v10887_v36  ;;  %v10914_v50 = vsel %vm59_vm1, %v14348_v62, %v1562_v10  ;;  %v1642_v26 = vmul.f32 %v10876_v46, %v14349_v33  ;;  %8506 = vrot.lane.b32.xlu1 %v8505_v54, %s9560_s0  ;;  %v14351_v36 = vld [vmem:[#allocation56_spill] sm:$0xff]  ;;  %v14352_v43 = vld [vmem:[#allocation27_spill] sm:$0xff]  ;;  %v14355_v63 = vld [vmem:[#allocation61_spill] sm:$0xff] }
 0x421   :  { %v10920_v22 = vsel %vm59_vm1, %v1559_v42, %v1560_v34  ;;  %v8545_v45 = vpack.i.bf16 %v1634_v24, %v1633_v0  ;;  %v1641_v60 = vmul.f32 %v10914_v50, %v14350_v27  ;;  %v1615_v29 = vmul.f32 %v10882_v40, %v14351_v36  ;;  %v14354_v42 = vld [vmem:[#allocation23_spill] sm:$0xff]  ;;  %7818 = vmatprep.subr.bf16.mxu0 %v9331_v48 }
 0x422   :  { %v8560_v13 = vpack.i.bf16 %v1608_v6, %v1607_v19  ;;  %v1616_v62 = vmul.f32 %v10920_v22, %v14352_v43  ;;  %v14353_v10 = vrot.slane %v10800_v56, 1  ;;  %v1610_v33 = vmul.f32 %v1595_v37, %v14354_v42  ;;  %v14356_v24 = vld [vmem:[#allocation55_spill] sm:$0xff]  ;;  %8521 = vrot.lane.b32.xlu0 %v8520_v8, %s9561_s1 }
 0x423   :  { %v1631_v54 = vmul.f32 %v1597_v3, %v14355_v63  ;;  %v8550_v0 = vpack.i.bf16 %v1642_v26, %v1641_v60  ;;  %v14357_v19 = vld [vmem:[#allocation39_spill] sm:$0xff]  ;;  %v14358_v36 = vrot.slane %v10800_v56, 7  ;;  %v14360_v3 = vld [vmem:[#allocation58_spill] sm:$0xff]  ;;  %v14361_v26 = vld [vmem:[#allocation45_spill] sm:$0xff]  ;;  %7819 = vmatpush3.bf16.msra.mxu0 %v9331_v48 }
 0x424   :  { %v1596_v35 = vsel %vm164_vm0, %v1592_v39, %v14353_v10  ;;  %v8570_v39 = vpack.i.bf16 %v1616_v62, %v1615_v29  ;;  %v14359_v10 = vld [vmem:[#allocation57_spill] sm:$0xff]  ;;  %v1618_v44 = vmul.f32 %v10914_v50, %v14360_v3  ;;  %v1639_v60 = vmul.f32 %v10920_v22, %v14361_v26  ;;  %8511 = vrot.lane.b32.xlu1 %v8510_v2, %s9544_s26  ;;  %v14362_v63 = vld [vmem:[#allocation64_spill] sm:$0xff]  ;;  %v14364_v62 = vld [vmem:[#allocation67_spill] sm:$0xff] }
 0x425   :  { %v1609_v6 = vmul.f32 %v1596_v35, %v14356_v24  ;;  %v1632_v27 = vmul.f32 %v1596_v35, %v14357_v19  ;;  %v10941_v43 = vsel %vm59_vm1, %v1560_v34, %v14358_v36  ;;  %v14363_v36 = vld [vmem:[#allocation68_spill] sm:$0xff]  ;;  %v1655_v24 = vmul.f32 %v1596_v35, %v14364_v62  ;;  %v9332_v2 = vld [vmem:[#allocation2 + $0x38] ss:$0 sps:$4 sm:$0x33]  }
 0x426   :  { %v1617_v42 = vmul.f32 %v10941_v43, %v14359_v10  ;;  %v1640_v34 = vmul.f32 %v10941_v43, %v14362_v63  ;;  %v1649_v8 = vmul.f32 %v10824_v11, %v14363_v36  ;;  %v14365_v10 = vld [vmem:[#allocation72_spill] sm:$0xff]  ;;  %v1657_v3 = vmul.f32 %v1602_v9, %v14366_v28  ;;  %8536 = vrot.lane.b32.xlu0 %v8535_v38, %s9556_s27 }
 0x427   :  { %v8565_v56 = vpack.i.bf16 %v1610_v33, %v1609_v6  ;;  %v8585_v19 = vpack.i.bf16 %v1632_v27, %v1631_v54  ;;  %v1656_v21 = vmul.f32 %v1595_v37, %v14365_v10  ;;  %8057 = vmatprep.subr.msk.bf16.mxu0 %vm2025_vm12, %v9332_v2  ;;  %v2027_v35 = vsel %vm2025_vm12, %v9332_v2, 0 }
 0x428   :  { %v8575_v29 = vpack.i.bf16 %v1618_v44, %v1617_v42  ;;  %v8590_v25 = vpack.i.bf16 %v1640_v34, %v1639_v60  ;;  %v8580_v26 = vpack.i.bf16 %v10817_v58, %v1649_v8  ;;  %v8600_v27 = vpack.i.bf16 %v10820_v15, %v1657_v3  ;;  %8526 = vrot.lane.b32.xlu1 %v8525_v59, %s9562_s18  ;;  %v14368_v3 = vld [vmem:[#allocation77_spill] sm:$0xff] }
 0x429   :  { %v8595_v33 = vpack.i.bf16 %v1656_v21, %v1655_v24  ;;  %7821 = vmatpush3.bf16.msra.mxu0 %v2027_v35  ;;  %v7200_v21 = vld [vmem:[%s13919_s3 + $0x1] ss:$0 sm:$0xff]  ;;  %v1574_v44 = vmul.f32 %v10764_v14, %v14368_v3 }
 0x42a   :  { %8541 = vrot.lane.b32.xlu0 %v8540_v23, %s9558_s8  ;;  %v944_v9 = vadd.f32 %v7200_v21, %v10643_v32  ;;  %v947_v11 = vadd.f32 %v7200_v21, %v10659_v30  ;;  %v952_v15 = vadd.f32 %v10639_v47, %v7200_v21  ;;  %v955_v58 = vadd.f32 %v10650_v20, %v7200_v21 }
 0x42b   :  { %v960_v37 = vadd.f32 %v7200_v21, %v10707_v49  ;;  %v963_v32 = vadd.f32 %v7200_v21, %v10711_v53  ;;  %v968_v30 = vadd.f32 %v10705_v18, %v7200_v21 }
 0x42c   :  { %8531 = vrot.lane.b32.xlu1 %v8530_v52, %s9563_s19 }
 0x42e   :  { %8556 = vrot.lane.b32.xlu0 %v8555_v4, %s9564_s20 }
 0x430   :  { %8546 = vrot.lane.b32.xlu1 %v8545_v45, %s9562_s18 }
 0x432   :  { %8561 = vrot.lane.b32.xlu0 %v8560_v13, %s9556_s27 }
 0x434   :  { %8551 = vrot.lane.b32.xlu1 %v8550_v0, %s9563_s19  ;;  %v14367_v0 = vld [vmem:[#allocation76_spill] sm:$0xff] }
 0x435   :  { %v1573_v24 = vmul.f32 %v10770_v5, %v14367_v0 }
 0x436   :  { %8571 = vrot.lane.b32.xlu0 %v8570_v39, %s9558_s8 }
 0x438   :  { %8566 = vrot.lane.b32.xlu1 %v8565_v56, %s9556_s27  ;;  %v14369_v56 = vld [vmem:[#allocation74_spill] sm:$0xff] }
 0x439   :  { %v1571_v34 = vmul.f32 %v10914_v50, %v14369_v56 }
 0x43a   :  { %8586 = vrot.lane.b32.xlu0 %v8585_v19, %s9562_s18 }
 0x43c   :  { %8576 = vrot.lane.b32.xlu1 %v8575_v29, %s9558_s8  ;;  %v14370_v29 = vld [vmem:[#allocation71_spill] sm:$0xff] }
 0x43d   :  { %v1572_v2 = vmul.f32 %v10876_v46, %v14370_v29 }
 0x43e   :  { %8591 = vrot.lane.b32.xlu0 %v8590_v25, %s9563_s19  ;;  %v971_v25 = vadd.f32 %v10709_v16, %v7200_v21 }
 0x440   :  { %8581 = vrot.lane.b32.xlu1 %v8580_v26, %s9561_s1 }
 0x442   :  { %8596 = vrot.lane.b32.xlu0 %v8595_v33, %s9564_s20 }
 0x444   :  { %8601 = vrot.lane.b32.xlu1 %v8600_v27, %s9564_s20 }
 0x446   :  { %982 = vrot.lane.b32.xlu0 %v944_v9, %s9554_s21 }
 0x448   :  { %984 = vrot.lane.b32.xlu1 %v947_v11, %s9554_s21 }
 0x44a   :  { %996 = vrot.lane.b32.xlu0 %v971_v25, %s9554_s21 }
 0x44c   :  { %986 = vrot.lane.b32.xlu1 %v952_v15, %s9554_s21 }
 0x44e   :  { %988 = vrot.lane.b32.xlu0 %v955_v58, %s9554_s21 }
 0x450   :  { %990 = vrot.lane.b32.xlu1 %v960_v37, %s9554_s21 }
 0x452   :  { %992 = vrot.lane.b32.xlu0 %v963_v32, %s9554_s21 }
 0x454   :  { %994 = vrot.lane.b32.xlu1 %v968_v30, %s9554_s21 }
 0x476   :  { %v8447_v47 = vpop.permute.xlu1 %8446 }
 0x477   :  { %v10997_v16 = vpop.permute.xlu0 %8456  ;;  %v8449_v5 = vunpack.i.h.bf16 %v8447_v47  ;;  %v8448_v33 = vunpack.i.l.bf16 %v8447_v47 }
 0x478   :  { %v8459_v14 = vunpack.i.h.bf16 %v10997_v16  ;;  %v8458_v21 = vunpack.i.l.bf16 %v10997_v16 }
 0x47a   :  { %v8452_v38 = vpop.permute.xlu1 %8451 }
 0x47b   :  { %v10999_v59 = vpop.permute.xlu0 %8461  ;;  %v8454_v42 = vunpack.i.h.bf16 %v8452_v38  ;;  %v8453_v54 = vunpack.i.l.bf16 %v8452_v38 }
 0x47d   :  { %v1917_v27 = vsel %vm718_vm4, %v1573_v24, %v8453_v54  ;;  %v1918_v35 = vsel %vm718_vm4, %v1574_v44, %v8454_v42 }
 0x47e   :  { %v8467_v20 = vpop.permute.xlu1 %8466 }
 0x47f   :  { %v11001_v49 = vpop.permute.xlu0 %8476  ;;  %v8469_v6 = vunpack.i.h.bf16 %v8467_v20  ;;  %v8468_v19 = vunpack.i.l.bf16 %v8467_v20 }
 0x480   :  { %v8479_v32 = vunpack.i.h.bf16 %v11001_v49  ;;  %v8478_v30 = vunpack.i.l.bf16 %v11001_v49 }
 0x481   :  { %v1925_v50 = vsel %vm736_vm6, %v1917_v27, %v8468_v19  ;;  %v1926_v9 = vsel %vm736_vm6, %v1918_v35, %v8469_v6 }
 0x482   :  { %v8472_v4 = vpop.permute.xlu1 %8471 }
 0x483   :  { %v11003_v48 = vpop.permute.xlu0 %8481  ;;  %v8474_v26 = vunpack.i.h.bf16 %v8472_v4  ;;  %v8473_v60 = vunpack.i.l.bf16 %v8472_v4 }
 0x484   :  { %v8484_v16 = vunpack.i.h.bf16 %v11003_v48  ;;  %v8483_v20 = vunpack.i.l.bf16 %v11003_v48 }
 0x485   :  { %v1933_v46 = vsel %vm754_vm8, %v1925_v50, %v8473_v60  ;;  %v1934_v25 = vsel %vm754_vm8, %v1926_v9, %v8474_v26 }
 0x486   :  { %v1941_v6 = vsel %vm772_vm10, %v1933_v46, %v8448_v33 }
 0x487   :  { %v11005_v23 = vpop.permute.xlu0 %8486 }
 0x48a   :  { %v11007_v53 = vpop.permute.xlu1 %8491 }
 0x48b   :  { %v8502_v18 = vpop.permute.xlu0 %8501  ;;  %v8494_v54 = vunpack.i.h.bf16 %v11007_v53  ;;  %v8493_v24 = vunpack.i.l.bf16 %v11007_v53 }
 0x48c   :  { %v8504_v15 = vunpack.i.h.bf16 %v8502_v18  ;;  %v8503_v58 = vunpack.i.l.bf16 %v8502_v18  ;;  %v1942_v18 = vsel %vm772_vm10, %v1934_v25, %v8449_v5 }
 0x48e   :  { %v11009_v52 = vpop.permute.xlu1 %8496  ;;  %v1916_v44 = vsel %vm718_vm4, %v1572_v2, %v8504_v15  ;;  %v1915_v49 = vsel %vm718_vm4, %v1571_v34, %v8503_v58 }
 0x490   :  { %v11011_v45 = vpop.permute.xlu0 %8516 }
 0x492   :  { %v11013_v13 = vpop.permute.xlu1 %8506 }
 0x494   :  { %v11017_v39 = vpop.permute.xlu0 %8521 }
 0x496   :  { %v11023_v8 = vpop.permute.xlu1 %8511 }
 0x498   :  { %v8537_v11 = vpop.permute.xlu0 %8536 }
 0x499   :  { %v8539_v47 = vunpack.i.h.bf16 %v8537_v11  ;;  %v8538_v38 = vunpack.i.l.bf16 %v8537_v11 }
 0x49a   :  { %v8527_v37 = vpop.permute.xlu1 %8526 }
 0x49b   :  { %v8529_v4 = vunpack.i.h.bf16 %v8527_v37  ;;  %v8528_v42 = vunpack.i.l.bf16 %v8527_v37  ;;  %v1923_v48 = vsel %vm736_vm6, %v1915_v49, %v8538_v38  ;;  %v1924_v35 = vsel %vm736_vm6, %v1916_v44, %v8539_v47 }
 0x49c   :  { %v8542_v19 = vpop.permute.xlu0 %8541 }
 0x49d   :  { %v8544_v26 = vunpack.i.h.bf16 %v8542_v19  ;;  %v8543_v60 = vunpack.i.l.bf16 %v8542_v19  ;;  %v1950_v53 = vsel %vm1947_vm13, %v1941_v6, %v8528_v42  ;;  %v1951_v33 = vsel %vm1947_vm13, %v1942_v18, %v8529_v4 }
 0x49e   :  { %v8532_v27 = vpop.permute.xlu1 %8531  ;;  %v8464_v42 = vunpack.i.h.bf16 %v10999_v59  ;;  %v8488_v18 = vunpack.i.l.bf16 %v11005_v23 }
 0x49f   :  { %v8534_v50 = vunpack.i.h.bf16 %v8532_v27  ;;  %v8533_v9 = vunpack.i.l.bf16 %v8532_v27  ;;  %v1932_v5 = vsel %vm754_vm8, %v1924_v35, %v8544_v26  ;;  %v1931_v11 = vsel %vm754_vm8, %v1923_v48, %v8543_v60 }
 0x4a0   :  { %v1940_v2 = vsel %vm772_vm10, %v1932_v5, %v8459_v14  ;;  %v1939_v34 = vsel %vm772_vm10, %v1931_v11, %v8458_v21  ;;  %v8557_v15 = vpop.permute.xlu0 %8556  ;;  %v8463_v14 = vunpack.i.l.bf16 %v10999_v59  ;;  %v8499_v48 = vunpack.i.h.bf16 %v11009_v52 }
 0x4a1   :  { %v1959_v46 = vsel %vm1956_vm14, %v1950_v53, %v8533_v9  ;;  %v1960_v25 = vsel %vm1956_vm14, %v1951_v33, %v8534_v50  ;;  %v1949_v58 = vsel %vm1947_vm13, %v1940_v2, %v8479_v32  ;;  %v1948_v37 = vsel %vm1947_vm13, %v1939_v34, %v8478_v30 }
 0x4a2   :  { %v1969_v47 = vsel %vm1965_vm15, %v1960_v25, %v8494_v54  ;;  %v8559_v38 = vunpack.i.h.bf16 %v8557_v15  ;;  %v11058_v4 = vpop.permute.xlu1 %8546  ;;  %v8558_v6 = vunpack.i.l.bf16 %v8557_v15  ;;  %v1968_v21 = vsel %vm1965_vm15, %v1959_v46, %v8493_v24 }
 0x4a3   :  { %v1957_v32 = vsel %vm1956_vm14, %v1948_v37, %v8483_v20  ;;  %v1958_v30 = vsel %vm1956_vm14, %v1949_v58, %v8484_v16  ;;  %v8489_v54 = vunpack.i.h.bf16 %v11005_v23  ;;  %v8498_v20 = vunpack.i.l.bf16 %v11009_v52 }
 0x4a4   :  { %v1978_v19 = vsel %vm1974_vm2, %v1969_v47, %v8559_v38  ;;  %v1977_v44 = vsel %vm1974_vm2, %v1968_v21, %v8558_v6  ;;  %v8562_v49 = vpop.permute.xlu0 %8561  ;;  %v1966_v26 = vsel %vm1965_vm15, %v1957_v32, %v8463_v14  ;;  %v1967_v59 = vsel %vm1965_vm15, %v1958_v30, %v8464_v42 }
 0x4a5   :  { %v1989_v60 = vpack.c.bf16 %v1978_v19, %v1977_v44  ;;  %v1975_v24 = vsel %vm1974_vm2, %v1966_v26, %v8488_v18  ;;  %v1976_v16 = vsel %vm1974_vm2, %v1967_v59, %v8489_v54  ;;  %v1575_v23 = vmul.f32 %v10760_v41, %v10172_v12 }
 0x4a6   :  { %v11071_v27 = vpop.permute.xlu1 %8551  ;;  %v1576_v35 = vmul.f32 %v10882_v40, %v10183_v1  ;;  %v1988_v50 = vpack.c.bf16 %v1976_v16, %v1975_v24  ;;  %v8514_v9 = vunpack.i.h.bf16 %v11023_v8  ;;  %v8513_v53 = vunpack.i.l.bf16 %v11023_v8 }
 0x4a7   :  { %v8564_v33 = vunpack.i.h.bf16 %v8562_v49  ;;  %v8563_v5 = vunpack.i.l.bf16 %v8562_v49  ;;  %v1577_v52 = vmul.f32 %v10920_v22, %v10177_v31  ;;  %v1578_v2 = vmul.f32 %v10941_v43, %v10185_v57 }
 0x4a8   :  { %v8572_v11 = vpop.permute.xlu0 %8571  ;;  %7822 = vmatprep.mubr.msk.bf16.mxu0 %vm2012_vm5, %v1988_v50  ;;  %v1920_v40 = vsel %vm718_vm4, %v1576_v35, %v8499_v48  ;;  %v1919_v25 = vsel %vm718_vm4, %v1575_v23, %v8498_v20  ;;  %v8519_v8 = vunpack.i.h.bf16 %v11011_v45  ;;  %v8518_v15 = vunpack.i.l.bf16 %v11011_v45 }
 0x4a9   :  { %v8574_v41 = vunpack.i.h.bf16 %v8572_v11  ;;  %v8573_v34 = vunpack.i.l.bf16 %v8572_v11  ;;  %7823 = vmatmul.mubr.msk.bf16.vlgmr.msra.gmra.mrb[8].mxu0 %vm2012_vm5, %v1989_v60  ;;  %v8509_v22 = vunpack.i.h.bf16 %v11013_v13  ;;  %v8508_v58 = vunpack.i.l.bf16 %v11013_v13 }
 0x4aa   :  { %v8567_v46 = vpop.permute.xlu1 %8566  ;;  %v1922_v47 = vsel %vm718_vm4, %v1578_v2, %v8514_v9  ;;  %v1921_v38 = vsel %vm718_vm4, %v1577_v52, %v8513_v53  ;;  %v1928_v42 = vsel %vm736_vm6, %v1920_v40, %v8564_v33  ;;  %v1927_v14 = vsel %vm736_vm6, %v1919_v25, %v8563_v5 }
 0x4ab   :  { %v8569_v43 = vunpack.i.h.bf16 %v8567_v46  ;;  %v8568_v37 = vunpack.i.l.bf16 %v8567_v46  ;;  %v8549_v21 = vunpack.i.h.bf16 %v11058_v4  ;;  %v8548_v45 = vunpack.i.l.bf16 %v11058_v4 }
 0x4ac   :  { %v8587_v6 = vpop.permute.xlu0 %8586  ;;  %v1935_v18 = vsel %vm754_vm8, %v1927_v14, %v8573_v34  ;;  %v1936_v19 = vsel %vm754_vm8, %v1928_v42, %v8574_v41  ;;  %v8554_v49 = vunpack.i.h.bf16 %v11071_v27  ;;  %v8553_v26 = vunpack.i.l.bf16 %v11071_v27 }
 0x4ad   :  { %v8589_v32 = vunpack.i.h.bf16 %v8587_v6  ;;  %v8588_v30 = vunpack.i.l.bf16 %v8587_v6  ;;  %v1930_v59 = vsel %vm736_vm6, %v1922_v47, %v8569_v43  ;;  %v1929_v60 = vsel %vm736_vm6, %v1921_v38, %v8568_v37 }
 0x4ae   :  { %v8577_v13 = vpop.permute.xlu1 %8576  ;;  %v1943_v24 = vsel %vm772_vm10, %v1935_v18, %v8518_v15  ;;  %v1944_v4 = vsel %vm772_vm10, %v1936_v19, %v8519_v8  ;;  %v8524_v46 = vunpack.i.h.bf16 %v11017_v39  ;;  %v8523_v40 = vunpack.i.l.bf16 %v11017_v39 }
 0x4af   :  { %v8579_v54 = vunpack.i.h.bf16 %v8577_v13  ;;  %v8578_v44 = vunpack.i.l.bf16 %v8577_v13  ;;  %v1952_v53 = vsel %vm1947_vm13, %v1943_v24, %v8588_v30  ;;  %v1953_v33 = vsel %vm1947_vm13, %v1944_v4, %v8589_v32  ;;  %v2102_v32 = vld [vmem:[#allocation2 + $0x40] sm:$0x3] }
 0x4b0   :  { %v8592_v16 = vpop.permute.xlu0 %8591  ;;  %8058 = vmatprep.subr.msk.bf16.mxu1 %vm2025_vm12, %v2102_v32  ;;  %v2125_v30 = vsel %vm2025_vm12, %v2102_v32, 0 }
 0x4b1   :  { %v1937_v48 = vsel %vm754_vm8, %v1929_v60, %v8578_v44  ;;  %v1938_v20 = vsel %vm754_vm8, %v1930_v59, %v8579_v54  ;;  %v8594_v50 = vunpack.i.h.bf16 %v8592_v16  ;;  %v8593_v9 = vunpack.i.l.bf16 %v8592_v16  ;;  %7831 = vmatpush3.bf16.msra.mxu1 %v2125_v30 }
 0x4b2   :  { %v1945_v23 = vsel %vm772_vm10, %v1937_v48, %v8508_v58  ;;  %v1946_v35 = vsel %vm772_vm10, %v1938_v20, %v8509_v22  ;;  %v8582_v27 = vpop.permute.xlu1 %8581  ;;  %v14371_v20 = vld [vmem:[#allocation79_spill] sm:$0xff] }
 0x4b3   :  { %v1954_v5 = vsel %vm1947_vm13, %v1945_v23, %v8548_v45  ;;  %v1955_v11 = vsel %vm1947_vm13, %v1946_v35, %v8549_v21  ;;  %v1961_v52 = vsel %vm1956_vm14, %v1952_v53, %v8593_v9  ;;  %v1962_v2 = vsel %vm1956_vm14, %v1953_v33, %v8594_v50  ;;  %v14372_v50 = vld [vmem:[#allocation80_spill] sm:$0xff] }
 0x4b4   :  { %v8584_v41 = vunpack.i.h.bf16 %v8582_v27  ;;  %v8583_v34 = vunpack.i.l.bf16 %v8582_v27  ;;  %v1963_v25 = vsel %vm1956_vm14, %v1954_v5, %v8553_v26  ;;  %v1964_v8 = vsel %vm1956_vm14, %v1955_v11, %v8554_v49  ;;  %v8597_v15 = vpop.permute.xlu0 %8596  ;;  %v11140_v26 = vld [vmem:[%s13919_s3 + $0x3] ss:$0 sm:$0xff]  ;;  %v14374_v5 = vld [vmem:[#allocation81_spill] sm:$0xff] }
 0x4b5   :  { %v8599_v22 = vunpack.i.h.bf16 %v8597_v15  ;;  %v8598_v58 = vunpack.i.l.bf16 %v8597_v15  ;;  %v1970_v37 = vsel %vm1965_vm15, %v1961_v52, %v8523_v40  ;;  %v1971_v47 = vsel %vm1965_vm15, %v1962_v2, %v8524_v46 }
 0x4b6   :  { %v8602_v43 = vpop.permute.xlu1 %8601  ;;  %v1972_v14 = vsel %vm1965_vm15, %v1963_v25, %v8583_v34  ;;  %v1973_v6 = vsel %vm1965_vm15, %v1964_v8, %v8584_v41  ;;  %v14376_v41 = vld [vmem:[#allocation82_spill] sm:$0xff] }
 0x4b7   :  { %v8604_v38 = vunpack.i.h.bf16 %v8602_v43  ;;  %v8603_v42 = vunpack.i.l.bf16 %v8602_v43  ;;  %v1979_v39 = vsel %vm1974_vm2, %v1970_v37, %v8598_v58  ;;  %v1980_v21 = vsel %vm1974_vm2, %v1971_v47, %v8599_v22 }
 0x4b8   :  { %v1990_v19 = vpack.c.bf16 %v1980_v21, %v1979_v39  ;;  %v983_v54 = vpop.permute.xlu0 %982 }
 0x4b9   :  { %v1981_v45 = vsel %vm1974_vm2, %v1972_v14, %v8603_v42  ;;  %v1982_v18 = vsel %vm1974_vm2, %v1973_v6, %v8604_v38  ;;  %v1006_v9 = vsel %vm709_vm3, %v14372_v50, %v983_v54  ;;  %v14384_v50 = vld [vmem:[#allocation19_spill] sm:$0xff] }
 0x4ba   :  { %v1991_v13 = vpack.c.bf16 %v1982_v18, %v1981_v45  ;;  %7826 = vmatprep.mubr.msk.bf16.mxu0 %vm2012_vm5, %v1990_v19  ;;  %v985_v44 = vpop.permute.xlu1 %984  ;;  %v14379_v19 = vld [vmem:[#allocation38_spill] sm:$0xff] }
 0x4bb   :  { %v1007_v34 = vsel %vm709_vm3, %v14376_v41, %v985_v44  ;;  %v14385_v41 = vld [vmem:[#allocation28_spill] sm:$0xff] }
 0x4bc   :  { %7827 = vmatmul.mubr.msk.bf16.gmra.mrb[12].mxu0 %vm2012_vm5, %v1991_v13  ;;  %v11135_v49 = vpop.permute.xlu0 %996 }
 0x4be   :  { %v987_v59 = vpop.permute.xlu1 %986 }
 0x4bf   :  { %v1008_v16 = vsel %vm709_vm3, %v14371_v20, %v987_v59 }
 0x4c0   :  { %v989_v24 = vpop.permute.xlu0 %988 }
 0x4c1   :  { %v1009_v11 = vsel %vm709_vm3, %v14374_v5, %v989_v24  ;;  %v14381_v24 = vld [vmem:[#allocation10_spill] sm:$0xff] }
 0x57c   :  { %v7824_v60 = vpop.f32.mrb[8].mxu0 }
 0x57d   :  { %v2072_v4 = vadd.f32 %v7824_v60, %v11140_v26  ;;  %v2063_v48 = vpop.f32.mrb[9].mxu0  ;;  %v991_v60 = vpop.permute.xlu1 %990 }
 0x57e   :  { %v2064_v23 = vadd.f32 %v11140_v26, %v2063_v48  ;;  %v7825_v35 = vpop.f32.mrb[10].mxu0  ;;  %v14382_v48 = vld [vmem:[#allocation49_spill] sm:$0xff] }
 0x57f   :  { %v11148_v27 = vadd.f32 %v2072_v4, %v1008_v16  ;;  %v2075_v53 = vadd.f32 %v7825_v35, %v11140_v26  ;;  %v2066_v33 = vpop.f32.mrb[11].mxu0 }
 0x580   :  { %v11153_v52 = vadd.f32 %v2064_v23, %v1006_v9  ;;  %v2067_v2 = vadd.f32 %v11140_v26, %v2066_v33  ;;  %v14383_v23 = vld [vmem:[#allocation16_spill] sm:$0xff] }
 0x581   :  { %14373 = vst [vmem:[#allocation79_spill] sm:$0xff] %v11148_v27  ;;  %v2234_v46 = vmax.f32 %v11148_v27, 0.0  ;;  %v11159_v40 = vadd.f32 %v2075_v53, %v1009_v11 }
 0x582   :  { %14375 = vst [vmem:[#allocation80_spill] sm:$0xff] %v11153_v52  ;;  %v11162_v25 = vmax.f32 %v11153_v52, 0.0  ;;  %v11164_v8 = vadd.f32 %v2067_v2, %v1007_v34 }
 0x583   :  { %14377 = vst [vmem:[#allocation81_spill] sm:$0xff] %v11159_v40  ;;  %v11167_v15 = vmax.f32 %v11159_v40, 0.0  ;;  %v2104_v22 = vpack.c.bf16 %v11159_v40, %v11148_v27  ;;  %v2306_v37 = vmul.f32 %v2234_v46, %v9828_v55  ;;  %v2274_v38 = vrot.slane %v2234_v46, 1  ;;  %v14394_v40 = vld [vmem:[#allocation85_spill] sm:$0xff] }
 0x584   :  { %14378 = vst [vmem:[#allocation82_spill] sm:$0xff] %v11164_v8  ;;  %v2103_v58 = vpack.c.bf16 %v11164_v8, %v11153_v52  ;;  %v2233_v43 = vmax.f32 %v11164_v8, 0.0  ;;  %v2304_v14 = vmul.f32 %v11162_v25, %v9842_v61  ;;  %v14070_v21 = vrot.slane %v11162_v25, 1 }
 0x585   :  { %v2307_v47 = vmul.f32 %v11167_v15, %v9852_v7  ;;  %v14071_v42 = vrot.slane %v11167_v15, 1  ;;  %v2267_v4 = vmul.f32 %v2234_v46, %v14381_v24  ;;  %v2329_v20 = vmul.f32 %v2234_v46, %v14382_v48 }
 0x586   :  { %7832 = vmatprep.mubr.msk.bf16.mxu1 %vm718_vm4, %v2103_v58  ;;  %v2305_v6 = vmul.f32 %v2233_v43, %v9813_v51  ;;  %v2273_v39 = vrot.slane %v2233_v43, 1  ;;  %v2266_v18 = vmul.f32 %v2233_v43, %v9727_v17  ;;  %v2328_v13 = vmul.f32 %v2233_v43, %v14379_v19 }
 0x587   :  { %7833 = vmatmul.mubr.msk.bf16.vlgmr.msra.gmra.mrb[16].mxu1 %vm718_vm4, %v2104_v22  ;;  %v8605_v45 = vpack.i.bf16 %v2307_v47, %v2306_v37  ;;  %v11190_v30 = vsel %vm164_vm0, %v2274_v38, %v14071_v42  ;;  %v2241_v59 = vrot.slane %v2233_v43, 7  ;;  %v2242_v53 = vrot.slane %v2234_v46, 7  ;;  %v14386_v22 = vld [vmem:[#allocation37_spill] sm:$0xff] }
 0x588   :  { %v8615_v54 = vpack.i.bf16 %v2305_v6, %v2304_v14  ;;  %v2285_v44 = vsel %vm164_vm0, %v2273_v39, %v2274_v38  ;;  %v11201_v16 = vsel %vm164_vm0, %v14070_v21, %v2273_v39  ;;  %v2291_v9 = vmul.f32 %v11190_v30, %v14384_v50  ;;  %v14387_v38 = vld [vmem:[#allocation83_spill] sm:$0xff]  ;;  %v993_v6 = vpop.permute.xlu0 %992 }
 0x589   :  { %8606 = vrot.lane.b32.xlu1 %v8605_v45, %s9560_s0  ;;  %v2290_v35 = vmul.f32 %v2285_v44, %v14383_v23  ;;  %v14069_v33 = vrot.slane %v11167_v15, 7  ;;  %v8610_v5 = vpack.i.bf16 %v2267_v4, %v2266_v18  ;;  %v8620_v11 = vpack.i.bf16 %v2329_v20, %v2328_v13  ;;  %v995_v18 = vpop.permute.xlu1 %994  ;;  %v14388_v4 = vld [vmem:[#allocation20_spill] sm:$0xff] }
 0x58a   :  { %8616 = vrot.lane.b32.xlu0 %v8615_v54, %s9560_s0  ;;  %v14068_v2 = vrot.slane %v11162_v25, 7  ;;  %v2312_v34 = vmul.f32 %v11201_v16, %v14385_v41  ;;  %v2313_v58 = vmul.f32 %v2285_v44, %v14386_v22  ;;  %v11220_v46 = vsel %vm59_vm1, %v2241_v59, %v2242_v53 }
 0x58b   :  { %v11216_v43 = vsel %vm59_vm1, %v2242_v53, %v14069_v33  ;;  %v1010_v14 = vsel %vm709_vm3, %v14387_v38, %v991_v60  ;;  %v8625_v39 = vpack.i.bf16 %v2291_v9, %v2290_v35  ;;  %v2298_v20 = vmul.f32 %v11220_v46, %v14388_v4  ;;  %v14389_v53 = vld [vmem:[#allocation22_spill] sm:$0xff]  ;;  %v14391_v9 = vld [vmem:[#allocation41_spill] sm:$0xff] }
 0x58c   :  { %v11227_v47 = vsel %vm59_vm1, %v14068_v2, %v2241_v59  ;;  %v14390_v59 = vld [vmem:[#allocation34_spill] sm:$0xff]  ;;  %v8635_v38 = vpack.i.bf16 %v2313_v58, %v2312_v34 }
 0x58d   :  { %8611 = vrot.lane.b32.xlu1 %v8610_v5, %s9544_s26  ;;  %v2299_v5 = vmul.f32 %v11216_v43, %v14389_v53  ;;  %v2321_v2 = vmul.f32 %v11220_v46, %v14390_v59  ;;  %v2320_v33 = vmul.f32 %v11227_v47, %v14391_v9  ;;  %v14395_v34 = vld [vmem:[#allocation86_spill] sm:$0xff] }
 0x58e   :  { %8621 = vrot.lane.b32.xlu0 %v8620_v11, %s9561_s1  ;;  %v1012_v58 = vsel %vm709_vm3, %v14395_v34, %v995_v18  ;;  %v14429_v59 = vld [vmem:[#allocation50_spill] sm:$0xff] }
 0x58f   :  { %v7828_v37 = vpop.f32.mrb[12].mxu0 }
 0x590   :  { %v2079_v45 = vpop.f32.mrb[13].mxu0  ;;  %v2088_v60 = vadd.f32 %v7828_v37, %v11140_v26  ;;  %v1011_v37 = vsel %vm709_vm3, %v14394_v40, %v993_v6  ;;  %v8640_v40 = vpack.i.bf16 %v2321_v2, %v2320_v33  ;;  %v14400_v6 = vld [vmem:[#allocation44_spill] sm:$0xff]  ;;  %v14403_v33 = vld [vmem:[#allocation9_spill] sm:$0xff] }
 0x591   :  { %v2080_v13 = vadd.f32 %v11140_v26, %v2079_v45  ;;  %v7829_v54 = vpop.f32.mrb[14].mxu0  ;;  %v14392_v45 = vld [vmem:[#allocation84_spill] sm:$0xff]  ;;  %8626 = vrot.lane.b32.xlu1 %v8625_v39, %s9556_s27  ;;  %v8630_v39 = vpack.i.bf16 %v2299_v5, %v2298_v20  ;;  %v2337_v18 = vmul.f32 %v11190_v30, %v14400_v6  ;;  %v14402_v20 = vld [vmem:[#allocation42_spill] sm:$0xff]  ;;  %v9335_v6 = vld [vmem:[#allocation2 + $0x58] ss:$0 sps:$4 sm:$0x33]  }
 0x592   :  { %v2091_v11 = vadd.f32 %v7829_v54, %v11140_v26  ;;  %v2082_v35 = vpop.f32.mrb[15].mxu0  ;;  %v1013_v21 = vsel %vm709_vm3, %v14392_v45, %v11135_v49  ;;  %8636 = vrot.lane.b32.xlu0 %v8635_v38, %s9562_s18  ;;  %v11263_v45 = vadd.f32 %v2088_v60, %v1012_v58  ;;  %v14401_v38 = vld [vmem:[#allocation40_spill] sm:$0xff]  ;;  %v14405_v58 = vld [vmem:[#allocation11_spill] sm:$0xff]  ;;  %vm3267_vm3 = vcmask 1043456  }
 0x593   :  { %v11247_v42 = vadd.f32 %v2080_v13, %v1010_v14  ;;  %v2083_v8 = vadd.f32 %v11140_v26, %v2082_v35  ;;  %v14398_v14 = vld [vmem:[#allocation53_spill] sm:$0xff] }
 0x594   :  { %v11255_v54 = vadd.f32 %v2091_v11, %v1013_v21  ;;  %v2336_v13 = vmul.f32 %v2285_v44, %v14398_v14  ;;  %14399 = vst [vmem:[#allocation85_spill] sm:$0xff] %v11263_v45  ;;  %v14404_v11 = vld [vmem:[#allocation12_spill] sm:$0xff] }
 0x595   :  { %14393 = vst [vmem:[#allocation13_spill] sm:$0xff] %v11247_v42  ;;  %v11258_v52 = vmax.f32 %v11247_v42, 0.0  ;;  %v11260_v49 = vadd.f32 %v2083_v8, %v1011_v37  ;;  %8631 = vrot.lane.b32.xlu1 %v8630_v39, %s9558_s8  ;;  %v2330_v8 = vmul.f32 %v11167_v15, %v14401_v38  ;;  %v2265_v39 = vmul.f32 %v11162_v25, %v14405_v58 }
 0x596   :  { %14396 = vst [vmem:[#allocation83_spill] sm:$0xff] %v11255_v54  ;;  %v11266_v26 = vmax.f32 %v11255_v54, 0.0  ;;  %v2106_v5 = vpack.c.bf16 %v11255_v54, %v11263_v45  ;;  %8641 = vrot.lane.b32.xlu0 %v8640_v40, %s9563_s19  ;;  %v8645_v34 = vpack.i.bf16 %v2337_v18, %v2336_v13  ;;  %v11292_v40 = vmax.f32 %v11263_v45, 0.0  ;;  %v14406_v54 = vld [vmem:[#allocation46_spill] sm:$0xff]  ;;  %v14408_v18 = vld [vmem:[#allocation59_spill] sm:$0xff]  ;;  %v14409_v45 = vld [vmem:[#allocation60_spill] sm:$0xff] }
 0x597   :  { %14397 = vst [vmem:[#allocation84_spill] sm:$0xff] %v11260_v49  ;;  %v2105_v21 = vpack.c.bf16 %v11260_v49, %v11247_v42  ;;  %v2331_v44 = vmul.f32 %v11258_v52, %v14402_v20  ;;  %v2269_v35 = vmul.f32 %v11258_v52, %v14404_v11  ;;  %v11286_v37 = vmax.f32 %v11260_v49, 0.0  ;;  %v14407_v49 = vld [vmem:[#allocation35_spill] sm:$0xff]  ;;  %v14412_v11 = vld [vmem:[#allocation66_spill] sm:$0xff] }
 0x598   :  { %v2264_v2 = vmul.f32 %v11266_v26, %v14403_v33  ;;  %v2311_v13 = vmul.f32 %v11266_v26, %v14407_v49  ;;  %v2276_v42 = vrot.slane %v11258_v52, 1  ;;  %v2279_v27 = vrot.slane %v11266_v26, 1  ;;  %v9333_v49 = vld [vmem:[#allocation2 + $0x48] sm:$0xff]  }
 0x599   :  { %7836 = vmatprep.mubr.msk.bf16.mxu1 %vm718_vm4, %v2105_v21  ;;  %v8650_v60 = vpack.i.bf16 %v2331_v44, %v2330_v8  ;;  %v2268_v21 = vmul.f32 %v11167_v15, %v14406_v54  ;;  %v2332_v33 = vmul.f32 %v11286_v37, %v14412_v11  ;;  %v2244_v20 = vrot.slane %v11258_v52, 7  ;;  %7840 = vmatprep.subr.bf16.mxu0 %v9333_v49  ;;  %v14418_v54 = vld [vmem:[#allocation17_spill] sm:$0xff] }
 0x59a   :  { %7837 = vmatmul.mubr.msk.bf16.gmra.mrb[20].mxu1 %vm718_vm4, %v2106_v5  ;;  %8646 = vrot.lane.b32.xlu0 %v8645_v34, %s9564_s20  ;;  %v8660_v8 = vpack.i.bf16 %v2265_v39, %v2264_v2  ;;  %v2309_v5 = vmul.f32 %v11286_v37, %v14408_v18  ;;  %v14410_v34 = vld [vmem:[#allocation33_spill] sm:$0xff]  ;;  %v14411_v39 = vld [vmem:[#allocation15_spill] sm:$0xff]  ;;  %v14419_v58 = vrot.slane %v11167_v15, 7 }
 0x59b   :  { %8651 = vrot.lane.b32.xlu1 %v8650_v60, %s9561_s1  ;;  %v8655_v44 = vpack.i.bf16 %v2269_v35, %v2268_v21  ;;  %v2310_v60 = vmul.f32 %v11292_v40, %v14409_v45  ;;  %v2308_v2 = vmul.f32 %v11258_v52, %v14410_v34  ;;  %v2270_v21 = vmul.f32 %v11286_v37, %v14411_v39  ;;  %v14416_v39 = vld [vmem:[#allocation51_spill] sm:$0xff]  ;;  %v14417_v52 = vld [vmem:[#allocation32_spill] sm:$0xff] }
 0x59c   :  { %7841 = vmatpush3.bf16.msra.mxu0 %v9333_v49  ;;  %v2278_v49 = vrot.slane %v11292_v40, 1 }
 0x59d   :  { %v8665_v35 = vpack.i.bf16 %v2311_v13, %v2310_v60  ;;  %v8675_v18 = vpack.i.bf16 %v2309_v5, %v2308_v2  ;;  %v14415_v60 = vrot.slane %v11162_v25, 1  ;;  %v2247_v2 = vrot.slane %v11266_v26, 7 }
 0x59e   :  { %8661 = vrot.lane.b32.xlu0 %v8660_v8, %s9544_s26  ;;  %v14414_v8 = vld [vmem:[#allocation52_spill] sm:$0xff]  ;;  %v2280_v38 = vsel %vm164_vm0, %v2278_v49, %v2279_v27 }
 0x59f   :  { %8656 = vrot.lane.b32.xlu1 %v8655_v44, %s9544_s26  ;;  %v14413_v44 = vrot.slane %v11167_v15, 1  ;;  %v2271_v13 = vmul.f32 %v11292_v40, %v14414_v8  ;;  %v11326_v5 = vsel %vm164_vm0, %v2279_v27, %v14415_v60  ;;  %v11339_v60 = vsel %vm59_vm1, %v14419_v58, %v2244_v20  ;;  %v14422_v15 = vld [vmem:[#allocation14_spill] sm:$0xff] }
 0x5a0   :  { %v2288_v8 = vmul.f32 %v11326_v5, %v14418_v54  ;;  %v2289_v58 = vmul.f32 %v11201_v16, %v14422_v15 }
 0x5a1   :  { %v2283_v45 = vsel %vm164_vm0, %v14413_v44, %v2276_v42  ;;  %v2333_v44 = vmul.f32 %v11292_v40, %v14416_v39  ;;  %v8670_v11 = vpack.i.bf16 %v2271_v13, %v2270_v21  ;;  %v14421_v21 = vrot.slane %v11162_v25, 7 }
 0x5a2   :  { %8676 = vrot.lane.b32.xlu0 %v8675_v18, %s9560_s0  ;;  %v2315_v34 = vmul.f32 %v2283_v45, %v14417_v52  ;;  %v14420_v18 = vld [vmem:[#allocation30_spill] sm:$0xff]  ;;  %v2277_v13 = vrot.slane %v11286_v37, 1  ;;  %v14423_v52 = vld [vmem:[#allocation43_spill] sm:$0xff]  ;;  %v8695_v54 = vpack.i.bf16 %v2289_v58, %v2288_v8  ;;  %v2246_v58 = vrot.slane %v11292_v40, 7 }
 0x5a3   :  { %8666 = vrot.lane.b32.xlu1 %v8665_v35, %s9560_s0  ;;  %v8680_v35 = vpack.i.bf16 %v2333_v44, %v2332_v33  ;;  %v2314_v39 = vmul.f32 %v11190_v30, %v14420_v18  ;;  %v11348_v33 = vsel %vm59_vm1, %v2247_v2, %v14421_v21  ;;  %v9334_v44 = vld [vmem:[#allocation2 + $0x50] sm:$0xff]   ;;  %v2323_v30 = vmul.f32 %v11339_v60, %v14423_v52 }
 0x5a4   :  { %7842 = vmatprep.subr.bf16.mxu0 %v9334_v44  ;;  %v14424_v18 = vld [vmem:[#allocation18_spill] sm:$0xff]  ;;  %v2245_v40 = vrot.slane %v11286_v37, 7  ;;  %v14434_v37 = vld [vmem:[#allocation21_spill] sm:$0xff] }
 0x5a5   :  { %v2296_v21 = vmul.f32 %v11348_v33, %v14424_v18  ;;  %7843 = vmatpush3.bf16.msra.mxu0 %v9334_v44  ;;  %v14427_v44 = vld [vmem:[#allocation62_spill] sm:$0xff]  ;;  %v14428_v18 = vld [vmem:[#allocation63_spill] sm:$0xff] }
 0x5a6   :  { %8681 = vrot.lane.b32.xlu0 %v8680_v35, %s9561_s1  ;;  %v14425_v35 = vld [vmem:[#allocation36_spill] sm:$0xff]  ;;  %8059 = vmatprep.subr.msk.bf16.mxu0 %vm2025_vm12, %v9335_v6  ;;  %v2318_v52 = vmul.f32 %v2280_v38, %v14427_v44 }
 0x5a7   :  { %8671 = vrot.lane.b32.xlu1 %v8670_v11, %s9544_s26  ;;  %v8685_v11 = vpack.i.bf16 %v2315_v34, %v2314_v39  ;;  %v2322_v15 = vmul.f32 %v11216_v43, %v14425_v35  ;;  %v2282_v34 = vsel %vm164_vm0, %v2276_v42, %v2277_v13  ;;  %v14426_v39 = vld [vmem:[#allocation25_spill] sm:$0xff]  ;;  %v2706_v35 = vsel %vm2025_vm12, %v9335_v6, 0 }
 0x5a8   :  { %v2297_v8 = vmul.f32 %v11227_v47, %v14426_v39  ;;  %v2339_v42 = vmul.f32 %v2282_v34, %v14429_v59  ;;  %v14433_v39 = vld [vmem:[#allocation54_spill] sm:$0xff] }
 0x5a9   :  { %v8690_v27 = vpack.i.bf16 %v2323_v30, %v2322_v15  ;;  %7845 = vmatpush3.bf16.msra.mxu0 %v2706_v35  ;;  %v14430_v15 = vld [vmem:[#allocation48_spill] sm:$0xff]  ;;  %v2281_v35 = vsel %vm164_vm0, %v2277_v13, %v2278_v49  ;;  %v11404_v13 = vsel %vm59_vm1, %v2245_v40, %v2246_v58  ;;  %v14439_v49 = vld [vmem:[#allocation57_spill] sm:$0xff] }
 0x5aa   :  { %8696 = vrot.lane.b32.xlu0 %v8695_v54, %s9556_s27  ;;  %v8700_v14 = vpack.i.bf16 %v2297_v8, %v2296_v21  ;;  %v11378_v54 = vsel %vm59_vm1, %v2246_v58, %v2247_v2  ;;  %v2338_v30 = vmul.f32 %v2283_v45, %v14430_v15  ;;  %v14432_v21 = vld [vmem:[#allocation47_spill] sm:$0xff]  ;;  %v2293_v2 = vmul.f32 %v2282_v34, %v14433_v39 }
 0x5ab   :  { %8686 = vrot.lane.b32.xlu1 %v8685_v11, %s9562_s18  ;;  %v2319_v11 = vmul.f32 %v11326_v5, %v14428_v18  ;;  %v14431_v18 = vld [vmem:[#allocation65_spill] sm:$0xff]  ;;  %v2327_v8 = vmul.f32 %v11348_v33, %v14432_v21  ;;  %v14436_v21 = vld [vmem:[#allocation23_spill] sm:$0xff] }
 0x5ac   :  { %v2326_v6 = vmul.f32 %v11378_v54, %v14431_v18  ;;  %v8715_v59 = vpack.i.bf16 %v2339_v42, %v2338_v30  ;;  %v2295_v42 = vmul.f32 %v2280_v38, %v14436_v21  ;;  %v14437_v39 = vld [vmem:[#allocation27_spill] sm:$0xff] }
 0x5ad   :  { %v8705_v44 = vpack.i.bf16 %v2319_v11, %v2318_v52  ;;  %v2292_v52 = vmul.f32 %v2283_v45, %v14434_v37  ;;  %v14435_v11 = vld [vmem:[#allocation55_spill] sm:$0xff] }
 0x5ae   :  { %8701 = vrot.lane.b32.xlu0 %v8700_v14, %s9558_s8  ;;  %v11394_v14 = vsel %vm59_vm1, %v2244_v20, %v2245_v40  ;;  %v2294_v18 = vmul.f32 %v2281_v35, %v14435_v11  ;;  %v14442_v11 = vld [vmem:[#allocation39_spill] sm:$0xff] }
 0x5af   :  { %8691 = vrot.lane.b32.xlu1 %v8690_v27, %s9563_s19  ;;  %v8710_v27 = vpack.i.bf16 %v2327_v8, %v2326_v6  ;;  %v8720_v30 = vpack.i.bf16 %v2293_v2, %v2292_v52  ;;  %v2301_v15 = vmul.f32 %v11394_v14, %v14437_v39  ;;  %v14440_v6 = vld [vmem:[#allocation58_spill] sm:$0xff]  ;;  %v14441_v52 = vld [vmem:[#allocation61_spill] sm:$0xff]  ;;  %v2317_v58 = vmul.f32 %v2281_v35, %v14442_v11 }
 0x5b0   :  { %v8725_v20 = vpack.i.bf16 %v2295_v42, %v2294_v18  ;;  %v2303_v8 = vmul.f32 %v11378_v54, %v14440_v6  ;;  %v2316_v21 = vmul.f32 %v2282_v34, %v14441_v52  ;;  %v14443_v42 = vld [vmem:[#allocation45_spill] sm:$0xff]  ;;  %v14444_v34 = vld [vmem:[#allocation70_spill] sm:$0xff] }
 0x5b2   :  { %8716 = vrot.lane.b32.xlu0 %v8715_v59, %s9564_s20  ;;  %v14438_v59 = vld [vmem:[#allocation56_spill] sm:$0xff]  ;;  %v8745_v18 = vpack.i.bf16 %v2317_v58, %v2316_v21  ;;  %v2341_v21 = vmul.f32 %v2280_v38, %v14365_v10  ;;  %v2259_v10 = vmul.f32 %v11220_v46, %v14368_v3 }
 0x5b3   :  { %8706 = vrot.lane.b32.xlu1 %v8705_v44, %s9562_s18  ;;  %v2300_v45 = vmul.f32 %v11339_v60, %v14438_v59  ;;  %v2302_v44 = vmul.f32 %v11404_v13, %v14439_v49  ;;  %v2325_v49 = vmul.f32 %v11404_v13, %v14362_v63 }
 0x5b5   :  { %v8730_v2 = vpack.i.bf16 %v2301_v15, %v2300_v45  ;;  %v8735_v40 = vpack.i.bf16 %v2303_v8, %v2302_v44  ;;  %v2335_v15 = vmul.f32 %v11162_v25, %v14444_v34  ;;  %v14445_v8 = vld [vmem:[#allocation69_spill] sm:$0xff] }
 0x5b6   :  { %8721 = vrot.lane.b32.xlu0 %v8720_v30, %s9556_s27  ;;  %v2324_v30 = vmul.f32 %v11394_v14, %v14443_v42  ;;  %v2256_v42 = vmul.f32 %v11378_v54, %v14369_v56 }
 0x5b7   :  { %8711 = vrot.lane.b32.xlu1 %v8710_v27, %s9563_s19  ;;  %v2334_v27 = vmul.f32 %v11266_v26, %v14363_v36  ;;  %v2340_v26 = vmul.f32 %v2281_v35, %v14364_v62 }
 0x5b8   :  { %v8750_v44 = vpack.i.bf16 %v2325_v49, %v2324_v30 }
 0x5b9   :  { %v8740_v45 = vpack.i.bf16 %v2335_v15, %v2334_v27  ;;  %v8755_v25 = vpack.i.bf16 %v2341_v21, %v2340_v26 }
 0x5ba   :  { %8731 = vrot.lane.b32.xlu0 %v8730_v2, %s9558_s8  ;;  %v2343_v2 = vmul.f32 %v11201_v16, %v14445_v8 }
 0x5bb   :  { %8726 = vrot.lane.b32.xlu1 %v8725_v20, %s9556_s27  ;;  %v2342_v20 = vmul.f32 %v11326_v5, %v14366_v28  ;;  %v2258_v28 = vmul.f32 %v11227_v47, %v14367_v0 }
 0x5bd   :  { %v8760_v58 = vpack.i.bf16 %v2343_v2, %v2342_v20 }
 0x5be   :  { %8746 = vrot.lane.b32.xlu0 %v8745_v18, %s9562_s18 }
 0x5bf   :  { %8736 = vrot.lane.b32.xlu1 %v8735_v40, %s9558_s8 }
 0x5c2   :  { %8751 = vrot.lane.b32.xlu0 %v8750_v44, %s9563_s19 }
 0x5c3   :  { %8741 = vrot.lane.b32.xlu1 %v8740_v45, %s9561_s1 }
 0x5c6   :  { %8756 = vrot.lane.b32.xlu0 %v8755_v25, %s9564_s20 }
 0x5c7   :  { %8761 = vrot.lane.b32.xlu1 %v8760_v58, %s9564_s20 }
 0x5fb   :  { %v8607_v40 = vpop.permute.xlu1 %8606 }
 0x5fc   :  { %v11438_v5 = vpop.permute.xlu0 %8616  ;;  %v8609_v6 = vunpack.i.h.bf16 %v8607_v40 }
 0x5fd   :  { %v8619_v47 = vunpack.i.h.bf16 %v11438_v5  ;;  %v8618_v46 = vunpack.i.l.bf16 %v11438_v5 }
 0x5ff   :  { %v8612_v49 = vpop.permute.xlu1 %8611 }
 0x600   :  { %v11440_v35 = vpop.permute.xlu0 %8621  ;;  %v8614_v21 = vunpack.i.h.bf16 %v8612_v49  ;;  %v8613_v2 = vunpack.i.l.bf16 %v8612_v49  ;;  %v2257_v49 = vmul.f32 %v11348_v33, %v14370_v29 }
 0x602   :  { %v2603_v11 = vsel %vm718_vm4, %v2259_v10, %v8614_v21  ;;  %v2602_v52 = vsel %vm718_vm4, %v2258_v28, %v8613_v2  ;;  %v8624_v10 = vunpack.i.h.bf16 %v11440_v35  ;;  %v8623_v28 = vunpack.i.l.bf16 %v11440_v35 }
 0x603   :  { %v8627_v38 = vpop.permute.xlu1 %8626 }
 0x604   :  { %v11442_v27 = vpop.permute.xlu0 %8636  ;;  %v8629_v58 = vunpack.i.h.bf16 %v8627_v38  ;;  %v8628_v25 = vunpack.i.l.bf16 %v8627_v38  ;;  %v8608_v38 = vunpack.i.l.bf16 %v8607_v40 }
 0x605   :  { %v8639_v5 = vunpack.i.h.bf16 %v11442_v27 }
 0x606   :  { %v2610_v3 = vsel %vm736_vm6, %v2602_v52, %v8628_v25 }
 0x607   :  { %v8632_v18 = vpop.permute.xlu1 %8631 }
 0x608   :  { %v11444_v30 = vpop.permute.xlu0 %8641  ;;  %v8634_v62 = vunpack.i.h.bf16 %v8632_v18  ;;  %v8633_v36 = vunpack.i.l.bf16 %v8632_v18  ;;  %v2611_v18 = vsel %vm736_vm6, %v2603_v11, %v8629_v58  ;;  %v8638_v11 = vunpack.i.l.bf16 %v11442_v27 }
 0x60a   :  { %v2619_v54 = vsel %vm754_vm8, %v2611_v18, %v8634_v62  ;;  %v2618_v56 = vsel %vm754_vm8, %v2610_v3, %v8633_v36 }
 0x60b   :  { %v2626_v36 = vsel %vm772_vm10, %v2618_v56, %v8608_v38  ;;  %v2627_v3 = vsel %vm772_vm10, %v2619_v54, %v8609_v6 }
 0x60c   :  { %v11448_v15 = vpop.permute.xlu0 %8646 }
 0x60d   :  { %v11446_v16 = vpop.permute.xlu1 %8651 }
 0x60e   :  { %v8654_v25 = vunpack.i.h.bf16 %v11446_v16  ;;  %v8653_v62 = vunpack.i.l.bf16 %v11446_v16 }
 0x610   :  { %v8662_v20 = vpop.permute.xlu0 %8661 }
 0x611   :  { %v11450_v45 = vpop.permute.xlu1 %8656  ;;  %v8664_v33 = vunpack.i.h.bf16 %v8662_v20  ;;  %v8663_v29 = vunpack.i.l.bf16 %v8662_v20 }
 0x613   :  { %v2601_v18 = vsel %vm718_vm4, %v2257_v49, %v8664_v33  ;;  %v2600_v35 = vsel %vm718_vm4, %v2256_v42, %v8663_v29  ;;  %v8644_v49 = vunpack.i.h.bf16 %v11444_v30  ;;  %v8643_v29 = vunpack.i.l.bf16 %v11444_v30 }
 0x614   :  { %v11454_v26 = vpop.permute.xlu0 %8676 }
 0x615   :  { %v11452_v44 = vpop.permute.xlu1 %8666 }
 0x618   :  { %v11462_v63 = vpop.permute.xlu0 %8681 }
 0x619   :  { %v11456_v8 = vpop.permute.xlu1 %8671 }
 0x61c   :  { %v8697_v40 = vpop.permute.xlu0 %8696 }
 0x61d   :  { %v8687_v0 = vpop.permute.xlu1 %8686  ;;  %v8699_v58 = vunpack.i.h.bf16 %v8697_v40  ;;  %v8698_v52 = vunpack.i.l.bf16 %v8697_v40 }
 0x61e   :  { %v8689_v21 = vunpack.i.h.bf16 %v8687_v0  ;;  %v8688_v2 = vunpack.i.l.bf16 %v8687_v0 }
 0x61f   :  { %v2608_v16 = vsel %vm736_vm6, %v2600_v35, %v8698_v52  ;;  %v2609_v56 = vsel %vm736_vm6, %v2601_v18, %v8699_v58  ;;  %v8659_v18 = vunpack.i.h.bf16 %v11450_v45  ;;  %v8658_v35 = vunpack.i.l.bf16 %v11450_v45 }
 0x620   :  { %v8702_v0 = vpop.permute.xlu0 %8701  ;;  %v2635_v27 = vsel %vm1947_vm13, %v2627_v3, %v8689_v21  ;;  %v2634_v40 = vsel %vm1947_vm13, %v2626_v36, %v8688_v2  ;;  %v2262_v45 = vmul.f32 %v11394_v14, %v10177_v31  ;;  %v8679_v14 = vunpack.i.h.bf16 %v11454_v26 }
 0x621   :  { %v8692_v20 = vpop.permute.xlu1 %8691  ;;  %v8704_v37 = vunpack.i.h.bf16 %v8702_v0  ;;  %v8703_v34 = vunpack.i.l.bf16 %v8702_v0 }
 0x622   :  { %v8694_v39 = vunpack.i.h.bf16 %v8692_v20  ;;  %v8693_v59 = vunpack.i.l.bf16 %v8692_v20 }
 0x623   :  { %v2616_v42 = vsel %vm754_vm8, %v2608_v16, %v8703_v34  ;;  %v2617_v54 = vsel %vm754_vm8, %v2609_v56, %v8704_v37  ;;  %v8649_v34 = vunpack.i.h.bf16 %v11448_v15  ;;  %v8648_v37 = vunpack.i.l.bf16 %v11448_v15 }
 0x624   :  { %v2642_v6 = vsel %vm1956_vm14, %v2634_v40, %v8693_v59  ;;  %v2643_v38 = vsel %vm1956_vm14, %v2635_v27, %v8694_v39  ;;  %v2624_v21 = vsel %vm772_vm10, %v2616_v42, %v8618_v46  ;;  %v2625_v2 = vsel %vm772_vm10, %v2617_v54, %v8619_v47  ;;  %v8717_v52 = vpop.permute.xlu0 %8716 }
 0x625   :  { %v11496_v33 = vpop.permute.xlu1 %8706  ;;  %v2650_v58 = vsel %vm1965_vm15, %v2642_v6, %v8653_v62  ;;  %v2651_v59 = vsel %vm1965_vm15, %v2643_v38, %v8654_v25  ;;  %v2632_v39 = vsel %vm1947_vm13, %v2624_v21, %v8638_v11  ;;  %v2633_v36 = vsel %vm1947_vm13, %v2625_v2, %v8639_v5 }
 0x626   :  { %v8719_v30 = vunpack.i.h.bf16 %v8717_v52  ;;  %v8718_v3 = vunpack.i.l.bf16 %v8717_v52  ;;  %v2640_v20 = vsel %vm1956_vm14, %v2632_v39, %v8643_v29  ;;  %v2641_v46 = vsel %vm1956_vm14, %v2633_v36, %v8644_v49 }
 0x627   :  { %v2648_v11 = vsel %vm1965_vm15, %v2640_v20, %v8623_v28  ;;  %v2649_v5 = vsel %vm1965_vm15, %v2641_v46, %v8624_v10  ;;  %v2260_v16 = vmul.f32 %v11216_v43, %v10172_v12  ;;  %v2261_v56 = vmul.f32 %v11339_v60, %v10183_v1 }
 0x628   :  { %v2659_v47 = vsel %vm1974_vm2, %v2651_v59, %v8719_v30  ;;  %v2658_v62 = vsel %vm1974_vm2, %v2650_v58, %v8718_v3  ;;  %v8722_v15 = vpop.permute.xlu0 %8721  ;;  %v2656_v27 = vsel %vm1974_vm2, %v2648_v11, %v8648_v37  ;;  %v2657_v40 = vsel %vm1974_vm2, %v2649_v5, %v8649_v34 }
 0x629   :  { %v11510_v25 = vpop.permute.xlu1 %8711  ;;  %v2670_v0 = vpack.c.bf16 %v2659_v47, %v2658_v62  ;;  %v2669_v6 = vpack.c.bf16 %v2657_v40, %v2656_v27  ;;  %v8674_v28 = vunpack.i.h.bf16 %v11456_v8  ;;  %v8673_v10 = vunpack.i.l.bf16 %v11456_v8 }
 0x62a   :  { %v2263_v38 = vmul.f32 %v11404_v13, %v10185_v57  ;;  %v2604_v29 = vsel %vm718_vm4, %v2260_v16, %v8658_v35  ;;  %v2605_v42 = vsel %vm718_vm4, %v2261_v56, %v8659_v18  ;;  %v8724_v43 = vunpack.i.h.bf16 %v8722_v15 }
 0x62b   :  { %v8723_v54 = vunpack.i.l.bf16 %v8722_v15  ;;  %7846 = vmatprep.mubr.msk.bf16.mxu0 %vm2012_vm5, %v2669_v6  ;;  %v8678_v13 = vunpack.i.l.bf16 %v11454_v26  ;;  %v8669_v59 = vunpack.i.h.bf16 %v11452_v44  ;;  %v8668_v52 = vunpack.i.l.bf16 %v11452_v44 }
 0x62c   :  { %v8732_v60 = vpop.permute.xlu0 %8731  ;;  %7847 = vmatmul.mubr.msk.bf16.vlgmr.msra.gmra.mrb[16].mxu0 %vm2012_vm5, %v2670_v0  ;;  %v2606_v39 = vsel %vm718_vm4, %v2262_v45, %v8673_v10  ;;  %v2607_v36 = vsel %vm718_vm4, %v2263_v38, %v8674_v28  ;;  %v8709_v30 = vunpack.i.h.bf16 %v11496_v33  ;;  %v8708_v3 = vunpack.i.l.bf16 %v11496_v33 }
 0x62d   :  { %v8727_v49 = vpop.permute.xlu1 %8726  ;;  %v8734_v21 = vunpack.i.h.bf16 %v8732_v60  ;;  %v8733_v2 = vunpack.i.l.bf16 %v8732_v60  ;;  %v2613_v37 = vsel %vm736_vm6, %v2605_v42, %v8724_v43  ;;  %v2612_v20 = vsel %vm736_vm6, %v2604_v29, %v8723_v54 }
 0x62e   :  { %v8729_v8 = vunpack.i.h.bf16 %v8727_v49  ;;  %v8728_v58 = vunpack.i.l.bf16 %v8727_v49  ;;  %v8714_v15 = vunpack.i.h.bf16 %v11510_v25  ;;  %v8713_v27 = vunpack.i.l.bf16 %v11510_v25 }
 0x62f   :  { %v2620_v62 = vsel %vm754_vm8, %v2612_v20, %v8733_v2  ;;  %v2621_v44 = vsel %vm754_vm8, %v2613_v37, %v8734_v21 }
 0x630   :  { %v8747_v46 = vpop.permute.xlu0 %8746  ;;  %v2614_v11 = vsel %vm736_vm6, %v2606_v39, %v8728_v58  ;;  %v2615_v5 = vsel %vm736_vm6, %v2607_v36, %v8729_v8  ;;  %v2628_v6 = vsel %vm772_vm10, %v2620_v62, %v8678_v13  ;;  %v2629_v28 = vsel %vm772_vm10, %v2621_v44, %v8679_v14 }
 0x631   :  { %v8737_v34 = vpop.permute.xlu1 %8736  ;;  %v8749_v18 = vunpack.i.h.bf16 %v8747_v46  ;;  %v8748_v35 = vunpack.i.l.bf16 %v8747_v46  ;;  %v8684_v14 = vunpack.i.h.bf16 %v11462_v63  ;;  %v8683_v13 = vunpack.i.l.bf16 %v11462_v63 }
 0x632   :  { %v8739_v47 = vunpack.i.h.bf16 %v8737_v34  ;;  %v8738_v26 = vunpack.i.l.bf16 %v8737_v34 }
 0x633   :  { %v2636_v25 = vsel %vm1947_vm13, %v2628_v6, %v8748_v35  ;;  %v2637_v54 = vsel %vm1947_vm13, %v2629_v28, %v8749_v18 }
 0x634   :  { %v2622_v33 = vsel %vm754_vm8, %v2614_v11, %v8738_v26  ;;  %v2623_v0 = vsel %vm754_vm8, %v2615_v5, %v8739_v47  ;;  %v8752_v10 = vpop.permute.xlu0 %8751  ;;  %vm3182_vm8 = vcmask 392192  }
 0x635   :  { %v2630_v40 = vsel %vm772_vm10, %v2622_v33, %v8668_v52  ;;  %v2631_v16 = vsel %vm772_vm10, %v2623_v0, %v8669_v59  ;;  %v8742_v56 = vpop.permute.xlu1 %8741  ;;  %v8754_v49 = vunpack.i.h.bf16 %v8752_v10  ;;  %v8753_v29 = vunpack.i.l.bf16 %v8752_v10 }
 0x636   :  { %v2638_v45 = vsel %vm1947_vm13, %v2630_v40, %v8708_v3  ;;  %v2639_v38 = vsel %vm1947_vm13, %v2631_v16, %v8709_v30  ;;  %v8744_v42 = vunpack.i.h.bf16 %v8742_v56  ;;  %v8743_v43 = vunpack.i.l.bf16 %v8742_v56  ;;  %v11593_v40 = vld [vmem:[%s13919_s3 + $0x5] ss:$0 sm:$0xff] }
 0x637   :  { %v2646_v60 = vsel %vm1956_vm14, %v2638_v45, %v8713_v27  ;;  %v2647_v21 = vsel %vm1956_vm14, %v2639_v38, %v8714_v15  ;;  %v2644_v2 = vsel %vm1956_vm14, %v2636_v25, %v8753_v29  ;;  %v2645_v8 = vsel %vm1956_vm14, %v2637_v54, %v8754_v49 }
 0x638   :  { %v8757_v59 = vpop.permute.xlu0 %8756  ;;  %v2654_v36 = vsel %vm1965_vm15, %v2646_v60, %v8743_v43  ;;  %v2655_v30 = vsel %vm1965_vm15, %v2647_v21, %v8744_v42  ;;  %v2652_v37 = vsel %vm1965_vm15, %v2644_v2, %v8683_v13  ;;  %v2653_v20 = vsel %vm1965_vm15, %v2645_v8, %v8684_v14 }
 0x639   :  { %v8762_v58 = vpop.permute.xlu1 %8761  ;;  %v8759_v3 = vunpack.i.h.bf16 %v8757_v59  ;;  %v8758_v34 = vunpack.i.l.bf16 %v8757_v59  ;;  %vm3254_vm13 = vcmask 588800  }
 0x63a   :  { %v8764_v52 = vunpack.i.h.bf16 %v8762_v58  ;;  %v8763_v39 = vunpack.i.l.bf16 %v8762_v58 }
 0x63b   :  { %v2660_v26 = vsel %vm1974_vm2, %v2652_v37, %v8758_v34  ;;  %v2661_v63 = vsel %vm1974_vm2, %v2653_v20, %v8759_v3 }
 0x63c   :  { %v2662_v46 = vsel %vm1974_vm2, %v2654_v36, %v8763_v39  ;;  %v2663_v47 = vsel %vm1974_vm2, %v2655_v30, %v8764_v52  ;;  %v2671_v44 = vpack.c.bf16 %v2661_v63, %v2660_v26 }
 0x63d   :  { %v2672_v62 = vpack.c.bf16 %v2663_v47, %v2662_v46 }
 0x63e   :  { %7850 = vmatprep.mubr.msk.bf16.mxu0 %vm2012_vm5, %v2671_v44 }
 0x63f   :  { %7851 = vmatmul.mubr.msk.bf16.gmra.mrb[20].mxu0 %vm2012_vm5, %v2672_v62 }
 0x65a   :  { %v11574_v11 = vpop.f32.mrb[16].mxu1 }
 0x65b   :  { %v11576_v5 = vpop.f32.mrb[17].mxu1 }
 0x65c   :  { %v11578_v18 = vpop.f32.mrb[18].mxu1 }
 0x65d   :  { %v11580_v35 = vpop.f32.mrb[19].mxu1 }
 0x66d   :  { %v11582_v33 = vpop.f32.mrb[20].mxu1 }
 0x66e   :  { %v11584_v0 = vpop.f32.mrb[21].mxu1 }
 0x66f   :  { %v11586_v15 = vpop.f32.mrb[22].mxu1 }
 0x670   :  { %v11588_v27 = vpop.f32.mrb[23].mxu1 }
 0x6ff   :  { %v7848_v16 = vpop.f32.mrb[16].mxu0 }
 0x700   :  { %v2751_v56 = vadd.f32 %v7848_v16, %v11593_v40  ;;  %v2742_v6 = vpop.f32.mrb[17].mxu0 }
 0x701   :  { %v2743_v28 = vadd.f32 %v11593_v40, %v2742_v6  ;;  %v7849_v10 = vpop.f32.mrb[18].mxu0 }
 0x702   :  { %v2775_v45 = vmax.f32 %v2751_v56, 0.0  ;;  %v2754_v38 = vadd.f32 %v7849_v10, %v11593_v40  ;;  %v2745_v49 = vpop.f32.mrb[19].mxu0 }
 0x703   :  { %v11598_v29 = vmax.f32 %v2743_v28, 0.0  ;;  %v2746_v42 = vadd.f32 %v11593_v40, %v2745_v49 }
 0x704   :  { %v2783_v43 = vrot.slane %v2775_v45, 7  ;;  %v2815_v25 = vrot.slane %v2775_v45, 1  ;;  %v11601_v54 = vmax.f32 %v2754_v38, 0.0  ;;  %v2847_v60 = vmul.f32 %v2775_v45, %v9828_v55 }
 0x705   :  { %v14090_v21 = vrot.slane %v11598_v29, 7  ;;  %v14092_v2 = vrot.slane %v11598_v29, 1  ;;  %v2774_v8 = vmax.f32 %v2746_v42, 0.0  ;;  %v2845_v58 = vmul.f32 %v11598_v29, %v9842_v61 }
 0x706   :  { %v14089_v14 = vrot.slane %v11601_v54, 7  ;;  %v14091_v13 = vrot.slane %v11601_v54, 1  ;;  %v2848_v59 = vmul.f32 %v11601_v54, %v9852_v7  ;;  %v2808_v52 = vmul.f32 %v2775_v45, %v14381_v24 }
 0x707   :  { %v2782_v39 = vrot.slane %v2774_v8, 7  ;;  %v2814_v36 = vrot.slane %v2774_v8, 1  ;;  %v2846_v30 = vmul.f32 %v2774_v8, %v9813_v51  ;;  %v2807_v3 = vmul.f32 %v2774_v8, %v9727_v17 }
 0x708   :  { %v8765_v34 = vpack.i.bf16 %v2848_v59, %v2847_v60  ;;  %v2869_v37 = vmul.f32 %v2774_v8, %v14379_v19  ;;  %v2870_v20 = vmul.f32 %v2775_v45, %v14382_v48  ;;  %v2825_v46 = vsel %vm164_vm0, %v2815_v25, %v14091_v13  ;;  %v14447_v59 = vld [vmem:[#allocation53_spill] sm:$0xff]  ;;  %v14496_v19 = vld [vmem:[#allocation58_spill] sm:$0xff] }
 0x709   :  { %v8775_v47 = vpack.i.bf16 %v2846_v30, %v2845_v58  ;;  %v8770_v26 = vpack.i.bf16 %v2808_v52, %v2807_v3  ;;  %v2826_v63 = vsel %vm164_vm0, %v2814_v36, %v2815_v25  ;;  %v2832_v62 = vmul.f32 %v2825_v46, %v14384_v50  ;;  %v14446_v58 = vld [vmem:[#allocation34_spill] sm:$0xff]  ;;  %v14482_v50 = vld [vmem:[#allocation21_spill] sm:$0xff] }
 0x70a   :  { %8766 = vrot.lane.b32.xlu1 %v8765_v34, %s9564_s20  ;;  %v8780_v44 = vpack.i.bf16 %v2870_v20, %v2869_v37  ;;  %v2831_v16 = vmul.f32 %v2826_v63, %v14383_v23  ;;  %v11630_v56 = vsel %vm164_vm0, %v14092_v2, %v2814_v36  ;;  %v2854_v6 = vmul.f32 %v2826_v63, %v14386_v22  ;;  %v14448_v36 = vld [vmem:[#allocation44_spill] sm:$0xff]  ;;  %v14473_v22 = vld [vmem:[#allocation18_spill] sm:$0xff] }
 0x70b   :  { %8776 = vrot.lane.b32.xlu0 %v8775_v47, %s9564_s20  ;;  %v2853_v28 = vmul.f32 %v11630_v56, %v14385_v41  ;;  %v11640_v10 = vsel %vm59_vm1, %v2783_v43, %v14089_v14  ;;  %v11644_v45 = vsel %vm59_vm1, %v2782_v39, %v2783_v43  ;;  %v11650_v38 = vsel %vm59_vm1, %v14090_v21, %v2782_v39  ;;  %v14454_v14 = vld [vmem:[#allocation25_spill] sm:$0xff]  ;;  %v14458_v2 = vld [vmem:[#allocation60_spill] sm:$0xff] }
 0x70c   :  { %v8785_v49 = vpack.i.bf16 %v2832_v62, %v2831_v16  ;;  %v2839_v42 = vmul.f32 %v11644_v45, %v14388_v4  ;;  %v2840_v25 = vmul.f32 %v11640_v10, %v14389_v53  ;;  %v2861_v60 = vmul.f32 %v11650_v38, %v14391_v9  ;;  %v14449_v16 = vld [vmem:[#allocation40_spill] sm:$0xff]  ;;  %v14463_v9 = vld [vmem:[#allocation35_spill] sm:$0xff] }
 0x70d   :  { %v8795_v8 = vpack.i.bf16 %v2854_v6, %v2853_v28  ;;  %v2862_v43 = vmul.f32 %v11644_v45, %v14446_v58  ;;  %v2877_v52 = vmul.f32 %v2826_v63, %v14447_v59  ;;  %v2878_v30 = vmul.f32 %v2825_v46, %v14448_v36  ;;  %v14450_v6 = vld [vmem:[#allocation11_spill] sm:$0xff]  ;;  %v14451_v28 = vld [vmem:[#allocation46_spill] sm:$0xff] }
 0x70e   :  { %8771 = vrot.lane.b32.xlu1 %v8770_v26, %s9556_s27  ;;  %v8790_v39 = vpack.i.bf16 %v2840_v25, %v2839_v42  ;;  %v2871_v26 = vmul.f32 %v11601_v54, %v14449_v16  ;;  %v2809_v42 = vmul.f32 %v11601_v54, %v14451_v28  ;;  %v11689_v21 = vmul.f32 %v11650_v38, %v14454_v14  ;;  %v14461_v16 = vld [vmem:[#allocation33_spill] sm:$0xff]  ;;  %v14462_v36 = vld [vmem:[#allocation59_spill] sm:$0xff] }
 0x70f   :  { %8781 = vrot.lane.b32.xlu0 %v8780_v44, %s9565_s30  ;;  %v8800_v3 = vpack.i.bf16 %v2862_v43, %v2861_v60  ;;  %v8805_v34 = vpack.i.bf16 %v2878_v30, %v2877_v52  ;;  %v2806_v44 = vmul.f32 %v11598_v29, %v14450_v6  ;;  %v14452_v43 = vld [vmem:[#allocation14_spill] sm:$0xff]  ;;  %v14460_v6 = vld [vmem:[#allocation12_spill] sm:$0xff] }
 0x710   :  { %v14453_v52 = vld [vmem:[#allocation30_spill] sm:$0xff] }
 0x711   :  { %v11682_v30 = vmul.f32 %v2825_v46, %v14453_v52  ;;  %v14456_v46 = vld [vmem:[#allocation70_spill] sm:$0xff] }
 0x712   :  { %v7852_v37 = vpop.f32.mrb[20].mxu0  ;;  %8786 = vrot.lane.b32.xlu1 %v8785_v49, %s9560_s0 }
 0x713   :  { %v2767_v20 = vadd.f32 %v7852_v37, %v11593_v40  ;;  %v2758_v47 = vpop.f32.mrb[21].mxu0  ;;  %8796 = vrot.lane.b32.xlu0 %v8795_v8, %s9566_s5  ;;  %v11679_v8 = vmul.f32 %v11630_v56, %v14452_v43 }
 0x714   :  { %v2759_v63 = vadd.f32 %v11593_v40, %v2758_v47  ;;  %v7853_v62 = vpop.f32.mrb[22].mxu0 }
 0x715   :  { %v11674_v25 = vmax.f32 %v2767_v20, 0.0  ;;  %v2770_v49 = vadd.f32 %v7853_v62, %v11593_v40  ;;  %v2761_v60 = vpop.f32.mrb[23].mxu0  ;;  %v14455_v20 = vld [vmem:[#allocation36_spill] sm:$0xff] }
 0x716   :  { %v11684_v37 = vmax.f32 %v2759_v63, 0.0  ;;  %v2762_v47 = vadd.f32 %v11593_v40, %v2761_v60  ;;  %v11693_v13 = vmul.f32 %v11640_v10, %v14455_v20  ;;  %8791 = vrot.lane.b32.xlu1 %v8790_v39, %s9563_s19  ;;  %v11702_v63 = vmul.f32 %v11598_v29, %v14456_v46  ;;  %v9336_v40 = vld [vmem:[#allocation2 + $0x60] sm:$0xff]   ;;  %v14457_v20 = vld [vmem:[#allocation42_spill] sm:$0xff]  ;;  %v14459_v46 = vld [vmem:[#allocation9_spill] sm:$0xff] }
 0x717   :  { %v11697_v43 = vmax.f32 %v2770_v49, 0.0  ;;  %8801 = vrot.lane.b32.xlu0 %v8800_v3, %s9567_s6  ;;  %v2851_v49 = vmul.f32 %v11674_v25, %v14458_v2  ;;  %7854 = vmatprep.subr.bf16.mxu1 %v9336_v40 }
 0x718   :  { %v11705_v14 = vmax.f32 %v2762_v47, 0.0  ;;  %v2872_v62 = vmul.f32 %v11684_v37, %v14457_v20  ;;  %v2817_v39 = vrot.slane %v11684_v37, 1  ;;  %v2810_v47 = vmul.f32 %v11684_v37, %v14460_v6  ;;  %7855 = vmatpush3.bf16.msra.mxu1 %v9336_v40  ;;  %v14466_v6 = vld [vmem:[#allocation15_spill] sm:$0xff] }
 0x719   :  { %v2820_v52 = vrot.slane %v11697_v43, 1  ;;  %v2805_v28 = vmul.f32 %v11697_v43, %v14459_v46  ;;  %v2788_v60 = vrot.slane %v11697_v43, 7  ;;  %v2849_v20 = vmul.f32 %v11684_v37, %v14461_v16  ;;  %v14464_v46 = vld [vmem:[#allocation66_spill] sm:$0xff] }
 0x71a   :  { %v8810_v3 = vpack.i.bf16 %v2872_v62, %v2871_v26  ;;  %v2850_v2 = vmul.f32 %v11705_v14, %v14462_v36  ;;  %v8815_v58 = vpack.i.bf16 %v2810_v47, %v2809_v42  ;;  %v2852_v53 = vmul.f32 %v11697_v43, %v14463_v9  ;;  %v14465_v62 = vld [vmem:[#allocation51_spill] sm:$0xff]  ;;  %v14467_v42 = vld [vmem:[#allocation52_spill] sm:$0xff] }
 0x71b   :  { %v8820_v59 = vpack.i.bf16 %v2806_v44, %v2805_v28  ;;  %v2873_v4 = vmul.f32 %v11705_v14, %v14464_v46  ;;  %8806 = vrot.lane.b32.xlu0 %v8805_v34, %s9543_s25  ;;  %v2874_v16 = vmul.f32 %v11674_v25, %v14465_v62  ;;  %v2811_v36 = vmul.f32 %v11705_v14, %v14466_v6  ;;  %v14470_v6 = vld [vmem:[#allocation17_spill] sm:$0xff] }
 0x71c   :  { %8811 = vrot.lane.b32.xlu1 %v8810_v3, %s9565_s30  ;;  %v8835_v26 = vpack.i.bf16 %v2850_v2, %v2849_v20  ;;  %v2818_v44 = vrot.slane %v11705_v14, 1  ;;  %v8825_v28 = vpack.i.bf16 %v2852_v53, %v2851_v49  ;;  %v2812_v40 = vmul.f32 %v11674_v25, %v14467_v42  ;;  %v9337_v3 = vld [vmem:[#allocation2 + $0x68] sm:$0xff]   ;;  %v14471_v53 = vld [vmem:[#allocation32_spill] sm:$0xff] }
 0x71d   :  { %v14468_v47 = vrot.slane %v11598_v29, 1  ;;  %v14469_v2 = vrot.slane %v11601_v54, 1  ;;  %v8840_v62 = vpack.i.bf16 %v2874_v16, %v2873_v4  ;;  %v14472_v42 = vrot.slane %v11598_v29, 7  ;;  %7856 = vmatprep.subr.bf16.mxu1 %v9337_v3 }
 0x71e   :  { %v8830_v9 = vpack.i.bf16 %v2812_v40, %v2811_v36  ;;  %v14474_v4 = vrot.slane %v11684_v37, 7  ;;  %v14475_v16 = vrot.slane %v11601_v54, 7  ;;  %v2823_v29 = vsel %vm164_vm0, %v2817_v39, %v2818_v44  ;;  %v14476_v40 = vld [vmem:[#allocation43_spill] sm:$0xff]  ;;  %7857 = vmatpush3.bf16.msra.mxu1 %v9337_v3 }
 0x71f   :  { %v11740_v34 = vsel %vm164_vm0, %v2820_v52, %v14468_v47  ;;  %v2824_v20 = vsel %vm164_vm0, %v14469_v2, %v2817_v39  ;;  %v11757_v47 = vsel %vm59_vm1, %v2788_v60, %v14472_v42  ;;  %v2786_v42 = vrot.slane %v11705_v14, 7  ;;  %8821 = vrot.lane.b32.xlu0 %v8820_v59, %s9556_s27  ;;  %v14477_v39 = vld [vmem:[#allocation48_spill] sm:$0xff] }
 0x720   :  { %v11748_v46 = vmul.f32 %v11740_v34, %v14470_v6  ;;  %v11751_v49 = vmul.f32 %v2824_v20, %v14471_v53  ;;  %v11761_v41 = vmul.f32 %v11757_v47, %v14473_v22  ;;  %v11769_v2 = vsel %vm59_vm1, %v14475_v16, %v14474_v4  ;;  %8816 = vrot.lane.b32.xlu1 %v8815_v58, %s9556_s27  ;;  %v14478_v53 = vld [vmem:[#allocation50_spill] sm:$0xff]  ;;  %v14481_v6 = vld [vmem:[#allocation63_spill] sm:$0xff] }
 0x721   :  { %v2864_v4 = vmul.f32 %v11769_v2, %v14476_v40  ;;  %v2879_v22 = vmul.f32 %v2824_v20, %v14477_v39  ;;  %v2880_v14 = vmul.f32 %v2823_v29, %v14478_v53  ;;  %v14479_v59 = vrot.slane %v11674_v25, 1  ;;  %v14483_v39 = vld [vmem:[#allocation54_spill] sm:$0xff] }
 0x722   :  { %v8855_v36 = vpack.i.bf16 %v11679_v8, %v11748_v46  ;;  %v8845_v54 = vpack.i.bf16 %v11751_v49, %v11682_v30  ;;  %v8860_v16 = vpack.i.bf16 %v11689_v21, %v11761_v41  ;;  %v9338_v8 = vld [vmem:[#allocation2 + $0x70] sm:$0xff]   ;;  %v2860_v40 = vmul.f32 %v11740_v34, %v14481_v6 }
 0x723   :  { %v2821_v58 = vsel %vm164_vm0, %v14479_v59, %v2820_v52  ;;  %v8850_v46 = vpack.i.bf16 %v2864_v4, %v11693_v13  ;;  %v14480_v30 = vld [vmem:[#allocation62_spill] sm:$0xff]  ;;  %v2833_v41 = vmul.f32 %v2824_v20, %v14482_v50  ;;  %v8875_v21 = vpack.i.bf16 %v2880_v14, %v2879_v22  ;;  %v14485_v52 = vld [vmem:[#allocation47_spill] sm:$0xff]  ;;  %7858 = vmatprep.subr.bf16.mxu1 %v9338_v8  ;;  %v14486_v4 = vld [vmem:[#allocation65_spill] sm:$0xff] }
 0x724   :  { %v2859_v49 = vmul.f32 %v2821_v58, %v14480_v30  ;;  %v2834_v23 = vmul.f32 %v2823_v29, %v14483_v39  ;;  %v14484_v53 = vrot.slane %v11674_v25, 7  ;;  %v2868_v3 = vmul.f32 %v11757_v47, %v14485_v52  ;;  %8836 = vrot.lane.b32.xlu0 %v8835_v26, %s9564_s20  ;;  %8826 = vrot.lane.b32.xlu1 %v8825_v28, %s9564_s20  ;;  %v14489_v50 = vld [vmem:[#allocation27_spill] sm:$0xff] }
 0x725   :  { %v14487_v20 = vrot.slane %v11684_v37, 7  ;;  %v14490_v26 = vrot.slane %v11674_v25, 1  ;;  %7859 = vmatpush3.bf16.msra.mxu1 %v9338_v8  ;;  %v9339_v8 = vld [vmem:[#allocation2 + $0x78] sm:$0xff]  }
 0x726   :  { %v11800_v48 = vsel %vm59_vm1, %v14484_v53, %v2788_v60  ;;  %v8865_v13 = vpack.i.bf16 %v2860_v40, %v2859_v49  ;;  %v8880_v60 = vpack.i.bf16 %v2834_v23, %v2833_v41  ;;  %v14488_v53 = vld [vmem:[#allocation56_spill] sm:$0xff]  ;;  %v14491_v49 = vld [vmem:[#allocation55_spill] sm:$0xff]  ;;  %7860 = vmatprep.subr.bf16.mxu1 %v9339_v8 }
 0x727   :  { %v2867_v22 = vmul.f32 %v11800_v48, %v14486_v4  ;;  %v11812_v14 = vsel %vm59_vm1, %v14487_v20, %v2786_v42  ;;  %v2841_v59 = vmul.f32 %v11769_v2, %v14488_v53  ;;  %v2822_v28 = vsel %vm164_vm0, %v2818_v44, %v14490_v26  ;;  %v14492_v4 = vld [vmem:[#allocation23_spill] sm:$0xff]  ;;  %v14493_v20 = vld [vmem:[#allocation61_spill] sm:$0xff]  ;;  %v14499_v26 = vld [vmem:[#allocation64_spill] sm:$0xff] }
 0x728   :  { %v2842_v52 = vmul.f32 %v11812_v14, %v14489_v50  ;;  %v2835_v37 = vmul.f32 %v2822_v28, %v14491_v49  ;;  %v2836_v39 = vmul.f32 %v2821_v58, %v14492_v4  ;;  %v2857_v6 = vmul.f32 %v2823_v29, %v14493_v20  ;;  %v14494_v41 = vld [vmem:[#allocation39_spill] sm:$0xff]  ;;  %8841 = vrot.lane.b32.xlu0 %v8840_v62, %s9565_s30  ;;  %v14502_v4 = vld [vmem:[#allocation72_spill] sm:$0xff] }
 0x729   :  { %v8870_v40 = vpack.i.bf16 %v2868_v3, %v2867_v22  ;;  %v2858_v30 = vmul.f32 %v2822_v28, %v14494_v41  ;;  %v14495_v53 = vrot.slane %v11674_v25, 7  ;;  %v2844_v44 = vmul.f32 %v11800_v48, %v14496_v19  ;;  %8831 = vrot.lane.b32.xlu1 %v8830_v9, %s9556_s27  ;;  %v14497_v22 = vld [vmem:[#allocation57_spill] sm:$0xff]  ;;  %v14501_v19 = vld [vmem:[#allocation67_spill] sm:$0xff]  ;;  %7861 = vmatpush3.bf16.msra.mxu1 %v9339_v8 }
 0x72a   :  { %v8890_v23 = vpack.i.bf16 %v2842_v52, %v2841_v59  ;;  %v8885_v3 = vpack.i.bf16 %v2836_v39, %v2835_v37  ;;  %v14498_v52 = vld [vmem:[#allocation45_spill] sm:$0xff]  ;;  %v2881_v20 = vmul.f32 %v2822_v28, %v14501_v19  ;;  %v2882_v9 = vmul.f32 %v2821_v58, %v14502_v4 }
 0x72b   :  { %v11830_v50 = vsel %vm59_vm1, %v2786_v42, %v14495_v53  ;;  %v2865_v59 = vmul.f32 %v11812_v14, %v14498_v52  ;;  %v8905_v25 = vpack.i.bf16 %v2858_v30, %v2857_v6  ;;  %v14500_v53 = vld [vmem:[#allocation68_spill] sm:$0xff]  ;;  %v14503_v39 = vld [vmem:[#allocation73_spill] sm:$0xff] }
 0x72c   :  { %v2843_v29 = vmul.f32 %v11830_v50, %v14497_v22  ;;  %v2866_v42 = vmul.f32 %v11830_v50, %v14499_v26  ;;  %v2875_v41 = vmul.f32 %v11697_v43, %v14500_v53  ;;  %v2883_v37 = vmul.f32 %v11740_v34, %v14503_v39  ;;  %v14504_v22 = vld [vmem:[#allocation69_spill] sm:$0xff]  ;;  %v9340_v6 = vld [vmem:[#allocation2 + $0x80] ss:$0 sps:$4 sm:$0xff]   ;;  %8856 = vrot.lane.b32.xlu0 %v8855_v36, %s9560_s0 }
 0x72d   :  { %v2884_v49 = vmul.f32 %v11630_v56, %v14504_v22  ;;  %8846 = vrot.lane.b32.xlu1 %v8845_v54, %s9566_s5  ;;  %v8915_v43 = vpack.i.bf16 %v2882_v9, %v2881_v20  ;;  %8060 = vmatprep.subr.msk.bf16.mxu1 %vm3267_vm3, %v9340_v6  ;;  %v3269_v58 = vsel %vm3267_vm3, %v9340_v6, 0  ;;  %v7220_v56 = vld [vmem:[%s13919_s3 + $0x4] ss:$0 sm:$0xff] }
 0x72e   :  { %v8895_v62 = vpack.i.bf16 %v2844_v44, %v2843_v29  ;;  %v8910_v30 = vpack.i.bf16 %v2866_v42, %v2865_v59  ;;  %v8900_v26 = vpack.i.bf16 %v11702_v63, %v2875_v41  ;;  %7863 = vmatpush3.bf16.msra.mxu1 %v3269_v58  ;;  %v2162_v63 = vadd.f32 %v7220_v56, %v11576_v5 }
 0x72f   :  { %v8920_v28 = vpack.i.bf16 %v2884_v49, %v2883_v37  ;;  %v2165_v34 = vadd.f32 %v7220_v56, %v11580_v35  ;;  %v2170_v36 = vadd.f32 %v11574_v11, %v7220_v56  ;;  %v2189_v54 = vadd.f32 %v11586_v15, %v7220_v56 }
 0x730   :  { %8861 = vrot.lane.b32.xlu0 %v8860_v16, %s9563_s19  ;;  %v2173_v16 = vadd.f32 %v11578_v18, %v7220_v56  ;;  %v2186_v5 = vadd.f32 %v11582_v33, %v7220_v56  ;;  %v2181_v35 = vadd.f32 %v7220_v56, %v11588_v27 }
 0x731   :  { %8851 = vrot.lane.b32.xlu1 %v8850_v46, %s9567_s6  ;;  %v2178_v46 = vadd.f32 %v7220_v56, %v11584_v0 }
 0x734   :  { %8876 = vrot.lane.b32.xlu0 %v8875_v21, %s9543_s25 }
 0x735   :  { %8866 = vrot.lane.b32.xlu1 %v8865_v13, %s9566_s5 }
 0x738   :  { %8881 = vrot.lane.b32.xlu0 %v8880_v60, %s9560_s0 }
 0x739   :  { %8871 = vrot.lane.b32.xlu1 %v8870_v40, %s9567_s6 }
 0x73c   :  { %8891 = vrot.lane.b32.xlu0 %v8890_v23, %s9563_s19 }
 0x73d   :  { %8886 = vrot.lane.b32.xlu1 %v8885_v3, %s9560_s0  ;;  %v14505_v3 = vld [vmem:[#allocation76_spill] sm:$0xff] }
 0x73e   :  { %v2799_v29 = vmul.f32 %v11650_v38, %v14505_v3 }
 0x740   :  { %8906 = vrot.lane.b32.xlu0 %v8905_v25, %s9566_s5 }
 0x741   :  { %8896 = vrot.lane.b32.xlu1 %v8895_v62, %s9563_s19 }
 0x744   :  { %8911 = vrot.lane.b32.xlu0 %v8910_v30, %s9567_s6  ;;  %v14507_v30 = vld [vmem:[#allocation74_spill] sm:$0xff] }
 0x745   :  { %8901 = vrot.lane.b32.xlu1 %v8900_v26, %s9565_s30  ;;  %v14506_v26 = vld [vmem:[#allocation77_spill] sm:$0xff] }
 0x746   :  { %v2800_v42 = vmul.f32 %v11644_v45, %v14506_v26 }
 0x748   :  { %8916 = vrot.lane.b32.xlu0 %v8915_v43, %s9543_s25  ;;  %v2797_v43 = vmul.f32 %v11800_v48, %v14507_v30 }
 0x749   :  { %8921 = vrot.lane.b32.xlu1 %v8920_v28, %s9543_s25  ;;  %v14508_v28 = vld [vmem:[#allocation71_spill] sm:$0xff] }
 0x74a   :  { %v2798_v58 = vmul.f32 %v11757_v47, %v14508_v28 }
 0x74c   :  { %2200 = vrot.lane.b32.xlu0 %v2162_v63, %s9544_s26 }
 0x74d   :  { %2202 = vrot.lane.b32.xlu1 %v2165_v34, %s9544_s26 }
 0x750   :  { %2214 = vrot.lane.b32.xlu0 %v2189_v54, %s9544_s26 }
 0x751   :  { %2204 = vrot.lane.b32.xlu1 %v2170_v36, %s9544_s26 }
 0x754   :  { %2206 = vrot.lane.b32.xlu0 %v2173_v16, %s9544_s26 }
 0x755   :  { %2208 = vrot.lane.b32.xlu1 %v2178_v46, %s9544_s26 }
 0x758   :  { %2210 = vrot.lane.b32.xlu0 %v2181_v35, %s9544_s26 }
 0x759   :  { %2212 = vrot.lane.b32.xlu1 %v2186_v5, %s9544_s26 }
 0x77c   :  { %v8767_v11 = vpop.permute.xlu1 %8766 }
 0x77d   :  { %v11888_v15 = vpop.permute.xlu0 %8776  ;;  %v8769_v38 = vunpack.i.h.bf16 %v8767_v11  ;;  %v8768_v56 = vunpack.i.l.bf16 %v8767_v11 }
 0x77e   :  { %v8779_v34 = vunpack.i.h.bf16 %v11888_v15  ;;  %v8778_v36 = vunpack.i.l.bf16 %v11888_v15 }
 0x780   :  { %v8772_v21 = vpop.permute.xlu1 %8771 }
 0x781   :  { %v11890_v13 = vpop.permute.xlu0 %8781  ;;  %v8774_v44 = vunpack.i.h.bf16 %v8772_v21  ;;  %v8773_v8 = vunpack.i.l.bf16 %v8772_v21 }
 0x782   :  { %v8784_v21 = vunpack.i.h.bf16 %v11890_v13 }
 0x783   :  { %v3143_v63 = vsel %vm736_vm6, %v2799_v29, %v8773_v8  ;;  %v3144_v45 = vsel %vm736_vm6, %v2800_v42, %v8774_v44 }
 0x784   :  { %v8787_v18 = vpop.permute.xlu1 %8786 }
 0x785   :  { %v11892_v0 = vpop.permute.xlu0 %8796  ;;  %v8789_v59 = vunpack.i.h.bf16 %v8787_v18  ;;  %v8788_v25 = vunpack.i.l.bf16 %v8787_v18  ;;  %v8783_v18 = vunpack.i.l.bf16 %v11890_v13 }
 0x786   :  { %v8798_v15 = vunpack.i.l.bf16 %v11892_v0 }
 0x787   :  { %v3151_v54 = vsel %vm772_vm10, %v3143_v63, %v8788_v25  ;;  %v3152_v16 = vsel %vm772_vm10, %v3144_v45, %v8789_v59 }
 0x788   :  { %v8792_v60 = vpop.permute.xlu1 %8791 }
 0x789   :  { %v11894_v40 = vpop.permute.xlu0 %8801  ;;  %v8794_v62 = vunpack.i.h.bf16 %v8792_v60  ;;  %v8793_v9 = vunpack.i.l.bf16 %v8792_v60  ;;  %v8799_v60 = vunpack.i.h.bf16 %v11892_v0 }
 0x78a   :  { %v8804_v25 = vunpack.i.h.bf16 %v11894_v40  ;;  %v8803_v42 = vunpack.i.l.bf16 %v11894_v40 }
 0x78b   :  { %v3159_v48 = vsel %vm1956_vm14, %v3151_v54, %v8793_v9  ;;  %v3160_v47 = vsel %vm1956_vm14, %v3152_v16, %v8794_v62 }
 0x78c   :  { %v3168_v62 = vsel %vm1974_vm2, %v3160_v47, %v8769_v38 }
 0x78d   :  { %v11896_v49 = vpop.permute.xlu0 %8806 }
 0x78e   :  { %v11898_v33 = vpop.permute.xlu1 %8811 }
 0x78f   :  { %v8814_v9 = vunpack.i.h.bf16 %v11898_v33  ;;  %v8813_v13 = vunpack.i.l.bf16 %v11898_v33 }
 0x791   :  { %v8822_v27 = vpop.permute.xlu0 %8821 }
 0x792   :  { %v11900_v20 = vpop.permute.xlu1 %8816  ;;  %v8824_v46 = vunpack.i.h.bf16 %v8822_v27  ;;  %v8823_v5 = vunpack.i.l.bf16 %v8822_v27  ;;  %v3167_v27 = vsel %vm1974_vm2, %v3159_v48, %v8768_v56 }
 0x794   :  { %v3142_v63 = vsel %vm736_vm6, %v2798_v58, %v8824_v46  ;;  %v3141_v0 = vsel %vm736_vm6, %v2797_v43, %v8823_v5 }
 0x796   :  { %v11902_v23 = vpop.permute.xlu0 %8836  ;;  %v11904_v41 = vpop.permute.xlu1 %8826 }
 0x79a   :  { %v11910_v37 = vpop.permute.xlu0 %8841 }
 0x79b   :  { %v11912_v6 = vpop.permute.xlu1 %8831 }
 0x79e   :  { %v8857_v35 = vpop.permute.xlu0 %8856 }
 0x79f   :  { %v8847_v11 = vpop.permute.xlu1 %8846  ;;  %v8859_v44 = vunpack.i.h.bf16 %v8857_v35  ;;  %v8858_v8 = vunpack.i.l.bf16 %v8857_v35 }
 0x7a0   :  { %v8849_v29 = vunpack.i.h.bf16 %v8847_v11  ;;  %v8848_v59 = vunpack.i.l.bf16 %v8847_v11 }
 0x7a1   :  { %v3149_v40 = vsel %vm772_vm10, %v3141_v0, %v8858_v8  ;;  %v3150_v56 = vsel %vm772_vm10, %v3142_v63, %v8859_v44 }
 0x7a2   :  { %v8862_v45 = vpop.permute.xlu0 %8861  ;;  %v3176_v38 = vsel %vm3173_vm7, %v3167_v27, %v8848_v59  ;;  %v3177_v48 = vsel %vm3173_vm7, %v3168_v62, %v8849_v29 }
 0x7a3   :  { %v8852_v54 = vpop.permute.xlu1 %8851  ;;  %v8864_v16 = vunpack.i.h.bf16 %v8862_v45  ;;  %v8863_v35 = vunpack.i.l.bf16 %v8862_v45  ;;  %v8808_v45 = vunpack.i.l.bf16 %v11896_v49 }
 0x7a4   :  { %v8854_v11 = vunpack.i.h.bf16 %v8852_v54  ;;  %v8853_v28 = vunpack.i.l.bf16 %v8852_v54 }
 0x7a5   :  { %v3158_v33 = vsel %vm1956_vm14, %v3150_v56, %v8864_v16  ;;  %v3157_v58 = vsel %vm1956_vm14, %v3149_v40, %v8863_v35  ;;  %v2801_v56 = vmul.f32 %v11640_v10, %v10172_v12 }
 0x7a6   :  { %v3185_v43 = vsel %vm3182_vm8, %v3176_v38, %v8853_v28  ;;  %v3186_v47 = vsel %vm3182_vm8, %v3177_v48, %v8854_v11  ;;  %v3166_v46 = vsel %vm1974_vm2, %v3158_v33, %v8779_v34  ;;  %v3165_v5 = vsel %vm1974_vm2, %v3157_v58, %v8778_v36  ;;  %v8877_v0 = vpop.permute.xlu0 %8876 }
 0x7a7   :  { %v3195_v8 = vsel %vm3191_vm9, %v3186_v47, %v8814_v9  ;;  %v3194_v44 = vsel %vm3191_vm9, %v3185_v43, %v8813_v13  ;;  %v11950_v59 = vpop.permute.xlu1 %8866  ;;  %v3175_v29 = vsel %vm3173_vm7, %v3166_v46, %v8799_v60  ;;  %v3174_v27 = vsel %vm3173_vm7, %v3165_v5, %v8798_v15 }
 0x7a8   :  { %v8879_v62 = vunpack.i.h.bf16 %v8877_v0  ;;  %v8878_v63 = vunpack.i.l.bf16 %v8877_v0  ;;  %v8809_v28 = vunpack.i.h.bf16 %v11896_v49  ;;  %v3183_v34 = vsel %vm3182_vm8, %v3174_v27, %v8803_v42 }
 0x7a9   :  { %v3184_v36 = vsel %vm3182_vm8, %v3175_v29, %v8804_v25  ;;  %v3192_v54 = vsel %vm3191_vm9, %v3183_v34, %v8783_v18  ;;  %v8819_v42 = vunpack.i.h.bf16 %v11900_v20  ;;  %v8818_v25 = vunpack.i.l.bf16 %v11900_v20 }
 0x7aa   :  { %v3204_v9 = vsel %vm3200_vm11, %v3195_v8, %v8879_v62  ;;  %v3203_v13 = vsel %vm3200_vm11, %v3194_v44, %v8878_v63  ;;  %v3193_v60 = vsel %vm3191_vm9, %v3184_v36, %v8784_v21  ;;  %v8882_v15 = vpop.permute.xlu0 %8881  ;;  %v3201_v11 = vsel %vm3200_vm11, %v3192_v54, %v8808_v45 }
 0x7ab   :  { %v3219_v16 = vpack.c.bf16 %v3204_v9, %v3203_v13  ;;  %v11962_v35 = vpop.permute.xlu1 %8871  ;;  %v3202_v49 = vsel %vm3200_vm11, %v3193_v60, %v8809_v28  ;;  %v2802_v21 = vmul.f32 %v11769_v2, %v10183_v1  ;;  %v8884_v18 = vunpack.i.h.bf16 %v8882_v15 }
 0x7ac   :  { %v3218_v40 = vpack.c.bf16 %v3202_v49, %v3201_v11  ;;  %v8883_v38 = vunpack.i.l.bf16 %v8882_v15  ;;  %v2803_v48 = vmul.f32 %v11812_v14, %v10177_v31  ;;  %v2804_v33 = vmul.f32 %v11830_v50, %v10185_v57 }
 0x7ad   :  { %v8834_v58 = vunpack.i.h.bf16 %v11912_v6  ;;  %v8833_v20 = vunpack.i.l.bf16 %v11912_v6  ;;  %v3146_v10 = vsel %vm736_vm6, %v2802_v21, %v8819_v42  ;;  %v3145_v2 = vsel %vm736_vm6, %v2801_v56, %v8818_v25 }
 0x7ae   :  { %7864 = vmatprep.mubr.msk.bf16.mxu1 %vm3254_vm13, %v3218_v40  ;;  %v8892_v43 = vpop.permute.xlu0 %8891  ;;  %v8839_v14 = vunpack.i.h.bf16 %v11902_v23  ;;  %v8838_v50 = vunpack.i.l.bf16 %v11902_v23  ;;  %v8829_v6 = vunpack.i.h.bf16 %v11904_v41  ;;  %v8828_v44 = vunpack.i.l.bf16 %v11904_v41 }
 0x7af   :  { %v8887_v47 = vpop.permute.xlu1 %8886  ;;  %v8894_v46 = vunpack.i.h.bf16 %v8892_v43  ;;  %v8893_v5 = vunpack.i.l.bf16 %v8892_v43  ;;  %7865 = vmatmul.mubr.msk.bf16.vlgmr.msra.gmra.mrb[24].mxu1 %vm3254_vm13, %v3219_v16  ;;  %v3154_v29 = vsel %vm772_vm10, %v3146_v10, %v8884_v18  ;;  %v3153_v27 = vsel %vm772_vm10, %v3145_v2, %v8883_v38 }
 0x7b0   :  { %v8889_v8 = vunpack.i.h.bf16 %v8887_v47  ;;  %v8888_v0 = vunpack.i.l.bf16 %v8887_v47  ;;  %v3148_v62 = vsel %vm736_vm6, %v2804_v33, %v8834_v58  ;;  %v3147_v63 = vsel %vm736_vm6, %v2803_v48, %v8833_v20 }
 0x7b1   :  { %v3161_v28 = vsel %vm1956_vm14, %v3153_v27, %v8893_v5  ;;  %v3162_v45 = vsel %vm1956_vm14, %v3154_v29, %v8894_v46  ;;  %v8869_v41 = vunpack.i.h.bf16 %v11950_v59  ;;  %v8868_v60 = vunpack.i.l.bf16 %v11950_v59 }
 0x7b2   :  { %v8907_v34 = vpop.permute.xlu0 %8906  ;;  %v3156_v16 = vsel %vm772_vm10, %v3148_v62, %v8889_v8  ;;  %v3155_v15 = vsel %vm772_vm10, %v3147_v63, %v8888_v0  ;;  %v8874_v11 = vunpack.i.h.bf16 %v11962_v35  ;;  %v8873_v49 = vunpack.i.l.bf16 %v11962_v35 }
 0x7b3   :  { %v8897_v23 = vpop.permute.xlu1 %8896  ;;  %v8909_v36 = vunpack.i.h.bf16 %v8907_v34  ;;  %v8908_v9 = vunpack.i.l.bf16 %v8907_v34  ;;  %v3169_v40 = vsel %vm1974_vm2, %v3161_v28, %v8838_v50  ;;  %v3170_v56 = vsel %vm1974_vm2, %v3162_v45, %v8839_v14 }
 0x7b4   :  { %v8899_v13 = vunpack.i.h.bf16 %v8897_v23  ;;  %v8898_v54 = vunpack.i.l.bf16 %v8897_v23  ;;  %v8844_v50 = vunpack.i.h.bf16 %v11910_v37  ;;  %v8843_v8 = vunpack.i.l.bf16 %v11910_v37 }
 0x7b5   :  { %v3178_v48 = vsel %vm3173_vm7, %v3169_v40, %v8908_v9  ;;  %v3179_v33 = vsel %vm3173_vm7, %v3170_v56, %v8909_v36 }
 0x7b6   :  { %v3163_v42 = vsel %vm1956_vm14, %v3155_v15, %v8898_v54  ;;  %v3164_v25 = vsel %vm1956_vm14, %v3156_v16, %v8899_v13  ;;  %v8912_v18 = vpop.permute.xlu0 %8911 }
 0x7b7   :  { %v3171_v21 = vsel %vm1974_vm2, %v3163_v42, %v8828_v44  ;;  %v3172_v59 = vsel %vm1974_vm2, %v3164_v25, %v8829_v6  ;;  %v8902_v38 = vpop.permute.xlu1 %8901  ;;  %v8914_v58 = vunpack.i.h.bf16 %v8912_v18  ;;  %v8913_v35 = vunpack.i.l.bf16 %v8912_v18 }
 0x7b8   :  { %v8904_v20 = vunpack.i.h.bf16 %v8902_v38  ;;  %v8903_v43 = vunpack.i.l.bf16 %v8902_v38  ;;  %v3180_v47 = vsel %vm3173_vm7, %v3171_v21, %v8868_v60  ;;  %v3181_v10 = vsel %vm3173_vm7, %v3172_v59, %v8869_v41  ;;  %v3344_v41 = vld [vmem:[#allocation2 + $0x88] sm:$0xf]  ;;  %v14509_v59 = vld [vmem:[#allocation79_spill] sm:$0xff] }
 0x7b9   :  { %v3187_v2 = vsel %vm3182_vm8, %v3178_v48, %v8913_v35  ;;  %v3188_v46 = vsel %vm3182_vm8, %v3179_v33, %v8914_v58  ;;  %v3189_v5 = vsel %vm3182_vm8, %v3180_v47, %v8873_v49  ;;  %v3190_v14 = vsel %vm3182_vm8, %v3181_v10, %v8874_v11  ;;  %8061 = vmatprep.subr.msk.bf16.mxu0 %vm3267_vm3, %v3344_v41  ;;  %v12031_v49 = vld [vmem:[%s13919_s3 + $0x6] ss:$0 sm:$0xff]  ;;  %v14512_v47 = vld [vmem:[#allocation81_spill] sm:$0xff] }
 0x7ba   :  { %v8917_v0 = vpop.permute.xlu0 %8916  ;;  %v3198_v63 = vsel %vm3191_vm9, %v3189_v5, %v8903_v43  ;;  %v3199_v28 = vsel %vm3191_vm9, %v3190_v14, %v8904_v20  ;;  %v3196_v45 = vsel %vm3191_vm9, %v3187_v2, %v8843_v8  ;;  %v3197_v34 = vsel %vm3191_vm9, %v3188_v46, %v8844_v50  ;;  %v14510_v33 = vld [vmem:[#allocation80_spill] sm:$0xff]  ;;  %v14514_v5 = vld [vmem:[#allocation82_spill] sm:$0xff] }
 0x7bb   :  { %v8922_v6 = vpop.permute.xlu1 %8921  ;;  %v8919_v44 = vunpack.i.h.bf16 %v8917_v0  ;;  %v8918_v29 = vunpack.i.l.bf16 %v8917_v0  ;;  %v3367_v60 = vsel %vm3267_vm3, %v3344_v41, 0  ;;  %v14517_v41 = vld [vmem:[#allocation38_spill] sm:$0xff] }
 0x7bc   :  { %v8924_v27 = vunpack.i.h.bf16 %v8922_v6  ;;  %v8923_v62 = vunpack.i.l.bf16 %v8922_v6  ;;  %7873 = vmatpush3.bf16.msra.mxu0 %v3367_v60 }
 0x7bd   :  { %v3205_v23 = vsel %vm3200_vm11, %v3196_v45, %v8918_v29  ;;  %v3206_v36 = vsel %vm3200_vm11, %v3197_v34, %v8919_v44 }
 0x7be   :  { %v3207_v37 = vsel %vm3200_vm11, %v3198_v63, %v8923_v62  ;;  %v3208_v9 = vsel %vm3200_vm11, %v3199_v28, %v8924_v27  ;;  %v3220_v13 = vpack.c.bf16 %v3206_v36, %v3205_v23  ;;  %v2201_v16 = vpop.permute.xlu0 %2200 }
 0x7bf   :  { %v3221_v54 = vpack.c.bf16 %v3208_v9, %v3207_v37  ;;  %v2203_v15 = vpop.permute.xlu1 %2202  ;;  %v2224_v58 = vsel %vm718_vm4, %v14510_v33, %v2201_v16 }
 0x7c0   :  { %7868 = vmatprep.mubr.msk.bf16.mxu1 %vm3254_vm13, %v3220_v13  ;;  %v2225_v14 = vsel %vm718_vm4, %v14514_v5, %v2203_v15  ;;  %v14521_v5 = vld [vmem:[#allocation28_spill] sm:$0xff] }
 0x7c1   :  { %7869 = vmatmul.mubr.msk.bf16.gmra.mrb[28].mxu1 %vm3254_vm13, %v3221_v54 }
 0x7c2   :  { %v12026_v11 = vpop.permute.xlu0 %2214 }
 0x7c3   :  { %v2205_v42 = vpop.permute.xlu1 %2204 }
 0x7c4   :  { %v2226_v18 = vsel %vm718_vm4, %v14509_v59, %v2205_v42 }
 0x7c6   :  { %v2207_v40 = vpop.permute.xlu0 %2206 }
 0x7c7   :  { %v2227_v10 = vsel %vm718_vm4, %v14512_v47, %v2207_v40  ;;  %v14520_v47 = vld [vmem:[#allocation19_spill] sm:$0xff] }
 0x882   :  { %v7866_v25 = vpop.f32.mrb[24].mxu1 }
 0x883   :  { %v3314_v56 = vadd.f32 %v7866_v25, %v12031_v49  ;;  %v3305_v21 = vpop.f32.mrb[25].mxu1 }
 0x884   :  { %v3306_v38 = vadd.f32 %v12031_v49, %v3305_v21  ;;  %v7867_v48 = vpop.f32.mrb[26].mxu1 }
 0x885   :  { %v12039_v35 = vadd.f32 %v3314_v56, %v2226_v18  ;;  %v3317_v20 = vadd.f32 %v7867_v48, %v12031_v49  ;;  %v3308_v43 = vpop.f32.mrb[27].mxu1  ;;  %v14518_v56 = vld [vmem:[#allocation49_spill] sm:$0xff]  ;;  %v2209_v18 = vpop.permute.xlu1 %2208 }
 0x886   :  { %v12044_v2 = vadd.f32 %v3306_v38, %v2224_v58  ;;  %v3309_v46 = vadd.f32 %v12031_v49, %v3308_v43 }
 0x887   :  { %14511 = vst [vmem:[#allocation86_spill] sm:$0xff] %v12039_v35  ;;  %v3476_v50 = vmax.f32 %v12039_v35, 0.0  ;;  %v12050_v8 = vadd.f32 %v3317_v20, %v2227_v10  ;;  %v14519_v20 = vld [vmem:[#allocation16_spill] sm:$0xff] }
 0x888   :  { %14513 = vst [vmem:[#allocation79_spill] sm:$0xff] %v12044_v2  ;;  %v12053_v0 = vmax.f32 %v12044_v2, 0.0  ;;  %v12055_v6 = vadd.f32 %v3309_v46, %v2225_v14 }
 0x889   :  { %14515 = vst [vmem:[#allocation80_spill] sm:$0xff] %v12050_v8  ;;  %v12058_v44 = vmax.f32 %v12050_v8, 0.0  ;;  %v3346_v29 = vpack.c.bf16 %v12050_v8, %v12039_v35  ;;  %v3548_v63 = vmul.f32 %v3476_v50, %v9828_v55  ;;  %v3516_v9 = vrot.slane %v3476_v50, 1 }
 0x88a   :  { %14516 = vst [vmem:[#allocation81_spill] sm:$0xff] %v12055_v6  ;;  %v3345_v27 = vpack.c.bf16 %v12055_v6, %v12044_v2  ;;  %v3475_v62 = vmax.f32 %v12055_v6, 0.0  ;;  %v3546_v45 = vmul.f32 %v12053_v0, %v9842_v61  ;;  %v3509_v54 = vmul.f32 %v3476_v50, %v14381_v24  ;;  %v14533_v6 = vld [vmem:[#allocation53_spill] sm:$0xff] }
 0x88b   :  { %v3549_v28 = vmul.f32 %v12058_v44, %v9852_v7  ;;  %v14104_v34 = vrot.slane %v12058_v44, 1  ;;  %v14105_v16 = vrot.slane %v12053_v0, 1  ;;  %v3571_v21 = vmul.f32 %v3476_v50, %v14518_v56 }
 0x88c   :  { %7874 = vmatprep.mubr.msk.bf16.mxu0 %vm736_vm6, %v3345_v27  ;;  %v3547_v23 = vmul.f32 %v3475_v62, %v9813_v51  ;;  %v3508_v36 = vmul.f32 %v3475_v62, %v9727_v17  ;;  %v3515_v37 = vrot.slane %v3475_v62, 1  ;;  %v3570_v60 = vmul.f32 %v3475_v62, %v14517_v41 }
 0x88d   :  { %7875 = vmatmul.mubr.msk.bf16.vlgmr.msra.gmra.mrb[24].mxu0 %vm736_vm6, %v3346_v29  ;;  %v8925_v13 = vpack.i.bf16 %v3549_v28, %v3548_v63  ;;  %v12082_v42 = vsel %vm164_vm0, %v3516_v9, %v14104_v34  ;;  %v3483_v40 = vrot.slane %v3475_v62, 7  ;;  %v3484_v48 = vrot.slane %v3476_v50, 7  ;;  %v14522_v29 = vld [vmem:[#allocation37_spill] sm:$0xff] }
 0x88e   :  { %v8935_v15 = vpack.i.bf16 %v3547_v23, %v3546_v45  ;;  %v3527_v25 = vsel %vm164_vm0, %v3515_v37, %v3516_v9  ;;  %v12092_v59 = vsel %vm164_vm0, %v14105_v16, %v3515_v37  ;;  %v8930_v38 = vpack.i.bf16 %v3509_v54, %v3508_v36  ;;  %v2211_v45 = vpop.permute.xlu0 %2210  ;;  %v14523_v37 = vld [vmem:[#allocation20_spill] sm:$0xff] }
 0x88f   :  { %8926 = vrot.lane.b32.xlu1 %v8925_v13, %s9564_s20  ;;  %v14102_v33 = vrot.slane %v12058_v44, 7  ;;  %v8940_v58 = vpack.i.bf16 %v3571_v21, %v3570_v60  ;;  %v3532_v43 = vmul.f32 %v3527_v25, %v14519_v20  ;;  %v3533_v10 = vmul.f32 %v12082_v42, %v14520_v47  ;;  %v14524_v13 = vld [vmem:[#allocation22_spill] sm:$0xff]  ;;  %v2213_v60 = vpop.permute.xlu1 %2212 }
 0x890   :  { %8936 = vrot.lane.b32.xlu0 %v8935_v15, %s9564_s20  ;;  %v14103_v46 = vrot.slane %v12053_v0, 7  ;;  %v3554_v14 = vmul.f32 %v12092_v59, %v14521_v5  ;;  %v3555_v27 = vmul.f32 %v3527_v25, %v14522_v29  ;;  %v12111_v62 = vsel %vm59_vm1, %v3483_v40, %v3484_v48 }
 0x891   :  { %v12107_v50 = vsel %vm59_vm1, %v3484_v48, %v14102_v33  ;;  %v8945_v23 = vpack.i.bf16 %v3533_v10, %v3532_v43  ;;  %v3540_v9 = vmul.f32 %v12111_v62, %v14523_v37  ;;  %v14525_v48 = vld [vmem:[#allocation41_spill] sm:$0xff]  ;;  %v14526_v33 = vld [vmem:[#allocation34_spill] sm:$0xff]  ;;  %v3578_v2 = vmul.f32 %v3527_v25, %v14533_v6  ;;  %v14537_v25 = vld [vmem:[#allocation40_spill] sm:$0xff] }
 0x892   :  { %v12118_v63 = vsel %vm59_vm1, %v14103_v46, %v3483_v40  ;;  %v3541_v54 = vmul.f32 %v12107_v50, %v14524_v13  ;;  %v8955_v21 = vpack.i.bf16 %v3555_v27, %v3554_v14  ;;  %v14527_v46 = vld [vmem:[#allocation13_spill] sm:$0xff]  ;;  %v14529_v27 = vld [vmem:[#allocation84_spill] sm:$0xff]  ;;  %v14550_v61 = vrot.slane %v12053_v0, 1 }
 0x893   :  { %8931 = vrot.lane.b32.xlu1 %v8930_v38, %s9556_s27  ;;  %v3562_v40 = vmul.f32 %v12118_v63, %v14525_v48  ;;  %v2228_v43 = vsel %vm718_vm4, %v14527_v46, %v2209_v18  ;;  %v2229_v8 = vsel %vm718_vm4, %v14529_v27, %v2211_v45  ;;  %v14531_v46 = vld [vmem:[#allocation85_spill] sm:$0xff] }
 0x894   :  { %8941 = vrot.lane.b32.xlu0 %v8940_v58, %s9565_s30  ;;  %v7870_v28 = vpop.f32.mrb[28].mxu1  ;;  %v3563_v58 = vmul.f32 %v12111_v62, %v14526_v33 }
 0x895   :  { %v3321_v36 = vpop.f32.mrb[29].mxu1  ;;  %v3330_v10 = vadd.f32 %v7870_v28, %v12031_v49  ;;  %v2230_v28 = vsel %vm718_vm4, %v14531_v46, %v2213_v60  ;;  %v14541_v46 = vld [vmem:[#allocation12_spill] sm:$0xff] }
 0x896   :  { %v3322_v15 = vadd.f32 %v12031_v49, %v3321_v36  ;;  %v7871_v38 = vpop.f32.mrb[30].mxu1  ;;  %v14528_v36 = vld [vmem:[#allocation83_spill] sm:$0xff]  ;;  %v8960_v45 = vpack.i.bf16 %v3563_v58, %v3562_v40  ;;  %v14539_v40 = vld [vmem:[#allocation9_spill] sm:$0xff] }
 0x897   :  { %8946 = vrot.lane.b32.xlu1 %v8945_v23, %s9560_s0  ;;  %v3333_v34 = vadd.f32 %v7871_v38, %v12031_v49  ;;  %v3324_v16 = vpop.f32.mrb[31].mxu1  ;;  %v2231_v14 = vsel %vm718_vm4, %v14528_v36, %v12026_v11  ;;  %v8950_v38 = vpack.i.bf16 %v3541_v54, %v3540_v9  ;;  %v14538_v9 = vld [vmem:[#allocation42_spill] sm:$0xff] }
 0x898   :  { %v12140_v35 = vadd.f32 %v3322_v15, %v2228_v43  ;;  %8956 = vrot.lane.b32.xlu0 %v8955_v21, %s9566_s5  ;;  %v3325_v18 = vadd.f32 %v12031_v49, %v3324_v16  ;;  %v14535_v15 = vld [vmem:[#allocation44_spill] sm:$0xff]  ;;  %v12156_v21 = vadd.f32 %v3330_v10, %v2230_v28  ;;  %v14540_v10 = vld [vmem:[#allocation11_spill] sm:$0xff] }
 0x899   :  { %v12146_v23 = vadd.f32 %v3333_v34, %v2231_v14  ;;  %v3579_v43 = vmul.f32 %v12082_v42, %v14535_v15  ;;  %v9341_v34 = vld [vmem:[#allocation2 + $0x90] sm:$0xff]   ;;  %v3507_v36 = vmul.f32 %v12053_v0, %v14540_v10 }
 0x89a   :  { %14530 = vst [vmem:[#allocation82_spill] sm:$0xff] %v12140_v35  ;;  %v12150_v7 = vmax.f32 %v12140_v35, 0.0  ;;  %v12152_v11 = vadd.f32 %v3325_v18, %v2229_v8  ;;  %14536 = vst [vmem:[#allocation84_spill] sm:$0xff] %v12156_v21  ;;  %v3572_v8 = vmul.f32 %v12058_v44, %v14537_v25  ;;  %7882 = vmatprep.subr.bf16.mxu0 %v9341_v34  ;;  %v14565_v25 = vld [vmem:[#allocation63_spill] sm:$0xff] }
 0x89b   :  { %14532 = vst [vmem:[#allocation13_spill] sm:$0xff] %v12146_v23  ;;  %v12159_v49 = vmax.f32 %v12146_v23, 0.0  ;;  %8951 = vrot.lane.b32.xlu1 %v8950_v38, %s9563_s19  ;;  %v3348_v60 = vpack.c.bf16 %v12146_v23, %v12156_v21  ;;  %v8965_v27 = vpack.i.bf16 %v3579_v43, %v3578_v2  ;;  %v12183_v38 = vmax.f32 %v12156_v21, 0.0  ;;  %v14542_v23 = vld [vmem:[#allocation46_spill] sm:$0xff]  ;;  %7883 = vmatpush3.bf16.msra.mxu0 %v9341_v34  ;;  %v14543_v43 = vld [vmem:[#allocation59_spill] sm:$0xff] }
 0x89c   :  { %14534 = vst [vmem:[#allocation83_spill] sm:$0xff] %v12152_v11  ;;  %v3347_v16 = vpack.c.bf16 %v12152_v11, %v12140_v35  ;;  %8961 = vrot.lane.b32.xlu0 %v8960_v45, %s9567_s6  ;;  %v3573_v54 = vmul.f32 %v12150_v7, %v14538_v9  ;;  %v12176_v14 = vmax.f32 %v12152_v11, 0.0  ;;  %v3511_v28 = vmul.f32 %v12150_v7, %v14541_v46  ;;  %v14547_v34 = vld [vmem:[#allocation66_spill] sm:$0xff] }
 0x89d   :  { %v3506_v58 = vmul.f32 %v12159_v49, %v14539_v40  ;;  %v3510_v11 = vmul.f32 %v12058_v44, %v14542_v23  ;;  %v3518_v21 = vrot.slane %v12150_v7, 1  ;;  %v3489_v51 = vrot.slane %v12159_v49, 7  ;;  %v14554_v40 = vld [vmem:[#allocation32_spill] sm:$0xff] }
 0x89e   :  { %7878 = vmatprep.mubr.msk.bf16.mxu0 %vm736_vm6, %v3347_v16  ;;  %v8970_v18 = vpack.i.bf16 %v3573_v54, %v3572_v8  ;;  %v3551_v16 = vmul.f32 %v12176_v14, %v14543_v43  ;;  %v14544_v8 = vld [vmem:[#allocation35_spill] sm:$0xff] }
 0x89f   :  { %7879 = vmatmul.mubr.msk.bf16.gmra.mrb[28].mxu0 %vm736_vm6, %v3348_v60  ;;  %v8980_v45 = vpack.i.bf16 %v3507_v36, %v3506_v58  ;;  %v8975_v2 = vpack.i.bf16 %v3511_v28, %v3510_v11  ;;  %v3553_v54 = vmul.f32 %v12159_v49, %v14544_v8  ;;  %v3521_v60 = vrot.slane %v12159_v49, 1  ;;  %v14545_v58 = vld [vmem:[#allocation33_spill] sm:$0xff]  ;;  %v9342_v28 = vld [vmem:[#allocation2 + $0x98] sm:$0xff]  }
 0x8a0   :  { %8966 = vrot.lane.b32.xlu0 %v8965_v27, %s9543_s25  ;;  %8971 = vrot.lane.b32.xlu1 %v8970_v18, %s9565_s30  ;;  %v3550_v36 = vmul.f32 %v12150_v7, %v14545_v58  ;;  %v14546_v27 = vld [vmem:[#allocation60_spill] sm:$0xff]  ;;  %v3574_v18 = vmul.f32 %v12176_v14, %v14547_v34  ;;  %v14548_v43 = vld [vmem:[#allocation15_spill] sm:$0xff] }
 0x8a1   :  { %v3552_v11 = vmul.f32 %v12183_v38, %v14546_v27  ;;  %v3512_v55 = vmul.f32 %v12176_v14, %v14548_v43  ;;  %v12212_v58 = vsel %vm164_vm0, %v3521_v60, %v14550_v61  ;;  %v14551_v27 = vrot.slane %v12058_v44, 1  ;;  %7884 = vmatprep.subr.bf16.mxu0 %v9342_v28  ;;  %v14553_v61 = vld [vmem:[#allocation17_spill] sm:$0xff] }
 0x8a2   :  { %v8995_v35 = vpack.i.bf16 %v3551_v16, %v3550_v36  ;;  %v14552_v36 = vld [vmem:[#allocation52_spill] sm:$0xff]  ;;  %7885 = vmatpush3.bf16.msra.mxu0 %v9342_v28  ;;  %v3530_v46 = vmul.f32 %v12212_v58, %v14553_v61  ;;  %v14557_v28 = vld [vmem:[#allocation14_spill] sm:$0xff]  ;;  %v3520_v61 = vrot.slane %v12183_v38, 1 }
 0x8a3   :  { %v8985_v8 = vpack.i.bf16 %v3553_v54, %v3552_v11  ;;  %v3525_v16 = vsel %vm164_vm0, %v14551_v27, %v3518_v21  ;;  %v3486_v54 = vrot.slane %v12150_v7, 7  ;;  %v3513_v11 = vmul.f32 %v12183_v38, %v14552_v36  ;;  %v14559_v36 = vld [vmem:[#allocation18_spill] sm:$0xff] }
 0x8a4   :  { %8981 = vrot.lane.b32.xlu0 %v8980_v45, %s9556_s27  ;;  %8976 = vrot.lane.b32.xlu1 %v8975_v2, %s9556_s27  ;;  %v14549_v45 = vld [vmem:[#allocation51_spill] sm:$0xff]  ;;  %v3557_v9 = vmul.f32 %v3525_v16, %v14554_v40  ;;  %v14555_v27 = vrot.slane %v12053_v0, 7 }
 0x8a5   :  { %v3575_v2 = vmul.f32 %v12183_v38, %v14549_v45  ;;  %v8990_v34 = vpack.i.bf16 %v3513_v11, %v3512_v55  ;;  %v9343_v55 = vld [vmem:[#allocation2 + $0xa0] sm:$0xff]   ;;  %v14558_v11 = vld [vmem:[#allocation30_spill] sm:$0xff]  ;;  %v14560_v45 = vld [vmem:[#allocation43_spill] sm:$0xff] }
 0x8a6   :  { %v12230_v7 = vsel %vm59_vm1, %v3489_v51, %v14555_v27  ;;  %v3556_v27 = vmul.f32 %v12082_v42, %v14558_v11  ;;  %7886 = vmatprep.subr.bf16.mxu0 %v9343_v55  ;;  %v3522_v42 = vsel %vm164_vm0, %v3520_v61, %v3521_v60  ;;  %v14564_v11 = vld [vmem:[#allocation62_spill] sm:$0xff]  ;;  %v3561_v60 = vmul.f32 %v12212_v58, %v14565_v25 }
 0x8a7   :  { %v9000_v43 = vpack.i.bf16 %v3575_v2, %v3574_v18  ;;  %v3519_v18 = vrot.slane %v12176_v14, 1  ;;  %v3531_v2 = vmul.f32 %v12092_v59, %v14557_v28  ;;  %7887 = vmatpush3.bf16.msra.mxu0 %v9343_v55  ;;  %v3488_v55 = vrot.slane %v12183_v38, 7 }
 0x8a8   :  { %8996 = vrot.lane.b32.xlu0 %v8995_v35, %s9564_s20  ;;  %8986 = vrot.lane.b32.xlu1 %v8985_v8, %s9564_s20  ;;  %v14556_v35 = vrot.slane %v12058_v44, 7  ;;  %v3538_v44 = vmul.f32 %v12230_v7, %v14559_v36  ;;  %v9005_v40 = vpack.i.bf16 %v3557_v9, %v3556_v27  ;;  %v9345_v27 = vld [vmem:[#allocation2 + $0xb0] ss:$0 sps:$4 sm:$0xff]  }
 0x8a9   :  { %v3524_v28 = vsel %vm164_vm0, %v3518_v21, %v3519_v18  ;;  %v3560_v21 = vmul.f32 %v3522_v42, %v14564_v11  ;;  %v14568_v11 = vld [vmem:[#allocation65_spill] sm:$0xff] }
 0x8aa   :  { %v12236_v8 = vsel %vm59_vm1, %v14556_v35, %v3486_v54  ;;  %v9015_v35 = vpack.i.bf16 %v3531_v2, %v3530_v46  ;;  %v14562_v46 = vld [vmem:[#allocation36_spill] sm:$0xff] }
 0x8ab   :  { %v3565_v23 = vmul.f32 %v12236_v8, %v14560_v45  ;;  %v3564_v9 = vmul.f32 %v12107_v50, %v14562_v46  ;;  %v14563_v45 = vld [vmem:[#allocation50_spill] sm:$0xff]  ;;  %v14570_v46 = vld [vmem:[#allocation21_spill] sm:$0xff] }
 0x8ac   :  { %9001 = vrot.lane.b32.xlu0 %v9000_v43, %s9565_s30  ;;  %8991 = vrot.lane.b32.xlu1 %v8990_v34, %s9556_s27  ;;  %v9344_v43 = vld [vmem:[#allocation2 + $0xa8] sm:$0xff]   ;;  %v3534_v48 = vmul.f32 %v3525_v16, %v14570_v46 }
 0x8ad   :  { %v14561_v34 = vld [vmem:[#allocation25_spill] sm:$0xff]  ;;  %7888 = vmatprep.subr.bf16.mxu0 %v9344_v43  ;;  %v9010_v36 = vpack.i.bf16 %v3565_v23, %v3564_v9  ;;  %v14566_v23 = vld [vmem:[#allocation48_spill] sm:$0xff] }
 0x8ae   :  { %v3539_v10 = vmul.f32 %v12118_v63, %v14561_v34  ;;  %v3581_v34 = vmul.f32 %v3524_v28, %v14563_v45  ;;  %7889 = vmatpush3.bf16.msra.mxu0 %v9344_v43  ;;  %v3580_v38 = vmul.f32 %v3525_v16, %v14566_v23  ;;  %v9025_v43 = vpack.i.bf16 %v3561_v60, %v3560_v21  ;;  %v14569_v45 = vld [vmem:[#allocation47_spill] sm:$0xff] }
 0x8af   :  { %8062 = vmatprep.subr.msk.bf16.mxu0 %vm3267_vm3, %v9345_v27  ;;  %v14571_v21 = vld [vmem:[#allocation27_spill] sm:$0xff] }
 0x8b0   :  { %9016 = vrot.lane.b32.xlu0 %v9015_v35, %s9560_s0  ;;  %9006 = vrot.lane.b32.xlu1 %v9005_v40, %s9566_s5  ;;  %v9020_v2 = vpack.i.bf16 %v3539_v10, %v3538_v44  ;;  %v12267_v40 = vsel %vm59_vm1, %v3488_v55, %v3489_v51  ;;  %v3487_v35 = vrot.slane %v12176_v14, 7  ;;  %v3964_v10 = vsel %vm3267_vm3, %v9345_v27, 0  ;;  %v14567_v44 = vld [vmem:[#allocation54_spill] sm:$0xff] }
 0x8b1   :  { %v3535_v9 = vmul.f32 %v3524_v28, %v14567_v44  ;;  %v9035_v25 = vpack.i.bf16 %v3581_v34, %v3580_v38  ;;  %v3568_v51 = vmul.f32 %v12267_v40, %v14568_v11  ;;  %v3569_v14 = vmul.f32 %v12230_v7, %v14569_v45  ;;  %v14572_v38 = vld [vmem:[#allocation55_spill] sm:$0xff]  ;;  %v14578_v45 = vld [vmem:[#allocation58_spill] sm:$0xff] }
 0x8b2   :  { %7891 = vmatpush3.bf16.msra.mxu0 %v3964_v10  ;;  %v14573_v11 = vld [vmem:[#allocation23_spill] sm:$0xff] }
 0x8b3   :  { %v9040_v34 = vpack.i.bf16 %v3535_v9, %v3534_v48  ;;  %v9030_v27 = vpack.i.bf16 %v3569_v14, %v3568_v51  ;;  %v3537_v16 = vmul.f32 %v3522_v42, %v14573_v11  ;;  %v14575_v48 = vld [vmem:[#allocation61_spill] sm:$0xff]  ;;  %v14576_v9 = vld [vmem:[#allocation39_spill] sm:$0xff] }
 0x8b4   :  { %9021 = vrot.lane.b32.xlu0 %v9020_v2, %s9563_s19  ;;  %9011 = vrot.lane.b32.xlu1 %v9010_v36, %s9567_s6  ;;  %v12283_v2 = vsel %vm59_vm1, %v3486_v54, %v3487_v35  ;;  %v3523_v36 = vsel %vm164_vm0, %v3519_v18, %v3520_v61  ;;  %v12295_v54 = vsel %vm59_vm1, %v3487_v35, %v3488_v55 }
 0x8b5   :  { %v3543_v60 = vmul.f32 %v12283_v2, %v14571_v21  ;;  %v3536_v10 = vmul.f32 %v3523_v36, %v14572_v38  ;;  %v3558_v18 = vmul.f32 %v3524_v28, %v14575_v48  ;;  %v14577_v38 = vld [vmem:[#allocation57_spill] sm:$0xff]  ;;  %v3545_v55 = vmul.f32 %v12267_v40, %v14578_v45  ;;  %v14579_v28 = vld [vmem:[#allocation64_spill] sm:$0xff] }
 0x8b6   :  { %v3544_v11 = vmul.f32 %v12295_v54, %v14577_v38  ;;  %v3566_v35 = vmul.f32 %v12283_v2, %v14498_v52  ;;  %v3567_v21 = vmul.f32 %v12295_v54, %v14579_v28  ;;  %v3501_v45 = vmul.f32 %v12111_v62, %v14506_v26  ;;  %v14581_v52 = vld [vmem:[#allocation71_spill] sm:$0xff] }
 0x8b7   :  { %v9045_v14 = vpack.i.bf16 %v3537_v16, %v3536_v10  ;;  %v14580_v10 = vld [vmem:[#allocation70_spill] sm:$0xff]  ;;  %v3498_v28 = vmul.f32 %v12267_v40, %v14507_v30 }
 0x8b8   :  { %9036 = vrot.lane.b32.xlu0 %v9035_v25, %s9543_s25  ;;  %9026 = vrot.lane.b32.xlu1 %v9025_v43, %s9566_s5  ;;  %v14574_v25 = vld [vmem:[#allocation56_spill] sm:$0xff]  ;;  %v3559_v43 = vmul.f32 %v3523_v36, %v14576_v9  ;;  %v3577_v16 = vmul.f32 %v12053_v0, %v14580_v10 }
 0x8b9   :  { %v3542_v61 = vmul.f32 %v12236_v8, %v14574_v25 }
 0x8bb   :  { %v9050_v51 = vpack.i.bf16 %v3543_v60, %v3542_v61  ;;  %v3576_v60 = vmul.f32 %v12159_v49, %v14500_v53  ;;  %v3582_v61 = vmul.f32 %v3523_v36, %v14501_v19  ;;  %v3585_v49 = vmul.f32 %v12092_v59, %v14504_v22 }
 0x8bc   :  { %9041 = vrot.lane.b32.xlu0 %v9040_v34, %s9560_s0  ;;  %9031 = vrot.lane.b32.xlu1 %v9030_v27, %s9567_s6  ;;  %v9065_v34 = vpack.i.bf16 %v3559_v43, %v3558_v18  ;;  %v9055_v27 = vpack.i.bf16 %v3545_v55, %v3544_v11  ;;  %v3583_v18 = vmul.f32 %v3522_v42, %v14502_v4 }
 0x8bd   :  { %v3584_v11 = vmul.f32 %v12212_v58, %v14503_v39 }
 0x8be   :  { %v9075_v43 = vpack.i.bf16 %v3583_v18, %v3582_v61 }
 0x8bf   :  { %v9080_v55 = vpack.i.bf16 %v3585_v49, %v3584_v11 }
 0x8c0   :  { %9051 = vrot.lane.b32.xlu0 %v9050_v51, %s9563_s19  ;;  %9046 = vrot.lane.b32.xlu1 %v9045_v14, %s9560_s0  ;;  %v9070_v51 = vpack.i.bf16 %v3567_v21, %v3566_v35  ;;  %v9060_v14 = vpack.i.bf16 %v3577_v16, %v3576_v60 }
 0x8c4   :  { %9066 = vrot.lane.b32.xlu0 %v9065_v34, %s9566_s5  ;;  %9056 = vrot.lane.b32.xlu1 %v9055_v27, %s9563_s19 }
 0x8c8   :  { %9071 = vrot.lane.b32.xlu0 %v9070_v51, %s9567_s6  ;;  %9061 = vrot.lane.b32.xlu1 %v9060_v14, %s9565_s30 }
 0x8cc   :  { %9076 = vrot.lane.b32.xlu0 %v9075_v43, %s9543_s25  ;;  %9081 = vrot.lane.b32.xlu1 %v9080_v55, %s9543_s25  ;;  %v3500_v55 = vmul.f32 %v12118_v63, %v14505_v3 }
 0x901   :  { %v8927_v0 = vpop.permute.xlu1 %8926 }
 0x902   :  { %v12329_v36 = vpop.permute.xlu0 %8936  ;;  %v8929_v44 = vunpack.i.h.bf16 %v8927_v0 }
 0x903   :  { %v8939_v62 = vunpack.i.h.bf16 %v12329_v36 }
 0x905   :  { %v8932_v42 = vpop.permute.xlu1 %8931 }
 0x906   :  { %v12331_v21 = vpop.permute.xlu0 %8941  ;;  %v8934_v18 = vunpack.i.h.bf16 %v8932_v42  ;;  %v8933_v11 = vunpack.i.l.bf16 %v8932_v42  ;;  %v3499_v42 = vmul.f32 %v12230_v7, %v14581_v52 }
 0x908   :  { %v3844_v46 = vsel %vm736_vm6, %v3500_v55, %v8933_v11  ;;  %v3845_v63 = vsel %vm736_vm6, %v3501_v45, %v8934_v18  ;;  %v8944_v11 = vunpack.i.h.bf16 %v12331_v21  ;;  %v8943_v45 = vunpack.i.l.bf16 %v12331_v21 }
 0x909   :  { %v8947_v58 = vpop.permute.xlu1 %8946 }
 0x90a   :  { %v12333_v35 = vpop.permute.xlu0 %8956  ;;  %v8949_v49 = vunpack.i.h.bf16 %v8947_v58  ;;  %v8948_v43 = vunpack.i.l.bf16 %v8947_v58  ;;  %v8928_v58 = vunpack.i.l.bf16 %v8927_v0 }
 0x90b   :  { %v8959_v18 = vunpack.i.h.bf16 %v12333_v35 }
 0x90c   :  { %v3852_v26 = vsel %vm772_vm10, %v3844_v46, %v8948_v43  ;;  %v3853_v3 = vsel %vm772_vm10, %v3845_v63, %v8949_v49 }
 0x90d   :  { %v8952_v34 = vpop.permute.xlu1 %8951 }
 0x90e   :  { %v12335_v27 = vpop.permute.xlu0 %8961  ;;  %v8954_v38 = vunpack.i.h.bf16 %v8952_v34  ;;  %v8953_v53 = vunpack.i.l.bf16 %v8952_v34  ;;  %v8938_v34 = vunpack.i.l.bf16 %v12329_v36  ;;  %v8958_v36 = vunpack.i.l.bf16 %v12333_v35 }
 0x910   :  { %v3860_v9 = vsel %vm1956_vm14, %v3852_v26, %v8953_v53  ;;  %v3861_v40 = vsel %vm1956_vm14, %v3853_v3, %v8954_v38  ;;  %v8964_v53 = vunpack.i.h.bf16 %v12335_v27  ;;  %v8963_v3 = vunpack.i.l.bf16 %v12335_v27 }
 0x911   :  { %v3868_v26 = vsel %vm1974_vm2, %v3860_v9, %v8928_v58  ;;  %v3869_v38 = vsel %vm1974_vm2, %v3861_v40, %v8929_v44 }
 0x912   :  { %v12337_v60 = vpop.permute.xlu0 %8966  ;;  %v12339_v59 = vpop.permute.xlu1 %8971 }
 0x913   :  { %v8973_v21 = vunpack.i.l.bf16 %v12339_v59 }
 0x916   :  { %v8982_v16 = vpop.permute.xlu0 %8981  ;;  %v12341_v61 = vpop.permute.xlu1 %8976 }
 0x917   :  { %v8984_v30 = vunpack.i.h.bf16 %v8982_v16  ;;  %v8983_v7 = vunpack.i.l.bf16 %v8982_v16  ;;  %v8974_v16 = vunpack.i.h.bf16 %v12339_v59 }
 0x919   :  { %v3843_v63 = vsel %vm736_vm6, %v3499_v42, %v8984_v30  ;;  %v3842_v35 = vsel %vm736_vm6, %v3498_v28, %v8983_v7 }
 0x91a   :  { %v12343_v51 = vpop.permute.xlu0 %8996  ;;  %v12345_v14 = vpop.permute.xlu1 %8986 }
 0x91e   :  { %v12351_v10 = vpop.permute.xlu0 %9001  ;;  %v12353_v25 = vpop.permute.xlu1 %8991 }
 0x922   :  { %v9017_v52 = vpop.permute.xlu0 %9016  ;;  %v9007_v0 = vpop.permute.xlu1 %9006 }
 0x923   :  { %v9019_v55 = vunpack.i.h.bf16 %v9017_v52  ;;  %v9018_v46 = vunpack.i.l.bf16 %v9017_v52  ;;  %v9009_v43 = vunpack.i.h.bf16 %v9007_v0  ;;  %v9008_v49 = vunpack.i.l.bf16 %v9007_v0 }
 0x925   :  { %v3850_v27 = vsel %vm772_vm10, %v3842_v35, %v9018_v46  ;;  %v3851_v9 = vsel %vm772_vm10, %v3843_v63, %v9019_v55  ;;  %v3876_v44 = vsel %vm3173_vm7, %v3868_v26, %v9008_v49  ;;  %v3877_v58 = vsel %vm3173_vm7, %v3869_v38, %v9009_v43 }
 0x926   :  { %v9022_v48 = vpop.permute.xlu0 %9021  ;;  %v9012_v52 = vpop.permute.xlu1 %9011 }
 0x927   :  { %v9024_v39 = vunpack.i.h.bf16 %v9022_v48  ;;  %v9023_v0 = vunpack.i.l.bf16 %v9022_v48  ;;  %v9014_v4 = vunpack.i.h.bf16 %v9012_v52  ;;  %v9013_v19 = vunpack.i.l.bf16 %v9012_v52 }
 0x929   :  { %v3859_v59 = vsel %vm1956_vm14, %v3851_v9, %v9024_v39  ;;  %v3858_v30 = vsel %vm1956_vm14, %v3850_v27, %v9023_v0  ;;  %v3884_v28 = vsel %vm3182_vm8, %v3876_v44, %v9013_v19  ;;  %v3885_v42 = vsel %vm3182_vm8, %v3877_v58, %v9014_v4 }
 0x92a   :  { %v3867_v48 = vsel %vm1974_vm2, %v3859_v59, %v8939_v62  ;;  %v3866_v40 = vsel %vm1974_vm2, %v3858_v30, %v8938_v34  ;;  %v3893_v7 = vsel %vm3191_vm9, %v3885_v42, %v8974_v16  ;;  %v9037_v46 = vpop.permute.xlu0 %9036  ;;  %v3892_v55 = vsel %vm3191_vm9, %v3884_v28, %v8973_v21  ;;  %v12391_v49 = vpop.permute.xlu1 %9026 }
 0x92b   :  { %v3875_v43 = vsel %vm3173_vm7, %v3867_v48, %v8959_v18  ;;  %v3874_v39 = vsel %vm3173_vm7, %v3866_v40, %v8958_v36  ;;  %v9039_v26 = vunpack.i.h.bf16 %v9037_v46  ;;  %v9038_v38 = vunpack.i.l.bf16 %v9037_v46 }
 0x92c   :  { %v8969_v19 = vunpack.i.h.bf16 %v12337_v60  ;;  %v8968_v4 = vunpack.i.l.bf16 %v12337_v60  ;;  %v3882_v62 = vsel %vm3182_vm8, %v3874_v39, %v8963_v3  ;;  %v3883_v34 = vsel %vm3182_vm8, %v3875_v43, %v8964_v53 }
 0x92d   :  { %v3901_v16 = vsel %vm3200_vm11, %v3893_v7, %v9039_v26  ;;  %v3900_v21 = vsel %vm3200_vm11, %v3892_v55, %v9038_v38  ;;  %v3890_v63 = vsel %vm3191_vm9, %v3882_v62, %v8943_v45  ;;  %v3891_v18 = vsel %vm3191_vm9, %v3883_v34, %v8944_v11 }
 0x92e   :  { %v3916_v35 = vpack.c.bf16 %v3901_v16, %v3900_v21  ;;  %v9042_v36 = vpop.permute.xlu0 %9041  ;;  %v12403_v52 = vpop.permute.xlu1 %9031  ;;  %v3898_v0 = vsel %vm3200_vm11, %v3890_v63, %v8968_v4  ;;  %v3899_v60 = vsel %vm3200_vm11, %v3891_v18, %v8969_v19  ;;  %v8979_v3 = vunpack.i.h.bf16 %v12341_v61 }
 0x92f   :  { %v8978_v53 = vunpack.i.l.bf16 %v12341_v61  ;;  %v3915_v27 = vpack.c.bf16 %v3899_v60, %v3898_v0  ;;  %v3502_v9 = vmul.f32 %v12107_v50, %v10172_v12  ;;  %v3503_v45 = vmul.f32 %v12236_v8, %v10183_v1 }
 0x930   :  { %v9044_v11 = vunpack.i.h.bf16 %v9042_v36  ;;  %v9043_v44 = vunpack.i.l.bf16 %v9042_v36  ;;  %v3504_v58 = vmul.f32 %v12283_v2, %v10177_v31  ;;  %v3505_v59 = vmul.f32 %v12295_v54, %v10185_v57 }
 0x931   :  { %v8994_v30 = vunpack.i.h.bf16 %v12353_v25  ;;  %v8993_v28 = vunpack.i.l.bf16 %v12353_v25  ;;  %7892 = vmatprep.mubr.msk.bf16.mxu0 %vm3254_vm13, %v3915_v27  ;;  %v3847_v50 = vsel %vm736_vm6, %v3503_v45, %v8979_v3  ;;  %v3846_v8 = vsel %vm736_vm6, %v3502_v9, %v8978_v53 }
 0x932   :  { %v9052_v61 = vpop.permute.xlu0 %9051  ;;  %v9047_v42 = vpop.permute.xlu1 %9046  ;;  %7893 = vmatmul.mubr.msk.bf16.vlgmr.msra.gmra.mrb[32].mxu0 %vm3254_vm13, %v3916_v35  ;;  %v8999_v2 = vunpack.i.h.bf16 %v12343_v51  ;;  %v8998_v54 = vunpack.i.l.bf16 %v12343_v51  ;;  %v8989_v25 = vunpack.i.h.bf16 %v12345_v14  ;;  %v8988_v55 = vunpack.i.l.bf16 %v12345_v14 }
 0x933   :  { %v9054_v48 = vunpack.i.h.bf16 %v9052_v61  ;;  %v9053_v40 = vunpack.i.l.bf16 %v9052_v61  ;;  %v9049_v7 = vunpack.i.h.bf16 %v9047_v42  ;;  %v9048_v46 = vunpack.i.l.bf16 %v9047_v42 }
 0x934   :  { %v3855_v43 = vsel %vm772_vm10, %v3847_v50, %v9044_v11  ;;  %v3854_v39 = vsel %vm772_vm10, %v3846_v8, %v9043_v44  ;;  %v3849_v26 = vsel %vm736_vm6, %v3505_v59, %v8994_v30  ;;  %v3848_v38 = vsel %vm736_vm6, %v3504_v58, %v8993_v28 }
 0x935   :  { %v3862_v19 = vsel %vm1956_vm14, %v3854_v39, %v9053_v40  ;;  %v3863_v4 = vsel %vm1956_vm14, %v3855_v43, %v9054_v48  ;;  %v9029_v14 = vunpack.i.h.bf16 %v12391_v49  ;;  %v9028_v18 = vunpack.i.l.bf16 %v12391_v49 }
 0x936   :  { %v9067_v62 = vpop.permute.xlu0 %9066  ;;  %v9057_v51 = vpop.permute.xlu1 %9056  ;;  %v3857_v35 = vsel %vm772_vm10, %v3849_v26, %v9049_v7  ;;  %v3856_v36 = vsel %vm772_vm10, %v3848_v38, %v9048_v46  ;;  %v9034_v0 = vunpack.i.h.bf16 %v12403_v52  ;;  %v9033_v60 = vunpack.i.l.bf16 %v12403_v52 }
 0x937   :  { %v9069_v34 = vunpack.i.h.bf16 %v9067_v62  ;;  %v9068_v16 = vunpack.i.l.bf16 %v9067_v62  ;;  %v9059_v21 = vunpack.i.h.bf16 %v9057_v51  ;;  %v9058_v63 = vunpack.i.l.bf16 %v9057_v51 }
 0x938   :  { %v3870_v27 = vsel %vm1974_vm2, %v3862_v19, %v8998_v54  ;;  %v3871_v9 = vsel %vm1974_vm2, %v3863_v4, %v8999_v2  ;;  %v9004_v54 = vunpack.i.h.bf16 %v12351_v10  ;;  %v9003_v7 = vunpack.i.l.bf16 %v12351_v10 }
 0x939   :  { %v3864_v3 = vsel %vm1956_vm14, %v3856_v36, %v9058_v63  ;;  %v3865_v53 = vsel %vm1956_vm14, %v3857_v35, %v9059_v21  ;;  %v3878_v58 = vsel %vm3173_vm7, %v3870_v27, %v9068_v16  ;;  %v3879_v59 = vsel %vm3173_vm7, %v3871_v9, %v9069_v34  ;;  %v9346_v27 = vld [vmem:[#allocation2 + $0x138] sm:$0xff]   ;;  %v9347_v9 = vld [vmem:[#allocation2 + $0x140] sm:$0xff]  }
 0x93a   :  { %v3872_v45 = vsel %vm1974_vm2, %v3864_v3, %v8988_v55  ;;  %v3873_v49 = vsel %vm1974_vm2, %v3865_v53, %v8989_v25  ;;  %v9072_v11 = vpop.permute.xlu0 %9071  ;;  %v9062_v44 = vpop.permute.xlu1 %9061  ;;  %7900 = vmatprep.subr.bf16.mxu0 %v9346_v27  ;;  %vm4351_vm10 = vcmask 785408  }
 0x93b   :  { %v9074_v30 = vunpack.i.h.bf16 %v9072_v11  ;;  %v9073_v52 = vunpack.i.l.bf16 %v9072_v11  ;;  %v9064_v28 = vunpack.i.h.bf16 %v9062_v44  ;;  %v9063_v61 = vunpack.i.l.bf16 %v9062_v44  ;;  %7901 = vmatpush3.bf16.msra.mxu0 %v9346_v27 }
 0x93c   :  { %v3880_v42 = vsel %vm3173_vm7, %v3872_v45, %v9028_v18  ;;  %v3881_v50 = vsel %vm3173_vm7, %v3873_v49, %v9029_v14  ;;  %7902 = vmatprep.subr.bf16.mxu0 %v9347_v9  ;;  %v12484_v45 = vld [vmem:[%s13919_s3 + $0x8] ss:$0 sm:$0xff] }
 0x93d   :  { %v3886_v8 = vsel %vm3182_vm8, %v3878_v58, %v9073_v52  ;;  %v3887_v48 = vsel %vm3182_vm8, %v3879_v59, %v9074_v30  ;;  %v3888_v40 = vsel %vm3182_vm8, %v3880_v42, %v9033_v60  ;;  %v3889_v2 = vsel %vm3182_vm8, %v3881_v50, %v9034_v0  ;;  %v9348_v58 = vld [vmem:[#allocation2 + $0xf8] sm:$0xff]  }
 0x93e   :  { %v9077_v46 = vpop.permute.xlu0 %9076  ;;  %v9082_v25 = vpop.permute.xlu1 %9081  ;;  %v3896_v38 = vsel %vm3191_vm9, %v3888_v40, %v9063_v61  ;;  %v3897_v19 = vsel %vm3191_vm9, %v3889_v2, %v9064_v28  ;;  %v3894_v4 = vsel %vm3191_vm9, %v3886_v8, %v9003_v7  ;;  %v3895_v62 = vsel %vm3191_vm9, %v3887_v48, %v9004_v54  ;;  %v9349_v59 = vld [vmem:[#allocation2 + $0xb8] sm:$0xff]   ;;  %7473 = vmatprep.subr.bf16.mxu1 %v9348_v58  ;;  %v9350_v40 = vld [vmem:[#allocation2 + $0x100] sm:$0xff]  }
 0x93f   :  { %v9079_v55 = vunpack.i.h.bf16 %v9077_v46  ;;  %v9078_v43 = vunpack.i.l.bf16 %v9077_v46  ;;  %v9084_v39 = vunpack.i.h.bf16 %v9082_v25  ;;  %v9083_v26 = vunpack.i.l.bf16 %v9082_v25  ;;  %7903 = vmatpush3.bf16.msra.mxu0 %v9347_v9  ;;  %7474 = vmatpush3.bf16.msra.mxu1 %v9349_v59  ;;  %v9351_v2 = vld [vmem:[#allocation2 + $0xc0] sm:$0xff]  }
 0x940   :  { %7475 = vmatprep.subr.bf16.mxu1 %v9350_v40 }
 0x941   :  { %v3902_v51 = vsel %vm3200_vm11, %v3894_v4, %v9078_v43  ;;  %v3903_v34 = vsel %vm3200_vm11, %v3895_v62, %v9079_v55  ;;  %v3904_v10 = vsel %vm3200_vm11, %v3896_v38, %v9083_v26  ;;  %v3905_v16 = vsel %vm3200_vm11, %v3897_v19, %v9084_v39 }
 0x942   :  { %v3917_v21 = vpack.c.bf16 %v3903_v34, %v3902_v51  ;;  %v3918_v63 = vpack.c.bf16 %v3905_v16, %v3904_v10  ;;  %v9352_v10 = vld [vmem:[#allocation2 + $0x108] sm:$0xff]  }
 0x943   :  { %7476 = vmatpush3.bf16.msra.mxu1 %v9351_v2  ;;  %v9353_v16 = vld [vmem:[#allocation2 + $0xc8] sm:$0xff]  }
 0x944   :  { %7896 = vmatprep.mubr.msk.bf16.mxu0 %vm3254_vm13, %v3917_v21  ;;  %7477 = vmatprep.subr.bf16.mxu1 %v9352_v10  ;;  %v14582_v10 = vld [vmem:[#allocation41_spill] sm:$0xff] }
 0x945   :  { %7897 = vmatmul.mubr.msk.bf16.gmra.mrb[36].mxu0 %vm3254_vm13, %v3918_v63 }
 0x947   :  { %7478 = vmatpush3.bf16.msra.mxu1 %v9353_v16 }
 0x960   :  { %v12465_v14 = vpop.f32.mrb[24].mxu0 }
 0x961   :  { %v12467_v18 = vpop.f32.mrb[25].mxu0 }
 0x962   :  { %v12469_v35 = vpop.f32.mrb[26].mxu0 }
 0x963   :  { %v12471_v36 = vpop.f32.mrb[27].mxu0 }
 0x972   :  { %v12473_v0 = vpop.f32.mrb[28].mxu0 }
 0x973   :  { %v12475_v60 = vpop.f32.mrb[29].mxu0 }
 0x974   :  { %v12477_v3 = vpop.f32.mrb[30].mxu0 }
 0x975   :  { %v12479_v53 = vpop.f32.mrb[31].mxu0 }
 0xa05   :  { %v7894_v49 = vpop.f32.mrb[32].mxu0 }
 0xa06   :  { %v4009_v11 = vadd.f32 %v7894_v49, %v12484_v45  ;;  %v4000_v44 = vpop.f32.mrb[33].mxu0  ;;  %v9354_v49 = vld [vmem:[#allocation2 + $0x110] sm:$0xff]  }
 0xa07   :  { %v4001_v30 = vadd.f32 %v12484_v45, %v4000_v44  ;;  %v7895_v52 = vpop.f32.mrb[34].mxu0  ;;  %7479 = vmatprep.subr.bf16.mxu1 %v9354_v49 }
 0xa08   :  { %v12488_v28 = vmax.f32 %v4009_v11, 0.0  ;;  %v4012_v61 = vadd.f32 %v7895_v52, %v12484_v45  ;;  %v4003_v42 = vpop.f32.mrb[35].mxu0 }
 0xa09   :  { %v4004_v50 = vadd.f32 %v12484_v45, %v4003_v42  ;;  %v12492_v8 = vmax.f32 %v4001_v30, 0.0 }
 0xa0a   :  { %v12494_v48 = vmax.f32 %v4012_v61, 0.0  ;;  %v4041_v54 = vrot.slane %v12488_v28, 7  ;;  %v4073_v7 = vrot.slane %v12488_v28, 1  ;;  %v4128_v43 = vmul.f32 %v12488_v28, %v14518_v56 }
 0xa0b   :  { %v12498_v46 = vmax.f32 %v4004_v50, 0.0  ;;  %v4066_v39 = vmul.f32 %v12488_v28, %v14381_v24  ;;  %v14131_v62 = vrot.slane %v12492_v8, 1  ;;  %v14130_v42 = vrot.slane %v12492_v8, 7 }
 0xa0c   :  { %v14132_v25 = vrot.slane %v12494_v48, 7  ;;  %v14133_v55 = vrot.slane %v12494_v48, 1 }
 0xa0d   :  { %v4040_v26 = vrot.slane %v12498_v46, 7  ;;  %v4072_v38 = vrot.slane %v12498_v46, 1  ;;  %v4127_v19 = vmul.f32 %v12498_v46, %v14517_v41  ;;  %v4065_v4 = vmul.f32 %v12498_v46, %v9727_v17 }
 0xa0e   :  { %v4083_v51 = vsel %vm164_vm0, %v4073_v7, %v14133_v55  ;;  %v12521_v34 = vsel %vm59_vm1, %v4041_v54, %v14132_v25  ;;  %v14589_v25 = vld [vmem:[#allocation25_spill] sm:$0xff] }
 0xa0f   :  { %v9085_v21 = vpack.i.bf16 %v4128_v43, %v4127_v19  ;;  %v9090_v63 = vpack.i.bf16 %v4066_v39, %v4065_v4  ;;  %v4084_v27 = vsel %vm164_vm0, %v4072_v38, %v4073_v7  ;;  %v4136_v9 = vmul.f32 %v4083_v51, %v14535_v15  ;;  %v9355_v43 = vld [vmem:[#allocation2 + $0xd0] sm:$0xff]   ;;  %v9356_v19 = vld [vmem:[#allocation2 + $0x118] sm:$0xff]  }
 0xa10   :  { %v4135_v11 = vmul.f32 %v4084_v27, %v14533_v6  ;;  %v4089_v44 = vmul.f32 %v4084_v27, %v14519_v20  ;;  %v4090_v58 = vmul.f32 %v4083_v51, %v14520_v47  ;;  %v4085_v59 = vsel %vm164_vm0, %v14131_v62, %v4072_v38  ;;  %7480 = vmatpush3.bf16.msra.mxu1 %v9355_v43 }
 0xa11   :  { %9086 = vrot.lane.b32.xlu0 %v9085_v21, %s9568_s11  ;;  %9091 = vrot.lane.b32.xlu1 %v9090_v63, %s9564_s20  ;;  %v4111_v30 = vmul.f32 %v4085_v59, %v14521_v5  ;;  %v4112_v52 = vmul.f32 %v4084_v27, %v14522_v29  ;;  %v12539_v61 = vsel %vm59_vm1, %v4040_v26, %v4041_v54  ;;  %v9357_v63 = vld [vmem:[#allocation2 + $0xd8] sm:$0xff]   ;;  %v9358_v27 = vld [vmem:[#allocation2 + $0x120] sm:$0xff]  }
 0xa12   :  { %v4422_v50 = vpack.c.bf16 %v4136_v9, %v4135_v11  ;;  %v9105_v40 = vpack.i.bf16 %v4090_v58, %v4089_v44  ;;  %v4097_v2 = vmul.f32 %v12539_v61, %v14523_v37  ;;  %v4098_v7 = vmul.f32 %v12521_v34, %v14524_v13  ;;  %7481 = vmatprep.subr.bf16.mxu1 %v9356_v19  ;;  %v14583_v11 = vld [vmem:[#allocation40_spill] sm:$0xff]  ;;  %v14602_v29 = vld [vmem:[#allocation43_spill] sm:$0xff] }
 0xa13   :  { %v9095_v39 = vpack.i.bf16 %v4112_v52, %v4111_v30  ;;  %v12550_v38 = vsel %vm59_vm1, %v14130_v42, %v4040_v26  ;;  %v4120_v54 = vmul.f32 %v12539_v61, %v14526_v33  ;;  %v4129_v44 = vmul.f32 %v12494_v48, %v14583_v11  ;;  %v14584_v52 = vld [vmem:[#allocation11_spill] sm:$0xff]  ;;  %v14588_v42 = vld [vmem:[#allocation36_spill] sm:$0xff] }
 0xa14   :  { %7904 = vmatprep.mubr.msk.bf16.mxu0 %vm1974_vm2, %v4422_v50  ;;  %v9110_v4 = vpack.i.bf16 %v4098_v7, %v4097_v2  ;;  %v4119_v21 = vmul.f32 %v12550_v38, %v14582_v10  ;;  %v4064_v50 = vmul.f32 %v12492_v8, %v14584_v52  ;;  %7482 = vmatpush3.bf16.msra.mxu1 %v9357_v63  ;;  %v14590_v63 = vld [vmem:[#allocation51_spill] sm:$0xff]  ;;  %v14594_v37 = vrot.slane %v12494_v48, 1  ;;  %v9361_v52 = vld [vmem:[#allocation2 + $0xe8] sm:$0xff]   ;;  %v9362_v10 = vld [vmem:[#allocation2 + $0x130] sm:$0xff]  }
 0xa15   :  { %9106 = vrot.lane.b32.xlu1 %v9105_v40, %s9543_s25  ;;  %9096 = vrot.lane.b32.xlu0 %v9095_v39, %s9564_s20  ;;  %v14585_v40 = vld [vmem:[#allocation46_spill] sm:$0xff]  ;;  %v12581_v62 = vmul.f32 %v12521_v34, %v14588_v42  ;;  %v14595_v42 = vrot.slane %v12494_v48, 7  ;;  %v14601_v5 = vld [vmem:[#allocation72_spill] sm:$0xff] }
 0xa16   :  { %v9100_v16 = vpack.i.bf16 %v4120_v54, %v4119_v21  ;;  %v12569_v2 = vmul.f32 %v12494_v48, %v14585_v40  ;;  %v14586_v54 = vld [vmem:[#allocation30_spill] sm:$0xff]  ;;  %7483 = vmatprep.subr.bf16.mxu1 %v9358_v27 }
 0xa17   :  { %v4113_v19 = vmul.f32 %v4083_v51, %v14586_v54  ;;  %v14593_v54 = vld [vmem:[#allocation12_spill] sm:$0xff] }
 0xa18   :  { %v7898_v26 = vpop.f32.mrb[36].mxu0 }
 0xa19   :  { %v4025_v9 = vadd.f32 %v7898_v26, %v12484_v45  ;;  %v4016_v49 = vpop.f32.mrb[37].mxu0  ;;  %9111 = vrot.lane.b32.xlu1 %v9110_v4, %s9568_s11  ;;  %9101 = vrot.lane.b32.xlu0 %v9100_v16, %s9543_s25  ;;  %v14587_v4 = vld [vmem:[#allocation14_spill] sm:$0xff]  ;;  %v9359_v16 = vld [vmem:[#allocation2 + $0xe0] sm:$0xff]  }
 0xa1a   :  { %v4017_v58 = vadd.f32 %v12484_v45, %v4016_v49  ;;  %v7899_v30 = vpop.f32.mrb[38].mxu0  ;;  %v4088_v21 = vmul.f32 %v4085_v59, %v14587_v4  ;;  %v14591_v4 = vld [vmem:[#allocation42_spill] sm:$0xff]  ;;  %7484 = vmatpush3.bf16.msra.mxu1 %v9359_v16 }
 0xa1b   :  { %v12571_v7 = vmax.f32 %v4025_v9, 0.0  ;;  %v4028_v43 = vadd.f32 %v7899_v30, %v12484_v45  ;;  %v4019_v39 = vpop.f32.mrb[39].mxu0  ;;  %v12585_v9 = vmul.f32 %v12550_v38, %v14589_v25  ;;  %v9360_v30 = vld [vmem:[#allocation2 + $0x128] sm:$0xff]  }
 0xa1c   :  { %v12576_v26 = vmax.f32 %v4017_v58, 0.0  ;;  %v4020_v49 = vadd.f32 %v12484_v45, %v4019_v39  ;;  %v12595_v45 = vmul.f32 %v4085_v59, %v14504_v22  ;;  %7485 = vmatprep.subr.bf16.mxu1 %v9360_v30 }
 0xa1d   :  { %v4077_v51 = vrot.slane %v12571_v7, 1  ;;  %v12588_v55 = vmax.f32 %v4028_v43, 0.0  ;;  %v12592_v58 = vmul.f32 %v12571_v7, %v14590_v63  ;;  %v14592_v43 = vld [vmem:[#allocation9_spill] sm:$0xff] }
 0xa1e   :  { %v4075_v39 = vrot.slane %v12576_v26, 1  ;;  %v12598_v40 = vmax.f32 %v4020_v49, 0.0  ;;  %v4130_v25 = vmul.f32 %v12576_v26, %v14591_v4  ;;  %v4043_v27 = vrot.slane %v12576_v26, 7  ;;  %7486 = vmatpush3.bf16.msra.mxu1 %v9361_v52  ;;  %v14609_v52 = vld [vmem:[#allocation61_spill] sm:$0xff] }
 0xa1f   :  { %v4063_v13 = vmul.f32 %v12588_v55, %v14592_v43  ;;  %v4078_v63 = vrot.slane %v12588_v55, 1  ;;  %v12609_v59 = vmul.f32 %v12576_v26, %v14593_v54  ;;  %v14596_v54 = vld [vmem:[#allocation32_spill] sm:$0xff]  ;;  %7487 = vmatprep.subr.bf16.mxu1 %v9362_v10 }
 0xa20   :  { %v4076_v49 = vrot.slane %v12598_v40, 1  ;;  %v9115_v22 = vpack.i.bf16 %v4130_v25, %v4129_v44  ;;  %v4082_v47 = vsel %vm164_vm0, %v14594_v37, %v4075_v39  ;;  %v12620_v20 = vsel %vm59_vm1, %v14595_v42, %v4043_v27  ;;  %v14598_v42 = vld [vmem:[#allocation17_spill] sm:$0xff] }
 0xa21   :  { %v9120_v43 = vpack.i.bf16 %v4064_v50, %v4063_v13  ;;  %v4114_v33 = vmul.f32 %v4082_v47, %v14596_v54  ;;  %v4137_v16 = vmul.f32 %v4082_v47, %v14566_v23  ;;  %v14597_v25 = vrot.slane %v12492_v8, 1  ;;  %v14599_v54 = vld [vmem:[#allocation50_spill] sm:$0xff] }
 0xa22   :  { %v4081_v37 = vsel %vm164_vm0, %v4075_v39, %v4076_v49  ;;  %9116 = vrot.lane.b32.xlu0 %v9115_v22, %s9568_s11  ;;  %v4079_v13 = vsel %vm164_vm0, %v4077_v51, %v4078_v63  ;;  %v4080_v50 = vsel %vm164_vm0, %v4076_v49, %v4077_v51  ;;  %v4122_v22 = vmul.f32 %v12620_v20, %v14602_v29 }
 0xa23   :  { %v4086_v44 = vsel %vm164_vm0, %v4078_v63, %v14597_v25  ;;  %9121 = vrot.lane.b32.xlu1 %v9120_v43, %s9564_s20  ;;  %v9125_v30 = vpack.i.bf16 %v4114_v33, %v4113_v19  ;;  %v4138_v23 = vmul.f32 %v4081_v37, %v14599_v54  ;;  %v14600_v25 = vld [vmem:[#allocation67_spill] sm:$0xff]  ;;  %v4140_v6 = vmul.f32 %v4079_v13, %v14601_v5  ;;  %v14605_v43 = vld [vmem:[#allocation52_spill] sm:$0xff]  ;;  %v9363_v19 = vld [vmem:[#allocation2 + $0xf0] sm:$0xff]  }
 0xa24   :  { %v4087_v4 = vmul.f32 %v4086_v44, %v14598_v42  ;;  %v4139_v15 = vmul.f32 %v4080_v50, %v14600_v25  ;;  %v14603_v42 = vrot.slane %v12492_v8, 7  ;;  %v14604_v63 = vrot.slane %v12588_v55, 7  ;;  %v14606_v5 = vld [vmem:[#allocation18_spill] sm:$0xff]  ;;  %7488 = vmatpush3.bf16.msra.mxu1 %v9363_v19 }
 0xa25   :  { %v4070_v33 = vmul.f32 %v12571_v7, %v14605_v43  ;;  %v4425_v49 = vpack.c.bf16 %v4138_v23, %v4137_v16  ;;  %v9130_v54 = vpack.i.bf16 %v4122_v22, %v12581_v62  ;;  %v9145_v43 = vpack.i.bf16 %v12609_v59, %v12569_v2  ;;  %v14610_v23 = vld [vmem:[#allocation39_spill] sm:$0xff]  ;;  %v14612_v22 = vld [vmem:[#allocation21_spill] sm:$0xff] }
 0xa26   :  { %v9135_v39 = vpack.i.bf16 %v4088_v21, %v4087_v4  ;;  %v12648_v51 = vsel %vm59_vm1, %v14604_v63, %v14603_v42  ;;  %v4428_v25 = vpack.c.bf16 %v4140_v6, %v4139_v15  ;;  %v14607_v21 = vld [vmem:[#allocation66_spill] sm:$0xff]  ;;  %9126 = vrot.lane.b32.xlu0 %v9125_v30, %s9564_s20  ;;  %v14608_v42 = vld [vmem:[#allocation73_spill] sm:$0xff]  ;;  %v4115_v11 = vmul.f32 %v4081_v37, %v14609_v52  ;;  %v14611_v30 = vld [vmem:[#allocation15_spill] sm:$0xff] }
 0xa27   :  { %v4095_v4 = vmul.f32 %v12648_v51, %v14606_v5  ;;  %v4131_v29 = vmul.f32 %v12598_v40, %v14607_v21  ;;  %v4141_v63 = vmul.f32 %v4086_v44, %v14608_v42  ;;  %7905 = vmatmul.mubr.msk.bf16.vlgmr.msra.gmra.mrb[40].mxu0 %vm1974_vm2, %v4425_v49  ;;  %v4116_v10 = vmul.f32 %v4080_v50, %v14610_v23  ;;  %v14625_v52 = vld [vmem:[#allocation23_spill] sm:$0xff] }
 0xa28   :  { %9136 = vrot.lane.b32.xlu1 %v9135_v39, %s9543_s25  ;;  %v4044_v16 = vrot.slane %v12598_v40, 7  ;;  %7908 = vmatprep.mubr.msk.bf16.mxu0 %vm1974_vm2, %v4428_v25  ;;  %v4069_v2 = vmul.f32 %v12598_v40, %v14611_v30  ;;  %v4045_v59 = vrot.slane %v12571_v7, 7  ;;  %v4091_v49 = vmul.f32 %v4082_v47, %v14612_v22  ;;  %v14618_v22 = vld [vmem:[#allocation56_spill] sm:$0xff] }
 0xa29   :  { %v9140_v6 = vpack.i.bf16 %v12585_v9, %v4095_v4  ;;  %v9150_v15 = vpack.i.bf16 %v12592_v58, %v4131_v29  ;;  %v4431_v62 = vpack.c.bf16 %v12595_v45, %v4141_v63  ;;  %v9155_v39 = vpack.i.bf16 %v4116_v10, %v4115_v11  ;;  %v14613_v9 = vld [vmem:[#allocation54_spill] sm:$0xff]  ;;  %v14615_v63 = vld [vmem:[#allocation45_spill] sm:$0xff]  ;;  %v14616_v11 = vld [vmem:[#allocation64_spill] sm:$0xff] }
 0xa2a   :  { %v12676_v29 = vsel %vm59_vm1, %v4043_v27, %v4044_v16  ;;  %v4092_v58 = vmul.f32 %v4081_v37, %v14613_v9  ;;  %v14614_v4 = vld [vmem:[#allocation62_spill] sm:$0xff]  ;;  %9131 = vrot.lane.b32.xlu0 %v9130_v54, %s9543_s25  ;;  %v9170_v45 = vpack.i.bf16 %v4070_v33, %v4069_v2  ;;  %v12683_v25 = vsel %vm59_vm1, %v4044_v16, %v4045_v59  ;;  %v14617_v10 = vld [vmem:[#allocation63_spill] sm:$0xff] }
 0xa2b   :  { %v4117_v23 = vmul.f32 %v4079_v13, %v14614_v4  ;;  %v4123_v47 = vmul.f32 %v12676_v29, %v14615_v63  ;;  %v4124_v27 = vmul.f32 %v12683_v25, %v14616_v11  ;;  %v4118_v37 = vmul.f32 %v4086_v44, %v14617_v10  ;;  %v14619_v54 = vld [vmem:[#allocation27_spill] sm:$0xff] }
 0xa2c   :  { %9141 = vrot.lane.b32.xlu1 %v9140_v6, %s9568_s11  ;;  %v9185_v19 = vpack.i.bf16 %v4092_v58, %v4091_v49  ;;  %v4099_v9 = vmul.f32 %v12620_v20, %v14618_v22  ;;  %v4100_v33 = vmul.f32 %v12676_v29, %v14619_v54  ;;  %v14620_v16 = vrot.slane %v12588_v55, 7  ;;  %v14621_v4 = vld [vmem:[#allocation47_spill] sm:$0xff]  ;;  %v14622_v49 = vld [vmem:[#allocation65_spill] sm:$0xff]  ;;  %v14623_v58 = vld [vmem:[#allocation70_spill] sm:$0xff] }
 0xa2d   :  { %v4126_v6 = vmul.f32 %v12648_v51, %v14621_v4  ;;  %v9160_v30 = vpack.i.bf16 %v4124_v27, %v4123_v47  ;;  %v9165_v11 = vpack.i.bf16 %v4118_v37, %v4117_v23  ;;  %v4134_v22 = vmul.f32 %v12492_v8, %v14623_v58  ;;  %v14624_v10 = vld [vmem:[#allocation55_spill] sm:$0xff]  ;;  %v14627_v47 = vld [vmem:[#allocation57_spill] sm:$0xff]  ;;  %v14628_v37 = vld [vmem:[#allocation58_spill] sm:$0xff] }
 0xa2e   :  { %v12699_v2 = vsel %vm59_vm1, %v4045_v59, %v14620_v16  ;;  %9151 = vrot.lane.b32.xlu0 %v9150_v15, %s9568_s11  ;;  %v9190_v54 = vpack.i.bf16 %v4100_v33, %v4099_v9  ;;  %v4093_v63 = vmul.f32 %v4080_v50, %v14624_v10  ;;  %v4094_v5 = vmul.f32 %v4079_v13, %v14625_v52  ;;  %v14626_v59 = vld [vmem:[#allocation68_spill] sm:$0xff] }
 0xa2f   :  { %v4125_v44 = vmul.f32 %v12699_v2, %v14622_v49  ;;  %v4133_v16 = vmul.f32 %v12588_v55, %v14626_v59  ;;  %7909 = vmatmul.mubr.msk.bf16.gmra.mrb[44].mxu0 %vm1974_vm2, %v4431_v62  ;;  %v4101_v27 = vmul.f32 %v12683_v25, %v14627_v47  ;;  %v4102_v58 = vmul.f32 %v12699_v2, %v14628_v37 }
 0xa30   :  { %9146 = vrot.lane.b32.xlu1 %v9145_v43, %s9564_s20  ;;  %v9195_v15 = vpack.i.bf16 %v4094_v5, %v4093_v63  ;;  %v7243_v5 = vld [vmem:[%s13919_s3 + $0x7] ss:$0 sm:$0xff] }
 0xa31   :  { %v9175_v23 = vpack.i.bf16 %v4126_v6, %v4125_v44  ;;  %v9180_v9 = vpack.i.bf16 %v4134_v22, %v4133_v16  ;;  %v9200_v33 = vpack.i.bf16 %v4102_v58, %v4101_v27  ;;  %v3404_v13 = vadd.f32 %v7243_v5, %v12467_v18  ;;  %v14631_v16 = vld [vmem:[#allocation29_spill] sm:$0xff]  ;;  %v14632_v27 = vld [vmem:[#allocation24_spill] sm:$0xff] }
 0xa32   :  { %9156 = vrot.lane.b32.xlu0 %v9155_v39, %s9564_s20  ;;  %v3407_v50 = vadd.f32 %v7243_v5, %v12471_v36  ;;  %v3412_v43 = vadd.f32 %v12465_v14, %v7243_v5  ;;  %v3415_v62 = vadd.f32 %v12469_v35, %v7243_v5  ;;  %v3423_v22 = vadd.f32 %v7243_v5, %v12479_v53  ;;  %v12747_v39 = vld [vmem:[#allocation2 + $0x438] sm:$0xff]  }
 0xa33   :  { %v3428_v18 = vadd.f32 %v12473_v0, %v7243_v5  ;;  %v3431_v36 = vadd.f32 %v12477_v3, %v7243_v5  ;;  %7924 = vmatprep.subr.bf16.mxu1 %v12747_v39  ;;  %v14630_v0 = vld [vmem:[#allocation77_spill] sm:$0xff] }
 0xa34   :  { %9171 = vrot.lane.b32.xlu1 %v9170_v45, %s9564_s20  ;;  %v4058_v3 = vmul.f32 %v12539_v61, %v14630_v0 }
 0xa36   :  { %9161 = vrot.lane.b32.xlu0 %v9160_v30, %s9543_s25  ;;  %v3420_v30 = vadd.f32 %v7243_v5, %v12475_v60 }
 0xa38   :  { %9186 = vrot.lane.b32.xlu1 %v9185_v19, %s9543_s25 }
 0xa3a   :  { %9166 = vrot.lane.b32.xlu0 %v9165_v11, %s9564_s20  ;;  %v14629_v11 = vld [vmem:[#allocation76_spill] sm:$0xff] }
 0xa3b   :  { %v4057_v19 = vmul.f32 %v12550_v38, %v14629_v11 }
 0xa3c   :  { %9191 = vrot.lane.b32.xlu1 %v9190_v54, %s9568_s11 }
 0xa3e   :  { %9176 = vrot.lane.b32.xlu0 %v9175_v23, %s9543_s25  ;;  %v4103_v23 = vmul.f32 %v12492_v8, %v14631_v16 }
 0xa40   :  { %9196 = vrot.lane.b32.xlu1 %v9195_v15, %s9543_s25  ;;  %v4104_v15 = vmul.f32 %v12498_v46, %v14632_v27 }
 0xa42   :  { %9181 = vrot.lane.b32.xlu0 %v9180_v9, %s9568_s11 }
 0xa44   :  { %9201 = vrot.lane.b32.xlu1 %v9200_v33, %s9568_s11 }
 0xa46   :  { %3442 = vrot.lane.b32.xlu0 %v3404_v13, %s9556_s27 }
 0xa48   :  { %3444 = vrot.lane.b32.xlu1 %v3407_v50, %s9556_s27 }
 0xa4a   :  { %3446 = vrot.lane.b32.xlu0 %v3412_v43, %s9556_s27 }
 0xa4c   :  { %3448 = vrot.lane.b32.xlu1 %v3415_v62, %s9556_s27 }
 0xa4e   :  { %3450 = vrot.lane.b32.xlu0 %v3420_v30, %s9556_s27 }
 0xa50   :  { %3452 = vrot.lane.b32.xlu1 %v3423_v22, %s9556_s27 }
 0xa52   :  { %3454 = vrot.lane.b32.xlu0 %v3428_v18, %s9556_s27 }
 0xa54   :  { %3456 = vrot.lane.b32.xlu1 %v3431_v36, %s9556_s27 }
 0xa83   :  { %v9087_v14 = vpop.permute.xlu0 %9086  ;;  %v9092_v35 = vpop.permute.xlu1 %9091 }
 0xa84   :  { %v9094_v60 = vunpack.i.h.bf16 %v9092_v35  ;;  %v9093_v53 = vunpack.i.l.bf16 %v9092_v35  ;;  %v9089_v9 = vunpack.i.h.bf16 %v9087_v14  ;;  %v9088_v33 = vunpack.i.l.bf16 %v9087_v14 }
 0xa86   :  { %v4337_v5 = vsel %vm1974_vm2, %v4057_v19, %v9093_v53  ;;  %v4338_v38 = vsel %vm1974_vm2, %v4058_v3, %v9094_v60 }
 0xa87   :  { %v9107_v45 = vpop.permute.xlu1 %9106  ;;  %v9097_v63 = vpop.permute.xlu0 %9096 }
 0xa88   :  { %v9109_v54 = vunpack.i.h.bf16 %v9107_v45  ;;  %v9108_v6 = vunpack.i.l.bf16 %v9107_v45  ;;  %v9099_v44 = vunpack.i.h.bf16 %v9097_v63  ;;  %v9098_v58 = vunpack.i.l.bf16 %v9097_v63 }
 0xa8a   :  { %v4345_v22 = vsel %vm3200_vm11, %v4337_v5, %v9108_v6  ;;  %v4346_v8 = vsel %vm3200_vm11, %v4338_v38, %v9109_v54  ;;  %v4361_v18 = vsel %vm1974_vm2, %v4104_v15, %v9099_v44  ;;  %v4360_v46 = vsel %vm1974_vm2, %v4103_v23, %v9098_v58  ;;  %v14633_v38 = vld [vmem:[#allocation74_spill] sm:$0xff] }
 0xa8b   :  { %v9112_v13 = vpop.permute.xlu1 %9111  ;;  %v9102_v50 = vpop.permute.xlu0 %9101 }
 0xa8c   :  { %v9114_v61 = vunpack.i.h.bf16 %v9112_v13  ;;  %v9113_v43 = vunpack.i.l.bf16 %v9112_v13  ;;  %v9104_v62 = vunpack.i.h.bf16 %v9102_v50  ;;  %v9103_v30 = vunpack.i.l.bf16 %v9102_v50  ;;  %v14634_v50 = vld [vmem:[#allocation71_spill] sm:$0xff] }
 0xa8d   :  { %v4055_v13 = vmul.f32 %v12699_v2, %v14633_v38 }
 0xa8e   :  { %v4369_v36 = vsel %vm3200_vm11, %v4361_v18, %v9104_v62  ;;  %v4368_v14 = vsel %vm3200_vm11, %v4360_v46, %v9103_v30  ;;  %v12767_v35 = vsel %vm4351_vm10, %v4345_v22, %v9113_v43  ;;  %v12770_v60 = vsel %vm4351_vm10, %v4346_v8, %v9114_v61  ;;  %v14635_v30 = vld [vmem:[#allocation26_spill] sm:$0xff]  ;;  %v14636_v8 = vld [vmem:[#allocation31_spill] sm:$0xff] }
 0xa8f   :  { %v4376_v53 = vsel %vm4351_vm10, %v4368_v14, %v9088_v33  ;;  %v4377_v45 = vsel %vm4351_vm10, %v4369_v36, %v9089_v9  ;;  %v4423_v63 = vpack.c.bf16 %v12770_v60, %v12767_v35  ;;  %v4056_v33 = vmul.f32 %v12648_v51, %v14634_v50 }
 0xa90   :  { %v4421_v19 = vpack.c.bf16 %v4377_v45, %v4376_v53  ;;  %v4105_v22 = vmul.f32 %v12488_v28, %v14635_v30  ;;  %v4106_v18 = vmul.f32 %v12494_v48, %v14636_v8 }
 0xa92   :  { %4589 = vmatprep.mubr.bf16.mxu1 %v4421_v19 }
 0xa94   :  { %v9117_v3 = vpop.permute.xlu0 %9116 }
 0xa95   :  { %v9122_v54 = vpop.permute.xlu1 %9121  ;;  %v9119_v43 = vunpack.i.h.bf16 %v9117_v3  ;;  %v9118_v62 = vunpack.i.l.bf16 %v9117_v3 }
 0xa96   :  { %v9124_v44 = vunpack.i.h.bf16 %v9122_v54  ;;  %v9123_v58 = vunpack.i.l.bf16 %v9122_v54 }
 0xa98   :  { %v9127_v6 = vpop.permute.xlu0 %9126  ;;  %v4335_v36 = vsel %vm1974_vm2, %v4055_v13, %v9123_v58  ;;  %v4336_v14 = vsel %vm1974_vm2, %v4056_v33, %v9124_v44 }
 0xa99   :  { %v9129_v15 = vunpack.i.h.bf16 %v9127_v6  ;;  %v9128_v5 = vunpack.i.l.bf16 %v9127_v6 }
 0xa9a   :  { %v9137_v23 = vpop.permute.xlu1 %9136 }
 0xa9b   :  { %v9139_v9 = vunpack.i.h.bf16 %v9137_v23  ;;  %v9138_v61 = vunpack.i.l.bf16 %v9137_v23  ;;  %v4363_v51 = vsel %vm1974_vm2, %v4106_v18, %v9129_v15  ;;  %v4362_v19 = vsel %vm1974_vm2, %v4105_v22, %v9128_v5 }
 0xa9c   :  { %v9132_v46 = vpop.permute.xlu0 %9131 }
 0xa9d   :  { %v9134_v53 = vunpack.i.h.bf16 %v9132_v46  ;;  %v9133_v2 = vunpack.i.l.bf16 %v9132_v46  ;;  %v4343_v6 = vsel %vm3200_vm11, %v4335_v36, %v9138_v61  ;;  %v4344_v28 = vsel %vm3200_vm11, %v4336_v14, %v9139_v9  ;;  %v14637_v14 = vld [vmem:[#allocation33_spill] sm:$0xff] }
 0xa9e   :  { %v9142_v45 = vpop.permute.xlu1 %9141 }
 0xa9f   :  { %v9144_v54 = vunpack.i.h.bf16 %v9142_v45  ;;  %v9143_v3 = vunpack.i.l.bf16 %v9142_v45  ;;  %v4370_v48 = vsel %vm3200_vm11, %v4362_v19, %v9133_v2  ;;  %v4371_v23 = vsel %vm3200_vm11, %v4363_v51, %v9134_v53  ;;  %v14638_v2 = vld [vmem:[#allocation59_spill] sm:$0xff] }
 0xaa0   :  { %v9152_v13 = vpop.permute.xlu0 %9151  ;;  %v4378_v33 = vsel %vm4351_vm10, %v4370_v48, %v9118_v62  ;;  %v4379_v15 = vsel %vm4351_vm10, %v4371_v23, %v9119_v43  ;;  %v4107_v53 = vmul.f32 %v12576_v26, %v14637_v14  ;;  %v4108_v45 = vmul.f32 %v12598_v40, %v14638_v2 }
 0xaa1   :  { %v4353_v58 = vsel %vm4351_vm10, %v4344_v28, %v9144_v54  ;;  %v4352_v44 = vsel %vm4351_vm10, %v4343_v6, %v9143_v3  ;;  %v4424_v18 = vpack.c.bf16 %v4379_v15, %v4378_v33  ;;  %v9154_v51 = vunpack.i.h.bf16 %v9152_v13 }
 0xaa2   :  { %v4420_v5 = vpack.c.bf16 %v4353_v58, %v4352_v44  ;;  %v9147_v22 = vpop.permute.xlu1 %9146  ;;  %v9153_v43 = vunpack.i.l.bf16 %v9152_v13  ;;  %v4060_v40 = vmul.f32 %v12620_v20, %v10183_v1  ;;  %v4059_v13 = vmul.f32 %v12521_v34, %v10172_v12 }
 0xaa3   :  { %v9149_v6 = vunpack.i.h.bf16 %v9147_v22  ;;  %v9148_v28 = vunpack.i.l.bf16 %v9147_v22 }
 0xaa4   :  { %4590 = vmatmul.mubr.bf16.vlgmr.msra.gmra.mrb[32].mxu1 %v4420_v5  ;;  %v9157_v61 = vpop.permute.xlu0 %9156 }
 0xaa5   :  { %4597 = vmatprep.mubr.bf16.mxu1 %v4424_v18  ;;  %7925 = vmatpush3.bf16.msra.mxu1 %v12747_v39  ;;  %v9159_v46 = vunpack.i.h.bf16 %v9157_v61  ;;  %v9158_v36 = vunpack.i.l.bf16 %v9157_v61  ;;  %v4340_v61 = vsel %vm1974_vm2, %v4060_v40, %v9149_v6  ;;  %v4061_v6 = vmul.f32 %v12676_v29, %v10177_v31  ;;  %v9386_v31 = vld [vmem:[#allocation2 + $0x1c8] sm:$0xff]  }
 0xaa6   :  { %v9172_v9 = vpop.permute.xlu1 %9171 }
 0xaa7   :  { %v4365_v48 = vsel %vm1974_vm2, %v4108_v45, %v9159_v46  ;;  %v4364_v39 = vsel %vm1974_vm2, %v4107_v53, %v9158_v36  ;;  %v4339_v46 = vsel %vm1974_vm2, %v4059_v13, %v9148_v28  ;;  %v9173_v34 = vunpack.i.l.bf16 %v9172_v9 }
 0xaa8   :  { %v9162_v62 = vpop.permute.xlu0 %9161 }
 0xaa9   :  { %v9164_v19 = vunpack.i.h.bf16 %v9162_v62  ;;  %v9163_v54 = vunpack.i.l.bf16 %v9162_v62  ;;  %v4341_v13 = vsel %vm1974_vm2, %v4061_v6, %v9173_v34 }
 0xaaa   :  { %v9187_v3 = vpop.permute.xlu1 %9186 }
 0xaab   :  { %v4372_v23 = vsel %vm3200_vm11, %v4364_v39, %v9163_v54  ;;  %v4373_v58 = vsel %vm3200_vm11, %v4365_v48, %v9164_v19  ;;  %v9189_v26 = vunpack.i.h.bf16 %v9187_v3  ;;  %v9188_v44 = vunpack.i.l.bf16 %v9187_v3  ;;  %v14639_v39 = vld [vmem:[#allocation60_spill] sm:$0xff] }
 0xaac   :  { %4598 = vmatmul.mubr.bf16.gmra.mrb[36].mxu1 %v4423_v63  ;;  %v9167_v33 = vpop.permute.xlu0 %9166  ;;  %v4380_v15 = vsel %vm4351_vm10, %v4372_v23, %v9153_v43  ;;  %v4381_v5 = vsel %vm4351_vm10, %v4373_v58, %v9154_v51  ;;  %v9174_v63 = vunpack.i.h.bf16 %v9172_v9  ;;  %v4062_v3 = vmul.f32 %v12683_v25, %v10185_v57  ;;  %v14640_v23 = vld [vmem:[#allocation35_spill] sm:$0xff] }
 0xaad   :  { %v4427_v18 = vpack.c.bf16 %v4381_v5, %v4380_v15  ;;  %v4347_v60 = vsel %vm3200_vm11, %v4339_v46, %v9188_v44  ;;  %v4348_v20 = vsel %vm3200_vm11, %v4340_v61, %v9189_v26  ;;  %v9169_v51 = vunpack.i.h.bf16 %v9167_v33 }
 0xaae   :  { %v9192_v22 = vpop.permute.xlu1 %9191  ;;  %v9168_v43 = vunpack.i.l.bf16 %v9167_v33  ;;  %v4109_v9 = vmul.f32 %v12571_v7, %v14639_v39  ;;  %v4110_v58 = vmul.f32 %v12588_v55, %v14640_v23  ;;  %v4342_v40 = vsel %vm1974_vm2, %v4062_v3, %v9174_v63  ;;  %v9387_v39 = vld [vmem:[#allocation2 + $0x188] sm:$0xff]  }
 0xaaf   :  { %v9194_v36 = vunpack.i.h.bf16 %v9192_v22  ;;  %v9193_v35 = vunpack.i.l.bf16 %v9192_v22  ;;  %4605 = vmatprep.mubr.bf16.mxu1 %v4427_v18 }
 0xab0   :  { %v9177_v53 = vpop.permute.xlu0 %9176  ;;  %v4367_v25 = vsel %vm1974_vm2, %v4110_v58, %v9169_v51  ;;  %v4366_v29 = vsel %vm1974_vm2, %v4109_v9, %v9168_v43  ;;  %v9367_v9 = vld [vmem:[#allocation2 + $0x430] sm:$0xff]   ;;  %v9368_v58 = vld [vmem:[#allocation2 + $0x448] sm:$0xff]  }
 0xab1   :  { %v4356_v45 = vsel %vm4351_vm10, %v4347_v60, %v9193_v35  ;;  %v4357_v62 = vsel %vm4351_vm10, %v4348_v20, %v9194_v36  ;;  %v9179_v28 = vunpack.i.h.bf16 %v9177_v53  ;;  %v9178_v48 = vunpack.i.l.bf16 %v9177_v53 }
 0xab2   :  { %v9197_v19 = vpop.permute.xlu1 %9196  ;;  %v4426_v54 = vpack.c.bf16 %v4357_v62, %v4356_v45 }
 0xab3   :  { %v9199_v26 = vunpack.i.h.bf16 %v9197_v19  ;;  %v9198_v44 = vunpack.i.l.bf16 %v9197_v19  ;;  %v4374_v7 = vsel %vm3200_vm11, %v4366_v29, %v9178_v48  ;;  %v4375_v18 = vsel %vm3200_vm11, %v4367_v25, %v9179_v28  ;;  %v9365_v19 = vld [vmem:[#allocation2 + $0x440] sm:$0xff]   ;;  %v9366_v48 = vld [vmem:[#allocation2 + $0x428] sm:$0xff]  }
 0xab4   :  { %4606 = vmatmul.mubr.bf16.gmra.mrb[40].mxu1 %v4426_v54  ;;  %v9182_v33 = vpop.permute.xlu0 %9181  ;;  %7926 = vmatprep.subr.bf16.mxu1 %v9365_v19 }
 0xab5   :  { %v9184_v15 = vunpack.i.h.bf16 %v9182_v33  ;;  %v9183_v5 = vunpack.i.l.bf16 %v9182_v33  ;;  %v4349_v46 = vsel %vm3200_vm11, %v4341_v13, %v9198_v44  ;;  %v4350_v36 = vsel %vm3200_vm11, %v4342_v40, %v9199_v26  ;;  %7927 = vmatpush3.bf16.msra.mxu1 %v9365_v19  ;;  %7912 = vmatprep.subr.bf16.mxu0 %v9366_v48  ;;  %v12847_v44 = vld [vmem:[%s13919_s3 + $0x9] ss:$0 sm:$0xff] }
 0xab6   :  { %v9202_v22 = vpop.permute.xlu1 %9201  ;;  %7913 = vmatpush3.bf16.msra.mxu0 %v9366_v48 }
 0xab7   :  { %v9204_v55 = vunpack.i.h.bf16 %v9202_v22  ;;  %v9203_v61 = vunpack.i.l.bf16 %v9202_v22  ;;  %v4382_v35 = vsel %vm4351_vm10, %v4374_v7, %v9183_v5  ;;  %v4383_v60 = vsel %vm4351_vm10, %v4375_v18, %v9184_v15  ;;  %7914 = vmatprep.subr.bf16.mxu0 %v9367_v9 }
 0xab8   :  { %v4430_v20 = vpack.c.bf16 %v4383_v60, %v4382_v35  ;;  %v3443_v5 = vpop.permute.xlu0 %3442  ;;  %v14642_v35 = vld [vmem:[#allocation81_spill] sm:$0xff] }
 0xab9   :  { %v4358_v63 = vsel %vm4351_vm10, %v4349_v46, %v9203_v61  ;;  %v4359_v34 = vsel %vm4351_vm10, %v4350_v36, %v9204_v55  ;;  %v14641_v46 = vld [vmem:[#allocation79_spill] sm:$0xff] }
 0xaba   :  { %v4429_v53 = vpack.c.bf16 %v4359_v34, %v4358_v63  ;;  %4613 = vmatprep.mubr.bf16.mxu1 %v4430_v20  ;;  %7915 = vmatpush3.bf16.msra.mxu0 %v9367_v9  ;;  %v3445_v22 = vpop.permute.xlu1 %3444  ;;  %v3466_v36 = vsel %vm736_vm6, %v14641_v46, %v3443_v5 }
 0xabb   :  { %7936 = vmatprep.subr.bf16.mxu0 %v9368_v58  ;;  %v3467_v60 = vsel %vm736_vm6, %v14642_v35, %v3445_v22  ;;  %v14644_v22 = vld [vmem:[#allocation80_spill] sm:$0xff] }
 0xabc   :  { %4614 = vmatmul.mubr.bf16.gmra.mrb[44].mxu1 %v4429_v53 }
 0xafa   :  { %v7906_v45 = vpop.f32.mrb[40].mxu0 }
 0xafb   :  { %v4656_v62 = vpop.f32.mrb[41].mxu0 }
 0xafc   :  { %v7907_v51 = vpop.f32.mrb[42].mxu0 }
 0xafd   :  { %v4659_v43 = vpop.f32.mrb[43].mxu0 }
 0xb02   :  { %v12840_v54 = vpop.f32.mrb[44].mxu0 }
 0xb03   :  { %v4672_v3 = vpop.f32.mrb[45].mxu0 }
 0xb04   :  { %v12842_v6 = vpop.f32.mrb[46].mxu0 }
 0xb05   :  { %v4675_v28 = vpop.f32.mrb[47].mxu0 }
 0xb77   :  { %v7489_v26 = vpop.f32.mrb[32].mxu1 }
 0xb78   :  { %v7490_v40 = vpop.f32.mrb[33].mxu1 }
 0xb79   :  { %v7491_v13 = vadd.f32 %v7490_v40, %v7489_v26  ;;  %v7492_v33 = vpop.f32.mrb[34].mxu1  ;;  %v3447_v26 = vpop.permute.xlu0 %3446 }
 0xb7a   :  { %v7493_v25 = vpop.f32.mrb[35].mxu1  ;;  %v3449_v40 = vpop.permute.xlu1 %3448 }
 0xb7b   :  { %v4592_v29 = vadd.f32 %v7491_v13, %v12847_v44  ;;  %v7494_v15 = vadd.f32 %v7493_v25, %v7492_v33 }
 0xb7d   :  { %v4657_v7 = vadd.f32 %v4656_v62, %v4592_v29  ;;  %v4595_v18 = vadd.f32 %v7494_v15, %v12847_v44  ;;  %v14643_v15 = vld [vmem:[#allocation86_spill] sm:$0xff] }
 0xb7e   :  { %v3468_v5 = vsel %vm736_vm6, %v14643_v15, %v3447_v26 }
 0xb7f   :  { %v4660_v55 = vadd.f32 %v4659_v43, %v4595_v18  ;;  %v7495_v61 = vpop.f32.mrb[36].mxu1  ;;  %v12855_v63 = vadd.f32 %v4657_v7, %v3466_v36  ;;  %v3469_v7 = vsel %vm736_vm6, %v14644_v22, %v3449_v40  ;;  %v14645_v40 = vld [vmem:[#allocation82_spill] sm:$0xff] }
 0xb80   :  { %v7496_v20 = vpop.f32.mrb[37].mxu1 }
 0xb81   :  { %v12857_v34 = vadd.f32 %v4660_v55, %v3467_v60  ;;  %v7497_v53 = vadd.f32 %v7496_v20, %v7495_v61  ;;  %v7498_v19 = vpop.f32.mrb[38].mxu1  ;;  %v9369_v20 = vld [vmem:[#allocation2 + $0x450] sm:$0xff]  }
 0xb82   :  { %v7499_v48 = vpop.f32.mrb[39].mxu1 }
 0xb83   :  { %v4600_v62 = vadd.f32 %v7497_v53, %v12847_v44  ;;  %v7500_v9 = vadd.f32 %v7499_v48, %v7498_v19  ;;  %v4699_v43 = vpack.c.bf16 %v12857_v34, %v12855_v63  ;;  %v3451_v53 = vpop.permute.xlu0 %3450  ;;  %v3453_v19 = vpop.permute.xlu1 %3452 }
 0xb85   :  { %v4665_v13 = vadd.f32 %v7906_v45, %v4600_v62  ;;  %v4603_v33 = vadd.f32 %v7500_v9, %v12847_v44  ;;  %7916 = vmatprep.mubr.msk.bf16.mxu0 %vm1974_vm2, %v4699_v43  ;;  %7928 = vmatprep.mubr.msk.bf16.mxu1 %vm1974_vm2, %v4699_v43 }
 0xb87   :  { %v4668_v25 = vadd.f32 %v7907_v51, %v4603_v33  ;;  %v7501_v29 = vpop.f32.mrb[40].mxu1  ;;  %v12869_v55 = vadd.f32 %v4665_v13, %v3468_v5  ;;  %v3470_v13 = vsel %vm736_vm6, %v14645_v40, %v3451_v53  ;;  %v14646_v33 = vld [vmem:[#allocation83_spill] sm:$0xff]  ;;  %v14647_v53 = vld [vmem:[#allocation84_spill] sm:$0xff] }
 0xb88   :  { %v7502_v18 = vpop.f32.mrb[41].mxu1 }
 0xb89   :  { %v12871_v61 = vadd.f32 %v4668_v25, %v3469_v7  ;;  %v7503_v45 = vadd.f32 %v7502_v18, %v7501_v29  ;;  %v7504_v46 = vpop.f32.mrb[42].mxu1  ;;  %v3471_v25 = vsel %vm736_vm6, %v14646_v33, %v3453_v19  ;;  %v14648_v19 = vld [vmem:[#allocation13_spill] sm:$0xff] }
 0xb8a   :  { %v7505_v36 = vpop.f32.mrb[43].mxu1 }
 0xb8b   :  { %v4700_v35 = vpack.c.bf16 %v12871_v61, %v12869_v55  ;;  %v4608_v51 = vadd.f32 %v7503_v45, %v12847_v44  ;;  %v7506_v60 = vadd.f32 %v7505_v36, %v7504_v46  ;;  %v3455_v45 = vpop.permute.xlu0 %3454  ;;  %v3457_v46 = vpop.permute.xlu1 %3456 }
 0xb8d   :  { %v4673_v48 = vadd.f32 %v4672_v3, %v4608_v51  ;;  %v4611_v62 = vadd.f32 %v7506_v60, %v12847_v44  ;;  %7917 = vmatmul.mubr.msk.bf16.vlgmr.msra.gmra.mrb[48].mxu0 %vm1974_vm2, %v4700_v35  ;;  %7929 = vmatmul.mubr.msk.bf16.vlgmr.msra.gmra.mrb[48].mxu1 %vm1974_vm2, %v4700_v35 }
 0xb8e   :  { %7937 = vmatpush3.bf16.msra.mxu0 %v9368_v58 }
 0xb8f   :  { %v4676_v9 = vadd.f32 %v4675_v28, %v4611_v62  ;;  %v7507_v26 = vpop.f32.mrb[44].mxu1  ;;  %7938 = vmatprep.subr.bf16.mxu0 %v9369_v20  ;;  %v12883_v15 = vadd.f32 %v4673_v48, %v3470_v13  ;;  %v3473_v48 = vsel %vm736_vm6, %v14648_v19, %v3457_v46 }
 0xb90   :  { %v7508_v29 = vpop.f32.mrb[45].mxu1 }
 0xb91   :  { %v12885_v3 = vadd.f32 %v4676_v9, %v3471_v25  ;;  %v7509_v5 = vadd.f32 %v7508_v29, %v7507_v26  ;;  %v7510_v22 = vpop.f32.mrb[46].mxu1 }
 0xb92   :  { %v7511_v7 = vpop.f32.mrb[47].mxu1  ;;  %7939 = vmatpush3.bf16.msra.mxu0 %v9369_v20  ;;  %v3472_v20 = vsel %vm736_vm6, %v14647_v53, %v3455_v45 }
 0xb93   :  { %v4616_v58 = vadd.f32 %v7509_v5, %v12847_v44  ;;  %v7512_v28 = vadd.f32 %v7511_v7, %v7510_v22  ;;  %v4701_v18 = vpack.c.bf16 %v12885_v3, %v12883_v15 }
 0xb95   :  { %v4681_v36 = vadd.f32 %v12840_v54, %v4616_v58  ;;  %v4619_v51 = vadd.f32 %v7512_v28, %v12847_v44  ;;  %7920 = vmatprep.mubr.msk.bf16.mxu0 %vm1974_vm2, %v4701_v18  ;;  %7932 = vmatprep.mubr.msk.bf16.mxu1 %vm1974_vm2, %v4701_v18 }
 0xb97   :  { %v4684_v60 = vadd.f32 %v12842_v6, %v4619_v51  ;;  %v12899_v62 = vadd.f32 %v4681_v36, %v3472_v20 }
 0xb99   :  { %v12901_v9 = vadd.f32 %v4684_v60, %v3473_v48 }
 0xb9b   :  { %v4702_v54 = vpack.c.bf16 %v12901_v9, %v12899_v62 }
 0xb9d   :  { %7921 = vmatmul.mubr.msk.bf16.gmra.mrb[52].mxu0 %vm1974_vm2, %v4702_v54  ;;  %7933 = vmatmul.mubr.msk.bf16.gmra.mrb[52].mxu1 %vm1974_vm2, %v4702_v54 }
 0xb9e   :  { %7940 = vmatprep.mubr.msk.bf16.mxu0 %vm1974_vm2, %v4699_v43 }
 0xba5   :  { %7941 = vmatmul.mubr.msk.bf16.vlgmr.msra.gmra.mrb[56].mxu0 %vm1974_vm2, %v4700_v35 }
 0xba6   :  { %7944 = vmatprep.mubr.msk.bf16.mxu0 %vm1974_vm2, %v4701_v18 }
 0xbad   :  { %7945 = vmatmul.mubr.msk.bf16.gmra.mrb[60].mxu0 %vm1974_vm2, %v4702_v54 }
 0xc60   :  { %v7918_v6 = vpop.f32.mrb[48].mxu0  ;;  %v7930_v44 = vpop.f32.mrb[48].mxu1 }
 0xc61   :  { %v4761_v26 = vpop.f32.mrb[49].mxu0  ;;  %v4842_v40 = vpop.f32.mrb[49].mxu1 }
 0xc62   :  { %v7919_v13 = vpop.f32.mrb[50].mxu0  ;;  %v7931_v33 = vpop.f32.mrb[50].mxu1 }
 0xc63   :  { %v4955_v25 = vpack.c.bf16 %v7919_v13, %v7918_v6  ;;  %v4959_v29 = vpack.c.bf16 %v7931_v33, %v7930_v44  ;;  %v4764_v5 = vpop.f32.mrb[51].mxu0  ;;  %v4845_v22 = vpop.f32.mrb[51].mxu1 }
 0xc64   :  { %v4954_v7 = vpack.c.bf16 %v4764_v5, %v4761_v26  ;;  %v4958_v58 = vpack.c.bf16 %v4845_v22, %v4842_v40 }
 0xc65   :  { %v4978_v35 = vsel %vm718_vm4, %v4959_v29, 0 }
 0xc66   :  { %v4975_v43 = vsel %vm718_vm4, %v4958_v58, 0  ;;  %8063 = vmatprep.subr.msk.bf16.mxu1 %vm718_vm4, %v4958_v58  ;;  %7956 = vmatprep.mubr.msk.bf16.mxu1 %vm718_vm4, %v4954_v7 }
 0xc67   :  { %7949 = vmatpush3.bf16.xpose.msra.mxu1 %v4975_v43 }
 0xc68   :  { %8064 = vmatprep.subr.msk.bf16.mxu1 %vm718_vm4, %v4959_v29 }
 0xc6f   :  { %7951 = vmatpush3.bf16.xpose.msra.mxu1 %v4978_v35 }
 0xc70   :  { %v7922_v28 = vpop.f32.mrb[52].mxu0  ;;  %v7934_v18 = vpop.f32.mrb[52].mxu1 }
 0xc71   :  { %v4777_v45 = vpop.f32.mrb[53].mxu0  ;;  %v4858_v46 = vpop.f32.mrb[53].mxu1 }
 0xc72   :  { %v7923_v36 = vpop.f32.mrb[54].mxu0  ;;  %v7935_v51 = vpop.f32.mrb[54].mxu1 }
 0xc73   :  { %v4957_v60 = vpack.c.bf16 %v7923_v36, %v7922_v28  ;;  %v4961_v53 = vpack.c.bf16 %v7935_v51, %v7934_v18  ;;  %v4780_v20 = vpop.f32.mrb[55].mxu0  ;;  %v4861_v19 = vpop.f32.mrb[55].mxu1 }
 0xc74   :  { %v4956_v48 = vpack.c.bf16 %v4780_v20, %v4777_v45  ;;  %v4960_v54 = vpack.c.bf16 %v4861_v19, %v4858_v46 }
 0xc75   :  { %v4984_v5 = vsel %vm718_vm4, %v4961_v53, 0 }
 0xc76   :  { %v4981_v6 = vsel %vm718_vm4, %v4960_v54, 0  ;;  %8065 = vmatprep.subr.msk.bf16.mxu1 %vm718_vm4, %v4960_v54 }
 0xc77   :  { %7953 = vmatpush3.bf16.xpose.msra.mxu1 %v4981_v6 }
 0xc78   :  { %v7942_v44 = vpop.f32.mrb[56].mxu0  ;;  %8066 = vmatprep.subr.msk.bf16.mxu1 %vm718_vm4, %v4961_v53 }
 0xc79   :  { %v4923_v26 = vpop.f32.mrb[57].mxu0 }
 0xc7a   :  { %v7943_v40 = vpop.f32.mrb[58].mxu0 }
 0xc7b   :  { %v5144_v13 = vpack.c.bf16 %v7943_v40, %v7942_v44  ;;  %v4926_v33 = vpop.f32.mrb[59].mxu0 }
 0xc7c   :  { %v5143_v29 = vpack.c.bf16 %v4926_v33, %v4923_v26 }
 0xc7e   :  { %7964 = vmatprep.subr.bf16.mxu0 %v5143_v29 }
 0xc7f   :  { %7955 = vmatpush3.bf16.xpose.msra.mxu1 %v4984_v5  ;;  %7965 = vmatpush3.bf16.msra.mxu0 %v5143_v29 }
 0xc80   :  { %v7946_v22 = vpop.f32.mrb[60].mxu0  ;;  %7966 = vmatprep.subr.bf16.mxu0 %v5144_v13 }
 0xc81   :  { %v4939_v7 = vpop.f32.mrb[61].mxu0 }
 0xc82   :  { %v7947_v58 = vpop.f32.mrb[62].mxu0 }
 0xc83   :  { %v5146_v43 = vpack.c.bf16 %v7947_v58, %v7946_v22  ;;  %v4942_v35 = vpop.f32.mrb[63].mxu0  ;;  %7967 = vmatpush3.bf16.msra.mxu0 %v5144_v13 }
 0xc84   :  { %v5145_v28 = vpack.c.bf16 %v4942_v35, %v4939_v7 }
 0xc86   :  { %7957 = vmatmul.mubr.msk.bf16.vlgmr.msra.gmra.mrb[56].mxu1 %vm718_vm4, %v4955_v25  ;;  %7968 = vmatprep.subr.bf16.mxu0 %v5145_v28 }
 0xc87   :  { %7960 = vmatprep.mubr.msk.bf16.mxu1 %vm718_vm4, %v4956_v48  ;;  %7969 = vmatpush3.bf16.msra.mxu0 %v5145_v28 }
 0xc88   :  { %7970 = vmatprep.subr.bf16.mxu0 %v5146_v43 }
 0xc8b   :  { %7971 = vmatpush3.bf16.msra.mxu0 %v5146_v43 }
 0xc8e   :  { %7961 = vmatmul.mubr.msk.bf16.gmra.mrb[60].mxu1 %vm718_vm4, %v4957_v60 }
 0xd59   :  { %v7958_v18 = vpop.f32.mrb[56].mxu1 }
 0xd5a   :  { %v5020_v45 = vpop.f32.mrb[57].mxu1  ;;  %v5057_v25 = vsel %vm3200_vm11, %v7958_v18, -inf }
 0xd5b   :  { %v7959_v46 = vpop.f32.mrb[58].mxu1  ;;  %v5051_v36 = vsel %vm3200_vm11, %v5020_v45, -inf }
 0xd5c   :  { %5052 = vmax.xlane.f32.xlu0 %v5051_v36  ;;  %v5023_v51 = vpop.f32.mrb[59].mxu1  ;;  %v5060_v54 = vsel %vm3200_vm11, %v7959_v46, -inf }
 0xd5d   :  { %v5054_v53 = vsel %vm3200_vm11, %v5023_v51, -inf }
 0xd5e   :  { %5055 = vmax.xlane.f32.xlu1 %v5054_v53 }
 0xd60   :  { %5058 = vmax.xlane.f32.xlu0 %v5057_v25 }
 0xd61   :  { %v7962_v20 = vpop.f32.mrb[60].mxu1 }
 0xd62   :  { %v5036_v19 = vpop.f32.mrb[61].mxu1  ;;  %v5069_v44 = vsel %vm3200_vm11, %v7962_v20, -inf }
 0xd63   :  { %v7963_v48 = vpop.f32.mrb[62].mxu1  ;;  %v5063_v60 = vsel %vm3200_vm11, %v5036_v19, -inf }
 0xd64   :  { %5061 = vmax.xlane.f32.xlu0 %v5060_v54  ;;  %5064 = vmax.xlane.f32.xlu1 %v5063_v60  ;;  %v5039_v6 = vpop.f32.mrb[63].mxu1  ;;  %v5072_v40 = vsel %vm3200_vm11, %v7963_v48, -inf }
 0xd65   :  { %v5066_v26 = vsel %vm3200_vm11, %v5039_v6, -inf }
 0xd68   :  { %5070 = vmax.xlane.f32.xlu1 %v5069_v44  ;;  %5067 = vmax.xlane.f32.xlu0 %v5066_v26 }
 0xd6c   :  { %5073 = vmax.xlane.f32.xlu0 %v5072_v40 }
 0xde9   :  { %v5053_v13 = vpop.xlane.xlu0 %5052 }
 0xdea   :  { %v5075_v33 = vsub.f32 %v5020_v45, %v5053_v13 }
 0xdeb   :  { %v5056_v29 = vpop.xlane.xlu1 %5055 }
 0xdec   :  { %v5083_v5 = vmul.f32 1.442695, %v5075_v33  ;;  %v5076_v22 = vsub.f32 %v5023_v51, %v5056_v29 }
 0xded   :  { %v5059_v7 = vpop.xlane.xlu0 %5058 }
 0xdee   :  { %9462 = vpow2.f32 %v5083_v5  ;;  %v5085_v58 = vmul.f32 1.442695, %v5076_v22  ;;  %v5077_v43 = vsub.f32 %v7958_v18, %v5059_v7 }
 0xdf0   :  { %9464 = vpow2.f32 %v5085_v58  ;;  %v5087_v35 = vmul.f32 1.442695, %v5077_v43 }
 0xdf1   :  { %v5062_v28 = vpop.xlane.xlu0 %5061  ;;  %v5065_v36 = vpop.xlane.xlu1 %5064 }
 0xdf2   :  { %9466 = vpow2.f32 %v5087_v35  ;;  %v5078_v53 = vsub.f32 %v7959_v46, %v5062_v28  ;;  %v5079_v25 = vsub.f32 %v5036_v19, %v5065_v36 }
 0xdf4   :  { %v5089_v54 = vmul.f32 1.442695, %v5078_v53  ;;  %v5091_v60 = vmul.f32 1.442695, %v5079_v25 }
 0xdf5   :  { %v5071_v44 = vpop.xlane.xlu1 %5070  ;;  %v5068_v26 = vpop.xlane.xlu0 %5067 }
 0xdf6   :  { %9468 = vpow2.f32 %v5089_v54  ;;  %v5081_v45 = vsub.f32 %v7962_v20, %v5071_v44  ;;  %v5080_v40 = vsub.f32 %v5039_v6, %v5068_v26 }
 0xdf7   :  { %9470 = vpow2.f32 %v5091_v60  ;;  %v5224_v60 = vld [vmem:[#allocation2 + $0x458] sm:$0x3] }
 0xdf8   :  { %v9463_v51 = vpop.eup %9462  ;;  %v5095_v13 = vmul.f32 1.442695, %v5081_v45  ;;  %v5093_v33 = vmul.f32 1.442695, %v5080_v40  ;;  %8067 = vmatprep.subr.msk.bf16.mxu0 %vm2025_vm12, %v5224_v60 }
 0xdf9   :  { %v5074_v29 = vpop.xlane.xlu0 %5073  ;;  %v5099_v18 = vsel %vm3200_vm11, %v9463_v51, 0.0 }
 0xdfa   :  { %v9465_v5 = vpop.eup %9464  ;;  %9472 = vpow2.f32 %v5095_v13  ;;  %v5082_v22 = vsub.f32 %v7963_v48, %v5074_v29  ;;  %5100 = vadd.xlane.f32.xlu1 %v5099_v18 }
 0xdfb   :  { %9474 = vpow2.f32 %v5093_v33  ;;  %v5102_v46 = vsel %vm3200_vm11, %v9465_v5, 0.0 }
 0xdfc   :  { %v9467_v19 = vpop.eup %9466  ;;  %v5097_v7 = vmul.f32 1.442695, %v5082_v22  ;;  %5103 = vadd.xlane.f32.xlu0 %v5102_v46 }
 0xdfd   :  { %v5105_v20 = vsel %vm3200_vm11, %v9467_v19, 0.0 }
 0xdfe   :  { %9476 = vpow2.f32 %v5097_v7  ;;  %5106 = vadd.xlane.f32.xlu1 %v5105_v20 }
 0xe00   :  { %v9469_v6 = vpop.eup %9468 }
 0xe01   :  { %v9471_v58 = vpop.eup %9470  ;;  %v5108_v43 = vsel %vm3200_vm11, %v9469_v6, 0.0 }
 0xe02   :  { %v5111_v35 = vsel %vm3200_vm11, %v9471_v58, 0.0  ;;  %5109 = vadd.xlane.f32.xlu0 %v5108_v43 }
 0xe03   :  { %5112 = vadd.xlane.f32.xlu1 %v5111_v35 }
 0xe04   :  { %v9473_v48 = vpop.eup %9472 }
 0xe05   :  { %v9475_v28 = vpop.eup %9474  ;;  %v5117_v36 = vsel %vm3200_vm11, %v9473_v48, 0.0 }
 0xe06   :  { %v5114_v53 = vsel %vm3200_vm11, %v9475_v28, 0.0 }
 0xe07   :  { %5118 = vadd.xlane.f32.xlu1 %v5117_v36  ;;  %5115 = vadd.xlane.f32.xlu0 %v5114_v53 }
 0xe08   :  { %v9477_v25 = vpop.eup %9476 }
 0xe09   :  { %v5120_v54 = vsel %vm3200_vm11, %v9477_v25, 0.0 }
 0xe0b   :  { %5121 = vadd.xlane.f32.xlu0 %v5120_v54 }
 0xe87   :  { %v5101_v44 = vpop.xlane.xlu1 %5100 }
 0xe88   :  { %9478 = vrcp.f32 %v5101_v44 }
 0xe89   :  { %v5104_v26 = vpop.xlane.xlu0 %5103 }
 0xe8a   :  { %9480 = vrcp.f32 %v5104_v26  ;;  %v5242_v26 = vsel %vm2025_vm12, %v5224_v60, 0 }
 0xe8b   :  { %v5107_v45 = vpop.xlane.xlu1 %5106 }
 0xe8c   :  { %9482 = vrcp.f32 %v5107_v45 }
 0xe8f   :  { %v5110_v40 = vpop.xlane.xlu0 %5109 }
 0xe90   :  { %v5113_v13 = vpop.xlane.xlu1 %5112  ;;  %9484 = vrcp.f32 %v5110_v40 }
 0xe91   :  { %9486 = vrcp.f32 %v5113_v13 }
 0xe92   :  { %v9479_v33 = vpop.eup %9478 }
 0xe93   :  { %v5131_v46 = vmul.f32 %v9479_v33, %v9463_v51 }
 0xe94   :  { %v9481_v29 = vpop.eup %9480  ;;  %v5119_v18 = vpop.xlane.xlu1 %5118 }
 0xe95   :  { %v5116_v22 = vpop.xlane.xlu0 %5115  ;;  %v5132_v7 = vmul.f32 %v9481_v29, %v9465_v5 }
 0xe96   :  { %9488 = vrcp.f32 %v5116_v22  ;;  %v9483_v43 = vpop.eup %9482 }
 0xe97   :  { %9490 = vrcp.f32 %v5119_v18  ;;  %v5139_v20 = vpack.c.bf16 %v5132_v7, %v5131_v46  ;;  %v5133_v53 = vmul.f32 %v9483_v43, %v9467_v19 }
 0xe99   :  { %v5122_v35 = vpop.xlane.xlu0 %5121  ;;  %7972 = vmatprep.mubr.msk.bf16.mxu0 %vm3200_vm11, %v5139_v20 }
 0xe9a   :  { %9492 = vrcp.f32 %v5122_v35  ;;  %v9485_v36 = vpop.eup %9484 }
 0xe9b   :  { %v5134_v54 = vmul.f32 %v9485_v36, %v9469_v6  ;;  %v9487_v45 = vpop.eup %9486 }
 0xe9c   :  { %v5135_v5 = vmul.f32 %v9487_v45, %v9471_v58  ;;  %v9375_v45 = vld [vmem:[#allocation2 + $0x158] sm:$0xff]  }
 0xe9d   :  { %v5140_v44 = vpack.c.bf16 %v5134_v54, %v5133_v53  ;;  %v9370_v53 = vld [vmem:[#allocation2 + $0x148] sm:$0xff]   ;;  %v9371_v54 = vld [vmem:[#allocation2 + $0x150] sm:$0xff]  }
 0xe9e   :  { %7990 = vmatprep.subr.bf16.mxu1 %v9370_v53 }
 0xe9f   :  { %7973 = vmatmul.mubr.msk.bf16.vlgmr.msra.gmra.mrb[64].mxu0 %vm3200_vm11, %v5140_v44  ;;  %7991 = vmatpush3.bf16.msra.mxu1 %v9370_v53  ;;  %v9372_v44 = vld [vmem:[#allocation2 + $0x1d8] sm:$0xff]  }
 0xea0   :  { %v9489_v40 = vpop.eup %9488  ;;  %7981 = vmatpush3.bf16.msra.mxu0 %v5242_v26  ;;  %7992 = vmatprep.subr.bf16.mxu1 %v9371_v54  ;;  %v9374_v26 = vld [vmem:[#allocation2 + $0x198] sm:$0xff]  }
 0xea1   :  { %v9491_v51 = vpop.eup %9490  ;;  %v5136_v13 = vmul.f32 %v9489_v40, %v9475_v28  ;;  %7564 = vmatprep.subr.bf16.mxu0 %v9374_v26  ;;  %v14653_v26 = vld [vmem:[#allocation40_spill] sm:$0xff] }
 0xea2   :  { %v5137_v18 = vmul.f32 %v9491_v51, %v9473_v48 }
 0xea3   :  { %v5141_v29 = vpack.c.bf16 %v5136_v13, %v5135_v5  ;;  %7993 = vmatpush3.bf16.msra.mxu1 %v9371_v54  ;;  %v9376_v13 = vld [vmem:[#allocation2 + $0x1a0] sm:$0xff]  }
 0xea4   :  { %v9493_v33 = vpop.eup %9492  ;;  %8002 = vmatprep.subr.bf16.mxu1 %v9372_v44 }
 0xea5   :  { %v5138_v22 = vmul.f32 %v9493_v33, %v9477_v25  ;;  %7976 = vmatprep.mubr.msk.bf16.mxu0 %vm3200_vm11, %v5141_v29  ;;  %v9377_v33 = vld [vmem:[#allocation2 + $0x160] sm:$0xff]  }
 0xea7   :  { %v5142_v46 = vpack.c.bf16 %v5138_v22, %v5137_v18 }
 0xea9   :  { %7977 = vmatmul.mubr.msk.bf16.gmra.mrb[68].mxu0 %vm3200_vm11, %v5142_v46 }
 0xf72   :  { %v7974_v19 = vpop.f32.mrb[64].mxu0 }
 0xf73   :  { %v5193_v6 = vpop.f32.mrb[65].mxu0 }
 0xf74   :  { %v7975_v60 = vpop.f32.mrb[66].mxu0 }
 0xf75   :  { %v5226_v7 = vpack.c.bf16 %v7975_v60, %v7974_v19  ;;  %v5196_v20 = vpop.f32.mrb[67].mxu0 }
 0xf76   :  { %v5225_v43 = vpack.c.bf16 %v5196_v20, %v5193_v6 }
 0xf78   :  { %7982 = vmatprep.mubr.msk.bf16.mxu0 %vm718_vm4, %v5225_v43 }
 0xf79   :  { %7983 = vmatmul.mubr.msk.bf16.vlgmr.msra.gmra.mrb[72].mxu0 %vm718_vm4, %v5226_v7 }
 0xf7a   :  { %7565 = vmatpush3.bf16.msra.mxu0 %v9375_v45 }
 0xf7b   :  { %7566 = vmatprep.subr.bf16.mxu0 %v9376_v13 }
 0xf7c   :  { %v7978_v58 = vpop.f32.mrb[68].mxu0 }
 0xf7d   :  { %v5209_v28 = vpop.f32.mrb[69].mxu0 }
 0xf7e   :  { %v7979_v35 = vpop.f32.mrb[70].mxu0  ;;  %7567 = vmatpush3.bf16.msra.mxu0 %v9377_v33 }
 0xf7f   :  { %v5228_v48 = vpack.c.bf16 %v7979_v35, %v7978_v58  ;;  %v5212_v25 = vpop.f32.mrb[71].mxu0  ;;  %v9379_v58 = vld [vmem:[#allocation2 + $0x168] sm:$0xff]  }
 0xf80   :  { %v5227_v36 = vpack.c.bf16 %v5212_v25, %v5209_v28  ;;  %v9373_v25 = vld [vmem:[#allocation2 + $0x1e0] sm:$0xff]  }
 0xf82   :  { %7986 = vmatprep.mubr.msk.bf16.mxu0 %vm718_vm4, %v5227_v36 }
 0xf83   :  { %7987 = vmatmul.mubr.msk.bf16.gmra.mrb[76].mxu0 %vm718_vm4, %v5228_v48 }
0x104c   :  { %v7984_v40 = vpop.f32.mrb[72].mxu0 }
0x104d   :  { %v12950_v51 = vadd.f32 %v7984_v40, %v12869_v55  ;;  %v5278_v5 = vpop.f32.mrb[73].mxu0 }
0x104e   :  { %v12953_v29 = vadd.f32 %v5278_v5, %v12855_v63  ;;  %v7985_v18 = vpop.f32.mrb[74].mxu0  ;;  %v9378_v63 = vld [vmem:[#allocation2 + $0x1a8] sm:$0xff]  }
0x104f   :  { %14649 = vst [vmem:[#allocation85_spill] sm:$0xff] %v12950_v51  ;;  %v12956_v22 = vmax.f32 %v12950_v51, 0.0  ;;  %v12959_v46 = vadd.f32 %v7985_v18, %v12871_v61  ;;  %v5281_v19 = vpop.f32.mrb[75].mxu0  ;;  %7568 = vmatprep.subr.bf16.mxu0 %v9378_v63 }
0x1050   :  { %14650 = vst [vmem:[#allocation55_spill] sm:$0xff] %v12953_v29  ;;  %v12962_v6 = vmax.f32 %v12953_v29, 0.0  ;;  %v12965_v55 = vadd.f32 %v5281_v19, %v12857_v34  ;;  %7569 = vmatpush3.bf16.msra.mxu0 %v9379_v58  ;;  %v9380_v19 = vld [vmem:[#allocation2 + $0x1b0] sm:$0xff]  }
0x1051   :  { %14651 = vst [vmem:[#allocation57_spill] sm:$0xff] %v12959_v46  ;;  %v12968_v60 = vmax.f32 %v12959_v46, 0.0  ;;  %v5314_v7 = vpack.c.bf16 %v12959_v46, %v12950_v51  ;;  %v5548_v43 = vmul.f32 %v12956_v22, %v14518_v56  ;;  %v5486_v34 = vmul.f32 %v12956_v22, %v14381_v24  ;;  %v14657_v46 = vld [vmem:[#allocation37_spill] sm:$0xff]  ;;  %7570 = vmatprep.subr.bf16.mxu0 %v9380_v19  ;;  %v14665_v19 = vld [vmem:[#allocation42_spill] sm:$0xff] }
0x1052   :  { %14652 = vst [vmem:[#allocation58_spill] sm:$0xff] %v12965_v55  ;;  %v5313_v61 = vpack.c.bf16 %v12965_v55, %v12953_v29  ;;  %v12975_v20 = vmax.f32 %v12965_v55, 0.0  ;;  %v5493_v35 = vrot.slane %v12956_v22, 1  ;;  %v14656_v13 = vrot.slane %v12962_v6, 1 }
0x1053   :  { %v5494_v48 = vrot.slane %v12968_v60, 1  ;;  %v5549_v45 = vmul.f32 %v12968_v60, %v14653_v26 }
0x1054   :  { %7994 = vmatprep.mubr.msk.bf16.mxu1 %vm1974_vm2, %v5313_v61  ;;  %v5547_v36 = vmul.f32 %v12975_v20, %v14517_v41  ;;  %v5485_v53 = vmul.f32 %v12975_v20, %v9727_v17  ;;  %v5492_v54 = vrot.slane %v12975_v20, 1  ;;  %v5460_v33 = vrot.slane %v12975_v20, 7  ;;  %v14678_v41 = vld [vmem:[#allocation30_spill] sm:$0xff]  ;;  %v14679_v17 = vld [vmem:[#allocation72_spill] sm:$0xff] }
0x1055   :  { %7995 = vmatmul.mubr.msk.bf16.vlgmr.msra.gmra.mrb[64].mxu1 %vm1974_vm2, %v5314_v7  ;;  %v12995_v5 = vsel %vm164_vm0, %v5493_v35, %v5494_v48 }
0x1056   :  { %v7988_v40 = vpop.f32.mrb[76].mxu0  ;;  %v9205_v28 = vpack.i.bf16 %v5548_v43, %v5547_v36  ;;  %v9210_v58 = vpack.i.bf16 %v5486_v34, %v5485_v53  ;;  %v5504_v7 = vsel %vm164_vm0, %v5492_v54, %v5493_v35  ;;  %8003 = vmatpush3.bf16.msra.mxu1 %v9372_v44  ;;  %v13012_v18 = vsel %vm164_vm0, %v14656_v13, %v5492_v54  ;;  %v14661_v35 = vld [vmem:[#allocation44_spill] sm:$0xff]  ;;  %v9381_v53 = vld [vmem:[#allocation2 + $0x170] sm:$0xff]  }
0x1057   :  { %v13001_v63 = vadd.f32 %v7988_v40, %v12899_v62  ;;  %v5294_v61 = vpop.f32.mrb[77].mxu0  ;;  %v5532_v62 = vmul.f32 %v5504_v7, %v14657_v46  ;;  %v14658_v40 = vld [vmem:[#allocation53_spill] sm:$0xff]  ;;  %8004 = vmatprep.subr.bf16.mxu1 %v9373_v25  ;;  %v5556_v36 = vmul.f32 %v12995_v5, %v14661_v35  ;;  %7571 = vmatpush3.bf16.msra.mxu0 %v9381_v53  ;;  %v14667_v53 = vld [vmem:[#allocation34_spill] sm:$0xff] }
0x1058   :  { %v13006_v55 = vadd.f32 %v5294_v61, %v12883_v15  ;;  %v7989_v29 = vpop.f32.mrb[78].mxu0  ;;  %v5555_v51 = vmul.f32 %v5504_v7, %v14658_v40  ;;  %9206 = vrot.lane.b32.xlu0 %v9205_v28, %s9568_s11  ;;  %9211 = vrot.lane.b32.xlu1 %v9210_v58, %s9564_s20  ;;  %v14660_v15 = vld [vmem:[#allocation28_spill] sm:$0xff]  ;;  %v14664_v28 = vrot.slane %v12962_v6, 7  ;;  %v9382_v58 = vld [vmem:[#allocation2 + $0x1b8] sm:$0xff]   ;;  %v5462_v40 = vrot.slane %v12968_v60, 7 }
0x1059   :  { %14654 = vst [vmem:[#allocation76_spill] sm:$0xff] %v13001_v63  ;;  %v13017_v43 = vadd.f32 %v7989_v29, %v12901_v9  ;;  %v5297_v34 = vpop.f32.mrb[79].mxu0  ;;  %v5531_v44 = vmul.f32 %v13012_v18, %v14660_v15  ;;  %v14663_v9 = vrot.slane %v12956_v22, 7  ;;  %v13044_v35 = vmax.f32 %v13001_v63, 0.0  ;;  %7572 = vmatprep.subr.bf16.mxu0 %v9382_v58 }
0x105a   :  { %14655 = vst [vmem:[#allocation77_spill] sm:$0xff] %v13006_v55  ;;  %v13026_v54 = vmax.f32 %v13006_v55, 0.0  ;;  %v13029_v13 = vadd.f32 %v5297_v34, %v12885_v3  ;;  %v13041_v61 = vsel %vm59_vm1, %v14664_v28, %v5460_v33  ;;  %8005 = vmatpush3.bf16.msra.mxu1 %v9373_v25  ;;  %v5841_v25 = vpack.c.bf16 %v5556_v36, %v5555_v51  ;;  %v9384_v51 = vld [vmem:[#allocation2 + $0x1c0] sm:$0xff]  }
0x105b   :  { %14659 = vst [vmem:[#allocation29_spill] sm:$0xff] %v13017_v43  ;;  %v13035_v29 = vsel %vm59_vm1, %v5460_v33, %v14663_v9  ;;  %v13047_v3 = vmax.f32 %v13017_v43, 0.0  ;;  %v9215_v34 = vpack.i.bf16 %v5532_v62, %v5531_v44  ;;  %v5316_v46 = vpack.c.bf16 %v13017_v43, %v13001_v63  ;;  %v14666_v62 = vld [vmem:[#allocation41_spill] sm:$0xff]  ;;  %v14669_v63 = vld [vmem:[#allocation11_spill] sm:$0xff] }
0x105c   :  { %14662 = vst [vmem:[#allocation24_spill] sm:$0xff] %v13029_v13  ;;  %v5495_v9 = vrot.slane %v13026_v54, 1  ;;  %v5315_v26 = vpack.c.bf16 %v13029_v13, %v13006_v55  ;;  %v13054_v33 = vmax.f32 %v13029_v13, 0.0  ;;  %v5550_v28 = vmul.f32 %v13026_v54, %v14665_v19  ;;  %v9383_v55 = vld [vmem:[#allocation2 + $0x178] sm:$0xff]   ;;  %v14668_v43 = vld [vmem:[#allocation9_spill] sm:$0xff] }
0x105d   :  { %9216 = vrot.lane.b32.xlu1 %v9215_v34, %s9564_s20  ;;  %v5539_v44 = vmul.f32 %v13041_v61, %v14666_v62  ;;  %v5540_v56 = vmul.f32 %v13035_v29, %v14667_v53  ;;  %v5483_v34 = vmul.f32 %v13047_v3, %v14668_v43  ;;  %v5484_v19 = vmul.f32 %v12962_v6, %v14669_v63  ;;  %v14670_v53 = vld [vmem:[#allocation16_spill] sm:$0xff]  ;;  %v14671_v62 = vld [vmem:[#allocation19_spill] sm:$0xff]  ;;  %v14680_v63 = vld [vmem:[#allocation22_spill] sm:$0xff] }
0x105e   :  { %v5496_v13 = vrot.slane %v13054_v33, 1  ;;  %7998 = vmatprep.mubr.msk.bf16.mxu1 %vm1974_vm2, %v5315_v26  ;;  %v9235_v24 = vpack.i.bf16 %v5550_v28, %v5549_v45  ;;  %v13069_v58 = vsel %vm164_vm0, %v5494_v48, %v5495_v9  ;;  %v5509_v15 = vmul.f32 %v5504_v7, %v14670_v53  ;;  %v14673_v7 = vld [vmem:[#allocation50_spill] sm:$0xff]  ;;  %7573 = vmatpush3.bf16.msra.mxu0 %v9383_v55 }
0x105f   :  { %7999 = vmatmul.mubr.msk.bf16.gmra.mrb[68].mxu1 %vm1974_vm2, %v5316_v46  ;;  %v9220_v36 = vpack.i.bf16 %v5540_v56, %v5539_v44  ;;  %v5510_v26 = vmul.f32 %v12995_v5, %v14671_v62  ;;  %v5497_v45 = vrot.slane %v13044_v35, 1  ;;  %v9240_v56 = vpack.i.bf16 %v5484_v19, %v5483_v34  ;;  %v14672_v46 = vld [vmem:[#allocation48_spill] sm:$0xff]  ;;  %7574 = vmatprep.subr.bf16.mxu0 %v9384_v51 }
0x1060   :  { %9236 = vrot.lane.b32.xlu0 %v9235_v24, %s9568_s11  ;;  %8006 = vmatprep.mubr.msk.bf16.mxu1 %vm1974_vm2, %v5841_v25  ;;  %v13083_v48 = vsel %vm164_vm0, %v5495_v9, %v5496_v13  ;;  %v5557_v28 = vmul.f32 %v13069_v58, %v14672_v46  ;;  %v5498_v43 = vrot.slane %v13047_v3, 1  ;;  %v14674_v24 = vld [vmem:[#allocation32_spill] sm:$0xff]  ;;  %v14675_v62 = vrot.slane %v12956_v22, 7 }
0x1061   :  { %9221 = vrot.lane.b32.xlu1 %v9220_v36, %s9543_s25  ;;  %v5558_v44 = vmul.f32 %v13083_v48, %v14673_v7  ;;  %v5534_v25 = vmul.f32 %v13069_v58, %v14674_v24  ;;  %v13096_v9 = vsel %vm164_vm0, %v5496_v13, %v5497_v45  ;;  %v5463_v34 = vrot.slane %v13026_v54, 7  ;;  %v9385_v36 = vld [vmem:[#allocation2 + $0x180] sm:$0xff]   ;;  %v14676_v24 = vld [vmem:[#allocation67_spill] sm:$0xff] }
0x1062   :  { %v13102_v19 = vsel %vm59_vm1, %v14675_v62, %v5462_v40  ;;  %v9225_v7 = vpack.i.bf16 %v5510_v26, %v5509_v15  ;;  %v13107_v55 = vsel %vm164_vm0, %v5497_v45, %v5498_v43  ;;  %v5559_v46 = vmul.f32 %v13096_v9, %v14676_v24  ;;  %v14677_v13 = vld [vmem:[#allocation20_spill] sm:$0xff]  ;;  %7575 = vmatpush3.bf16.msra.mxu0 %v9385_v36 }
0x1063   :  { %v5517_v53 = vmul.f32 %v13035_v29, %v14677_v13  ;;  %v5533_v62 = vmul.f32 %v12995_v5, %v14678_v41  ;;  %v5560_v51 = vmul.f32 %v13107_v55, %v14679_v17  ;;  %v5518_v15 = vmul.f32 %v13102_v19, %v14680_v63  ;;  %v14682_v41 = vld [vmem:[#allocation43_spill] sm:$0xff]  ;;  %7576 = vmatprep.subr.bf16.mxu0 %v9386_v31  ;;  %v14690_v31 = vld [vmem:[#allocation25_spill] sm:$0xff] }
0x1064   :  { %9241 = vrot.lane.b32.xlu0 %v9240_v56, %s9564_s20  ;;  %v13122_v26 = vsel %vm59_vm1, %v5462_v40, %v5463_v34  ;;  %v5844_v45 = vpack.c.bf16 %v5558_v44, %v5557_v28  ;;  %v14681_v24 = vrot.slane %v12962_v6, 1  ;;  %v14683_v40 = vld [vmem:[#allocation17_spill] sm:$0xff]  ;;  %v14684_v28 = vld [vmem:[#allocation36_spill] sm:$0xff]  ;;  %v14686_v36 = vrot.slane %v12962_v6, 7 }
0x1065   :  { %9226 = vrot.lane.b32.xlu1 %v9225_v7, %s9543_s25  ;;  %v9245_v13 = vpack.i.bf16 %v5534_v25, %v5533_v62  ;;  %v5847_v5 = vpack.c.bf16 %v5560_v51, %v5559_v46  ;;  %v5542_v17 = vmul.f32 %v13122_v26, %v14682_v41  ;;  %v9230_v63 = vpack.i.bf16 %v5518_v15, %v5517_v53  ;;  %v14685_v7 = vld [vmem:[#allocation14_spill] sm:$0xff]  ;;  %v14687_v15 = vld [vmem:[#allocation69_spill] sm:$0xff] }
0x1066   :  { %v5506_v56 = vsel %vm164_vm0, %v5498_v43, %v14681_v24  ;;  %v5541_v43 = vmul.f32 %v13102_v19, %v14684_v28  ;;  %v5466_v46 = vrot.slane %v13047_v3, 7  ;;  %v5508_v44 = vmul.f32 %v13012_v18, %v14685_v7  ;;  %v9388_v62 = vld [vmem:[#allocation2 + $0x1d0] sm:$0xff]   ;;  %7577 = vmatpush3.bf16.msra.mxu0 %v9387_v39  ;;  %v14692_v28 = vld [vmem:[#allocation39_spill] sm:$0xff] }
0x1067   :  { %8007 = vmatmul.mubr.msk.bf16.vlgmr.msra.gmra.mrb[72].mxu1 %vm1974_vm2, %v5844_v45  ;;  %v5507_v57 = vmul.f32 %v5506_v56, %v14683_v40  ;;  %v5561_v24 = vmul.f32 %v5506_v56, %v14608_v42  ;;  %v5551_v25 = vmul.f32 %v13054_v33, %v14607_v21  ;;  %v14688_v45 = vld [vmem:[#allocation18_spill] sm:$0xff]  ;;  %v14691_v21 = vld [vmem:[#allocation61_spill] sm:$0xff]  ;;  %v5536_v39 = vmul.f32 %v13096_v9, %v14692_v28  ;;  %v14693_v40 = vld [vmem:[#allocation12_spill] sm:$0xff] }
0x1068   :  { %9246 = vrot.lane.b32.xlu0 %v9245_v13, %s9564_s20  ;;  %8010 = vmatprep.mubr.msk.bf16.mxu1 %vm1974_vm2, %v5847_v5  ;;  %v9250_v53 = vpack.i.bf16 %v5542_v17, %v5541_v43  ;;  %v13148_v13 = vsel %vm59_vm1, %v5466_v46, %v14686_v36  ;;  %v5464_v17 = vrot.slane %v13054_v33, 7  ;;  %v14689_v43 = vld [vmem:[#allocation51_spill] sm:$0xff]  ;;  %v5535_v41 = vmul.f32 %v13083_v48, %v14691_v21 }
0x1069   :  { %9231 = vrot.lane.b32.xlu1 %v9230_v63, %s9568_s11  ;;  %v9255_v51 = vpack.i.bf16 %v5508_v44, %v5507_v57  ;;  %v5562_v63 = vmul.f32 %v13012_v18, %v14687_v15  ;;  %v5515_v5 = vmul.f32 %v13148_v13, %v14688_v45  ;;  %v5552_v42 = vmul.f32 %v13044_v35, %v14689_v43  ;;  %v14697_v45 = vld [vmem:[#allocation15_spill] sm:$0xff] }
0x106a   :  { %v5516_v57 = vmul.f32 %v13041_v61, %v14690_v31  ;;  %v5465_v44 = vrot.slane %v13044_v35, 7  ;;  %7578 = vmatprep.subr.bf16.mxu0 %v9388_v62 }
0x106b   :  { %v5850_v36 = vpack.c.bf16 %v5562_v63, %v5561_v24  ;;  %v9270_v18 = vpack.i.bf16 %v5552_v42, %v5551_v25  ;;  %v5488_v24 = vmul.f32 %v13026_v54, %v14693_v40  ;;  %v13175_v42 = vsel %vm59_vm1, %v5463_v34, %v5464_v17  ;;  %v14694_v25 = vld [vmem:[#allocation46_spill] sm:$0xff] }
0x106c   :  { %9251 = vrot.lane.b32.xlu0 %v9250_v53, %s9543_s25  ;;  %v9389_v53 = vld [vmem:[#allocation2 + $0x190] sm:$0xff]   ;;  %v9260_v43 = vpack.i.bf16 %v5516_v57, %v5515_v5  ;;  %v5487_v62 = vmul.f32 %v12968_v60, %v14694_v25  ;;  %v9275_v63 = vpack.i.bf16 %v5536_v39, %v5535_v41  ;;  %v14695_v5 = vld [vmem:[#allocation45_spill] sm:$0xff]  ;;  %v14696_v57 = vld [vmem:[#allocation64_spill] sm:$0xff]  ;;  %v5489_v34 = vmul.f32 %v13054_v33, %v14697_v45 }
0x106d   :  { %9256 = vrot.lane.b32.xlu1 %v9255_v51, %s9543_s25  ;;  %v13171_v51 = vsel %vm59_vm1, %v5464_v17, %v5465_v44  ;;  %7579 = vmatpush3.bf16.msra.mxu0 %v9389_v53  ;;  %v14698_v17 = vld [vmem:[#allocation52_spill] sm:$0xff]  ;;  %v14699_v41 = vld [vmem:[#allocation62_spill] sm:$0xff] }
0x106e   :  { %v5544_v28 = vmul.f32 %v13171_v51, %v14696_v57  ;;  %v9265_v21 = vpack.i.bf16 %v5488_v24, %v5487_v62  ;;  %v5537_v39 = vmul.f32 %v13107_v55, %v14699_v41  ;;  %v14701_v57 = vld [vmem:[#allocation54_spill] sm:$0xff]  ;;  %v13198_v24 = vsel %vm59_vm1, %v5465_v44, %v5466_v46  ;;  %v14704_v46 = vld [vmem:[#allocation56_spill] sm:$0xff] }
0x106f   :  { %8011 = vmatmul.mubr.msk.bf16.gmra.mrb[76].mxu1 %vm1974_vm2, %v5850_v36  ;;  %v5543_v36 = vmul.f32 %v13175_v42, %v14695_v5  ;;  %v14700_v5 = vld [vmem:[#allocation63_spill] sm:$0xff]  ;;  %v5512_v53 = vmul.f32 %v13083_v48, %v14701_v57  ;;  %v5519_v44 = vmul.f32 %v13122_v26, %v14704_v46 }
0x1070   :  { %9271 = vrot.lane.b32.xlu0 %v9270_v18, %s9568_s11  ;;  %v5538_v40 = vmul.f32 %v5506_v56, %v14700_v5  ;;  %v5546_v56 = vmul.f32 %v13148_v13, %v14621_v4  ;;  %v14703_v48 = vld [vmem:[#allocation27_spill] sm:$0xff] }
0x1071   :  { %9261 = vrot.lane.b32.xlu1 %v9260_v43, %s9568_s11  ;;  %v5490_v43 = vmul.f32 %v13044_v35, %v14698_v17  ;;  %v9280_v18 = vpack.i.bf16 %v5544_v28, %v5543_v36 }
0x1072   :  { %v9285_v62 = vpack.i.bf16 %v5538_v40, %v5537_v39  ;;  %v14705_v39 = vld [vmem:[#allocation70_spill] sm:$0xff] }
0x1073   :  { %v9290_v25 = vpack.i.bf16 %v5490_v43, %v5489_v34  ;;  %v5520_v34 = vmul.f32 %v13175_v42, %v14703_v48  ;;  %v5513_v43 = vmul.f32 %v13096_v9, %v14624_v10 }
0x1074   :  { %9276 = vrot.lane.b32.xlu0 %v9275_v63, %s9564_s20  ;;  %v5545_v63 = vmul.f32 %v13198_v24, %v14622_v49 }
0x1075   :  { %9266 = vrot.lane.b32.xlu1 %v9265_v21, %s9564_s20  ;;  %v14702_v21 = vld [vmem:[#allocation21_spill] sm:$0xff]  ;;  %v9310_v40 = vpack.i.bf16 %v5520_v34, %v5519_v44 }
0x1076   :  { %v5511_v28 = vmul.f32 %v13069_v58, %v14702_v21  ;;  %v5553_v58 = vmul.f32 %v13047_v3, %v14626_v59 }
0x1078   :  { %9281 = vrot.lane.b32.xlu0 %v9280_v18, %s9543_s25  ;;  %v9305_v36 = vpack.i.bf16 %v5512_v53, %v5511_v28  ;;  %v5514_v18 = vmul.f32 %v13107_v55, %v14625_v52  ;;  %v5554_v53 = vmul.f32 %v12962_v6, %v14705_v39 }
0x1079   :  { %9291 = vrot.lane.b32.xlu1 %v9290_v25, %s9564_s20  ;;  %v9295_v25 = vpack.i.bf16 %v5546_v56, %v5545_v63  ;;  %v5521_v63 = vmul.f32 %v13171_v51, %v14627_v47  ;;  %v5522_v56 = vmul.f32 %v13198_v24, %v14628_v37 }
0x107a   :  { %v9300_v28 = vpack.i.bf16 %v5554_v53, %v5553_v58 }
0x107b   :  { %v9320_v9 = vpack.i.bf16 %v5522_v56, %v5521_v63 }
0x107c   :  { %9286 = vrot.lane.b32.xlu0 %v9285_v62, %s9564_s20  ;;  %v9315_v62 = vpack.i.bf16 %v5514_v18, %v5513_v43  ;;  %v5524_v43 = vmul.f32 %v12975_v20, %v14632_v27 }
0x107d   :  { %9306 = vrot.lane.b32.xlu1 %v9305_v36, %s9543_s25 }
0x1080   :  { %9296 = vrot.lane.b32.xlu0 %v9295_v25, %s9543_s25 }
0x1081   :  { %9311 = vrot.lane.b32.xlu1 %v9310_v40, %s9568_s11  ;;  %v5523_v40 = vmul.f32 %v12962_v6, %v14631_v16 }
0x1084   :  { %9301 = vrot.lane.b32.xlu0 %v9300_v28, %s9568_s11 }
0x1085   :  { %9316 = vrot.lane.b32.xlu1 %v9315_v62, %s9543_s25 }
0x1089   :  { %9321 = vrot.lane.b32.xlu1 %v9320_v9, %s9568_s11 }
0x10ca   :  { %v9212_v55 = vpop.permute.xlu1 %9211  ;;  %v9207_v36 = vpop.permute.xlu0 %9206 }
0x10cb   :  { %v9209_v4 = vunpack.i.h.bf16 %v9207_v36  ;;  %v9208_v62 = vunpack.i.l.bf16 %v9207_v36  ;;  %v9214_v59 = vunpack.i.h.bf16 %v9212_v55  ;;  %v9213_v5 = vunpack.i.l.bf16 %v9212_v55 }
0x10cc   :  { %v5478_v36 = vmul.f32 %v13035_v29, %v14630_v0 }
0x10ce   :  { %v5758_v55 = vsel %vm1974_vm2, %v5478_v36, %v9214_v59 }
0x10cf   :  { %v9217_v34 = vpop.permute.xlu1 %9216 }
0x10d0   :  { %v9219_v44 = vunpack.i.h.bf16 %v9217_v34  ;;  %v9218_v25 = vunpack.i.l.bf16 %v9217_v34 }
0x10d2   :  { %v9237_v58 = vpop.permute.xlu0 %9236  ;;  %v5780_v63 = vsel %vm1974_vm2, %v5524_v43, %v9219_v44  ;;  %v5779_v56 = vsel %vm1974_vm2, %v5523_v40, %v9218_v25  ;;  %v5477_v44 = vmul.f32 %v13041_v61, %v14629_v11  ;;  %v5525_v61 = vmul.f32 %v12956_v22, %v14635_v30 }
0x10d3   :  { %v9222_v18 = vpop.permute.xlu1 %9221 }
0x10d4   :  { %v9224_v53 = vunpack.i.h.bf16 %v9222_v18  ;;  %v9223_v28 = vunpack.i.l.bf16 %v9222_v18  ;;  %v5757_v18 = vsel %vm1974_vm2, %v5477_v44, %v9213_v5 }
0x10d6   :  { %v5788_v9 = vsel %vm3200_vm11, %v5780_v63, %v9224_v53  ;;  %v5787_v34 = vsel %vm3200_vm11, %v5779_v56, %v9223_v28  ;;  %v9242_v49 = vpop.permute.xlu0 %9241  ;;  %v9239_v56 = vunpack.i.h.bf16 %v9237_v58 }
0x10d7   :  { %v9227_v6 = vpop.permute.xlu1 %9226  ;;  %v5795_v41 = vsel %vm4351_vm10, %v5787_v34, %v9208_v62  ;;  %v5796_v20 = vsel %vm4351_vm10, %v5788_v9, %v9209_v4  ;;  %v9238_v34 = vunpack.i.l.bf16 %v9237_v58  ;;  %v5476_v58 = vmul.f32 %v13148_v13, %v14634_v50 }
0x10d8   :  { %v5840_v52 = vpack.c.bf16 %v5796_v20, %v5795_v41  ;;  %v9229_v25 = vunpack.i.h.bf16 %v9227_v6  ;;  %v9228_v40 = vunpack.i.l.bf16 %v9227_v6 }
0x10da   :  { %v9247_v43 = vpop.permute.xlu0 %9246  ;;  %6008 = vmatprep.mubr.bf16.mxu0 %v5840_v52  ;;  %v5766_v41 = vsel %vm3200_vm11, %v5758_v55, %v9229_v25  ;;  %v5765_v29 = vsel %vm3200_vm11, %v5757_v18, %v9228_v40  ;;  %v5526_v52 = vmul.f32 %v12968_v60, %v14636_v8  ;;  %v9244_v25 = vunpack.i.h.bf16 %v9242_v49 }
0x10db   :  { %v9232_v53 = vpop.permute.xlu1 %9231  ;;  %v9249_v28 = vunpack.i.h.bf16 %v9247_v43  ;;  %v9248_v62 = vunpack.i.l.bf16 %v9247_v43  ;;  %v9243_v43 = vunpack.i.l.bf16 %v9242_v49 }
0x10dc   :  { %v9234_v63 = vunpack.i.h.bf16 %v9232_v53  ;;  %v9233_v4 = vunpack.i.l.bf16 %v9232_v53 }
0x10dd   :  { %v5782_v40 = vsel %vm1974_vm2, %v5526_v52, %v9249_v28  ;;  %v5781_v22 = vsel %vm1974_vm2, %v5525_v61, %v9248_v62  ;;  %v5756_v62 = vsel %vm1974_vm2, %v5476_v58, %v9244_v25  ;;  %v5527_v25 = vmul.f32 %v13026_v54, %v14637_v14 }
0x10de   :  { %v9252_v9 = vpop.permute.xlu0 %9251  ;;  %v5773_v5 = vsel %vm4351_vm10, %v5765_v29, %v9233_v4  ;;  %v5774_v59 = vsel %vm4351_vm10, %v5766_v41, %v9234_v63  ;;  %v5475_v63 = vmul.f32 %v13198_v24, %v14633_v38 }
0x10df   :  { %v9254_v6 = vunpack.i.h.bf16 %v9252_v9  ;;  %v9253_v20 = vunpack.i.l.bf16 %v9252_v9  ;;  %v9257_v36 = vpop.permute.xlu1 %9256  ;;  %v5842_v44 = vpack.c.bf16 %v5774_v59, %v5773_v5 }
0x10e0   :  { %v9259_v55 = vunpack.i.h.bf16 %v9257_v36  ;;  %v9258_v53 = vunpack.i.l.bf16 %v9257_v36  ;;  %v5755_v61 = vsel %vm1974_vm2, %v5475_v63, %v9243_v43  ;;  %v5528_v43 = vmul.f32 %v13054_v33, %v14638_v2 }
0x10e1   :  { %v5790_v18 = vsel %vm3200_vm11, %v5782_v40, %v9254_v6  ;;  %v5789_v60 = vsel %vm3200_vm11, %v5781_v22, %v9253_v20 }
0x10e2   :  { %v9272_v4 = vpop.permute.xlu0 %9271  ;;  %v5797_v41 = vsel %vm4351_vm10, %v5789_v60, %v9238_v34  ;;  %v5798_v49 = vsel %vm4351_vm10, %v5790_v18, %v9239_v56  ;;  %v5763_v5 = vsel %vm3200_vm11, %v5755_v61, %v9258_v53  ;;  %v5764_v24 = vsel %vm3200_vm11, %v5756_v62, %v9259_v55 }
0x10e3   :  { %v9262_v28 = vpop.permute.xlu1 %9261  ;;  %v5843_v29 = vpack.c.bf16 %v5798_v49, %v5797_v41  ;;  %v9274_v55 = vunpack.i.h.bf16 %v9272_v4  ;;  %v9273_v53 = vunpack.i.l.bf16 %v9272_v4  ;;  %v5480_v4 = vmul.f32 %v13122_v26, %v10183_v1 }
0x10e4   :  { %v9264_v52 = vunpack.i.h.bf16 %v9262_v28  ;;  %v9263_v9 = vunpack.i.l.bf16 %v9262_v28 }
0x10e6   :  { %v5771_v59 = vsel %vm4351_vm10, %v5763_v5, %v9263_v9  ;;  %v5772_v13 = vsel %vm4351_vm10, %v5764_v24, %v9264_v52  ;;  %v9277_v6 = vpop.permute.xlu0 %9276  ;;  %v5479_v9 = vmul.f32 %v13102_v19, %v10172_v12  ;;  %v14706_v19 = vld [vmem:[#allocation60_spill] sm:$0xff] }
0x10e7   :  { %v5839_v34 = vpack.c.bf16 %v5772_v13, %v5771_v59  ;;  %v9267_v20 = vpop.permute.xlu1 %9266  ;;  %v9279_v56 = vunpack.i.h.bf16 %v9277_v6  ;;  %v9278_v36 = vunpack.i.l.bf16 %v9277_v6 }
0x10e8   :  { %v9269_v62 = vunpack.i.h.bf16 %v9267_v20 }
0x10e9   :  { %6009 = vmatmul.mubr.bf16.vlgmr.msra.gmra.mrb[80].mxu0 %v5839_v34  ;;  %v5784_v63 = vsel %vm1974_vm2, %v5528_v43, %v9279_v56  ;;  %v5783_v58 = vsel %vm1974_vm2, %v5527_v25, %v9278_v36 }
0x10ea   :  { %v9282_v40 = vpop.permute.xlu0 %9281  ;;  %6016 = vmatprep.mubr.bf16.mxu0 %v5843_v29  ;;  %v9268_v29 = vunpack.i.l.bf16 %v9267_v20  ;;  %v5760_v34 = vsel %vm1974_vm2, %v5480_v4, %v9269_v62  ;;  %v5530_v20 = vmul.f32 %v13047_v3, %v14640_v23 }
0x10eb   :  { %v9284_v22 = vunpack.i.h.bf16 %v9282_v40  ;;  %v9283_v18 = vunpack.i.l.bf16 %v9282_v40  ;;  %v9292_v60 = vpop.permute.xlu1 %9291 }
0x10ec   :  { %v5759_v6 = vsel %vm1974_vm2, %v5479_v9, %v9268_v29  ;;  %v9293_v62 = vunpack.i.l.bf16 %v9292_v60 }
0x10ed   :  { %v5792_v41 = vsel %vm3200_vm11, %v5784_v63, %v9284_v22  ;;  %v5791_v49 = vsel %vm3200_vm11, %v5783_v58, %v9283_v18  ;;  %v5529_v22 = vmul.f32 %v13044_v35, %v14706_v19 }
0x10ee   :  { %v9287_v28 = vpop.permute.xlu0 %9286  ;;  %v5799_v54 = vsel %vm4351_vm10, %v5791_v49, %v9273_v53  ;;  %v5800_v33 = vsel %vm4351_vm10, %v5792_v41, %v9274_v55 }
0x10ef   :  { %v9307_v61 = vpop.permute.xlu1 %9306  ;;  %v5846_v52 = vpack.c.bf16 %v5800_v33, %v5799_v54  ;;  %v9289_v59 = vunpack.i.h.bf16 %v9287_v28  ;;  %v9288_v56 = vunpack.i.l.bf16 %v9287_v28  ;;  %v9294_v33 = vunpack.i.h.bf16 %v9292_v60 }
0x10f0   :  { %v9309_v5 = vunpack.i.h.bf16 %v9307_v61  ;;  %v9308_v24 = vunpack.i.l.bf16 %v9307_v61 }
0x10f1   :  { %6017 = vmatmul.mubr.bf16.gmra.mrb[84].mxu0 %v5842_v44  ;;  %v5786_v55 = vsel %vm1974_vm2, %v5530_v20, %v9289_v59  ;;  %v5785_v58 = vsel %vm1974_vm2, %v5529_v22, %v9288_v56  ;;  %v14708_v59 = vld [vmem:[#allocation75_spill] sm:$0xff] }
0x10f2   :  { %v9297_v13 = vpop.permute.xlu0 %9296  ;;  %6024 = vmatprep.mubr.bf16.mxu0 %v5846_v52  ;;  %v5767_v44 = vsel %vm3200_vm11, %v5759_v6, %v9308_v24  ;;  %v5768_v18 = vsel %vm3200_vm11, %v5760_v34, %v9309_v5  ;;  %v14707_v5 = vld [vmem:[#allocation78_spill] sm:$0xff] }
0x10f3   :  { %v9312_v36 = vpop.permute.xlu1 %9311  ;;  %v9299_v25 = vunpack.i.h.bf16 %v9297_v13  ;;  %v9298_v26 = vunpack.i.l.bf16 %v9297_v13  ;;  %v5482_v24 = vmul.f32 %v13171_v51, %v14707_v5  ;;  %v5481_v13 = vmul.f32 %v13175_v42, %v14708_v59  ;;  %v7311_v42 = vld [vmem:[%s13919_s3 + $0xa] ss:$0 sm:$0xff] }
0x10f4   :  { %v9314_v43 = vunpack.i.h.bf16 %v9312_v36  ;;  %v9313_v40 = vunpack.i.l.bf16 %v9312_v36 }
0x10f5   :  { %v5793_v35 = vsel %vm3200_vm11, %v5785_v58, %v9298_v26  ;;  %v5794_v29 = vsel %vm3200_vm11, %v5786_v55, %v9299_v25  ;;  %v5762_v60 = vsel %vm1974_vm2, %v5482_v24, %v9294_v33  ;;  %v5761_v20 = vsel %vm1974_vm2, %v5481_v13, %v9293_v62 }
0x10f6   :  { %v9302_v53 = vpop.permute.xlu0 %9301  ;;  %v5775_v63 = vsel %vm4351_vm10, %v5767_v44, %v9313_v40  ;;  %v5776_v3 = vsel %vm4351_vm10, %v5768_v18, %v9314_v43 }
0x10f7   :  { %v9304_v41 = vunpack.i.h.bf16 %v9302_v53  ;;  %v9303_v49 = vunpack.i.l.bf16 %v9302_v53  ;;  %v9317_v28 = vpop.permute.xlu1 %9316  ;;  %v5845_v54 = vpack.c.bf16 %v5776_v3, %v5775_v63 }
0x10f8   :  { %v9319_v61 = vunpack.i.h.bf16 %v9317_v28  ;;  %v9318_v52 = vunpack.i.l.bf16 %v9317_v28 }
0x10f9   :  { %6025 = vmatmul.mubr.bf16.gmra.mrb[88].mxu0 %v5845_v54  ;;  %v5801_v4 = vsel %vm4351_vm10, %v5793_v35, %v9303_v49  ;;  %v5802_v9 = vsel %vm4351_vm10, %v5794_v29, %v9304_v41 }
0x10fa   :  { %v5849_v6 = vpack.c.bf16 %v5802_v9, %v5801_v4  ;;  %v5770_v25 = vsel %vm3200_vm11, %v5762_v60, %v9319_v61  ;;  %v5769_v26 = vsel %vm3200_vm11, %v5761_v20, %v9318_v52  ;;  %v9390_v60 = vld [vmem:[#allocation2 + $0x228] sm:$0xff]  }
0x10fb   :  { %v9322_v34 = vpop.permute.xlu1 %9321  ;;  %v9391_v20 = vld [vmem:[#allocation2 + $0x2a8] sm:$0xff]   ;;  %7610 = vmatprep.subr.bf16.mxu1 %v9390_v60  ;;  %v9416_v60 = vld [vmem:[#allocation2 + $0x218] sm:$0xff]  }
0x10fc   :  { %v9324_v56 = vunpack.i.h.bf16 %v9322_v34  ;;  %v9323_v36 = vunpack.i.l.bf16 %v9322_v34  ;;  %6032 = vmatprep.mubr.bf16.mxu0 %v5849_v6  ;;  %7650 = vmatprep.subr.bf16.mxu0 %v9391_v20  ;;  %v9417_v20 = vld [vmem:[#allocation2 + $0x298] sm:$0xff]  }
0x10fe   :  { %v5777_v43 = vsel %vm4351_vm10, %v5769_v26, %v9323_v36  ;;  %v5778_v51 = vsel %vm4351_vm10, %v5770_v25, %v9324_v56  ;;  %v9392_v56 = vld [vmem:[#allocation2 + $0x1e8] sm:$0xff]   ;;  %v9394_v25 = vld [vmem:[#allocation2 + $0x230] sm:$0xff]  }
0x10ff   :  { %v5848_v40 = vpack.c.bf16 %v5778_v51, %v5777_v43  ;;  %v9393_v36 = vld [vmem:[#allocation2 + $0x268] sm:$0xff]   ;;  %v9395_v26 = vld [vmem:[#allocation2 + $0x2b0] sm:$0xff]   ;;  %7611 = vmatpush3.bf16.msra.mxu1 %v9392_v56  ;;  %v9418_v56 = vld [vmem:[#allocation2 + $0x260] sm:$0xff]  }
0x1100   :  { %7651 = vmatpush3.bf16.msra.mxu0 %v9393_v36  ;;  %v9396_v43 = vld [vmem:[#allocation2 + $0x1f0] sm:$0xff]   ;;  %7612 = vmatprep.subr.bf16.mxu1 %v9394_v25  ;;  %v9419_v36 = vld [vmem:[#allocation2 + $0x2e0] sm:$0xff]  }
0x1101   :  { %6033 = vmatmul.mubr.bf16.gmra.mrb[92].mxu0 %v5848_v40  ;;  %v9397_v51 = vld [vmem:[#allocation2 + $0x270] sm:$0xff]   ;;  %7652 = vmatprep.subr.bf16.mxu0 %v9395_v26  ;;  %v9398_v40 = vld [vmem:[#allocation2 + $0x238] sm:$0xff]   ;;  %v9420_v25 = vld [vmem:[#allocation2 + $0x220] sm:$0xff]  }
0x1102   :  { %v9421_v26 = vld [vmem:[#allocation2 + $0x2a0] sm:$0xff]  }
0x1103   :  { %7613 = vmatpush3.bf16.msra.mxu1 %v9396_v43  ;;  %v9422_v43 = vld [vmem:[#allocation2 + $0x328] sm:$0xff]  }
0x1104   :  { %7653 = vmatpush3.bf16.msra.mxu0 %v9397_v51  ;;  %7614 = vmatprep.subr.bf16.mxu1 %v9398_v40  ;;  %v9423_v51 = vld [vmem:[#allocation2 + $0x3a8] sm:$0xff]  }
0x1128   :  { %v7996_v22 = vpop.f32.mrb[64].mxu1 }
0x1129   :  { %v5389_v44 = vadd.f32 %v7996_v22, %v7311_v42  ;;  %v5380_v18 = vpop.f32.mrb[65].mxu1  ;;  %v9400_v22 = vld [vmem:[#allocation2 + $0x1f8] sm:$0xff]  }
0x112a   :  { %v7997_v55 = vpop.f32.mrb[66].mxu1  ;;  %v5381_v3 = vadd.f32 %v7311_v42, %v5380_v18  ;;  %v9402_v18 = vld [vmem:[#allocation2 + $0x240] sm:$0xff]   ;;  %7615 = vmatpush3.bf16.msra.mxu1 %v9400_v22 }
0x112b   :  { %v5392_v53 = vadd.f32 %v7997_v55, %v7311_v42  ;;  %v5383_v63 = vpop.f32.mrb[67].mxu1  ;;  %5423 = vrot.lane.b32.xlu0 %v5389_v44, %s9564_s20  ;;  %v9401_v44 = vld [vmem:[#allocation2 + $0x278] sm:$0xff]   ;;  %v9403_v55 = vld [vmem:[#allocation2 + $0x2c0] sm:$0xff]   ;;  %7616 = vmatprep.subr.bf16.mxu1 %v9402_v18 }
0x112c   :  { %v5384_v58 = vadd.f32 %v7311_v42, %v5383_v63  ;;  %v9405_v63 = vld [vmem:[#allocation2 + $0x280] sm:$0xff]  }
0x112d   :  { %5425 = vrot.lane.b32.xlu1 %v5392_v53, %s9564_s20  ;;  %v9404_v53 = vld [vmem:[#allocation2 + $0x200] sm:$0xff]  }
0x112e   :  { %7617 = vmatpush3.bf16.msra.mxu1 %v9404_v53 }
0x112f   :  { %5419 = vrot.lane.b32.xlu0 %v5381_v3, %s9564_s20  ;;  %v9406_v3 = vld [vmem:[#allocation2 + $0x248] sm:$0xff]  }
0x1130   :  { %7618 = vmatprep.subr.bf16.mxu1 %v9406_v3 }
0x1131   :  { %5421 = vrot.lane.b32.xlu1 %v5384_v58, %s9564_s20  ;;  %v9407_v58 = vld [vmem:[#allocation2 + $0x2c8] sm:$0xff]  }
0x1132   :  { %v8000_v41 = vpop.f32.mrb[68].mxu1 }
0x1133   :  { %v5396_v49 = vpop.f32.mrb[69].mxu1  ;;  %v5405_v35 = vadd.f32 %v8000_v41, %v7311_v42  ;;  %v9408_v41 = vld [vmem:[#allocation2 + $0x208] sm:$0xff]  }
0x1134   :  { %v5397_v28 = vadd.f32 %v7311_v42, %v5396_v49  ;;  %v8001_v54 = vpop.f32.mrb[70].mxu1  ;;  %v9409_v49 = vld [vmem:[#allocation2 + $0x288] sm:$0xff]   ;;  %7619 = vmatpush3.bf16.msra.mxu1 %v9408_v41 }
0x1135   :  { %v5399_v33 = vpop.f32.mrb[71].mxu1  ;;  %v5408_v29 = vadd.f32 %v8001_v54, %v7311_v42  ;;  %v9411_v54 = vld [vmem:[#allocation2 + $0x2d0] sm:$0xff]  }
0x1136   :  { %v5400_v62 = vadd.f32 %v7311_v42, %v5399_v33  ;;  %5427 = vrot.lane.b32.xlu0 %v5397_v28, %s9564_s20  ;;  %v9399_v42 = vld [vmem:[#allocation2 + $0x2b8] sm:$0xff]   ;;  %v9410_v28 = vld [vmem:[#allocation2 + $0x250] sm:$0xff]  }
0x1137   :  { %7654 = vmatprep.subr.bf16.mxu0 %v9399_v42  ;;  %v9412_v33 = vld [vmem:[#allocation2 + $0x210] sm:$0xff]   ;;  %7620 = vmatprep.subr.bf16.mxu1 %v9410_v28  ;;  %v13341_v42 = vld [vmem:[%s13919_s3 + $0xb] ss:$0 sm:$0xff] }
0x1138   :  { %5429 = vrot.lane.b32.xlu1 %v5400_v62, %s9564_s20  ;;  %7655 = vmatpush3.bf16.msra.mxu0 %v9401_v44  ;;  %v9413_v62 = vld [vmem:[#allocation2 + $0x290] sm:$0xff]  }
0x1139   :  { %7656 = vmatprep.subr.bf16.mxu0 %v9403_v55  ;;  %7621 = vmatpush3.bf16.msra.mxu1 %v9412_v33 }
0x113a   :  { %v13320_v61 = vpop.f32.mrb[72].mxu1  ;;  %5431 = vrot.lane.b32.xlu0 %v5405_v35, %s9564_s20  ;;  %v9414_v35 = vld [vmem:[#allocation2 + $0x258] sm:$0xff]  }
0x113b   :  { %v13323_v52 = vpop.f32.mrb[73].mxu1  ;;  %7622 = vmatprep.subr.bf16.mxu1 %v9414_v35 }
0x113c   :  { %v13325_v4 = vpop.f32.mrb[74].mxu1  ;;  %5433 = vrot.lane.b32.xlu1 %v5408_v29, %s9564_s20  ;;  %7657 = vmatpush3.bf16.msra.mxu0 %v9405_v63  ;;  %v9415_v29 = vld [vmem:[#allocation2 + $0x2d8] sm:$0xff]  }
0x113d   :  { %v13328_v9 = vpop.f32.mrb[75].mxu1  ;;  %7658 = vmatprep.subr.bf16.mxu0 %v9407_v58  ;;  %7623 = vmatpush3.bf16.msra.mxu1 %v9416_v60 }
0x113e   :  { %7624 = vmatprep.subr.bf16.mxu1 %v9418_v56 }
0x1140   :  { %7659 = vmatpush3.bf16.msra.mxu0 %v9409_v49 }
0x1141   :  { %7660 = vmatprep.subr.bf16.mxu0 %v9411_v54  ;;  %7625 = vmatpush3.bf16.msra.mxu1 %v9420_v25 }
0x1142   :  { %v13330_v24 = vpop.f32.mrb[76].mxu1  ;;  %7690 = vmatprep.subr.bf16.mxu1 %v9422_v43 }
0x1143   :  { %v13332_v13 = vpop.f32.mrb[77].mxu1 }
0x1144   :  { %v13334_v6 = vpop.f32.mrb[78].mxu1  ;;  %7661 = vmatpush3.bf16.msra.mxu0 %v9413_v62 }
0x1145   :  { %v13336_v34 = vpop.f32.mrb[79].mxu1  ;;  %7662 = vmatprep.subr.bf16.mxu0 %v9415_v29 }
0x1148   :  { %7663 = vmatpush3.bf16.msra.mxu0 %v9417_v20 }
0x1149   :  { %7664 = vmatprep.subr.bf16.mxu0 %v9419_v36 }
0x114c   :  { %7665 = vmatpush3.bf16.msra.mxu0 %v9421_v26 }
0x114d   :  { %7730 = vmatprep.subr.bf16.mxu0 %v9423_v51 }
0x11bc   :  { %v7580_v40 = vpop.f32.mrb[80].mxu0 }
0x11bd   :  { %v7581_v22 = vpop.f32.mrb[81].mxu0 }
0x11be   :  { %v7582_v44 = vadd.f32 %v7581_v22, %v7580_v40  ;;  %v7583_v18 = vpop.f32.mrb[82].mxu0 }
0x11bf   :  { %v7584_v55 = vpop.f32.mrb[83].mxu0 }
0x11c0   :  { %v6011_v53 = vadd.f32 %v7582_v44, %v13341_v42  ;;  %v7585_v63 = vadd.f32 %v7584_v55, %v7583_v18  ;;  %v14711_v44 = vld [vmem:[#allocation11_spill] sm:$0xff] }
0x11c2   :  { %v6076_v3 = vadd.f32 %v13323_v52, %v6011_v53  ;;  %v6014_v58 = vadd.f32 %v7585_v63, %v13341_v42 }
0x11c4   :  { %v13346_v41 = vmax.f32 %v6076_v3, 0.0  ;;  %v6079_v49 = vadd.f32 %v13328_v9, %v6014_v58  ;;  %v7586_v28 = vpop.f32.mrb[84].mxu0 }
0x11c5   :  { %v7587_v54 = vpop.f32.mrb[85].mxu0 }
0x11c6   :  { %v6107_v33 = vmax.f32 %v6079_v49, 0.0  ;;  %v7588_v62 = vadd.f32 %v7587_v54, %v7586_v28  ;;  %v7589_v35 = vpop.f32.mrb[86].mxu0  ;;  %v14168_v29 = vrot.slane %v13346_v41, 7  ;;  %v14167_v60 = vrot.slane %v13346_v41, 1 }
0x11c7   :  { %v7590_v20 = vpop.f32.mrb[87].mxu0  ;;  %v13354_v26 = vmul.f32 %v13346_v41, %v14631_v16  ;;  %v13371_v16 = vmul.f32 %v13346_v41, %v14711_v44  ;;  %v13381_v53 = vmul.f32 %v13346_v41, %v14705_v39 }
0x11c8   :  { %v6147_v56 = vrot.slane %v6107_v33, 1  ;;  %v6019_v36 = vadd.f32 %v7588_v62, %v13341_v42  ;;  %v7591_v52 = vadd.f32 %v7590_v20, %v7589_v35  ;;  %v6115_v25 = vrot.slane %v6107_v33, 7  ;;  %v14715_v62 = vld [vmem:[#allocation41_spill] sm:$0xff]  ;;  %v14718_v20 = vld [vmem:[#allocation28_spill] sm:$0xff] }
0x11c9   :  { %14709 = vst [vmem:[#allocation74_spill] sm:$0xff] %v13354_v26  ;;  %v13357_v9 = vmul.f32 %v6107_v33, %v14632_v27  ;;  %v14712_v27 = vld [vmem:[#allocation8_spill] sm:$0xff] }
0x11ca   :  { %v6084_v43 = vadd.f32 %v13320_v61, %v6019_v36  ;;  %v6022_v51 = vadd.f32 %v7591_v52, %v13341_v42  ;;  %v6128_v40 = vsel %vm59_vm1, %v14168_v29, %v6115_v25  ;;  %v6160_v22 = vsel %vm164_vm0, %v14167_v60, %v6147_v56  ;;  %v14713_v61 = vld [vmem:[#allocation38_spill] sm:$0xff] }
0x11cb   :  { %14710 = vst [vmem:[#allocation71_spill] sm:$0xff] %v13357_v9  ;;  %v13374_v18 = vmul.f32 %v6107_v33, %v14712_v27  ;;  %v13377_v55 = vmul.f32 %v6107_v33, %v14713_v61  ;;  %v13385_v49 = vmul.f32 %v6128_v40, %v14690_v31  ;;  %v13390_v35 = vmul.f32 %v6128_v40, %v14715_v62  ;;  %v14721_v62 = vld [vmem:[#allocation49_spill] sm:$0xff]  ;;  %v14735_v9 = vld [vmem:[#allocation12_spill] sm:$0xff] }
0x11cc   :  { %v6108_v63 = vmax.f32 %v6084_v43, 0.0  ;;  %v6087_v3 = vadd.f32 %v13325_v4, %v6022_v51  ;;  %v7592_v58 = vpop.f32.mrb[88].mxu0  ;;  %v13393_v33 = vmul.f32 %v6160_v22, %v14685_v7  ;;  %v13396_v39 = vmul.f32 %v6128_v40, %v14629_v11  ;;  %v14720_v43 = vld [vmem:[#allocation10_spill] sm:$0xff] }
0x11cd   :  { %14714 = vst [vmem:[#allocation26_spill] sm:$0xff] %v13377_v55  ;;  %v7593_v54 = vpop.f32.mrb[89].mxu0  ;;  %14716 = vst [vmem:[#allocation31_spill] sm:$0xff] %v13390_v35  ;;  %v13399_v36 = vmul.f32 %v6160_v22, %v14718_v20  ;;  %v13413_v11 = vmul.f32 %v6160_v22, %v14687_v15 }
0x11ce   :  { %14717 = vst [vmem:[#allocation33_spill] sm:$0xff] %v13396_v39  ;;  %v13401_v4 = vmax.f32 %v6087_v3, 0.0  ;;  %v7594_v31 = vadd.f32 %v7593_v54, %v7592_v58  ;;  %v7595_v52 = vpop.f32.mrb[90].mxu0  ;;  %v13404_v51 = vmul.f32 %v6108_v63, %v14720_v43  ;;  %v6116_v44 = vrot.slane %v6108_v63, 7  ;;  %v14724_v43 = vld [vmem:[#allocation46_spill] sm:$0xff] }
0x11cf   :  { %14719 = vst [vmem:[#allocation59_spill] sm:$0xff] %v13399_v36  ;;  %v7596_v27 = vpop.f32.mrb[91].mxu0  ;;  %v6148_v61 = vrot.slane %v6108_v63, 1  ;;  %v13407_v28 = vmul.f32 %v6108_v63, %v14721_v62  ;;  %v13410_v7 = vmul.f32 %v6108_v63, %v14635_v30  ;;  %14723 = vst [vmem:[#allocation79_spill] sm:$0xff] %v13413_v11  ;;  %v14728_v58 = vld [vmem:[#allocation34_spill] sm:$0xff]  ;;  %v14742_v36 = vld [vmem:[#allocation9_spill] sm:$0xff] }
0x11d0   :  { %v6027_v40 = vadd.f32 %v7594_v31, %v13341_v42  ;;  %v7597_v3 = vadd.f32 %v7596_v27, %v7595_v52  ;;  %v6117_v54 = vrot.slane %v13401_v4, 7  ;;  %v6127_v20 = vsel %vm59_vm1, %v6115_v25, %v6116_v44  ;;  %v14726_v52 = vld [vmem:[#allocation20_spill] sm:$0xff]  ;;  %v14727_v27 = vld [vmem:[#allocation22_spill] sm:$0xff] }
0x11d1   :  { %14722 = vst [vmem:[#allocation35_spill] sm:$0xff] %v13407_v28  ;;  %v13423_v62 = vmul.f32 %v13401_v4, %v14724_v43  ;;  %v6149_v30 = vrot.slane %v13401_v4, 1  ;;  %v13428_v15 = vsel %vm164_vm0, %v6147_v56, %v6148_v61  ;;  %v13437_v25 = vmul.f32 %v6127_v20, %v14726_v52  ;;  %v14730_v52 = vld [vmem:[#allocation16_spill] sm:$0xff] }
0x11d2   :  { %14725 = vst [vmem:[#allocation81_spill] sm:$0xff] %v13428_v15  ;;  %v6092_v22 = vadd.f32 %v13332_v13, %v6027_v40  ;;  %v6030_v63 = vadd.f32 %v7597_v3, %v13341_v42  ;;  %v13434_v31 = vsel %vm59_vm1, %v6116_v44, %v6117_v54  ;;  %v13444_v60 = vmul.f32 %v6127_v20, %v14728_v58 }
0x11d3   :  { %v13441_v43 = vmul.f32 %v13434_v31, %v14727_v27  ;;  %v13447_v56 = vmul.f32 %v6127_v20, %v14630_v0  ;;  %v13451_v13 = vsel %vm164_vm0, %v6148_v61, %v6149_v30  ;;  %v13458_v29 = vmul.f32 %v13428_v15, %v14730_v52  ;;  %v14732_v27 = vld [vmem:[#allocation19_spill] sm:$0xff] }
0x11d4   :  { %14729 = vst [vmem:[#allocation86_spill] sm:$0xff] %v13444_v60  ;;  %v13453_v40 = vmax.f32 %v6092_v22, 0.0  ;;  %v6095_v44 = vadd.f32 %v13336_v34, %v6030_v63  ;;  %v7598_v3 = vpop.f32.mrb[92].mxu0  ;;  %v13462_v58 = vmul.f32 %v13451_v13, %v14732_v27  ;;  %v13470_v20 = vmul.f32 %v13434_v31, %v10172_v12  ;;  %v14733_v34 = vld [vmem:[#allocation37_spill] sm:$0xff] }
0x11d5   :  { %14731 = vst [vmem:[#allocation80_spill] sm:$0xff] %v13458_v29  ;;  %v7599_v26 = vpop.f32.mrb[93].mxu0  ;;  %v13474_v22 = vmul.f32 %v13428_v15, %v14733_v34 }
0x11d6   :  { %v13476_v63 = vmax.f32 %v6095_v44, 0.0  ;;  %v7600_v52 = vadd.f32 %v7599_v26, %v7598_v3  ;;  %v7601_v27 = vpop.f32.mrb[94].mxu0  ;;  %v13480_v11 = vmul.f32 %v13453_v40, %v14735_v9  ;;  %v6118_v39 = vrot.slane %v13453_v40, 7 }
0x11d7   :  { %14734 = vst [vmem:[#allocation82_spill] sm:$0xff] %v13474_v22  ;;  %v7602_v61 = vpop.f32.mrb[95].mxu0  ;;  %v6150_v12 = vrot.slane %v13453_v40, 1 }
0x11d8   :  { %v6035_v26 = vadd.f32 %v7600_v52, %v13341_v42  ;;  %v7603_v3 = vadd.f32 %v7602_v61, %v7601_v27  ;;  %v6119_v15 = vrot.slane %v13476_v63, 7  ;;  %v13496_v0 = vsel %vm59_vm1, %v6117_v54, %v6118_v39 }
0x11d9   :  { %v13500_v29 = vmul.f32 %v13476_v63, %v14697_v45  ;;  %v6151_v34 = vrot.slane %v13476_v63, 1  ;;  %v6157_v44 = vsel %vm164_vm0, %v6149_v30, %v6150_v12  ;;  %v13513_v54 = vmul.f32 %v13496_v0, %v14704_v46 }
0x11da   :  { %v6100_v61 = vadd.f32 %v13330_v24, %v6035_v26  ;;  %v6038_v52 = vadd.f32 %v7603_v3, %v13341_v42  ;;  %v13509_v27 = vsel %vm59_vm1, %v6118_v39, %v6119_v15  ;;  %v13521_v9 = vmul.f32 %v13496_v0, %v10183_v1  ;;  %v14736_v26 = vld [vmem:[#allocation48_spill] sm:$0xff]  ;;  %v14738_v3 = vld [vmem:[#allocation30_spill] sm:$0xff] }
0x11db   :  { %v13517_v45 = vmul.f32 %v13509_v27, %v14703_v48  ;;  %v6156_v24 = vsel %vm164_vm0, %v6150_v12, %v6151_v34  ;;  %v13526_v42 = vmul.f32 %v6157_v44, %v14702_v21  ;;  %v13535_v48 = vmul.f32 %v6157_v44, %v14736_v26  ;;  %v14737_v12 = vld [vmem:[#allocation50_spill] sm:$0xff]  ;;  %v14740_v1 = vld [vmem:[#allocation32_spill] sm:$0xff] }
0x11dc   :  { %v13528_v39 = vmax.f32 %v6100_v61, 0.0  ;;  %v6103_v30 = vadd.f32 %v13334_v6, %v6038_v52  ;;  %v13532_v46 = vmul.f32 %v6156_v24, %v14701_v57  ;;  %v13542_v55 = vmul.f32 %v6156_v24, %v14737_v12 }
0x11dd   :  { %v13546_v21 = vmul.f32 %v13509_v27, %v14708_v59  ;;  %v13560_v12 = vmul.f32 %v13451_v13, %v14738_v3  ;;  %v13563_v59 = vmul.f32 %v6157_v44, %v14740_v1  ;;  %v14744_v52 = vrot.slane %v13346_v41, 7 }
0x11de   :  { %v6120_v6 = vrot.slane %v13528_v39, 7  ;;  %v13549_v57 = vmax.f32 %v6103_v30, 0.0  ;;  %v13553_v61 = vmul.f32 %v13528_v39, %v14698_v17  ;;  %v6152_v26 = vrot.slane %v13528_v39, 1  ;;  %v14743_v30 = vld [vmem:[#allocation40_spill] sm:$0xff] }
0x11df   :  { %14739 = vst [vmem:[#allocation83_spill] sm:$0xff] %v13560_v12  ;;  %14741 = vst [vmem:[#allocation84_spill] sm:$0xff] %v13563_v59  ;;  %v13583_v35 = vmul.f32 %v13401_v4, %v14743_v30  ;;  %v14747_v12 = vld [vmem:[#allocation17_spill] sm:$0xff] }
0x11e0   :  { %v6121_v28 = vrot.slane %v13549_v57, 7  ;;  %v6153_v17 = vrot.slane %v13549_v57, 1  ;;  %v6138_v22 = vmul.f32 %v13549_v57, %v14742_v36  ;;  %v6123_v3 = vsel %vm59_vm1, %v6119_v15, %v6120_v6 }
0x11e1   :  { %v13577_v44 = vsel %vm164_vm0, %v6151_v34, %v6152_v26  ;;  %v14745_v34 = vrot.slane %v13346_v41, 1 }
0x11e2   :  { %v6363_v60 = vpack.c.bf16 %v13371_v16, %v6138_v22  ;;  %v13588_v36 = vsel %vm59_vm1, %v6120_v6, %v6121_v28  ;;  %v13594_v15 = vsel %vm59_vm1, %v6121_v28, %v14744_v52  ;;  %v14746_v22 = vld [vmem:[#allocation18_spill] sm:$0xff]  ;;  %v13611_v28 = vmul.f32 %v6123_v3, %v14627_v47 }
0x11e3   :  { %v13600_v1 = vsel %vm164_vm0, %v6153_v17, %v14745_v34  ;;  %v6130_v30 = vmul.f32 %v13588_v36, %v14633_v38  ;;  %v6131_v16 = vmul.f32 %v13594_v15, %v14634_v50  ;;  %v6170_v6 = vmul.f32 %v13594_v15, %v14746_v22  ;;  %v9425_v22 = vld [vmem:[#allocation2 + $0x368] sm:$0xff]  }
0x11e4   :  { %v6162_v59 = vmul.f32 %v13600_v1, %v14747_v12  ;;  %6867 = vmatprep.mubr.bf16.mxu1 %v6363_v60  ;;  %v13615_v41 = vmul.f32 %v13588_v36, %v14628_v37  ;;  %v13618_v52 = vmul.f32 %v6123_v3, %v14707_v5  ;;  %v13622_v38 = vsel %vm164_vm0, %v6152_v26, %v6153_v17  ;;  %v9424_v60 = vld [vmem:[#allocation2 + $0x2e8] sm:$0xff]   ;;  %v9426_v37 = vld [vmem:[#allocation2 + $0x330] sm:$0xff]   ;;  %v14748_v26 = vld [vmem:[#allocation23_spill] sm:$0xff] }
0x11e5   :  { %v6362_v50 = vpack.c.bf16 %v6131_v16, %v6130_v30  ;;  %v6365_v34 = vpack.c.bf16 %v13385_v49, %v6170_v6  ;;  %v13628_v47 = vmul.f32 %v13577_v44, %v14624_v10  ;;  %v13636_v17 = vmul.f32 %v13622_v38, %v14748_v26  ;;  %v14749_v49 = vld [vmem:[#allocation42_spill] sm:$0xff]  ;;  %v14750_v30 = vld [vmem:[#allocation61_spill] sm:$0xff]  ;;  %v14751_v6 = vld [vmem:[#allocation39_spill] sm:$0xff] }
0x11e6   :  { %v6364_v12 = vpack.c.bf16 %v13393_v33, %v6162_v59  ;;  %v6392_v5 = vpack.c.bf16 %v13615_v41, %v13611_v28  ;;  %v13640_v33 = vmul.f32 %v13453_v40, %v14749_v49  ;;  %v9427_v59 = vld [vmem:[#allocation2 + $0x3b0] sm:$0xff]   ;;  %v13644_v10 = vmul.f32 %v13401_v4, %v14636_v8  ;;  %v14753_v8 = vld [vmem:[#allocation36_spill] sm:$0xff]  ;;  %v14783_v41 = vld [vmem:[#allocation59_spill] sm:$0xff] }
0x11e7   :  { %6868 = vmatmul.mubr.bf16.vlgmr.msra.gmra.mrb[80].mxu1 %v6362_v50  ;;  %6932 = vmatprep.mubr.bf16.mxu0 %v6365_v34  ;;  %v13647_v16 = vmul.f32 %v6156_v24, %v14750_v30  ;;  %v13651_v32 = vmul.f32 %v13577_v44, %v14751_v6  ;;  %v14752_v26 = vpack.c.bf16 %v13404_v51, %v13374_v18  ;;  %v9428_v24 = vld [vmem:[#allocation2 + $0x2f0] sm:$0xff]   ;;  %v14754_v51 = vld [vmem:[#allocation43_spill] sm:$0xff] }
0x11e8   :  { %6933 = vmatmul.mubr.bf16.vlgmr.msra.gmra.mrb[96].mxu0 %v6364_v12  ;;  %v6391_v50 = vpack.c.bf16 %v13636_v17, %v13628_v47  ;;  %v6378_v34 = vpack.c.bf16 %v13640_v33, %v13583_v35  ;;  %v13662_v4 = vmul.f32 %v13434_v31, %v14753_v8  ;;  %7691 = vmatpush3.bf16.msra.mxu1 %v9424_v60  ;;  %v9429_v49 = vld [vmem:[#allocation2 + $0x370] sm:$0xff]   ;;  %v9430_v31 = vld [vmem:[#allocation2 + $0x338] sm:$0xff]  }
0x11e9   :  { %6875 = vmatprep.mubr.bf16.mxu1 %v14752_v26  ;;  %7731 = vmatpush3.bf16.msra.mxu0 %v9425_v22  ;;  %v13670_v12 = vmul.f32 %v13496_v0, %v14754_v51  ;;  %v14755_v6 = vpack.c.bf16 %v13441_v43, %v13437_v25  ;;  %v9431_v60 = vld [vmem:[#allocation2 + $0x3b8] sm:$0xff]   ;;  %v14756_v22 = vld [vmem:[#allocation66_spill] sm:$0xff]  ;;  %v13685_v18 = vmul.f32 %v13453_v40, %v14637_v14  ;;  %v14760_v40 = vld [vmem:[#allocation45_spill] sm:$0xff] }
0x11ea   :  { %7692 = vmatprep.subr.bf16.mxu1 %v9426_v37  ;;  %v13677_v26 = vmul.f32 %v13476_v63, %v14756_v22  ;;  %v14757_v8 = vld [vmem:[#allocation51_spill] sm:$0xff]  ;;  %7732 = vmatprep.subr.bf16.mxu0 %v9427_v59  ;;  %v13691_v43 = vmul.f32 %v13476_v63, %v14638_v2  ;;  %v14758_v0 = vld [vmem:[#allocation62_spill] sm:$0xff]  ;;  %v13705_v59 = vmul.f32 %v13509_v27, %v14760_v40  ;;  %v14761_v22 = vld [vmem:[#allocation64_spill] sm:$0xff] }
0x11eb   :  { %6940 = vmatprep.mubr.bf16.mxu0 %v14755_v6  ;;  %v13681_v30 = vmul.f32 %v13528_v39, %v14757_v8  ;;  %v13695_v37 = vmul.f32 %v13622_v38, %v14758_v0  ;;  %v14759_v51 = vld [vmem:[#allocation63_spill] sm:$0xff]  ;;  %v13708_v8 = vmul.f32 %v6123_v3, %v14761_v22  ;;  %v14762_v2 = vld [vmem:[#allocation68_spill] sm:$0xff]  ;;  %v13720_v27 = vmul.f32 %v13528_v39, %v14706_v19  ;;  %v14763_v22 = vld [vmem:[#allocation33_spill] sm:$0xff] }
0x11ec   :  { %v13699_v6 = vmul.f32 %v13600_v1, %v14759_v51  ;;  %v13712_v63 = vmul.f32 %v13549_v57, %v14762_v2  ;;  %7693 = vmatpush3.bf16.msra.mxu1 %v9428_v24  ;;  %v9432_v0 = vld [vmem:[#allocation2 + $0x2f8] sm:$0xff]   ;;  %v9434_v3 = vld [vmem:[#allocation2 + $0x340] sm:$0xff]   ;;  %v14764_v2 = vpack.c.bf16 %v13447_v56, %v14763_v22  ;;  %v14765_v19 = vld [vmem:[#allocation65_spill] sm:$0xff]  ;;  %v14769_v56 = vpack.c.bf16 %v13480_v11, %v13423_v62 }
0x11ed   :  { %7733 = vmatpush3.bf16.msra.mxu0 %v9429_v49  ;;  %v9433_v25 = vld [vmem:[#allocation2 + $0x378] sm:$0xff]   ;;  %7694 = vmatprep.subr.bf16.mxu1 %v9430_v31  ;;  %v13728_v49 = vmul.f32 %v13549_v57, %v14640_v23  ;;  %v9435_v14 = vld [vmem:[#allocation2 + $0x3c0] sm:$0xff]   ;;  %v13735_v39 = vmul.f32 %v13588_v36, %v14765_v19  ;;  %v14772_v22 = vld [vmem:[#allocation53_spill] sm:$0xff]  ;;  %v14799_v35 = vpack.c.bf16 %v13651_v32, %v13647_v16 }
0x11ee   :  { %7734 = vmatprep.subr.bf16.mxu0 %v9431_v60  ;;  %v14766_v31 = vld [vmem:[#allocation47_spill] sm:$0xff]  ;;  %v14768_v51 = vld [vmem:[#allocation72_spill] sm:$0xff]  ;;  %v14782_v28 = vld [vmem:[#allocation82_spill] sm:$0xff]  ;;  %v14800_v33 = vpack.c.bf16 %v13681_v30, %v13677_v26  ;;  %v14802_v32 = vpack.c.bf16 %v13708_v8, %v13705_v59  ;;  %v14803_v16 = vpack.c.bf16 %v13699_v6, %v13695_v37 }
0x11ef   :  { %6876 = vmatmul.mubr.bf16.gmra.mrb[84].mxu1 %v14764_v2  ;;  %v13739_v60 = vmul.f32 %v13594_v15, %v14766_v31  ;;  %v14767_v40 = vld [vmem:[#allocation67_spill] sm:$0xff]  ;;  %v13747_v23 = vmul.f32 %v13622_v38, %v14768_v51  ;;  %v14770_v57 = vld [vmem:[#allocation80_spill] sm:$0xff]  ;;  %v6393_v15 = vpack.c.bf16 %v13728_v49, %v13720_v27  ;;  %v14773_v2 = vld [vmem:[#allocation81_spill] sm:$0xff] }
0x11f0   :  { %v13743_v24 = vmul.f32 %v13577_v44, %v14767_v40  ;;  %6883 = vmatprep.mubr.bf16.mxu1 %v14769_v56  ;;  %v14771_v36 = vpack.c.bf16 %v13462_v58, %v14770_v57  ;;  %v13759_v19 = vmul.f32 %v14773_v2, %v14772_v22  ;;  %v14774_v44 = vld [vmem:[#allocation44_spill] sm:$0xff]  ;;  %7695 = vmatpush3.bf16.msra.mxu1 %v9432_v0  ;;  %v14775_v51 = vld [vmem:[#allocation73_spill] sm:$0xff]  ;;  %v14788_v47 = vld [vmem:[#allocation71_spill] sm:$0xff] }
0x11f1   :  { %v13763_v40 = vmul.f32 %v13451_v13, %v14774_v44  ;;  %7735 = vmatpush3.bf16.msra.mxu0 %v9433_v25  ;;  %v9436_v38 = vld [vmem:[#allocation2 + $0x300] sm:$0xff]   ;;  %v6395_v62 = vpack.c.bf16 %v13739_v60, %v13735_v39  ;;  %v13771_v31 = vmul.f32 %v13600_v1, %v14775_v51  ;;  %v14776_v56 = vpack.c.bf16 %v13517_v45, %v13513_v54  ;;  %v9438_v13 = vld [vmem:[#allocation2 + $0x348] sm:$0xff]   ;;  %v9442_v54 = vld [vmem:[#allocation2 + $0x350] sm:$0xff]  }
0x11f2   :  { %6941 = vmatmul.mubr.bf16.gmra.mrb[100].mxu0 %v14771_v36  ;;  %v9437_v11 = vld [vmem:[#allocation2 + $0x380] sm:$0xff]   ;;  %v6388_v58 = vpack.c.bf16 %v13747_v23, %v13743_v24  ;;  %7696 = vmatprep.subr.bf16.mxu1 %v9434_v3  ;;  %v9439_v0 = vld [vmem:[#allocation2 + $0x3c8] sm:$0xff]   ;;  %v6379_v57 = vpack.c.bf16 %v13542_v55, %v13535_v48  ;;  %v14777_v36 = vld [vmem:[#allocation79_spill] sm:$0xff]  ;;  %v14778_v45 = vpack.c.bf16 %v13521_v9, %v13470_v20 }
0x11f3   :  { %6948 = vmatprep.mubr.bf16.mxu0 %v14776_v56  ;;  %v6370_v25 = vpack.c.bf16 %v13763_v40, %v13759_v19  ;;  %7736 = vmatprep.subr.bf16.mxu0 %v9435_v14  ;;  %v6397_v22 = vpack.c.bf16 %v14777_v36, %v13771_v31  ;;  %v9440_v1 = vld [vmem:[#allocation2 + $0x308] sm:$0xff]   ;;  %v9443_v3 = vld [vmem:[#allocation2 + $0x3d0] sm:$0xff]   ;;  %v14779_v44 = vpack.c.bf16 %v13553_v61, %v13500_v29  ;;  %v9446_v20 = vld [vmem:[#allocation2 + $0x358] sm:$0xff]  }
0x11f4   :  { %7697 = vmatpush3.bf16.msra.mxu1 %v9436_v38  ;;  %v9441_v2 = vld [vmem:[#allocation2 + $0x388] sm:$0xff]   ;;  %v14780_v14 = vpack.c.bf16 %v13532_v46, %v13526_v42  ;;  %v9444_v38 = vld [vmem:[#allocation2 + $0x310] sm:$0xff]   ;;  %v9447_v9 = vld [vmem:[#allocation2 + $0x3d8] sm:$0xff]   ;;  %v14781_v46 = vpack.c.bf16 %v13618_v52, %v13546_v21 }
0x11f5   :  { %7737 = vmatpush3.bf16.msra.mxu0 %v9437_v11  ;;  %7698 = vmatprep.subr.bf16.mxu1 %v9438_v13  ;;  %v9445_v11 = vld [vmem:[#allocation2 + $0x390] sm:$0xff]   ;;  %v9448_v29 = vld [vmem:[#allocation2 + $0x318] sm:$0xff]   ;;  %v9450_v42 = vld [vmem:[#allocation2 + $0x360] sm:$0xff]  }
0x11f6   :  { %7738 = vmatprep.subr.bf16.mxu0 %v9439_v0  ;;  %v9449_v61 = vld [vmem:[#allocation2 + $0x398] sm:$0xff]   ;;  %v9451_v51 = vld [vmem:[#allocation2 + $0x3e0] sm:$0xff]   ;;  %v9454_v21 = vld [vmem:[#allocation2 + $0x3e8] sm:$0xff]  }
0x11f7   :  { %6884 = vmatmul.mubr.bf16.gmra.mrb[88].mxu1 %v14778_v45  ;;  %v9452_v56 = vld [vmem:[#allocation2 + $0x320] sm:$0xff]   ;;  %v14785_v0 = vld [vmem:[#allocation35_spill] sm:$0xff]  ;;  %v9455_v52 = vld [vmem:[#allocation2 + $0x3f0] sm:$0xff]  }
0x11f8   :  { %6891 = vmatprep.mubr.bf16.mxu1 %v14779_v44  ;;  %7699 = vmatpush3.bf16.msra.mxu1 %v9440_v1  ;;  %v9453_v13 = vld [vmem:[#allocation2 + $0x3a0] sm:$0xff]   ;;  %v14786_v1 = vld [vmem:[#allocation26_spill] sm:$0xff]  ;;  %v14792_v45 = vld [vmem:[#allocation31_spill] sm:$0xff] }
0x11f9   :  { %7739 = vmatpush3.bf16.msra.mxu0 %v9441_v2  ;;  %7700 = vmatprep.subr.bf16.mxu1 %v9442_v54  ;;  %v14787_v2 = vpack.c.bf16 %v14785_v0, %v14786_v1  ;;  %v14789_v17 = vld [vmem:[#allocation74_spill] sm:$0xff]  ;;  %v14794_v44 = vld [vmem:[#allocation84_spill] sm:$0xff]  ;;  %v9460_v30 = vld [vmem:[#allocation2 + $0x418] sm:$0xff]  }
0x11fa   :  { %6949 = vmatmul.mubr.bf16.gmra.mrb[104].mxu0 %v14780_v14  ;;  %7740 = vmatprep.subr.bf16.mxu0 %v9443_v3  ;;  %v14791_v54 = vld [vmem:[#allocation86_spill] sm:$0xff]  ;;  %v14795_v14 = vld [vmem:[#allocation83_spill] sm:$0xff] }
0x11fb   :  { %6956 = vmatprep.mubr.bf16.mxu0 %v6392_v5  ;;  %v14784_v5 = vpack.c.bf16 %v14782_v28, %v14783_v41  ;;  %v14793_v3 = vpack.c.bf16 %v14791_v54, %v14792_v45 }
0x11fc   :  { %7701 = vmatpush3.bf16.msra.mxu1 %v9444_v38  ;;  %v14796_v38 = vpack.c.bf16 %v14794_v44, %v14795_v14 }
0x11fd   :  { %7741 = vmatpush3.bf16.msra.mxu0 %v9445_v11  ;;  %7702 = vmatprep.subr.bf16.mxu1 %v9446_v20  ;;  %v9456_v11 = vld [vmem:[#allocation2 + $0x3f8] sm:$0xff]   ;;  %v9457_v20 = vld [vmem:[#allocation2 + $0x400] sm:$0xff]  }
0x11fe   :  { %7742 = vmatprep.subr.bf16.mxu0 %v9447_v9  ;;  %v14797_v9 = vpack.c.bf16 %v13644_v10, %v13410_v7  ;;  %v9459_v7 = vld [vmem:[#allocation2 + $0x410] sm:$0xff]   ;;  %v14801_v10 = vpack.c.bf16 %v13691_v43, %v13685_v18  ;;  %v9461_v18 = vld [vmem:[#allocation2 + $0x420] sm:$0xff]  }
0x11ff   :  { %6892 = vmatmul.mubr.bf16.gmra.mrb[92].mxu1 %v14781_v46 }
0x1200   :  { %6997 = vmatprep.mubr.bf16.mxu1 %v14784_v5  ;;  %7703 = vmatpush3.bf16.msra.mxu1 %v9448_v29  ;;  %v14798_v29 = vpack.c.bf16 %v13670_v12, %v13662_v4  ;;  %v14804_v4 = vpack.c.bf16 %v13381_v53, %v13712_v63  ;;  %v7341_v12 = vld [vmem:[%s13919_s3 + $0xc] ss:$0 sm:$0xff]  ;;  %s9569_s3 = smov [#allocation5]  }
0x1201   :  { %7743 = vmatpush3.bf16.msra.mxu0 %v9449_v61  ;;  %7704 = vmatprep.subr.bf16.mxu1 %v9450_v42  ;;  %s7181_s19 = sshll.u32 %s9569_s3, 4  ;;  %s7182_s19 = int_to_ptr.vmem [resolvable:$true] %s7181_s19 }
0x1202   :  { %6957 = vmatmul.mubr.bf16.gmra.mrb[108].mxu0 %v6391_v50  ;;  %7744 = vmatprep.subr.bf16.mxu0 %v9451_v51  ;;  %v14790_v50 = vpack.c.bf16 %v14788_v47, %v14789_v17  ;;  %s9516_s20 = scalar_lea.vmem %s7182_s19, 1024  ;;  %p9521_p9 = scmp.lt.s32.totalorder %s7182_s19, %s7182_s19 }
0x1203   :  { %7062 = vmatprep.mubr.bf16.mxu0 %v14787_v2  ;;  %p9517_p8 = scmp.ne.s32.totalorder %s7182_s19, %s9516_s20  ;;  %p9522_p10 = scmp.lt.s32.totalorder %s9516_s20, %s9516_s20 }
0x1204   :  { %7705 = vmatpush3.bf16.msra.mxu1 %v9452_v56 }
0x1205   :  { %7745 = vmatpush3.bf16.msra.mxu0 %v9453_v13  ;;  %8038 = vmatprep.subr.bf16.mxu1 %v9454_v21  ;;  %p9523_p11 = por %p9522_p10, %p9521_p9 }
0x1206   :  { %8014 = vmatprep.subr.bf16.mxu0 %v9454_v21 }
0x1207   :  { %6998 = vmatmul.mubr.bf16.vlgmr.msra.gmra.mrb[96].mxu1 %v14790_v50  ;;  %p9524_p12 = pnand %p9523_p11, %p9517_p8 }
0x1208   :  { %7005 = vmatprep.mubr.bf16.mxu1 %v14796_v38  ;;  %8046 = vmatpush3.bf16.msra.mxu1 %v9454_v21 }
0x1209   :  { %8039 = vmatprep.subr.bf16.mxu1 %v9455_v52 }
0x120a   :  { %7063 = vmatmul.mubr.bf16.vlgmr.msra.gmra.mrb[112].mxu0 %v14793_v3 }
0x120b   :  { %8015 = vmatpush3.bf16.msra.mxu0 %v9454_v21  ;;  %7070 = vmatprep.mubr.bf16.mxu0 %v6378_v34  ;;  %v9458_v34 = vld [vmem:[#allocation2 + $0x408] sm:$0xff]  }
0x120c   :  { %8016 = vmatprep.subr.bf16.mxu0 %v9455_v52  ;;  %8047 = vmatpush3.bf16.msra.mxu1 %v9455_v52 }
0x120d   :  { %8040 = vmatprep.subr.bf16.mxu1 %v9456_v11 }
0x120f   :  { %8017 = vmatpush3.bf16.msra.mxu0 %v9455_v52  ;;  %7006 = vmatmul.mubr.bf16.gmra.mrb[100].mxu1 %v14797_v9 }
0x1210   :  { %8018 = vmatprep.subr.bf16.mxu0 %v9456_v11  ;;  %7013 = vmatprep.mubr.bf16.mxu1 %v14799_v35 }
0x1211   :  { %8048 = vmatpush3.bf16.msra.mxu1 %v9456_v11 }
0x1212   :  { %7071 = vmatmul.mubr.bf16.gmra.mrb[116].mxu0 %v14798_v29  ;;  %8041 = vmatprep.subr.bf16.mxu1 %v9457_v20 }
0x1213   :  { %8019 = vmatpush3.bf16.msra.mxu0 %v9456_v11  ;;  %7078 = vmatprep.mubr.bf16.mxu0 %v14800_v33 }
0x1214   :  { %8020 = vmatprep.subr.bf16.mxu0 %v9457_v20 }
0x1215   :  { %8049 = vmatpush3.bf16.msra.mxu1 %v9457_v20 }
0x1216   :  { %8042 = vmatprep.subr.bf16.mxu1 %v9458_v34 }
0x1217   :  { %8021 = vmatpush3.bf16.msra.mxu0 %v9457_v20  ;;  %7014 = vmatmul.mubr.bf16.gmra.mrb[104].mxu1 %v14801_v10 }
0x1218   :  { %8022 = vmatprep.subr.bf16.mxu0 %v9458_v34  ;;  %7021 = vmatprep.mubr.bf16.mxu1 %v14803_v16 }
0x1219   :  { %8050 = vmatpush3.bf16.msra.mxu1 %v9458_v34 }
0x121a   :  { %7079 = vmatmul.mubr.bf16.gmra.mrb[120].mxu0 %v14802_v32  ;;  %8043 = vmatprep.subr.bf16.mxu1 %v9459_v7 }
0x121b   :  { %8023 = vmatpush3.bf16.msra.mxu0 %v9458_v34  ;;  %7086 = vmatprep.mubr.bf16.mxu0 %v14804_v4 }
0x121c   :  { %8024 = vmatprep.subr.bf16.mxu0 %v9459_v7 }
0x121d   :  { %8051 = vmatpush3.bf16.msra.mxu1 %v9459_v7 }
0x121e   :  { %8044 = vmatprep.subr.bf16.mxu1 %v9460_v30 }
0x121f   :  { %8025 = vmatpush3.bf16.msra.mxu0 %v9459_v7  ;;  %7022 = vmatmul.mubr.bf16.gmra.mrb[108].mxu1 %v6393_v15 }
0x1220   :  { %8026 = vmatprep.subr.bf16.mxu0 %v9460_v30  ;;  %8034 = vmatprep.mubr.bf16.mxu1 %v6388_v58 }
0x1221   :  { %8052 = vmatpush3.bf16.msra.mxu1 %v9460_v30 }
0x1222   :  { %7087 = vmatmul.mubr.bf16.gmra.mrb[124].mxu0 %v6395_v62  ;;  %8045 = vmatprep.subr.bf16.mxu1 %v9461_v18 }
0x1223   :  { %8027 = vmatpush3.bf16.msra.mxu0 %v9460_v30  ;;  %8030 = vmatprep.mubr.bf16.mxu0 %v6370_v25 }
0x1224   :  { %8028 = vmatprep.subr.bf16.mxu0 %v9461_v18 }
0x1225   :  { %8053 = vmatpush3.bf16.msra.mxu1 %v9461_v18 }
0x1227   :  { %8029 = vmatpush3.bf16.msra.mxu0 %v9461_v18 }
0x1228   :  { %8035 = vmatmul.mubr.bf16.vlgmr.msra.gmra.mrb[112].mxu1 %v6397_v22 }
0x122a   :  { %8031 = vmatmul.mubr.bf16.vlgmr.msra.gmra.mrb[128].mxu0 %v6379_v57 }
0x12ba   :  { %v7626_v53 = vpop.f32.mrb[80].mxu1 }
0x12bb   :  { %v7627_v26 = vpop.f32.mrb[81].mxu1  ;;  %v7666_v43 = vpop.f32.mrb[96].mxu0 }
0x12bc   :  { %v7628_v37 = vadd.f32 %v7627_v26, %v7626_v53  ;;  %v7629_v6 = vpop.f32.mrb[82].mxu1  ;;  %v7667_v59 = vpop.f32.mrb[97].mxu0 }
0x12bd   :  { %v7668_v8 = vadd.f32 %v7667_v59, %v7666_v43  ;;  %v7630_v63 = vpop.f32.mrb[83].mxu1  ;;  %v7669_v27 = vpop.f32.mrb[98].mxu0 }
0x12be   :  { %v6870_v24 = vadd.f32 %v7628_v37, %v7341_v12  ;;  %v7631_v55 = vadd.f32 %v7630_v63, %v7629_v6  ;;  %v7670_v48 = vpop.f32.mrb[99].mxu0 }
0x12bf   :  { %v7671_v49 = vadd.f32 %v7670_v48, %v7669_v27 }
0x12c0   :  { %v6935_v39 = vadd.f32 %v7668_v8, %v6870_v24  ;;  %v6873_v60 = vadd.f32 %v7631_v55, %v7341_v12 }
0x12c2   :  { %v6938_v23 = vadd.f32 %v7671_v49, %v6873_v60  ;;  %v7632_v15 = vpop.f32.mrb[84].mxu1 }
0x12c3   :  { %v7633_v19 = vpop.f32.mrb[85].mxu1 }
0x12c4   :  { %v7634_v62 = vadd.f32 %v7633_v19, %v7632_v15  ;;  %v7635_v58 = vpop.f32.mrb[86].mxu1 }
0x12c5   :  { %v7672_v40 = vpop.f32.mrb[100].mxu0  ;;  %v7636_v57 = vpop.f32.mrb[87].mxu1 }
0x12c6   :  { %v7673_v31 = vpop.f32.mrb[101].mxu0  ;;  %v6878_v22 = vadd.f32 %v7634_v62, %v7341_v12  ;;  %v7637_v61 = vadd.f32 %v7636_v57, %v7635_v58 }
0x12c7   :  { %v7674_v25 = vadd.f32 %v7673_v31, %v7672_v40  ;;  %v7675_v36 = vpop.f32.mrb[102].mxu0  ;;  %v5424_v40 = vpop.permute.xlu0 %5423 }
0x12c8   :  { %v7676_v42 = vpop.f32.mrb[103].mxu0  ;;  %v6881_v28 = vadd.f32 %v7637_v61, %v7341_v12 }
0x12c9   :  { %v7677_v46 = vadd.f32 %v7676_v42, %v7675_v36  ;;  %v13863_v51 = vadd.f32 %v7674_v25, %v6878_v22 }
0x12ca   :  { %v7638_v5 = vpop.f32.mrb[88].mxu1 }
0x12cb   :  { %v13865_v41 = vadd.f32 %v7677_v46, %v6881_v28  ;;  %v7639_v56 = vpop.f32.mrb[89].mxu1 }
0x12cc   :  { %v7640_v0 = vadd.f32 %v7639_v56, %v7638_v5  ;;  %v7641_v1 = vpop.f32.mrb[90].mxu1 }
0x12cd   :  { %v7678_v13 = vpop.f32.mrb[104].mxu0  ;;  %v7642_v52 = vpop.f32.mrb[91].mxu1 }
0x12ce   :  { %v7679_v2 = vpop.f32.mrb[105].mxu0  ;;  %v6886_v17 = vadd.f32 %v7640_v0, %v7341_v12  ;;  %v7643_v50 = vadd.f32 %v7642_v52, %v7641_v1  ;;  %v5420_v0 = vpop.permute.xlu0 %5419 }
0x12cf   :  { %v7680_v21 = vadd.f32 %v7679_v2, %v7678_v13  ;;  %v7681_v47 = vpop.f32.mrb[106].mxu0 }
0x12d0   :  { %v7682_v54 = vpop.f32.mrb[107].mxu0  ;;  %v6889_v44 = vadd.f32 %v7643_v50, %v7341_v12 }
0x12d1   :  { %v7683_v45 = vadd.f32 %v7682_v54, %v7681_v47  ;;  %v13867_v3 = vadd.f32 %v7680_v21, %v6886_v17 }
0x12d2   :  { %v7644_v38 = vpop.f32.mrb[92].mxu1 }
0x12d3   :  { %v13869_v14 = vadd.f32 %v7683_v45, %v6889_v44  ;;  %v7645_v11 = vpop.f32.mrb[93].mxu1 }
0x12d4   :  { %v7646_v9 = vadd.f32 %v7645_v11, %v7644_v38  ;;  %v7647_v29 = vpop.f32.mrb[94].mxu1 }
0x12d5   :  { %v7684_v20 = vpop.f32.mrb[108].mxu0  ;;  %v7648_v34 = vpop.f32.mrb[95].mxu1 }
0x12d6   :  { %v7685_v35 = vpop.f32.mrb[109].mxu0  ;;  %v6894_v10 = vadd.f32 %v7646_v9, %v7341_v12  ;;  %v7649_v32 = vadd.f32 %v7648_v34, %v7647_v29 }
0x12d7   :  { %v7686_v33 = vadd.f32 %v7685_v35, %v7684_v20  ;;  %v7687_v7 = vpop.f32.mrb[110].mxu0  ;;  %v5428_v35 = vpop.permute.xlu0 %5427 }
0x12d8   :  { %v7688_v16 = vpop.f32.mrb[111].mxu0  ;;  %v6897_v18 = vadd.f32 %v7649_v32, %v7341_v12  ;;  %v5426_v12 = vpop.permute.xlu1 %5425 }
0x12d9   :  { %v7689_v4 = vadd.f32 %v7688_v16, %v7687_v7  ;;  %v13871_v30 = vadd.f32 %v7686_v33, %v6894_v10 }
0x12da   :  { %v7706_v26 = vpop.f32.mrb[96].mxu1 }
0x12db   :  { %v13873_v53 = vadd.f32 %v7689_v4, %v6897_v18  ;;  %v7707_v37 = vpop.f32.mrb[97].mxu1 }
0x12dc   :  { %v7708_v59 = vadd.f32 %v7707_v37, %v7706_v26  ;;  %v7709_v8 = vpop.f32.mrb[98].mxu1  ;;  %v5422_v1 = vpop.permute.xlu1 %5421 }
0x12dd   :  { %v7746_v43 = vpop.f32.mrb[112].mxu0  ;;  %v7710_v24 = vpop.f32.mrb[99].mxu1 }
0x12de   :  { %v7747_v6 = vpop.f32.mrb[113].mxu0  ;;  %v7000_v48 = vadd.f32 %v7708_v59, %v6935_v39  ;;  %v7711_v49 = vadd.f32 %v7710_v24, %v7709_v8 }
0x12df   :  { %v7748_v63 = vadd.f32 %v7747_v6, %v7746_v43  ;;  %v7749_v27 = vpop.f32.mrb[114].mxu0 }
0x12e0   :  { %v7750_v55 = vpop.f32.mrb[115].mxu0  ;;  %v7003_v15 = vadd.f32 %v7711_v49, %v6938_v23  ;;  %v5430_v33 = vpop.permute.xlu1 %5429  ;;  %v14805_v49 = vld [vmem:[#allocation85_spill] sm:$0xff] }
0x12e1   :  { %v7751_v60 = vadd.f32 %v7750_v55, %v7749_v27  ;;  %v13875_v19 = vadd.f32 %v7748_v63, %v7000_v48  ;;  %v5432_v27 = vpop.permute.xlu0 %5431 }
0x12e2   :  { %v7712_v62 = vpop.f32.mrb[100].mxu1 }
0x12e3   :  { %v13877_v31 = vadd.f32 %v7751_v60, %v7003_v15  ;;  %v7713_v25 = vpop.f32.mrb[101].mxu1  ;;  %v5445_v60 = vsel %vm1974_vm2, %v14805_v49, %v5424_v40  ;;  %v14806_v15 = vld [vmem:[#allocation57_spill] sm:$0xff] }
0x12e4   :  { %v7714_v36 = vadd.f32 %v7713_v25, %v7712_v62  ;;  %v7715_v22 = vpop.f32.mrb[102].mxu1  ;;  %v5434_v24 = vpop.permute.xlu1 %5433  ;;  %v5446_v62 = vsel %vm1974_vm2, %v14806_v15, %v5426_v12 }
0x12e5   :  { %v7752_v58 = vpop.f32.mrb[116].mxu0  ;;  %v7716_v46 = vpop.f32.mrb[103].mxu1 }
0x12e6   :  { %v7753_v57 = vpop.f32.mrb[117].mxu0  ;;  %v7008_v39 = vadd.f32 %v7714_v36, %v13863_v51  ;;  %v7717_v5 = vadd.f32 %v7716_v46, %v7715_v22  ;;  %v14808_v22 = vld [vmem:[#allocation58_spill] sm:$0xff] }
0x12e7   :  { %v7754_v61 = vadd.f32 %v7753_v57, %v7752_v58  ;;  %v7755_v42 = vpop.f32.mrb[118].mxu0  ;;  %v14807_v58 = vld [vmem:[#allocation55_spill] sm:$0xff] }
0x12e8   :  { %v7756_v28 = vpop.f32.mrb[119].mxu0  ;;  %v7011_v56 = vadd.f32 %v7717_v5, %v13865_v41  ;;  %v5443_v25 = vsel %vm1974_vm2, %v14807_v58, %v5420_v0  ;;  %v14810_v5 = vld [vmem:[#allocation76_spill] sm:$0xff] }
0x12e9   :  { %v7757_v23 = vadd.f32 %v7756_v28, %v7755_v42  ;;  %v7073_v13 = vadd.f32 %v7754_v61, %v7008_v39  ;;  %v14809_v61 = vld [vmem:[#allocation77_spill] sm:$0xff]  ;;  %v5449_v12 = vsel %vm1974_vm2, %v14810_v5, %v5432_v27 }
0x12ea   :  { %v7718_v2 = vpop.f32.mrb[104].mxu1  ;;  %v5447_v42 = vsel %vm1974_vm2, %v14809_v61, %v5428_v35 }
0x12eb   :  { %v7076_v52 = vadd.f32 %v7757_v23, %v7011_v56  ;;  %v7719_v47 = vpop.f32.mrb[105].mxu1 }
0x12ec   :  { %v7720_v50 = vadd.f32 %v7719_v47, %v7718_v2  ;;  %v7721_v54 = vpop.f32.mrb[106].mxu1 }
0x12ed   :  { %v7758_v21 = vpop.f32.mrb[120].mxu0  ;;  %v7722_v38 = vpop.f32.mrb[107].mxu1 }
0x12ee   :  { %v7759_v17 = vpop.f32.mrb[121].mxu0  ;;  %v7016_v51 = vadd.f32 %v7720_v50, %v13867_v3  ;;  %v7723_v20 = vadd.f32 %v7722_v38, %v7721_v54  ;;  %v14811_v54 = vld [vmem:[#allocation29_spill] sm:$0xff] }
0x12ef   :  { %v7760_v45 = vadd.f32 %v7759_v17, %v7758_v21  ;;  %v7761_v44 = vpop.f32.mrb[122].mxu0 }
0x12f0   :  { %v7762_v11 = vpop.f32.mrb[123].mxu0  ;;  %v7019_v41 = vadd.f32 %v7723_v20, %v13869_v14 }
0x12f1   :  { %v7763_v9 = vadd.f32 %v7762_v11, %v7761_v44  ;;  %v7081_v29 = vadd.f32 %v7760_v45, %v7016_v51  ;;  %v14812_v11 = vld [vmem:[#allocation24_spill] sm:$0xff] }
0x12f2   :  { %v7724_v34 = vpop.f32.mrb[108].mxu1  ;;  %v5448_v51 = vsel %vm1974_vm2, %v14812_v11, %v5430_v33 }
0x12f3   :  { %v7084_v10 = vadd.f32 %v7763_v9, %v7019_v41  ;;  %v7725_v32 = vpop.f32.mrb[109].mxu1 }
0x12f4   :  { %v7726_v4 = vadd.f32 %v7725_v32, %v7724_v34  ;;  %v7727_v18 = vpop.f32.mrb[110].mxu1 }
0x12f5   :  { %v7764_v7 = vpop.f32.mrb[124].mxu0  ;;  %v7728_v37 = vpop.f32.mrb[111].mxu1 }
0x12f6   :  { %v7765_v16 = vpop.f32.mrb[125].mxu0  ;;  %v7024_v3 = vadd.f32 %v7726_v4, %v13871_v30  ;;  %v7729_v59 = vadd.f32 %v7728_v37, %v7727_v18 }
0x12f7   :  { %v7766_v26 = vadd.f32 %v7765_v16, %v7764_v7  ;;  %v7767_v43 = vpop.f32.mrb[126].mxu0 }
0x12f8   :  { %v7768_v6 = vpop.f32.mrb[127].mxu0  ;;  %v7027_v14 = vadd.f32 %v7729_v59, %v13873_v53  ;;  %v5444_v53 = vsel %vm1974_vm2, %v14808_v22, %v5422_v1 }
0x12f9   :  { %v7769_v8 = vadd.f32 %v7768_v6, %v7767_v43  ;;  %v7089_v63 = vadd.f32 %v7766_v26, %v7024_v3 }
0x12fb   :  { %v7092_v48 = vadd.f32 %v7769_v8, %v7027_v14  ;;  %v8036_v57 = vpop.f32.mrb[112].mxu1 }
0x12fc   :  { %v7154_v46 = vadd.f32 %v8036_v57, %v7089_v63  ;;  %v7145_v28 = vpop.f32.mrb[113].mxu1 }
0x12fd   :  { %v8032_v55 = vpop.f32.mrb[128].mxu0  ;;  %v7146_v56 = vadd.f32 %v7145_v28, %v7081_v29  ;;  %v8037_v0 = vpop.f32.mrb[114].mxu1 }
0x12fe   :  { %v7138_v30 = vadd.f32 %v8032_v55, %v7073_v13  ;;  %v7129_v36 = vpop.f32.mrb[129].mxu0  ;;  %v7166_v21 = vadd.f32 %v7154_v46, %v5449_v12  ;;  %v7157_v17 = vadd.f32 %v8037_v0, %v7092_v48  ;;  %v7148_v1 = vpop.f32.mrb[115].mxu1 }
0x12ff   :  { %v7130_v39 = vadd.f32 %v7129_v36, %v13875_v19  ;;  %v8033_v40 = vpop.f32.mrb[130].mxu0  ;;  %v5450_v19 = vsel %vm1974_vm2, %v14811_v54, %v5434_v24  ;;  %v7164_v45 = vadd.f32 %v7146_v56, %v5447_v42  ;;  %v7149_v38 = vadd.f32 %v7148_v1, %v7084_v10 }
0x1300   :  { %v7162_v23 = vadd.f32 %v7138_v30, %v5445_v60  ;;  %v7141_v2 = vadd.f32 %v8033_v40, %v7076_v52  ;;  %v7132_v13 = vpop.f32.mrb[131].mxu0  ;;  %7174 = vst [vmem:[#allocation5 + $0x30] sm:$0xff] %v7166_v21  ;;  %v7167_v52 = vadd.f32 %v7157_v17, %v5450_v19 }
0x1301   :  { %v7160_v47 = vadd.f32 %v7130_v39, %v5443_v25  ;;  %v7133_v50 = vadd.f32 %v7132_v13, %v13877_v31  ;;  %7172 = vst [vmem:[#allocation5 + $0x20] sm:$0xff] %v7164_v45  ;;  %v7165_v9 = vadd.f32 %v7149_v38, %v5448_v51 }
0x1302   :  { %7170 = vst [vmem:[#allocation5 + $0x10] sm:$0xff] %v7162_v23  ;;  %v7163_v44 = vadd.f32 %v7141_v2, %v5446_v62  ;;  %7175 = vst [vmem:[#allocation5 + $0x38] sm:$0xff] %v7167_v52 }
0x1303   :  { %7168 = vst [vmem:[#allocation5] sm:$0xff] %v7160_v47  ;;  %v7161_v20 = vadd.f32 %v7133_v50, %v5444_v53  ;;  %7173 = vst [vmem:[#allocation5 + $0x28] sm:$0xff] %v7165_v9 }
0x1304   :  { %7171 = vst [vmem:[#allocation5 + $0x18] sm:$0xff] %v7163_v44 }
0x1305   :  { %7169 = vst [vmem:[#allocation5 + $0x8] sm:$0xff] %v7161_v20 }
0x1306   :  { %9527 = shalt.err (!%p9524_p12)
}
0x1307   :  { %s9528_s21 = scalar_lea.hbm %s13920_s4, 1024 }
0x1308   :  { %p9529_p13 = scmp.ne.s32.totalorder %s13920_s4, %s9528_s21  ;;  %p9532_p0 = scmp.lt.u32.totalorder %s9528_s21, %s13920_s4 }
0x130a   :  { %p9534_p1 = pnand %p9532_p0, %p9529_p13 }
0x130c   :  { %9537 = shalt.err (!%p9534_p1)
}
0x130d   :  { %s9570_s5 = smov 128  }
0x130e   :  { %7187 = dma.vmem_to_hbm [thread:$0]  %s7182_s19, 1024, %s13920_s4, [#allocation4], %s9570_s5, %s9570_s5, %s9556_s27  }
0x130f   :  { %9540 = dma.done.wait [#allocation4], 1024  }
0x1310   :  { %9541 = vsyncadd [#allocation4], 4294966272 }
0x1311   :  { %7191 = vsyncpa [#allocation3], 1 }
0x1312   :  { %7192 = vsyncpa [#allocation4], 1 }

</bundles_post_ra>
